<compile_context>
chip_gen: v7x
topology: tpu7x:2x2x1
jax: 0.10.0
libtpu: 0.0.40
codegen_flags: <defaults>
</compile_context>

<pallas_src>
import functools
import math

import jax
import jax.numpy as jnp
from jax import lax
from jax.experimental import pallas as pl
from jax.experimental.pallas import tpu as pltpu

F32 = jnp.float32
BF16 = jnp.bfloat16


# ----------------------------------------------------------------------------
# In-kernel helpers (traced inside Pallas bodies)
# ----------------------------------------------------------------------------


def _ln(x, g, b, eps=1e-5):
    mean = jnp.mean(x, axis=-1, keepdims=True)
    var = jnp.mean(jnp.square(x - mean), axis=-1, keepdims=True)
    return (x - mean) * lax.rsqrt(var + eps) * g + b


def _dot(a, w_bf16):
    # bf16 MXU inputs, f32 accumulation.
    return jnp.dot(a.astype(BF16), w_bf16, preferred_element_type=F32)


def _softmax_lastdim(logits):
    m = jnp.max(logits, axis=-1, keepdims=True)
    p = jnp.exp(logits - m)
    return p * pl.reciprocal(jnp.sum(p, axis=-1, keepdims=True), approx=True)


def _quick_gelu(x):
    # HuggingFace CLIP activation: x * sigmoid(1.702 x) (explicit exp form).
    return x * (1.0 / (1.0 + jnp.exp(-1.702 * x)))


def _fullblock(shape):
    nd = len(shape)
    return pl.BlockSpec(shape, lambda *_: (0,) * nd)


def _layer_spec(shape):
    # One layer slice of a [L, ...]-stacked weight; picked by the layer grid axis.
    zeros = (0,) * (len(shape) - 1)
    return pl.BlockSpec((1,) + tuple(shape[1:]), lambda i, l: (l,) + zeros)


def _largest_divisor_leq(n, cap):
    for d in range(min(n, cap), 0, -1):
        if n % d == 0:
            return d
    return 1


# ----------------------------------------------------------------------------
# Fused transformer encoder stack: ONE pallas_call per stack.
# grid = (sequence_chunks [parallel], layers [arbitrary]); activations carried
# across the layer axis in a VMEM scratch buffer.
# ----------------------------------------------------------------------------


def _encoder_kernel(x_ref, ln1g, ln1b, wqkv, bqkv, wo, bo, ln2g, ln2b,
                    w1, b1, w2, b2, o_ref, h_ref, *, heads, causal):
    layer = pl.program_id(1)

    @pl.when(layer == 0)
    def _():
        h_ref[...] = x_ref[...].astype(F32)

    chunk, seq, d = h_ref.shape
    dh = d // heads
    scale = 1.0 / math.sqrt(dh)

    if causal:
        qi = lax.broadcasted_iota(jnp.int32, (seq, seq), 0)
        ki = lax.broadcasted_iota(jnp.int32, (seq, seq), 1)
        neg = jnp.where(ki <= qi, 0.0, -1e9).astype(F32)

    for s in range(chunk):                                # static unroll / sequence
        x = h_ref[s]                                      # [T, D] carried activation
        h1 = _ln(x, ln1g[0], ln1b[0])
        qkv = _dot(h1, wqkv[0]) + bqkv[0]                 # [T, 3D]

        head_outs = []
        for hh in range(heads):                           # static unroll / head
            q = qkv[:, hh * dh:(hh + 1) * dh]
            k = qkv[:, d + hh * dh:d + (hh + 1) * dh]
            v = qkv[:, 2 * d + hh * dh:2 * d + (hh + 1) * dh]
            logits = lax.dot_general(q.astype(BF16), k.astype(BF16),
                                     (((1,), (1,)), ((), ())),
                                     preferred_element_type=F32) * scale
            if causal:
                logits = logits + neg
            p = _softmax_lastdim(logits)
            head_outs.append(jnp.dot(p.astype(BF16), v.astype(BF16),
                                     preferred_element_type=F32))
        attn = jnp.concatenate(head_outs, axis=-1)        # [T, D]

        x = x + _dot(attn, wo[0]) + bo[0]
        h2 = _ln(x, ln2g[0], ln2b[0])
        h2 = _quick_gelu(_dot(h2, w1[0]) + b1[0])
        h2 = _dot(h2, w2[0]) + b2[0]
        h_ref[s] = x + h2

    # Write the carried block every step (canonical accumulator pattern).
    o_ref[...] = h_ref[...].astype(o_ref.dtype)


def transformer_encoder(x, blocks, heads, causal, chunk_cap=4):
    """Run all layers of an encoder stack in one pallas_call."""
    n, t, d = x.shape
    num_layers = len(blocks)

    def stack(fn):
        return jnp.stack([fn(bp) for bp in blocks], axis=0)

    weights = [
        stack(lambda bp: bp["ln1_g"].reshape(1, d)),
        stack(lambda bp: bp["ln1_b"].reshape(1, d)),
        stack(lambda bp: bp["qkv"]["w"].astype(BF16)),
        stack(lambda bp: bp["qkv"]["b"].reshape(1, 3 * d)),
        stack(lambda bp: bp["out"]["w"].astype(BF16)),
        stack(lambda bp: bp["out"]["b"].reshape(1, d)),
        stack(lambda bp: bp["ln2_g"].reshape(1, d)),
        stack(lambda bp: bp["ln2_b"].reshape(1, d)),
        stack(lambda bp: bp["fc1"]["w"].astype(BF16)),
        stack(lambda bp: bp["fc1"]["b"].reshape(1, 4 * d)),
        stack(lambda bp: bp["fc2"]["w"].astype(BF16)),
        stack(lambda bp: bp["fc2"]["b"].reshape(1, d)),
    ]

    chunk = _largest_divisor_leq(n, chunk_cap)
    kern = functools.partial(_encoder_kernel, heads=heads, causal=causal)
    x_spec = pl.BlockSpec((chunk, t, d), lambda i, l: (i, 0, 0))

    return pl.pallas_call(
        kern,
        out_shape=jax.ShapeDtypeStruct((n, t, d), F32),
        grid=(n // chunk, num_layers),
        in_specs=[x_spec] + [_layer_spec(w.shape) for w in weights],
        out_specs=x_spec,
        scratch_shapes=[pltpu.VMEM((chunk, t, d), F32)],
        compiler_params=pltpu.CompilerParams(
            dimension_semantics=("parallel", "arbitrary")),
    )(x, *weights)


# ----------------------------------------------------------------------------
# Small fused kernels: linear, LN+linear head, resize, X-Pool, stochastic text
# ----------------------------------------------------------------------------


def _linear_kernel(x_ref, w_ref, b_ref, o_ref):
    o_ref[...] = (_dot(x_ref[...].astype(F32), w_ref[...]) + b_ref[...]
                  ).astype(o_ref.dtype)


def linear(x, w, b):
    m, _ = x.shape
    n = w.shape[1]
    args = [x, w.astype(BF16), b.reshape(1, n)]
    return pl.pallas_call(
        _linear_kernel,
        out_shape=jax.ShapeDtypeStruct((m, n), F32),
        grid=(1,),
        in_specs=[_fullblock(a.shape) for a in args],
        out_specs=_fullblock((m, n)),
    )(*args)


def _ln_linear_kernel(x_ref, g_ref, b_ref, w_ref, wb_ref, o_ref):
    h = _ln(x_ref[...].astype(F32), g_ref[...], b_ref[...])
    o_ref[...] = (_dot(h, w_ref[...]) + wb_ref[...]).astype(o_ref.dtype)


def ln_linear(x, gamma, beta, w, b):
    m, d = x.shape
    n = w.shape[1]
    args = [x, gamma.reshape(1, d), beta.reshape(1, d),
            w.astype(BF16), b.reshape(1, n)]
    return pl.pallas_call(
        _ln_linear_kernel,
        out_shape=jax.ShapeDtypeStruct((m, n), F32),
        grid=(1,),
        in_specs=[_fullblock(a.shape) for a in args],
        out_specs=_fullblock((m, n)),
    )(*args)


def _resize_kernel(x_ref, wh_ref, ww_ref, o_ref):
    chunk = x_ref.shape[0]
    wh = wh_ref[...].astype(BF16)                        # [Rh, H]
    ww = ww_ref[...].astype(BF16)                        # [W, Rw]
    for p in range(chunk):                               # static unroll inside chunk
        img = x_ref[p].astype(BF16)                      # [H, W]
        t = jnp.dot(wh, img, preferred_element_type=F32)
        o_ref[p] = jnp.dot(t.astype(BF16), ww,
                           preferred_element_type=F32).astype(o_ref.dtype)


def _interp_matrix(in_size, out_size):
    # bilinear, align_corners=False (matches F.interpolate semantics)
    scale = in_size / out_size
    i = jnp.arange(out_size, dtype=jnp.float32)
    src = jnp.maximum((i + 0.5) * scale - 0.5, 0.0)
    i0 = jnp.clip(jnp.floor(src).astype(jnp.int32), 0, in_size - 1)
    i1 = jnp.clip(i0 + 1, 0, in_size - 1)
    lam = src - i0.astype(jnp.float32)
    m = jnp.zeros((out_size, in_size), jnp.float32)
    m = m.at[jnp.arange(out_size), i0].add(1.0 - lam)
    m = m.at[jnp.arange(out_size), i1].add(lam)
    return m


def bilinear_resize_nchw(x, out_h, out_w):
    """x: [N, C, H, W] -> [N, C, out_h, out_w]; batched planes per grid step."""
    n, c, h, w = x.shape
    planes = n * c
    chunk = _largest_divisor_leq(planes, 8)
    wh = _interp_matrix(h, out_h)                        # [out_h, H]
    ww = _interp_matrix(w, out_w).T                      # [W, out_w]
    flat = x.reshape(planes, h, w)
    out = pl.pallas_call(
        _resize_kernel,
        out_shape=jax.ShapeDtypeStruct((planes, out_h, out_w), F32),
        grid=(planes // chunk,),
        in_specs=[pl.BlockSpec((chunk, h, w), lambda i: (i, 0, 0)),
                  _fullblock(wh.shape), _fullblock(ww.shape)],
        out_specs=pl.BlockSpec((chunk, out_h, out_w), lambda i: (i, 0, 0)),
        compiler_params=pltpu.CompilerParams(dimension_semantics=("parallel",)),
    )(flat, wh, ww)
    return out.reshape(n, c, out_h, out_w)


def _pool_kernel(t_ref, v_ref, ln1g, ln1b, wq, bq, wk, bk, wvp, bvp,
                 wo, bo, ln2g, ln2b, wl, bl, ln3g, ln3b, o_ref,
                 *, num_vids, num_frames):
    d = t_ref.shape[1]
    scale = 1.0 / math.sqrt(d)

    t = _ln(t_ref[...].astype(F32), ln1g[...], ln1b[...])
    q = _dot(t, wq[...]) + bq[...]                       # [Bt, D]

    # Hoisted: LN + K/V projections over ALL videos' frames as single matmuls.
    v_all = _ln(v_ref[...].astype(F32), ln1g[...], ln1b[...])   # [Bv*F, D]
    k_all = _dot(v_all, wk[...]) + bk[...]
    vp_all = _dot(v_all, wvp[...]) + bvp[...]

    cols = []
    for b in range(num_vids):                            # static unroll over videos
        kb = k_all[b * num_frames:(b + 1) * num_frames, :]
        vb = vp_all[b * num_frames:(b + 1) * num_frames, :]
        logits = lax.dot_general(q.astype(BF16), kb.astype(BF16),
                                 (((1,), (1,)), ((), ())),
                                 preferred_element_type=F32) * scale   # [Bt, F]
        p = _softmax_lastdim(logits)
        att = jnp.dot(p.astype(BF16), vb.astype(BF16),
                      preferred_element_type=F32)        # [Bt, D]
        h = _dot(att, wo[...]) + bo[...]
        h = _ln(h, ln2g[...], ln2b[...])
        out_b = _ln(h + _dot(h, wl[...]) + bl[...], ln3g[...], ln3b[...])
        cols.append(out_b)
    # lane-dense output: [Bt, Bv*D]; reshaped to [Bt, Bv, D] by the caller
    o_ref[...] = jnp.concatenate(cols, axis=-1).astype(o_ref.dtype)


def pool_frames(text_feat, video_feat, pp):
    """X-Pool text-conditioned frame pooling -> [num_texts, num_vids, embed_dim]."""
    bt, d = text_feat.shape
    bv, f, _ = video_feat.shape
    v_flat = video_feat.reshape(bv * f, d)
    args = [
        text_feat, v_flat,
        pp["ln1_g"].reshape(1, d), pp["ln1_b"].reshape(1, d),
        pp["q"]["w"].astype(BF16), pp["q"]["b"].reshape(1, d),
        pp["k"]["w"].astype(BF16), pp["k"]["b"].reshape(1, d),
        pp["v"]["w"].astype(BF16), pp["v"]["b"].reshape(1, d),
        pp["o"]["w"].astype(BF16), pp["o"]["b"].reshape(1, d),
        pp["ln2_g"].reshape(1, d), pp["ln2_b"].reshape(1, d),
        pp["lin"]["w"].astype(BF16), pp["lin"]["b"].reshape(1, d),
        pp["ln3_g"].reshape(1, d), pp["ln3_b"].reshape(1, d),
    ]
    kern = functools.partial(_pool_kernel, num_vids=bv, num_frames=f)
    out = pl.pallas_call(
        kern,
        out_shape=jax.ShapeDtypeStruct((bt, bv * d), F32),
        grid=(1,),
        in_specs=[_fullblock(a.shape) for a in args],
        out_specs=_fullblock((bt, bv * d)),
    )(*args)
    return out.reshape(bt, bv, d)


def _stoch_kernel(t_ref, vctx_ref, wt_ref, wv_ref, b_ref, eps_ref,
                  stoch_ref, lv_ref):
    t = t_ref[...].astype(F32)
    log_var = (_dot(t, wt_ref[...]) + _dot(vctx_ref[...].astype(F32), wv_ref[...])
               + b_ref[...])
    lv_ref[...] = log_var.astype(lv_ref.dtype)
    # T-MASS re-parameterization: text + sigma * eps, sigma = exp(log_var)
    stoch_ref[...] = (t + jnp.exp(log_var) * eps_ref[...].astype(F32)
                      ).astype(stoch_ref.dtype)


def stochastic_text(text_feat, video_feat, sp, eps):
    """StochasticText: log_var branch + re-parameterization, one fused kernel."""
    b, e = text_feat.shape
    # TODO(synk): T-MASS's std branch can itself be a small transformer; approximated
    # by a linear on [text_feat, mean-over-frames(video_feat)] (mean left to XLA).
    vid_ctx = jnp.mean(video_feat, axis=1)               # [B, E], trivial -> XLA fuses
    args = [text_feat, vid_ctx,
            sp["w"][:e].astype(BF16), sp["w"][e:].astype(BF16),
            sp["b"].reshape(1, e), eps]
    stoch, log_var = pl.pallas_call(
        _stoch_kernel,
        out_shape=(jax.ShapeDtypeStruct((b, e), F32),
                   jax.ShapeDtypeStruct((b, e), F32)),
        grid=(1,),
        in_specs=[_fullblock(a.shape) for a in args],
        out_specs=(_fullblock((b, e)), _fullblock((b, e))),
    )(*args)
    return stoch, text_feat, log_var


# ----------------------------------------------------------------------------
# CLIP-like encoders (JAX glue around the fused kernels)
# ----------------------------------------------------------------------------


def encode_text(ids, params, cfg):
    b, t = ids.shape
    x = params["tok_emb"][ids] + params["text_pos"][None, :t]
    x = transformer_encoder(x, params["text_blocks"], cfg["heads"], causal=True)
    eot = jnp.argmax(ids, axis=-1)                       # CLIP pools at EOT token
    pooled = x[jnp.arange(b), eot]                       # gather stays in XLA
    # final LN is row-wise -> commutes with the gather; fuse LN + projection
    return ln_linear(pooled, params["text_ln_g"], params["text_ln_b"],
                     params["text_proj"]["w"], params["text_proj"]["b"])


def encode_image(pixels, params, cfg):
    n, c, r, _ = pixels.shape
    ps = cfg["patch_size"]
    d = cfg["width"]
    g = r // ps
    # TODO(synk): patchify transpose could be folded into the resize kernel output.
    patches = pixels.reshape(n, c, g, ps, g, ps).transpose(0, 2, 4, 1, 3, 5)
    patches = patches.reshape(n * g * g, c * ps * ps)
    x = linear(patches, params["patch"]["w"], params["patch"]["b"]).reshape(n, g * g, d)
    cls = jnp.broadcast_to(params["cls"][None, None, :], (n, 1, d))
    x = jnp.concatenate([cls, x], axis=1) + params["vis_pos"][None]
    x = transformer_encoder(x, params["vis_blocks"], cfg["heads"], causal=False)
    return ln_linear(x[:, 0], params["vis_ln_g"], params["vis_ln_b"],
                     params["vis_proj"]["w"], params["vis_proj"]["b"])


# ----------------------------------------------------------------------------
# Parameter init (deterministic, synthetic)
# ----------------------------------------------------------------------------


def _lin_init(key, din, dout, scale=0.02):
    return {"w": scale * jax.random.normal(key, (din, dout), jnp.float32),
            "b": jnp.zeros((dout,), jnp.float32)}


def _block_init(key, d):
    ks = jax.random.split(key, 4)
    return {
        "ln1_g": jnp.ones((d,), jnp.float32), "ln1_b": jnp.zeros((d,), jnp.float32),
        "ln2_g": jnp.ones((d,), jnp.float32), "ln2_b": jnp.zeros((d,), jnp.float32),
        "qkv": _lin_init(ks[0], d, 3 * d),
        "out": _lin_init(ks[1], d, d),
        "fc1": _lin_init(ks[2], d, 4 * d),
        "fc2": _lin_init(ks[3], 4 * d, d),
    }


def init_params(key, cfg):
    D, E = cfg["width"], cfg["embed_dim"]
    ps = cfg["patch_size"]
    g = cfg["input_res"] // ps
    ks = jax.random.split(key, 16)
    return {
        "tok_emb": 0.02 * jax.random.normal(ks[0], (cfg["vocab"], D), jnp.float32),
        "text_pos": 0.01 * jax.random.normal(ks[1], (cfg["text_len"], D), jnp.float32),
        "text_blocks": [_block_init(k, D) for k in jax.random.split(ks[2], cfg["layers"])],
        "text_ln_g": jnp.ones((D,), jnp.float32), "text_ln_b": jnp.zeros((D,), jnp.float32),
        "text_proj": _lin_init(ks[3], D, E),
        "patch": _lin_init(ks[4], 3 * ps * ps, D),
        "cls": 0.02 * jax.random.normal(ks[5], (D,), jnp.float32),
        "vis_pos": 0.01 * jax.random.normal(ks[6], (g * g + 1, D), jnp.float32),
        "vis_blocks": [_block_init(k, D) for k in jax.random.split(ks[7], cfg["layers"])],
        "vis_ln_g": jnp.ones((D,), jnp.float32), "vis_ln_b": jnp.zeros((D,), jnp.float32),
        "vis_proj": _lin_init(ks[8], D, E),
        "pool": {
            "ln1_g": jnp.ones((E,), jnp.float32), "ln1_b": jnp.zeros((E,), jnp.float32),
            "ln2_g": jnp.ones((E,), jnp.float32), "ln2_b": jnp.zeros((E,), jnp.float32),
            "ln3_g": jnp.ones((E,), jnp.float32), "ln3_b": jnp.zeros((E,), jnp.float32),
            "q": _lin_init(ks[9], E, E), "k": _lin_init(ks[10], E, E),
            "v": _lin_init(ks[11], E, E), "o": _lin_init(ks[12], E, E),
            "lin": _lin_init(ks[13], E, E),
        },
        "stoch": _lin_init(ks[14], 2 * E, E),
    }


# ----------------------------------------------------------------------------
# Full forward (mirrors CLIPStochastic.forward)
# ----------------------------------------------------------------------------


def clip_stochastic_forward(params, video, text_ids, eps, cfg,
                            is_train=True, return_all_frames=False):
    B, F, C, H0, W0 = video.shape
    R = cfg["input_res"]
    frames = video.reshape(B * F, C, H0, W0)
    frames = bilinear_resize_nchw(frames, R, R)          # F.interpolate(bilinear)
    text_features = encode_text(text_ids, params, cfg)   # clip.get_text_features
    video_features = encode_image(frames, params, cfg)   # clip.get_image_features
    video_features = video_features.reshape(B, F, -1)    # [bs, #F, E]
    video_features_pooled = pool_frames(text_features, video_features, params["pool"])
    text_stoch, text_mean, log_var = stochastic_text(
        text_features, video_features, params["stoch"], eps)
    if is_train:
        if return_all_frames:
            return (text_features, video_features, video_features_pooled,
                    text_stoch, text_mean, log_var)
        return text_features, video_features_pooled, text_stoch, text_mean, log_var
    else:
        if return_all_frames:
            return text_features, video_features, video_features_pooled, text_stoch
        return text_features, video_features_pooled, text_stoch


CFG = dict(
    input_res=16,      # resize target
    patch_size=8,      # -> 2x2 = 4 patches (+ cls)
    num_frames=4,
    width=32,          # transformer width
    layers=2,
    heads=4,
    embed_dim=32,      # CLIP projection dim
    text_len=8,
    vocab=64,
)


if __name__ == "__main__":
    key = jax.random.PRNGKey(0)
    kp, kv, kt, ke = jax.random.split(key, 4)
    cfg = CFG
    params = init_params(kp, cfg)

    B, F = 2, cfg["num_frames"]
    # raw video at 12x12 so the bilinear resize to input_res=16 is non-trivial
    video = jax.random.normal(kv, (B, F, 3, 12, 12), jnp.float32)
    text_ids = jax.random.randint(kt, (B, cfg["text_len"]), 1, cfg["vocab"], dtype=jnp.int32)
    eps = jax.random.normal(ke, (B, cfg["embed_dim"]), jnp.float32)  # torch.randn_like

    fwd = jax.jit(functools.partial(clip_stochastic_forward, cfg=cfg,
                                    is_train=True, return_all_frames=False))
    outs = fwd(params, video, text_ids, eps)
    outs = jax.block_until_ready(outs)
    tf, vfp, ts, tm, lv = outs
    assert tf.shape == (B, cfg["embed_dim"])
    assert vfp.shape == (B, B, cfg["embed_dim"])
    assert ts.shape == (B, cfg["embed_dim"])
    assert tm.shape == (B, cfg["embed_dim"])
    assert lv.shape == (B, cfg["embed_dim"])
    print("KERNEL_OK")
</pallas_src>

<mosaic_0001>
module attributes {stable_mosaic.version = 11 : i64} {
  func.func private @main(%arg0: i32) attributes {dimension_semantics = [#tpu.dimension_semantics<core_parallel>], iteration_bounds = array<i64: 2>, tpu.core_type = #tpu.core_type<sc_scalar_subcore>, window_params = []} {
    return
  }
}

module attributes {stable_mosaic.version = 11 : i64} {
  func.func private @main(%arg0: i32) attributes {dimension_semantics = [#tpu.dimension_semantics<core_parallel>], iteration_bounds = array<i64: 2>, tpu.core_type = #tpu.core_type<sc_scalar_subcore>, window_params = []} {
    return
  }
}

module attributes {stable_mosaic.version = 11 : i64} {
  func.func @_resize_kernel(%arg0: i32, %arg1: memref<8x12x12xf32, #tpu.memory_space<vmem>>, %arg2: memref<16x12xf32, #tpu.memory_space<vmem>>, %arg3: memref<12x16xf32, #tpu.memory_space<vmem>>, %arg4: memref<8x16x16xf32, #tpu.memory_space<vmem>>) attributes {dimension_semantics = [#tpu.dimension_semantics<parallel>], iteration_bounds = array<i64: 3>, scalar_prefetch = 0 : i64, scratch_operands = 0 : i64, tpu.core_type = #tpu.core_type<tc>, window_params = [{transform_indices = @transform_0, window_bounds = array<i64: 8, 12, 12>}, {pipeline_mode = #tpu.pipeline_mode<synchronous>, transform_indices = @transform_1, window_bounds = array<i64: 16, 12>}, {pipeline_mode = #tpu.pipeline_mode<synchronous>, transform_indices = @transform_2, window_bounds = array<i64: 12, 16>}, {transform_indices = @transform_3, window_bounds = array<i64: 8, 16, 16>}]} {
    %c0 = arith.constant 0 : index
    %c0_0 = arith.constant 0 : index
    %0 = vector.load %arg2[%c0, %c0_0] : memref<16x12xf32, #tpu.memory_space<vmem>>, vector<16x12xf32>
    %1 = arith.truncf %0 : vector<16x12xf32> to vector<16x12xbf16>
    %c0_1 = arith.constant 0 : index
    %c0_2 = arith.constant 0 : index
    %2 = vector.load %arg3[%c0_1, %c0_2] : memref<12x16xf32, #tpu.memory_space<vmem>>, vector<12x16xf32>
    %3 = arith.truncf %2 : vector<12x16xf32> to vector<12x16xbf16>
    %c0_3 = arith.constant 0 : index
    %c0_4 = arith.constant 0 : index
    %c0_5 = arith.constant 0 : index
    %4 = vector.load %arg1[%c0_3, %c0_4, %c0_5] : memref<8x12x12xf32, #tpu.memory_space<vmem>>, vector<1x12x12xf32>
    %5 = vector.shape_cast %4 : vector<1x12x12xf32> to vector<12x12xf32>
    %6 = arith.truncf %5 : vector<12x12xf32> to vector<12x12xbf16>
    %cst = arith.constant dense<0.000000e+00> : vector<16x12xf32>
    %7 = tpu.matmul %1, %6, %cst {dimension_numbers = #tpu.dot_dimension_numbers<[1], [0], [0], [1], [0, 0, 1, 1], [], []>} : vector<16x12xbf16>, vector<12x12xbf16>, vector<16x12xf32> -> vector<16x12xf32>
    %8 = arith.truncf %7 : vector<16x12xf32> to vector<16x12xbf16>
    %cst_6 = arith.constant dense<0.000000e+00> : vector<16x16xf32>
    %9 = tpu.matmul %8, %3, %cst_6 {dimension_numbers = #tpu.dot_dimension_numbers<[1], [0], [0], [1], [0, 0, 1, 1], [], []>} : vector<16x12xbf16>, vector<12x16xbf16>, vector<16x16xf32> -> vector<16x16xf32>
    %c0_7 = arith.constant 0 : index
    %c0_8 = arith.constant 0 : index
    %c0_9 = arith.constant 0 : index
    %10 = vector.load %arg4[%c0_7, %c0_8, %c0_9] : memref<8x16x16xf32, #tpu.memory_space<vmem>>, vector<1x16x16xf32>
    %11 = vector.shape_cast %10 : vector<1x16x16xf32> to vector<16x16xf32>
    %12 = vector.shape_cast %9 : vector<16x16xf32> to vector<1x16x16xf32>
    tpu.vector_store %arg4[%c0_7, %c0_8, %c0_9], %12 {strides = array<i32>} : memref<8x16x16xf32, #tpu.memory_space<vmem>>, vector<1x16x16xf32>,
    %c1 = arith.constant 1 : index
    %c0_10 = arith.constant 0 : index
    %c0_11 = arith.constant 0 : index
    %13 = vector.load %arg1[%c1, %c0_10, %c0_11] : memref<8x12x12xf32, #tpu.memory_space<vmem>>, vector<1x12x12xf32>
    %14 = vector.shape_cast %13 : vector<1x12x12xf32> to vector<12x12xf32>
    %15 = arith.truncf %14 : vector<12x12xf32> to vector<12x12xbf16>
    %cst_12 = arith.constant dense<0.000000e+00> : vector<16x12xf32>
    %16 = tpu.matmul %1, %15, %cst_12 {dimension_numbers = #tpu.dot_dimension_numbers<[1], [0], [0], [1], [0, 0, 1, 1], [], []>} : vector<16x12xbf16>, vector<12x12xbf16>, vector<16x12xf32> -> vector<16x12xf32>
    %17 = arith.truncf %16 : vector<16x12xf32> to vector<16x12xbf16>
    %cst_13 = arith.constant dense<0.000000e+00> : vector<16x16xf32>
    %18 = tpu.matmul %17, %3, %cst_13 {dimension_numbers = #tpu.dot_dimension_numbers<[1], [0], [0], [1], [0, 0, 1, 1], [], []>} : vector<16x12xbf16>, vector<12x16xbf16>, vector<16x16xf32> -> vector<16x16xf32>
    %c1_14 = arith.constant 1 : index
    %c0_15 = arith.constant 0 : index
    %c0_16 = arith.constant 0 : index
    %19 = vector.load %arg4[%c1_14, %c0_15, %c0_16] : memref<8x16x16xf32, #tpu.memory_space<vmem>>, vector<1x16x16xf32>
    %20 = vector.shape_cast %19 : vector<1x16x16xf32> to vector<16x16xf32>
    %21 = vector.shape_cast %18 : vector<16x16xf32> to vector<1x16x16xf32>
    tpu.vector_store %arg4[%c1_14, %c0_15, %c0_16], %21 {strides = array<i32>} : memref<8x16x16xf32, #tpu.memory_space<vmem>>, vector<1x16x16xf32>,
    %c2 = arith.constant 2 : index
    %c0_17 = arith.constant 0 : index
    %c0_18 = arith.constant 0 : index
    %22 = vector.load %arg1[%c2, %c0_17, %c0_18] : memref<8x12x12xf32, #tpu.memory_space<vmem>>, vector<1x12x12xf32>
    %23 = vector.shape_cast %22 : vector<1x12x12xf32> to vector<12x12xf32>
    %24 = arith.truncf %23 : vector<12x12xf32> to vector<12x12xbf16>
    %cst_19 = arith.constant dense<0.000000e+00> : vector<16x12xf32>
    %25 = tpu.matmul %1, %24, %cst_19 {dimension_numbers = #tpu.dot_dimension_numbers<[1], [0], [0], [1], [0, 0, 1, 1], [], []>} : vector<16x12xbf16>, vector<12x12xbf16>, vector<16x12xf32> -> vector<16x12xf32>
    %26 = arith.truncf %25 : vector<16x12xf32> to vector<16x12xbf16>
    %cst_20 = arith.constant dense<0.000000e+00> : vector<16x16xf32>
    %27 = tpu.matmul %26, %3, %cst_20 {dimension_numbers = #tpu.dot_dimension_numbers<[1], [0], [0], [1], [0, 0, 1, 1], [], []>} : vector<16x12xbf16>, vector<12x16xbf16>, vector<16x16xf32> -> vector<16x16xf32>
    %c2_21 = arith.constant 2 : index
    %c0_22 = arith.constant 0 : index
    %c0_23 = arith.constant 0 : index
    %28 = vector.load %arg4[%c2_21, %c0_22, %c0_23] : memref<8x16x16xf32, #tpu.memory_space<vmem>>, vector<1x16x16xf32>
    %29 = vector.shape_cast %28 : vector<1x16x16xf32> to vector<16x16xf32>
    %30 = vector.shape_cast %27 : vector<16x16xf32> to vector<1x16x16xf32>
    tpu.vector_store %arg4[%c2_21, %c0_22, %c0_23], %30 {strides = array<i32>} : memref<8x16x16xf32, #tpu.memory_space<vmem>>, vector<1x16x16xf32>,
    %c3 = arith.constant 3 : index
    %c0_24 = arith.constant 0 : index
    %c0_25 = arith.constant 0 : index
    %31 = vector.load %arg1[%c3, %c0_24, %c0_25] : memref<8x12x12xf32, #tpu.memory_space<vmem>>, vector<1x12x12xf32>
    %32 = vector.shape_cast %31 : vector<1x12x12xf32> to vector<12x12xf32>
    %33 = arith.truncf %32 : vector<12x12xf32> to vector<12x12xbf16>
    %cst_26 = arith.constant dense<0.000000e+00> : vector<16x12xf32>
    %34 = tpu.matmul %1, %33, %cst_26 {dimension_numbers = #tpu.dot_dimension_numbers<[1], [0], [0], [1], [0, 0, 1, 1], [], []>} : vector<16x12xbf16>, vector<12x12xbf16>, vector<16x12xf32> -> vector<16x12xf32>
    %35 = arith.truncf %34 : vector<16x12xf32> to vector<16x12xbf16>
    %cst_27 = arith.constant dense<0.000000e+00> : vector<16x16xf32>
    %36 = tpu.matmul %35, %3, %cst_27 {dimension_numbers = #tpu.dot_dimension_numbers<[1], [0], [0], [1], [0, 0, 1, 1], [], []>} : vector<16x12xbf16>, vector<12x16xbf16>, vector<16x16xf32> -> vector<16x16xf32>
    %c3_28 = arith.constant 3 : index
    %c0_29 = arith.constant 0 : index
    %c0_30 = arith.constant 0 : index
    %37 = vector.load %arg4[%c3_28, %c0_29, %c0_30] : memref<8x16x16xf32, #tpu.memory_space<vmem>>, vector<1x16x16xf32>
    %38 = vector.shape_cast %37 : vector<1x16x16xf32> to vector<16x16xf32>
    %39 = vector.shape_cast %36 : vector<16x16xf32> to vector<1x16x16xf32>
    tpu.vector_store %arg4[%c3_28, %c0_29, %c0_30], %39 {strides = array<i32>} : memref<8x16x16xf32, #tpu.memory_space<vmem>>, vector<1x16x16xf32>,
    %c4 = arith.constant 4 : index
    %c0_31 = arith.constant 0 : index
    %c0_32 = arith.constant 0 : index
    %40 = vector.load %arg1[%c4, %c0_31, %c0_32] : memref<8x12x12xf32, #tpu.memory_space<vmem>>, vector<1x12x12xf32>
    %41 = vector.shape_cast %40 : vector<1x12x12xf32> to vector<12x12xf32>
    %42 = arith.truncf %41 : vector<12x12xf32> to vector<12x12xbf16>
    %cst_33 = arith.constant dense<0.000000e+00> : vector<16x12xf32>
    %43 = tpu.matmul %1, %42, %cst_33 {dimension_numbers = #tpu.dot_dimension_numbers<[1], [0], [0], [1], [0, 0, 1, 1], [], []>} : vector<16x12xbf16>, vector<12x12xbf16>, vector<16x12xf32> -> vector<16x12xf32>
    %44 = arith.truncf %43 : vector<16x12xf32> to vector<16x12xbf16>
    %cst_34 = arith.constant dense<0.000000e+00> : vector<16x16xf32>
    %45 = tpu.matmul %44, %3, %cst_34 {dimension_numbers = #tpu.dot_dimension_numbers<[1], [0], [0], [1], [0, 0, 1, 1], [], []>} : vector<16x12xbf16>, vector<12x16xbf16>, vector<16x16xf32> -> vector<16x16xf32>
    %c4_35 = arith.constant 4 : index
    %c0_36 = arith.constant 0 : index
    %c0_37 = arith.constant 0 : index
    %46 = vector.load %arg4[%c4_35, %c0_36, %c0_37] : memref<8x16x16xf32, #tpu.memory_space<vmem>>, vector<1x16x16xf32>
    %47 = vector.shape_cast %46 : vector<1x16x16xf32> to vector<16x16xf32>
    %48 = vector.shape_cast %45 : vector<16x16xf32> to vector<1x16x16xf32>
    tpu.vector_store %arg4[%c4_35, %c0_36, %c0_37], %48 {strides = array<i32>} : memref<8x16x16xf32, #tpu.memory_space<vmem>>, vector<1x16x16xf32>,
    %c5 = arith.constant 5 : index
    %c0_38 = arith.constant 0 : index
    %c0_39 = arith.constant 0 : index
    %49 = vector.load %arg1[%c5, %c0_38, %c0_39] : memref<8x12x12xf32, #tpu.memory_space<vmem>>, vector<1x12x12xf32>
    %50 = vector.shape_cast %49 : vector<1x12x12xf32> to vector<12x12xf32>
    %51 = arith.truncf %50 : vector<12x12xf32> to vector<12x12xbf16>
    %cst_40 = arith.constant dense<0.000000e+00> : vector<16x12xf32>
    %52 = tpu.matmul %1, %51, %cst_40 {dimension_numbers = #tpu.dot_dimension_numbers<[1], [0], [0], [1], [0, 0, 1, 1], [], []>} : vector<16x12xbf16>, vector<12x12xbf16>, vector<16x12xf32> -> vector<16x12xf32>
    %53 = arith.truncf %52 : vector<16x12xf32> to vector<16x12xbf16>
    %cst_41 = arith.constant dense<0.000000e+00> : vector<16x16xf32>
    %54 = tpu.matmul %53, %3, %cst_41 {dimension_numbers = #tpu.dot_dimension_numbers<[1], [0], [0], [1], [0, 0, 1, 1], [], []>} : vector<16x12xbf16>, vector<12x16xbf16>, vector<16x16xf32> -> vector<16x16xf32>
    %c5_42 = arith.constant 5 : index
    %c0_43 = arith.constant 0 : index
    %c0_44 = arith.constant 0 : index
    %55 = vector.load %arg4[%c5_42, %c0_43, %c0_44] : memref<8x16x16xf32, #tpu.memory_space<vmem>>, vector<1x16x16xf32>
    %56 = vector.shape_cast %55 : vector<1x16x16xf32> to vector<16x16xf32>
    %57 = vector.shape_cast %54 : vector<16x16xf32> to vector<1x16x16xf32>
    tpu.vector_store %arg4[%c5_42, %c0_43, %c0_44], %57 {strides = array<i32>} : memref<8x16x16xf32, #tpu.memory_space<vmem>>, vector<1x16x16xf32>,
    %c6 = arith.constant 6 : index
    %c0_45 = arith.constant 0 : index
    %c0_46 = arith.constant 0 : index
    %58 = vector.load %arg1[%c6, %c0_45, %c0_46] : memref<8x12x12xf32, #tpu.memory_space<vmem>>, vector<1x12x12xf32>
    %59 = vector.shape_cast %58 : vector<1x12x12xf32> to vector<12x12xf32>
    %60 = arith.truncf %59 : vector<12x12xf32> to vector<12x12xbf16>
    %cst_47 = arith.constant dense<0.000000e+00> : vector<16x12xf32>
    %61 = tpu.matmul %1, %60, %cst_47 {dimension_numbers = #tpu.dot_dimension_numbers<[1], [0], [0], [1], [0, 0, 1, 1], [], []>} : vector<16x12xbf16>, vector<12x12xbf16>, vector<16x12xf32> -> vector<16x12xf32>
    %62 = arith.truncf %61 : vector<16x12xf32> to vector<16x12xbf16>
    %cst_48 = arith.constant dense<0.000000e+00> : vector<16x16xf32>
    %63 = tpu.matmul %62, %3, %cst_48 {dimension_numbers = #tpu.dot_dimension_numbers<[1], [0], [0], [1], [0, 0, 1, 1], [], []>} : vector<16x12xbf16>, vector<12x16xbf16>, vector<16x16xf32> -> vector<16x16xf32>
    %c6_49 = arith.constant 6 : index
    %c0_50 = arith.constant 0 : index
    %c0_51 = arith.constant 0 : index
    %64 = vector.load %arg4[%c6_49, %c0_50, %c0_51] : memref<8x16x16xf32, #tpu.memory_space<vmem>>, vector<1x16x16xf32>
    %65 = vector.shape_cast %64 : vector<1x16x16xf32> to vector<16x16xf32>
    %66 = vector.shape_cast %63 : vector<16x16xf32> to vector<1x16x16xf32>
    tpu.vector_store %arg4[%c6_49, %c0_50, %c0_51], %66 {strides = array<i32>} : memref<8x16x16xf32, #tpu.memory_space<vmem>>, vector<1x16x16xf32>,
    %c7 = arith.constant 7 : index
    %c0_52 = arith.constant 0 : index
    %c0_53 = arith.constant 0 : index
    %67 = vector.load %arg1[%c7, %c0_52, %c0_53] : memref<8x12x12xf32, #tpu.memory_space<vmem>>, vector<1x12x12xf32>
    %68 = vector.shape_cast %67 : vector<1x12x12xf32> to vector<12x12xf32>
    %69 = arith.truncf %68 : vector<12x12xf32> to vector<12x12xbf16>
    %cst_54 = arith.constant dense<0.000000e+00> : vector<16x12xf32>
    %70 = tpu.matmul %1, %69, %cst_54 {dimension_numbers = #tpu.dot_dimension_numbers<[1], [0], [0], [1], [0, 0, 1, 1], [], []>} : vector<16x12xbf16>, vector<12x12xbf16>, vector<16x12xf32> -> vector<16x12xf32>
    %71 = arith.truncf %70 : vector<16x12xf32> to vector<16x12xbf16>
    %cst_55 = arith.constant dense<0.000000e+00> : vector<16x16xf32>
    %72 = tpu.matmul %71, %3, %cst_55 {dimension_numbers = #tpu.dot_dimension_numbers<[1], [0], [0], [1], [0, 0, 1, 1], [], []>} : vector<16x12xbf16>, vector<12x16xbf16>, vector<16x16xf32> -> vector<16x16xf32>
    %c7_56 = arith.constant 7 : index
    %c0_57 = arith.constant 0 : index
    %c0_58 = arith.constant 0 : index
    %73 = vector.load %arg4[%c7_56, %c0_57, %c0_58] : memref<8x16x16xf32, #tpu.memory_space<vmem>>, vector<1x16x16xf32>
    %74 = vector.shape_cast %73 : vector<1x16x16xf32> to vector<16x16xf32>
    %75 = vector.shape_cast %72 : vector<16x16xf32> to vector<1x16x16xf32>
    tpu.vector_store %arg4[%c7_56, %c0_57, %c0_58], %75 {strides = array<i32>} : memref<8x16x16xf32, #tpu.memory_space<vmem>>, vector<1x16x16xf32>,
    return
  }
  func.func @transform_0(%arg0: i32) -> (i32, i32, i32) {
    %c0_i32 = arith.constant 0 : i32
    %c0_i32_0 = arith.constant 0 : i32
    %c0_i32_1 = arith.constant 0 : i32
    return %arg0, %c0_i32, %c0_i32_0 : i32, i32, i32
  }
  func.func @transform_1(%arg0: i32) -> (i32, i32) {
    %c0_i32 = arith.constant 0 : i32
    %c0_i32_0 = arith.constant 0 : i32
    %c0_i32_1 = arith.constant 0 : i32
    return %c0_i32, %c0_i32_0 : i32, i32
  }
  func.func @transform_2(%arg0: i32) -> (i32, i32) {
    %c0_i32 = arith.constant 0 : i32
    %c0_i32_0 = arith.constant 0 : i32
    %c0_i32_1 = arith.constant 0 : i32
    return %c0_i32, %c0_i32_0 : i32, i32
  }
  func.func @transform_3(%arg0: i32) -> (i32, i32, i32) {
    %c0_i32 = arith.constant 0 : i32
    %c0_i32_0 = arith.constant 0 : i32
    %c0_i32_1 = arith.constant 0 : i32
    return %arg0, %c0_i32, %c0_i32_0 : i32, i32, i32
  }
}

module attributes {stable_mosaic.version = 11 : i64} {
  func.func @_ln_linear_kernel(%arg0: i32, %arg1: memref<2x32xf32, #tpu.memory_space<vmem>>, %arg2: memref<1x32xf32, #tpu.memory_space<vmem>>, %arg3: memref<1x32xf32, #tpu.memory_space<vmem>>, %arg4: memref<32x32xbf16, #tpu.memory_space<vmem>>, %arg5: memref<1x32xf32, #tpu.memory_space<vmem>>, %arg6: memref<2x32xf32, #tpu.memory_space<vmem>>) attributes {dimension_semantics = [#tpu.dimension_semantics<arbitrary>], iteration_bounds = array<i64: 1>, scalar_prefetch = 0 : i64, scratch_operands = 0 : i64, tpu.core_type = #tpu.core_type<tc>, window_params = [{pipeline_mode = #tpu.pipeline_mode<synchronous>, transform_indices = @transform_0, window_bounds = array<i64: 2, 32>}, {pipeline_mode = #tpu.pipeline_mode<synchronous>, transform_indices = @transform_1, window_bounds = array<i64: 1, 32>}, {pipeline_mode = #tpu.pipeline_mode<synchronous>, transform_indices = @transform_2, window_bounds = array<i64: 1, 32>}, {pipeline_mode = #tpu.pipeline_mode<synchronous>, transform_indices = @transform_3, window_bounds = array<i64: 32, 32>}, {pipeline_mode = #tpu.pipeline_mode<synchronous>, transform_indices = @transform_4, window_bounds = array<i64: 1, 32>}, {pipeline_mode = #tpu.pipeline_mode<synchronous>, transform_indices = @transform_5, window_bounds = array<i64: 2, 32>}]} {
    %c0 = arith.constant 0 : index
    %c0_0 = arith.constant 0 : index
    %0 = vector.load %arg1[%c0, %c0_0] : memref<2x32xf32, #tpu.memory_space<vmem>>, vector<2x32xf32>
    %c0_1 = arith.constant 0 : index
    %c0_2 = arith.constant 0 : index
    %1 = vector.load %arg2[%c0_1, %c0_2] : memref<1x32xf32, #tpu.memory_space<vmem>>, vector<1x32xf32>
    %c0_3 = arith.constant 0 : index
    %c0_4 = arith.constant 0 : index
    %2 = vector.load %arg3[%c0_3, %c0_4] : memref<1x32xf32, #tpu.memory_space<vmem>>, vector<1x32xf32>
    %cst = arith.constant dense<0.000000e+00> : vector<2xf32>
    %3 = vector.multi_reduction <add>, %0, %cst [1] : vector<2x32xf32> to vector<2xf32>
    %4 = vector.shape_cast %3 : vector<2xf32> to vector<2x1xf32>
    %cst_5 = arith.constant 3.200000e+01 : f32
    %5 = vector.broadcast %cst_5 : f32 to vector<2x1xf32>
    %6 = arith.divf %4, %5 : vector<2x1xf32>
    %7 = vector.broadcast %6 : vector<2x1xf32> to vector<2x32xf32>
    %8 = arith.subf %0, %7 : vector<2x32xf32>
    %9 = arith.mulf %8, %8 : vector<2x32xf32>
    %cst_6 = arith.constant dense<0.000000e+00> : vector<2xf32>
    %10 = vector.multi_reduction <add>, %9, %cst_6 [1] : vector<2x32xf32> to vector<2xf32>
    %11 = vector.shape_cast %10 : vector<2xf32> to vector<2x1xf32>
    %cst_7 = arith.constant 3.200000e+01 : f32
    %12 = vector.broadcast %cst_7 : f32 to vector<2x1xf32>
    %13 = arith.divf %11, %12 : vector<2x1xf32>
    %14 = vector.broadcast %6 : vector<2x1xf32> to vector<2x32xf32>
    %15 = arith.subf %0, %14 : vector<2x32xf32>
    %cst_8 = arith.constant 9.99999974E-6 : f32
    %16 = vector.broadcast %cst_8 : f32 to vector<2x1xf32>
    %17 = arith.addf %13, %16 : vector<2x1xf32>
    %18 = math.rsqrt %17 : vector<2x1xf32>
    %19 = vector.broadcast %18 : vector<2x1xf32> to vector<2x32xf32>
    %20 = arith.mulf %15, %19 : vector<2x32xf32>
    %21 = vector.broadcast %1 : vector<1x32xf32> to vector<2x32xf32>
    %22 = arith.mulf %20, %21 : vector<2x32xf32>
    %23 = vector.broadcast %2 : vector<1x32xf32> to vector<2x32xf32>
    %24 = arith.addf %22, %23 : vector<2x32xf32>
    %c0_9 = arith.constant 0 : index
    %c0_10 = arith.constant 0 : index
    %25 = vector.load %arg4[%c0_9, %c0_10] : memref<32x32xbf16, #tpu.memory_space<vmem>>, vector<32x32xbf16>
    %26 = arith.truncf %24 : vector<2x32xf32> to vector<2x32xbf16>
    %cst_11 = arith.constant dense<0.000000e+00> : vector<2x32xf32>
    %27 = tpu.matmul %26, %25, %cst_11 {dimension_numbers = #tpu.dot_dimension_numbers<[1], [0], [0], [1], [0, 0, 1, 1], [], []>} : vector<2x32xbf16>, vector<32x32xbf16>, vector<2x32xf32> -> vector<2x32xf32>
    %c0_12 = arith.constant 0 : index
    %c0_13 = arith.constant 0 : index
    %28 = vector.load %arg5[%c0_12, %c0_13] : memref<1x32xf32, #tpu.memory_space<vmem>>, vector<1x32xf32>
    %29 = vector.broadcast %28 : vector<1x32xf32> to vector<2x32xf32>
    %30 = arith.addf %27, %29 : vector<2x32xf32>
    %c0_14 = arith.constant 0 : index
    %c0_15 = arith.constant 0 : index
    %31 = vector.load %arg6[%c0_14, %c0_15] : memref<2x32xf32, #tpu.memory_space<vmem>>, vector<2x32xf32>
    tpu.vector_store %arg6[%c0_14, %c0_15], %30 {strides = array<i32>} : memref<2x32xf32, #tpu.memory_space<vmem>>, vector<2x32xf32>,
    return
  }
  func.func @transform_0(%arg0: i32) -> (i32, i32) {
    %c0_i32 = arith.constant 0 : i32
    %c0_i32_0 = arith.constant 0 : i32
    %c0_i32_1 = arith.constant 0 : i32
    return %c0_i32, %c0_i32_0 : i32, i32
  }
  func.func @transform_1(%arg0: i32) -> (i32, i32) {
    %c0_i32 = arith.constant 0 : i32
    %c0_i32_0 = arith.constant 0 : i32
    %c0_i32_1 = arith.constant 0 : i32
    return %c0_i32, %c0_i32_0 : i32, i32
  }
  func.func @transform_2(%arg0: i32) -> (i32, i32) {
    %c0_i32 = arith.constant 0 : i32
    %c0_i32_0 = arith.constant 0 : i32
    %c0_i32_1 = arith.constant 0 : i32
    return %c0_i32, %c0_i32_0 : i32, i32
  }
  func.func @transform_3(%arg0: i32) -> (i32, i32) {
    %c0_i32 = arith.constant 0 : i32
    %c0_i32_0 = arith.constant 0 : i32
    %c0_i32_1 = arith.constant 0 : i32
    return %c0_i32, %c0_i32_0 : i32, i32
  }
  func.func @transform_4(%arg0: i32) -> (i32, i32) {
    %c0_i32 = arith.constant 0 : i32
    %c0_i32_0 = arith.constant 0 : i32
    %c0_i32_1 = arith.constant 0 : i32
    return %c0_i32, %c0_i32_0 : i32, i32
  }
  func.func @transform_5(%arg0: i32) -> (i32, i32) {
    %c0_i32 = arith.constant 0 : i32
    %c0_i32_0 = arith.constant 0 : i32
    %c0_i32_1 = arith.constant 0 : i32
    return %c0_i32, %c0_i32_0 : i32, i32
  }
}

module attributes {stable_mosaic.version = 11 : i64} {
  func.func @_encoder_kernel(%arg0: i32, %arg1: i32, %arg2: memref<2x8x32xf32, #tpu.memory_space<vmem>>, %arg3: memref<1x1x32xf32, #tpu.memory_space<vmem>>, %arg4: memref<1x1x32xf32, #tpu.memory_space<vmem>>, %arg5: memref<1x32x96xbf16, #tpu.memory_space<vmem>>, %arg6: memref<1x1x96xf32, #tpu.memory_space<vmem>>, %arg7: memref<1x32x32xbf16, #tpu.memory_space<vmem>>, %arg8: memref<1x1x32xf32, #tpu.memory_space<vmem>>, %arg9: memref<1x1x32xf32, #tpu.memory_space<vmem>>, %arg10: memref<1x1x32xf32, #tpu.memory_space<vmem>>, %arg11: memref<1x32x128xbf16, #tpu.memory_space<vmem>>, %arg12: memref<1x1x128xf32, #tpu.memory_space<vmem>>, %arg13: memref<1x128x32xbf16, #tpu.memory_space<vmem>>, %arg14: memref<1x1x32xf32, #tpu.memory_space<vmem>>, %arg15: memref<2x8x32xf32, #tpu.memory_space<vmem>>, %arg16: memref<2x8x32xf32, #tpu.memory_space<vmem>>) attributes {dimension_semantics = [#tpu.dimension_semantics<parallel>, #tpu.dimension_semantics<arbitrary>], iteration_bounds = array<i64: 1, 2>, scalar_prefetch = 0 : i64, scratch_operands = 1 : i64, tpu.core_type = #tpu.core_type<tc>, window_params = [{transform_indices = @transform_0, window_bounds = array<i64: 2, 8, 32>}, {transform_indices = @transform_1, window_bounds = array<i64: 1, 1, 32>}, {transform_indices = @transform_2, window_bounds = array<i64: 1, 1, 32>}, {transform_indices = @transform_3, window_bounds = array<i64: 1, 32, 96>}, {transform_indices = @transform_4, window_bounds = array<i64: 1, 1, 96>}, {transform_indices = @transform_5, window_bounds = array<i64: 1, 32, 32>}, {transform_indices = @transform_6, window_bounds = array<i64: 1, 1, 32>}, {transform_indices = @transform_7, window_bounds = array<i64: 1, 1, 32>}, {transform_indices = @transform_8, window_bounds = array<i64: 1, 1, 32>}, {transform_indices = @transform_9, window_bounds = array<i64: 1, 32, 128>}, {transform_indices = @transform_10, window_bounds = array<i64: 1, 1, 128>}, {transform_indices = @transform_11, window_bounds = array<i64: 1, 128, 32>}, {transform_indices = @transform_12, window_bounds = array<i64: 1, 1, 32>}, {transform_indices = @transform_13, window_bounds = array<i64: 2, 8, 32>}]} {
    %c0_i32 = arith.constant 0 : i32
    %0 = arith.cmpi eq, %arg1, %c0_i32 : i32
    %1 = arith.extui %0 : i1 to i32
    %c0_i32_0 = arith.constant 0 : i32
    %2 = arith.cmpi ne, %1, %c0_i32_0 : i32
    scf.if %2 {
      %c0_164 = arith.constant 0 : index
      %c0_165 = arith.constant 0 : index
      %c0_166 = arith.constant 0 : index
      %387 = vector.load %arg2[%c0_164, %c0_165, %c0_166] : memref<2x8x32xf32, #tpu.memory_space<vmem>>, vector<2x8x32xf32>
      %c0_167 = arith.constant 0 : index
      %c0_168 = arith.constant 0 : index
      %c0_169 = arith.constant 0 : index
      %388 = vector.load %arg16[%c0_167, %c0_168, %c0_169] : memref<2x8x32xf32, #tpu.memory_space<vmem>>, vector<2x8x32xf32>
      tpu.vector_store %arg16[%c0_167, %c0_168, %c0_169], %387 {strides = array<i32>} : memref<2x8x32xf32, #tpu.memory_space<vmem>>, vector<2x8x32xf32>,
    } else {
    }
    %3 = tpu.iota {dimensions = array<i32: 0>} : vector<8x8xi32>
    %4 = tpu.iota {dimensions = array<i32: 1>} : vector<8x8xi32>
    %5 = arith.cmpi sle, %4, %3 : vector<8x8xi32>
    %cst = arith.constant 0.000000e+00 : f32
    %cst_1 = arith.constant -1.000000e+09 : f32
    %6 = vector.broadcast %cst : f32 to vector<8x8xf32>
    %7 = vector.broadcast %cst_1 : f32 to vector<8x8xf32>
    %8 = arith.select %5, %6, %7 : vector<8x8xi1>, vector<8x8xf32>
    %c0 = arith.constant 0 : index
    %c0_2 = arith.constant 0 : index
    %c0_3 = arith.constant 0 : index
    %9 = vector.load %arg16[%c0, %c0_2, %c0_3] : memref<2x8x32xf32, #tpu.memory_space<vmem>>, vector<1x8x32xf32>
    %10 = vector.shape_cast %9 : vector<1x8x32xf32> to vector<8x32xf32>
    %c0_4 = arith.constant 0 : index
    %c0_5 = arith.constant 0 : index
    %c0_6 = arith.constant 0 : index
    %11 = vector.load %arg3[%c0_4, %c0_5, %c0_6] : memref<1x1x32xf32, #tpu.memory_space<vmem>>, vector<1x1x32xf32>
    %12 = vector.shape_cast %11 : vector<1x1x32xf32> to vector<1x32xf32>
    %c0_7 = arith.constant 0 : index
    %c0_8 = arith.constant 0 : index
    %c0_9 = arith.constant 0 : index
    %13 = vector.load %arg4[%c0_7, %c0_8, %c0_9] : memref<1x1x32xf32, #tpu.memory_space<vmem>>, vector<1x1x32xf32>
    %14 = vector.shape_cast %13 : vector<1x1x32xf32> to vector<1x32xf32>
    %cst_10 = arith.constant dense<0.000000e+00> : vector<8xf32>
    %15 = vector.multi_reduction <add>, %10, %cst_10 [1] : vector<8x32xf32> to vector<8xf32>
    %16 = vector.shape_cast %15 : vector<8xf32> to vector<8x1xf32>
    %cst_11 = arith.constant 3.200000e+01 : f32
    %17 = vector.broadcast %cst_11 : f32 to vector<8x1xf32>
    %18 = arith.divf %16, %17 : vector<8x1xf32>
    %19 = vector.broadcast %18 : vector<8x1xf32> to vector<8x32xf32>
    %20 = arith.subf %10, %19 : vector<8x32xf32>
    %21 = arith.mulf %20, %20 : vector<8x32xf32>
    %cst_12 = arith.constant dense<0.000000e+00> : vector<8xf32>
    %22 = vector.multi_reduction <add>, %21, %cst_12 [1] : vector<8x32xf32> to vector<8xf32>
    %23 = vector.shape_cast %22 : vector<8xf32> to vector<8x1xf32>
    %cst_13 = arith.constant 3.200000e+01 : f32
    %24 = vector.broadcast %cst_13 : f32 to vector<8x1xf32>
    %25 = arith.divf %23, %24 : vector<8x1xf32>
    %26 = vector.broadcast %18 : vector<8x1xf32> to vector<8x32xf32>
    %27 = arith.subf %10, %26 : vector<8x32xf32>
    %cst_14 = arith.constant 9.99999974E-6 : f32
    %28 = vector.broadcast %cst_14 : f32 to vector<8x1xf32>
    %29 = arith.addf %25, %28 : vector<8x1xf32>
    %30 = math.rsqrt %29 : vector<8x1xf32>
    %31 = vector.broadcast %30 : vector<8x1xf32> to vector<8x32xf32>
    %32 = arith.mulf %27, %31 : vector<8x32xf32>
    %33 = vector.broadcast %12 : vector<1x32xf32> to vector<8x32xf32>
    %34 = arith.mulf %32, %33 : vector<8x32xf32>
    %35 = vector.broadcast %14 : vector<1x32xf32> to vector<8x32xf32>
    %36 = arith.addf %34, %35 : vector<8x32xf32>
    %c0_15 = arith.constant 0 : index
    %c0_16 = arith.constant 0 : index
    %c0_17 = arith.constant 0 : index
    %37 = vector.load %arg5[%c0_15, %c0_16, %c0_17] : memref<1x32x96xbf16, #tpu.memory_space<vmem>>, vector<1x32x96xbf16>
    %38 = vector.shape_cast %37 : vector<1x32x96xbf16> to vector<32x96xbf16>
    %39 = arith.truncf %36 : vector<8x32xf32> to vector<8x32xbf16>
    %cst_18 = arith.constant dense<0.000000e+00> : vector<8x96xf32>
    %40 = tpu.matmul %39, %38, %cst_18 {dimension_numbers = #tpu.dot_dimension_numbers<[1], [0], [0], [1], [0, 0, 1, 1], [], []>} : vector<8x32xbf16>, vector<32x96xbf16>, vector<8x96xf32> -> vector<8x96xf32>
    %c0_19 = arith.constant 0 : index
    %c0_20 = arith.constant 0 : index
    %c0_21 = arith.constant 0 : index
    %41 = vector.load %arg6[%c0_19, %c0_20, %c0_21] : memref<1x1x96xf32, #tpu.memory_space<vmem>>, vector<1x1x96xf32>
    %42 = vector.shape_cast %41 : vector<1x1x96xf32> to vector<1x96xf32>
    %43 = vector.broadcast %42 : vector<1x96xf32> to vector<8x96xf32>
    %44 = arith.addf %40, %43 : vector<8x96xf32>
    %45 = vector.extract_strided_slice %44 {offsets = [0, 0], sizes = [8, 8], strides = [1, 1]} : vector<8x96xf32> to vector<8x8xf32>
    %46 = vector.extract_strided_slice %44 {offsets = [0, 32], sizes = [8, 8], strides = [1, 1]} : vector<8x96xf32> to vector<8x8xf32>
    %47 = vector.extract_strided_slice %44 {offsets = [0, 64], sizes = [8, 8], strides = [1, 1]} : vector<8x96xf32> to vector<8x8xf32>
    %48 = arith.truncf %45 : vector<8x8xf32> to vector<8x8xbf16>
    %49 = arith.truncf %46 : vector<8x8xf32> to vector<8x8xbf16>
    %cst_22 = arith.constant dense<0.000000e+00> : vector<8x8xf32>
    %50 = tpu.matmul %48, %49, %cst_22 {dimension_numbers = #tpu.dot_dimension_numbers<[1], [1], [0], [0], [0, 0, 1, 0], [], []>} : vector<8x8xbf16>, vector<8x8xbf16>, vector<8x8xf32> -> vector<8x8xf32>
    %cst_23 = arith.constant 0.353553385 : f32
    %51 = vector.broadcast %cst_23 : f32 to vector<8x8xf32>
    %52 = arith.mulf %50, %51 : vector<8x8xf32>
    %53 = arith.addf %52, %8 : vector<8x8xf32>
    %cst_24 = arith.constant dense<0xFF800000> : vector<8xf32>
    %54 = vector.multi_reduction <maximumf>, %53, %cst_24 [1] : vector<8x8xf32> to vector<8xf32>
    %55 = vector.shape_cast %54 : vector<8xf32> to vector<8x1xf32>
    %56 = vector.broadcast %55 : vector<8x1xf32> to vector<8x8xf32>
    %57 = arith.subf %53, %56 : vector<8x8xf32>
    %58 = math.exp %57 : vector<8x8xf32>
    %cst_25 = arith.constant dense<0.000000e+00> : vector<8xf32>
    %59 = vector.multi_reduction <add>, %58, %cst_25 [1] : vector<8x8xf32> to vector<8xf32>
    %60 = vector.shape_cast %59 : vector<8xf32> to vector<8x1xf32>
    %61 = tpu.reciprocal %60 {approx = true} : vector<8x1xf32> -> vector<8x1xf32>
    %62 = vector.broadcast %61 : vector<8x1xf32> to vector<8x8xf32>
    %63 = arith.mulf %58, %62 : vector<8x8xf32>
    %64 = arith.truncf %63 : vector<8x8xf32> to vector<8x8xbf16>
    %65 = arith.truncf %47 : vector<8x8xf32> to vector<8x8xbf16>
    %cst_26 = arith.constant dense<0.000000e+00> : vector<8x8xf32>
    %66 = tpu.matmul %64, %65, %cst_26 {dimension_numbers = #tpu.dot_dimension_numbers<[1], [0], [0], [1], [0, 0, 1, 1], [], []>} : vector<8x8xbf16>, vector<8x8xbf16>, vector<8x8xf32> -> vector<8x8xf32>
    %67 = vector.extract_strided_slice %44 {offsets = [0, 8], sizes = [8, 8], strides = [1, 1]} : vector<8x96xf32> to vector<8x8xf32>
    %68 = vector.extract_strided_slice %44 {offsets = [0, 40], sizes = [8, 8], strides = [1, 1]} : vector<8x96xf32> to vector<8x8xf32>
    %69 = vector.extract_strided_slice %44 {offsets = [0, 72], sizes = [8, 8], strides = [1, 1]} : vector<8x96xf32> to vector<8x8xf32>
    %70 = arith.truncf %67 : vector<8x8xf32> to vector<8x8xbf16>
    %71 = arith.truncf %68 : vector<8x8xf32> to vector<8x8xbf16>
    %cst_27 = arith.constant dense<0.000000e+00> : vector<8x8xf32>
    %72 = tpu.matmul %70, %71, %cst_27 {dimension_numbers = #tpu.dot_dimension_numbers<[1], [1], [0], [0], [0, 0, 1, 0], [], []>} : vector<8x8xbf16>, vector<8x8xbf16>, vector<8x8xf32> -> vector<8x8xf32>
    %cst_28 = arith.constant 0.353553385 : f32
    %73 = vector.broadcast %cst_28 : f32 to vector<8x8xf32>
    %74 = arith.mulf %72, %73 : vector<8x8xf32>
    %75 = arith.addf %74, %8 : vector<8x8xf32>
    %cst_29 = arith.constant dense<0xFF800000> : vector<8xf32>
    %76 = vector.multi_reduction <maximumf>, %75, %cst_29 [1] : vector<8x8xf32> to vector<8xf32>
    %77 = vector.shape_cast %76 : vector<8xf32> to vector<8x1xf32>
    %78 = vector.broadcast %77 : vector<8x1xf32> to vector<8x8xf32>
    %79 = arith.subf %75, %78 : vector<8x8xf32>
    %80 = math.exp %79 : vector<8x8xf32>
    %cst_30 = arith.constant dense<0.000000e+00> : vector<8xf32>
    %81 = vector.multi_reduction <add>, %80, %cst_30 [1] : vector<8x8xf32> to vector<8xf32>
    %82 = vector.shape_cast %81 : vector<8xf32> to vector<8x1xf32>
    %83 = tpu.reciprocal %82 {approx = true} : vector<8x1xf32> -> vector<8x1xf32>
    %84 = vector.broadcast %83 : vector<8x1xf32> to vector<8x8xf32>
    %85 = arith.mulf %80, %84 : vector<8x8xf32>
    %86 = arith.truncf %85 : vector<8x8xf32> to vector<8x8xbf16>
    %87 = arith.truncf %69 : vector<8x8xf32> to vector<8x8xbf16>
    %cst_31 = arith.constant dense<0.000000e+00> : vector<8x8xf32>
    %88 = tpu.matmul %86, %87, %cst_31 {dimension_numbers = #tpu.dot_dimension_numbers<[1], [0], [0], [1], [0, 0, 1, 1], [], []>} : vector<8x8xbf16>, vector<8x8xbf16>, vector<8x8xf32> -> vector<8x8xf32>
    %89 = vector.extract_strided_slice %44 {offsets = [0, 16], sizes = [8, 8], strides = [1, 1]} : vector<8x96xf32> to vector<8x8xf32>
    %90 = vector.extract_strided_slice %44 {offsets = [0, 48], sizes = [8, 8], strides = [1, 1]} : vector<8x96xf32> to vector<8x8xf32>
    %91 = vector.extract_strided_slice %44 {offsets = [0, 80], sizes = [8, 8], strides = [1, 1]} : vector<8x96xf32> to vector<8x8xf32>
    %92 = arith.truncf %89 : vector<8x8xf32> to vector<8x8xbf16>
    %93 = arith.truncf %90 : vector<8x8xf32> to vector<8x8xbf16>
    %cst_32 = arith.constant dense<0.000000e+00> : vector<8x8xf32>
    %94 = tpu.matmul %92, %93, %cst_32 {dimension_numbers = #tpu.dot_dimension_numbers<[1], [1], [0], [0], [0, 0, 1, 0], [], []>} : vector<8x8xbf16>, vector<8x8xbf16>, vector<8x8xf32> -> vector<8x8xf32>
    %cst_33 = arith.constant 0.353553385 : f32
    %95 = vector.broadcast %cst_33 : f32 to vector<8x8xf32>
    %96 = arith.mulf %94, %95 : vector<8x8xf32>
    %97 = arith.addf %96, %8 : vector<8x8xf32>
    %cst_34 = arith.constant dense<0xFF800000> : vector<8xf32>
    %98 = vector.multi_reduction <maximumf>, %97, %cst_34 [1] : vector<8x8xf32> to vector<8xf32>
    %99 = vector.shape_cast %98 : vector<8xf32> to vector<8x1xf32>
    %100 = vector.broadcast %99 : vector<8x1xf32> to vector<8x8xf32>
    %101 = arith.subf %97, %100 : vector<8x8xf32>
    %102 = math.exp %101 : vector<8x8xf32>
    %cst_35 = arith.constant dense<0.000000e+00> : vector<8xf32>
    %103 = vector.multi_reduction <add>, %102, %cst_35 [1] : vector<8x8xf32> to vector<8xf32>
    %104 = vector.shape_cast %103 : vector<8xf32> to vector<8x1xf32>
    %105 = tpu.reciprocal %104 {approx = true} : vector<8x1xf32> -> vector<8x1xf32>
    %106 = vector.broadcast %105 : vector<8x1xf32> to vector<8x8xf32>
    %107 = arith.mulf %102, %106 : vector<8x8xf32>
    %108 = arith.truncf %107 : vector<8x8xf32> to vector<8x8xbf16>
    %109 = arith.truncf %91 : vector<8x8xf32> to vector<8x8xbf16>
    %cst_36 = arith.constant dense<0.000000e+00> : vector<8x8xf32>
    %110 = tpu.matmul %108, %109, %cst_36 {dimension_numbers = #tpu.dot_dimension_numbers<[1], [0], [0], [1], [0, 0, 1, 1], [], []>} : vector<8x8xbf16>, vector<8x8xbf16>, vector<8x8xf32> -> vector<8x8xf32>
    %111 = vector.extract_strided_slice %44 {offsets = [0, 24], sizes = [8, 8], strides = [1, 1]} : vector<8x96xf32> to vector<8x8xf32>
    %112 = vector.extract_strided_slice %44 {offsets = [0, 56], sizes = [8, 8], strides = [1, 1]} : vector<8x96xf32> to vector<8x8xf32>
    %113 = vector.extract_strided_slice %44 {offsets = [0, 88], sizes = [8, 8], strides = [1, 1]} : vector<8x96xf32> to vector<8x8xf32>
    %114 = arith.truncf %111 : vector<8x8xf32> to vector<8x8xbf16>
    %115 = arith.truncf %112 : vector<8x8xf32> to vector<8x8xbf16>
    %cst_37 = arith.constant dense<0.000000e+00> : vector<8x8xf32>
    %116 = tpu.matmul %114, %115, %cst_37 {dimension_numbers = #tpu.dot_dimension_numbers<[1], [1], [0], [0], [0, 0, 1, 0], [], []>} : vector<8x8xbf16>, vector<8x8xbf16>, vector<8x8xf32> -> vector<8x8xf32>
    %cst_38 = arith.constant 0.353553385 : f32
    %117 = vector.broadcast %cst_38 : f32 to vector<8x8xf32>
    %118 = arith.mulf %116, %117 : vector<8x8xf32>
    %119 = arith.addf %118, %8 : vector<8x8xf32>
    %cst_39 = arith.constant dense<0xFF800000> : vector<8xf32>
    %120 = vector.multi_reduction <maximumf>, %119, %cst_39 [1] : vector<8x8xf32> to vector<8xf32>
    %121 = vector.shape_cast %120 : vector<8xf32> to vector<8x1xf32>
    %122 = vector.broadcast %121 : vector<8x1xf32> to vector<8x8xf32>
    %123 = arith.subf %119, %122 : vector<8x8xf32>
    %124 = math.exp %123 : vector<8x8xf32>
    %cst_40 = arith.constant dense<0.000000e+00> : vector<8xf32>
    %125 = vector.multi_reduction <add>, %124, %cst_40 [1] : vector<8x8xf32> to vector<8xf32>
    %126 = vector.shape_cast %125 : vector<8xf32> to vector<8x1xf32>
    %127 = tpu.reciprocal %126 {approx = true} : vector<8x1xf32> -> vector<8x1xf32>
    %128 = vector.broadcast %127 : vector<8x1xf32> to vector<8x8xf32>
    %129 = arith.mulf %124, %128 : vector<8x8xf32>
    %130 = arith.truncf %129 : vector<8x8xf32> to vector<8x8xbf16>
    %131 = arith.truncf %113 : vector<8x8xf32> to vector<8x8xbf16>
    %cst_41 = arith.constant dense<0.000000e+00> : vector<8x8xf32>
    %132 = tpu.matmul %130, %131, %cst_41 {dimension_numbers = #tpu.dot_dimension_numbers<[1], [0], [0], [1], [0, 0, 1, 1], [], []>} : vector<8x8xbf16>, vector<8x8xbf16>, vector<8x8xf32> -> vector<8x8xf32>
    %133 = tpu.concatenate %66, %88, %110, %132 in 1 : vector<8x8xf32>, vector<8x8xf32>, vector<8x8xf32>, vector<8x8xf32> -> vector<8x32xf32>
    %c0_42 = arith.constant 0 : index
    %c0_43 = arith.constant 0 : index
    %c0_44 = arith.constant 0 : index
    %134 = vector.load %arg7[%c0_42, %c0_43, %c0_44] : memref<1x32x32xbf16, #tpu.memory_space<vmem>>, vector<1x32x32xbf16>
    %135 = vector.shape_cast %134 : vector<1x32x32xbf16> to vector<32x32xbf16>
    %136 = arith.truncf %133 : vector<8x32xf32> to vector<8x32xbf16>
    %cst_45 = arith.constant dense<0.000000e+00> : vector<8x32xf32>
    %137 = tpu.matmul %136, %135, %cst_45 {dimension_numbers = #tpu.dot_dimension_numbers<[1], [0], [0], [1], [0, 0, 1, 1], [], []>} : vector<8x32xbf16>, vector<32x32xbf16>, vector<8x32xf32> -> vector<8x32xf32>
    %138 = arith.addf %10, %137 : vector<8x32xf32>
    %c0_46 = arith.constant 0 : index
    %c0_47 = arith.constant 0 : index
    %c0_48 = arith.constant 0 : index
    %139 = vector.load %arg8[%c0_46, %c0_47, %c0_48] : memref<1x1x32xf32, #tpu.memory_space<vmem>>, vector<1x1x32xf32>
    %140 = vector.shape_cast %139 : vector<1x1x32xf32> to vector<1x32xf32>
    %141 = vector.broadcast %140 : vector<1x32xf32> to vector<8x32xf32>
    %142 = arith.addf %138, %141 : vector<8x32xf32>
    %c0_49 = arith.constant 0 : index
    %c0_50 = arith.constant 0 : index
    %c0_51 = arith.constant 0 : index
    %143 = vector.load %arg9[%c0_49, %c0_50, %c0_51] : memref<1x1x32xf32, #tpu.memory_space<vmem>>, vector<1x1x32xf32>
    %144 = vector.shape_cast %143 : vector<1x1x32xf32> to vector<1x32xf32>
    %c0_52 = arith.constant 0 : index
    %c0_53 = arith.constant 0 : index
    %c0_54 = arith.constant 0 : index
    %145 = vector.load %arg10[%c0_52, %c0_53, %c0_54] : memref<1x1x32xf32, #tpu.memory_space<vmem>>, vector<1x1x32xf32>
    %146 = vector.shape_cast %145 : vector<1x1x32xf32> to vector<1x32xf32>
    %cst_55 = arith.constant dense<0.000000e+00> : vector<8xf32>
    %147 = vector.multi_reduction <add>, %142, %cst_55 [1] : vector<8x32xf32> to vector<8xf32>
    %148 = vector.shape_cast %147 : vector<8xf32> to vector<8x1xf32>
    %cst_56 = arith.constant 3.200000e+01 : f32
    %149 = vector.broadcast %cst_56 : f32 to vector<8x1xf32>
    %150 = arith.divf %148, %149 : vector<8x1xf32>
    %151 = vector.broadcast %150 : vector<8x1xf32> to vector<8x32xf32>
    %152 = arith.subf %142, %151 : vector<8x32xf32>
    %153 = arith.mulf %152, %152 : vector<8x32xf32>
    %cst_57 = arith.constant dense<0.000000e+00> : vector<8xf32>
    %154 = vector.multi_reduction <add>, %153, %cst_57 [1] : vector<8x32xf32> to vector<8xf32>
    %155 = vector.shape_cast %154 : vector<8xf32> to vector<8x1xf32>
    %cst_58 = arith.constant 3.200000e+01 : f32
    %156 = vector.broadcast %cst_58 : f32 to vector<8x1xf32>
    %157 = arith.divf %155, %156 : vector<8x1xf32>
    %158 = vector.broadcast %150 : vector<8x1xf32> to vector<8x32xf32>
    %159 = arith.subf %142, %158 : vector<8x32xf32>
    %cst_59 = arith.constant 9.99999974E-6 : f32
    %160 = vector.broadcast %cst_59 : f32 to vector<8x1xf32>
    %161 = arith.addf %157, %160 : vector<8x1xf32>
    %162 = math.rsqrt %161 : vector<8x1xf32>
    %163 = vector.broadcast %162 : vector<8x1xf32> to vector<8x32xf32>
    %164 = arith.mulf %159, %163 : vector<8x32xf32>
    %165 = vector.broadcast %144 : vector<1x32xf32> to vector<8x32xf32>
    %166 = arith.mulf %164, %165 : vector<8x32xf32>
    %167 = vector.broadcast %146 : vector<1x32xf32> to vector<8x32xf32>
    %168 = arith.addf %166, %167 : vector<8x32xf32>
    %c0_60 = arith.constant 0 : index
    %c0_61 = arith.constant 0 : index
    %c0_62 = arith.constant 0 : index
    %169 = vector.load %arg11[%c0_60, %c0_61, %c0_62] : memref<1x32x128xbf16, #tpu.memory_space<vmem>>, vector<1x32x128xbf16>
    %170 = vector.shape_cast %169 : vector<1x32x128xbf16> to vector<32x128xbf16>
    %171 = arith.truncf %168 : vector<8x32xf32> to vector<8x32xbf16>
    %cst_63 = arith.constant dense<0.000000e+00> : vector<8x128xf32>
    %172 = tpu.matmul %171, %170, %cst_63 {dimension_numbers = #tpu.dot_dimension_numbers<[1], [0], [0], [1], [0, 0, 1, 1], [], []>} : vector<8x32xbf16>, vector<32x128xbf16>, vector<8x128xf32> -> vector<8x128xf32>
    %c0_64 = arith.constant 0 : index
    %c0_65 = arith.constant 0 : index
    %c0_66 = arith.constant 0 : index
    %173 = vector.load %arg12[%c0_64, %c0_65, %c0_66] : memref<1x1x128xf32, #tpu.memory_space<vmem>>, vector<1x1x128xf32>
    %174 = vector.shape_cast %173 : vector<1x1x128xf32> to vector<1x128xf32>
    %175 = vector.broadcast %174 : vector<1x128xf32> to vector<8x128xf32>
    %176 = arith.addf %172, %175 : vector<8x128xf32>
    %cst_67 = arith.constant -1.702000e+00 : f32
    %177 = vector.broadcast %cst_67 : f32 to vector<8x128xf32>
    %178 = arith.mulf %177, %176 : vector<8x128xf32>
    %179 = math.exp %178 : vector<8x128xf32>
    %cst_68 = arith.constant 1.000000e+00 : f32
    %180 = vector.broadcast %cst_68 : f32 to vector<8x128xf32>
    %181 = arith.addf %180, %179 : vector<8x128xf32>
    %cst_69 = arith.constant 1.000000e+00 : f32
    %182 = vector.broadcast %cst_69 : f32 to vector<8x128xf32>
    %183 = arith.divf %182, %181 : vector<8x128xf32>
    %184 = arith.mulf %176, %183 : vector<8x128xf32>
    %c0_70 = arith.constant 0 : index
    %c0_71 = arith.constant 0 : index
    %c0_72 = arith.constant 0 : index
    %185 = vector.load %arg13[%c0_70, %c0_71, %c0_72] : memref<1x128x32xbf16, #tpu.memory_space<vmem>>, vector<1x128x32xbf16>
    %186 = vector.shape_cast %185 : vector<1x128x32xbf16> to vector<128x32xbf16>
    %187 = arith.truncf %184 : vector<8x128xf32> to vector<8x128xbf16>
    %cst_73 = arith.constant dense<0.000000e+00> : vector<8x32xf32>
    %188 = tpu.matmul %187, %186, %cst_73 {dimension_numbers = #tpu.dot_dimension_numbers<[1], [0], [0], [1], [0, 0, 1, 1], [], []>} : vector<8x128xbf16>, vector<128x32xbf16>, vector<8x32xf32> -> vector<8x32xf32>
    %c0_74 = arith.constant 0 : index
    %c0_75 = arith.constant 0 : index
    %c0_76 = arith.constant 0 : index
    %189 = vector.load %arg14[%c0_74, %c0_75, %c0_76] : memref<1x1x32xf32, #tpu.memory_space<vmem>>, vector<1x1x32xf32>
    %190 = vector.shape_cast %189 : vector<1x1x32xf32> to vector<1x32xf32>
    %191 = vector.broadcast %190 : vector<1x32xf32> to vector<8x32xf32>
    %192 = arith.addf %188, %191 : vector<8x32xf32>
    %193 = arith.addf %142, %192 : vector<8x32xf32>
    %c0_77 = arith.constant 0 : index
    %c0_78 = arith.constant 0 : index
    %c0_79 = arith.constant 0 : index
    %194 = vector.load %arg16[%c0_77, %c0_78, %c0_79] : memref<2x8x32xf32, #tpu.memory_space<vmem>>, vector<1x8x32xf32>
    %195 = vector.shape_cast %194 : vector<1x8x32xf32> to vector<8x32xf32>
    %196 = vector.shape_cast %193 : vector<8x32xf32> to vector<1x8x32xf32>
    tpu.vector_store %arg16[%c0_77, %c0_78, %c0_79], %196 {strides = array<i32>} : memref<2x8x32xf32, #tpu.memory_space<vmem>>, vector<1x8x32xf32>,
    %c1 = arith.constant 1 : index
    %c0_80 = arith.constant 0 : index
    %c0_81 = arith.constant 0 : index
    %197 = vector.load %arg16[%c1, %c0_80, %c0_81] : memref<2x8x32xf32, #tpu.memory_space<vmem>>, vector<1x8x32xf32>
    %198 = vector.shape_cast %197 : vector<1x8x32xf32> to vector<8x32xf32>
    %c0_82 = arith.constant 0 : index
    %c0_83 = arith.constant 0 : index
    %c0_84 = arith.constant 0 : index
    %199 = vector.load %arg3[%c0_82, %c0_83, %c0_84] : memref<1x1x32xf32, #tpu.memory_space<vmem>>, vector<1x1x32xf32>
    %200 = vector.shape_cast %199 : vector<1x1x32xf32> to vector<1x32xf32>
    %c0_85 = arith.constant 0 : index
    %c0_86 = arith.constant 0 : index
    %c0_87 = arith.constant 0 : index
    %201 = vector.load %arg4[%c0_85, %c0_86, %c0_87] : memref<1x1x32xf32, #tpu.memory_space<vmem>>, vector<1x1x32xf32>
    %202 = vector.shape_cast %201 : vector<1x1x32xf32> to vector<1x32xf32>
    %cst_88 = arith.constant dense<0.000000e+00> : vector<8xf32>
    %203 = vector.multi_reduction <add>, %198, %cst_88 [1] : vector<8x32xf32> to vector<8xf32>
    %204 = vector.shape_cast %203 : vector<8xf32> to vector<8x1xf32>
    %cst_89 = arith.constant 3.200000e+01 : f32
    %205 = vector.broadcast %cst_89 : f32 to vector<8x1xf32>
    %206 = arith.divf %204, %205 : vector<8x1xf32>
    %207 = vector.broadcast %206 : vector<8x1xf32> to vector<8x32xf32>
    %208 = arith.subf %198, %207 : vector<8x32xf32>
    %209 = arith.mulf %208, %208 : vector<8x32xf32>
    %cst_90 = arith.constant dense<0.000000e+00> : vector<8xf32>
    %210 = vector.multi_reduction <add>, %209, %cst_90 [1] : vector<8x32xf32> to vector<8xf32>
    %211 = vector.shape_cast %210 : vector<8xf32> to vector<8x1xf32>
    %cst_91 = arith.constant 3.200000e+01 : f32
    %212 = vector.broadcast %cst_91 : f32 to vector<8x1xf32>
    %213 = arith.divf %211, %212 : vector<8x1xf32>
    %214 = vector.broadcast %206 : vector<8x1xf32> to vector<8x32xf32>
    %215 = arith.subf %198, %214 : vector<8x32xf32>
    %cst_92 = arith.constant 9.99999974E-6 : f32
    %216 = vector.broadcast %cst_92 : f32 to vector<8x1xf32>
    %217 = arith.addf %213, %216 : vector<8x1xf32>
    %218 = math.rsqrt %217 : vector<8x1xf32>
    %219 = vector.broadcast %218 : vector<8x1xf32> to vector<8x32xf32>
    %220 = arith.mulf %215, %219 : vector<8x32xf32>
    %221 = vector.broadcast %200 : vector<1x32xf32> to vector<8x32xf32>
    %222 = arith.mulf %220, %221 : vector<8x32xf32>
    %223 = vector.broadcast %202 : vector<1x32xf32> to vector<8x32xf32>
    %224 = arith.addf %222, %223 : vector<8x32xf32>
    %c0_93 = arith.constant 0 : index
    %c0_94 = arith.constant 0 : index
    %c0_95 = arith.constant 0 : index
    %225 = vector.load %arg5[%c0_93, %c0_94, %c0_95] : memref<1x32x96xbf16, #tpu.memory_space<vmem>>, vector<1x32x96xbf16>
    %226 = vector.shape_cast %225 : vector<1x32x96xbf16> to vector<32x96xbf16>
    %227 = arith.truncf %224 : vector<8x32xf32> to vector<8x32xbf16>
    %cst_96 = arith.constant dense<0.000000e+00> : vector<8x96xf32>
    %228 = tpu.matmul %227, %226, %cst_96 {dimension_numbers = #tpu.dot_dimension_numbers<[1], [0], [0], [1], [0, 0, 1, 1], [], []>} : vector<8x32xbf16>, vector<32x96xbf16>, vector<8x96xf32> -> vector<8x96xf32>
    %c0_97 = arith.constant 0 : index
    %c0_98 = arith.constant 0 : index
    %c0_99 = arith.constant 0 : index
    %229 = vector.load %arg6[%c0_97, %c0_98, %c0_99] : memref<1x1x96xf32, #tpu.memory_space<vmem>>, vector<1x1x96xf32>
    %230 = vector.shape_cast %229 : vector<1x1x96xf32> to vector<1x96xf32>
    %231 = vector.broadcast %230 : vector<1x96xf32> to vector<8x96xf32>
    %232 = arith.addf %228, %231 : vector<8x96xf32>
    %233 = vector.extract_strided_slice %232 {offsets = [0, 0], sizes = [8, 8], strides = [1, 1]} : vector<8x96xf32> to vector<8x8xf32>
    %234 = vector.extract_strided_slice %232 {offsets = [0, 32], sizes = [8, 8], strides = [1, 1]} : vector<8x96xf32> to vector<8x8xf32>
    %235 = vector.extract_strided_slice %232 {offsets = [0, 64], sizes = [8, 8], strides = [1, 1]} : vector<8x96xf32> to vector<8x8xf32>
    %236 = arith.truncf %233 : vector<8x8xf32> to vector<8x8xbf16>
    %237 = arith.truncf %234 : vector<8x8xf32> to vector<8x8xbf16>
    %cst_100 = arith.constant dense<0.000000e+00> : vector<8x8xf32>
    %238 = tpu.matmul %236, %237, %cst_100 {dimension_numbers = #tpu.dot_dimension_numbers<[1], [1], [0], [0], [0, 0, 1, 0], [], []>} : vector<8x8xbf16>, vector<8x8xbf16>, vector<8x8xf32> -> vector<8x8xf32>
    %cst_101 = arith.constant 0.353553385 : f32
    %239 = vector.broadcast %cst_101 : f32 to vector<8x8xf32>
    %240 = arith.mulf %238, %239 : vector<8x8xf32>
    %241 = arith.addf %240, %8 : vector<8x8xf32>
    %cst_102 = arith.constant dense<0xFF800000> : vector<8xf32>
    %242 = vector.multi_reduction <maximumf>, %241, %cst_102 [1] : vector<8x8xf32> to vector<8xf32>
    %243 = vector.shape_cast %242 : vector<8xf32> to vector<8x1xf32>
    %244 = vector.broadcast %243 : vector<8x1xf32> to vector<8x8xf32>
    %245 = arith.subf %241, %244 : vector<8x8xf32>
    %246 = math.exp %245 : vector<8x8xf32>
    %cst_103 = arith.constant dense<0.000000e+00> : vector<8xf32>
    %247 = vector.multi_reduction <add>, %246, %cst_103 [1] : vector<8x8xf32> to vector<8xf32>
    %248 = vector.shape_cast %247 : vector<8xf32> to vector<8x1xf32>
    %249 = tpu.reciprocal %248 {approx = true} : vector<8x1xf32> -> vector<8x1xf32>
    %250 = vector.broadcast %249 : vector<8x1xf32> to vector<8x8xf32>
    %251 = arith.mulf %246, %250 : vector<8x8xf32>
    %252 = arith.truncf %251 : vector<8x8xf32> to vector<8x8xbf16>
    %253 = arith.truncf %235 : vector<8x8xf32> to vector<8x8xbf16>
    %cst_104 = arith.constant dense<0.000000e+00> : vector<8x8xf32>
    %254 = tpu.matmul %252, %253, %cst_104 {dimension_numbers = #tpu.dot_dimension_numbers<[1], [0], [0], [1], [0, 0, 1, 1], [], []>} : vector<8x8xbf16>, vector<8x8xbf16>, vector<8x8xf32> -> vector<8x8xf32>
    %255 = vector.extract_strided_slice %232 {offsets = [0, 8], sizes = [8, 8], strides = [1, 1]} : vector<8x96xf32> to vector<8x8xf32>
    %256 = vector.extract_strided_slice %232 {offsets = [0, 40], sizes = [8, 8], strides = [1, 1]} : vector<8x96xf32> to vector<8x8xf32>
    %257 = vector.extract_strided_slice %232 {offsets = [0, 72], sizes = [8, 8], strides = [1, 1]} : vector<8x96xf32> to vector<8x8xf32>
    %258 = arith.truncf %255 : vector<8x8xf32> to vector<8x8xbf16>
    %259 = arith.truncf %256 : vector<8x8xf32> to vector<8x8xbf16>
    %cst_105 = arith.constant dense<0.000000e+00> : vector<8x8xf32>
    %260 = tpu.matmul %258, %259, %cst_105 {dimension_numbers = #tpu.dot_dimension_numbers<[1], [1], [0], [0], [0, 0, 1, 0], [], []>} : vector<8x8xbf16>, vector<8x8xbf16>, vector<8x8xf32> -> vector<8x8xf32>
    %cst_106 = arith.constant 0.353553385 : f32
    %261 = vector.broadcast %cst_106 : f32 to vector<8x8xf32>
    %262 = arith.mulf %260, %261 : vector<8x8xf32>
    %263 = arith.addf %262, %8 : vector<8x8xf32>
    %cst_107 = arith.constant dense<0xFF800000> : vector<8xf32>
    %264 = vector.multi_reduction <maximumf>, %263, %cst_107 [1] : vector<8x8xf32> to vector<8xf32>
    %265 = vector.shape_cast %264 : vector<8xf32> to vector<8x1xf32>
    %266 = vector.broadcast %265 : vector<8x1xf32> to vector<8x8xf32>
    %267 = arith.subf %263, %266 : vector<8x8xf32>
    %268 = math.exp %267 : vector<8x8xf32>
    %cst_108 = arith.constant dense<0.000000e+00> : vector<8xf32>
    %269 = vector.multi_reduction <add>, %268, %cst_108 [1] : vector<8x8xf32> to vector<8xf32>
    %270 = vector.shape_cast %269 : vector<8xf32> to vector<8x1xf32>
    %271 = tpu.reciprocal %270 {approx = true} : vector<8x1xf32> -> vector<8x1xf32>
    %272 = vector.broadcast %271 : vector<8x1xf32> to vector<8x8xf32>
    %273 = arith.mulf %268, %272 : vector<8x8xf32>
    %274 = arith.truncf %273 : vector<8x8xf32> to vector<8x8xbf16>
    %275 = arith.truncf %257 : vector<8x8xf32> to vector<8x8xbf16>
    %cst_109 = arith.constant dense<0.000000e+00> : vector<8x8xf32>
    %276 = tpu.matmul %274, %275, %cst_109 {dimension_numbers = #tpu.dot_dimension_numbers<[1], [0], [0], [1], [0, 0, 1, 1], [], []>} : vector<8x8xbf16>, vector<8x8xbf16>, vector<8x8xf32> -> vector<8x8xf32>
    %277 = vector.extract_strided_slice %232 {offsets = [0, 16], sizes = [8, 8], strides = [1, 1]} : vector<8x96xf32> to vector<8x8xf32>
    %278 = vector.extract_strided_slice %232 {offsets = [0, 48], sizes = [8, 8], strides = [1, 1]} : vector<8x96xf32> to vector<8x8xf32>
    %279 = vector.extract_strided_slice %232 {offsets = [0, 80], sizes = [8, 8], strides = [1, 1]} : vector<8x96xf32> to vector<8x8xf32>
    %280 = arith.truncf %277 : vector<8x8xf32> to vector<8x8xbf16>
    %281 = arith.truncf %278 : vector<8x8xf32> to vector<8x8xbf16>
    %cst_110 = arith.constant dense<0.000000e+00> : vector<8x8xf32>
    %282 = tpu.matmul %280, %281, %cst_110 {dimension_numbers = #tpu.dot_dimension_numbers<[1], [1], [0], [0], [0, 0, 1, 0], [], []>} : vector<8x8xbf16>, vector<8x8xbf16>, vector<8x8xf32> -> vector<8x8xf32>
    %cst_111 = arith.constant 0.353553385 : f32
    %283 = vector.broadcast %cst_111 : f32 to vector<8x8xf32>
    %284 = arith.mulf %282, %283 : vector<8x8xf32>
    %285 = arith.addf %284, %8 : vector<8x8xf32>
    %cst_112 = arith.constant dense<0xFF800000> : vector<8xf32>
    %286 = vector.multi_reduction <maximumf>, %285, %cst_112 [1] : vector<8x8xf32> to vector<8xf32>
    %287 = vector.shape_cast %286 : vector<8xf32> to vector<8x1xf32>
    %288 = vector.broadcast %287 : vector<8x1xf32> to vector<8x8xf32>
    %289 = arith.subf %285, %288 : vector<8x8xf32>
    %290 = math.exp %289 : vector<8x8xf32>
    %cst_113 = arith.constant dense<0.000000e+00> : vector<8xf32>
    %291 = vector.multi_reduction <add>, %290, %cst_113 [1] : vector<8x8xf32> to vector<8xf32>
    %292 = vector.shape_cast %291 : vector<8xf32> to vector<8x1xf32>
    %293 = tpu.reciprocal %292 {approx = true} : vector<8x1xf32> -> vector<8x1xf32>
    %294 = vector.broadcast %293 : vector<8x1xf32> to vector<8x8xf32>
    %295 = arith.mulf %290, %294 : vector<8x8xf32>
    %296 = arith.truncf %295 : vector<8x8xf32> to vector<8x8xbf16>
    %297 = arith.truncf %279 : vector<8x8xf32> to vector<8x8xbf16>
    %cst_114 = arith.constant dense<0.000000e+00> : vector<8x8xf32>
    %298 = tpu.matmul %296, %297, %cst_114 {dimension_numbers = #tpu.dot_dimension_numbers<[1], [0], [0], [1], [0, 0, 1, 1], [], []>} : vector<8x8xbf16>, vector<8x8xbf16>, vector<8x8xf32> -> vector<8x8xf32>
    %299 = vector.extract_strided_slice %232 {offsets = [0, 24], sizes = [8, 8], strides = [1, 1]} : vector<8x96xf32> to vector<8x8xf32>
    %300 = vector.extract_strided_slice %232 {offsets = [0, 56], sizes = [8, 8], strides = [1, 1]} : vector<8x96xf32> to vector<8x8xf32>
    %301 = vector.extract_strided_slice %232 {offsets = [0, 88], sizes = [8, 8], strides = [1, 1]} : vector<8x96xf32> to vector<8x8xf32>
    %302 = arith.truncf %299 : vector<8x8xf32> to vector<8x8xbf16>
    %303 = arith.truncf %300 : vector<8x8xf32> to vector<8x8xbf16>
    %cst_115 = arith.constant dense<0.000000e+00> : vector<8x8xf32>
    %304 = tpu.matmul %302, %303, %cst_115 {dimension_numbers = #tpu.dot_dimension_numbers<[1], [1], [0], [0], [0, 0, 1, 0], [], []>} : vector<8x8xbf16>, vector<8x8xbf16>, vector<8x8xf32> -> vector<8x8xf32>
    %cst_116 = arith.constant 0.353553385 : f32
    %305 = vector.broadcast %cst_116 : f32 to vector<8x8xf32>
    %306 = arith.mulf %304, %305 : vector<8x8xf32>
    %307 = arith.addf %306, %8 : vector<8x8xf32>
    %cst_117 = arith.constant dense<0xFF800000> : vector<8xf32>
    %308 = vector.multi_reduction <maximumf>, %307, %cst_117 [1] : vector<8x8xf32> to vector<8xf32>
    %309 = vector.shape_cast %308 : vector<8xf32> to vector<8x1xf32>
    %310 = vector.broadcast %309 : vector<8x1xf32> to vector<8x8xf32>
    %311 = arith.subf %307, %310 : vector<8x8xf32>
    %312 = math.exp %311 : vector<8x8xf32>
    %cst_118 = arith.constant dense<0.000000e+00> : vector<8xf32>
    %313 = vector.multi_reduction <add>, %312, %cst_118 [1] : vector<8x8xf32> to vector<8xf32>
    %314 = vector.shape_cast %313 : vector<8xf32> to vector<8x1xf32>
    %315 = tpu.reciprocal %314 {approx = true} : vector<8x1xf32> -> vector<8x1xf32>
    %316 = vector.broadcast %315 : vector<8x1xf32> to vector<8x8xf32>
    %317 = arith.mulf %312, %316 : vector<8x8xf32>
    %318 = arith.truncf %317 : vector<8x8xf32> to vector<8x8xbf16>
    %319 = arith.truncf %301 : vector<8x8xf32> to vector<8x8xbf16>
    %cst_119 = arith.constant dense<0.000000e+00> : vector<8x8xf32>
    %320 = tpu.matmul %318, %319, %cst_119 {dimension_numbers = #tpu.dot_dimension_numbers<[1], [0], [0], [1], [0, 0, 1, 1], [], []>} : vector<8x8xbf16>, vector<8x8xbf16>, vector<8x8xf32> -> vector<8x8xf32>
    %321 = tpu.concatenate %254, %276, %298, %320 in 1 : vector<8x8xf32>, vector<8x8xf32>, vector<8x8xf32>, vector<8x8xf32> -> vector<8x32xf32>
    %c0_120 = arith.constant 0 : index
    %c0_121 = arith.constant 0 : index
    %c0_122 = arith.constant 0 : index
    %322 = vector.load %arg7[%c0_120, %c0_121, %c0_122] : memref<1x32x32xbf16, #tpu.memory_space<vmem>>, vector<1x32x32xbf16>
    %323 = vector.shape_cast %322 : vector<1x32x32xbf16> to vector<32x32xbf16>
    %324 = arith.truncf %321 : vector<8x32xf32> to vector<8x32xbf16>
    %cst_123 = arith.constant dense<0.000000e+00> : vector<8x32xf32>
    %325 = tpu.matmul %324, %323, %cst_123 {dimension_numbers = #tpu.dot_dimension_numbers<[1], [0], [0], [1], [0, 0, 1, 1], [], []>} : vector<8x32xbf16>, vector<32x32xbf16>, vector<8x32xf32> -> vector<8x32xf32>
    %326 = arith.addf %198, %325 : vector<8x32xf32>
    %c0_124 = arith.constant 0 : index
    %c0_125 = arith.constant 0 : index
    %c0_126 = arith.constant 0 : index
    %327 = vector.load %arg8[%c0_124, %c0_125, %c0_126] : memref<1x1x32xf32, #tpu.memory_space<vmem>>, vector<1x1x32xf32>
    %328 = vector.shape_cast %327 : vector<1x1x32xf32> to vector<1x32xf32>
    %329 = vector.broadcast %328 : vector<1x32xf32> to vector<8x32xf32>
    %330 = arith.addf %326, %329 : vector<8x32xf32>
    %c0_127 = arith.constant 0 : index
    %c0_128 = arith.constant 0 : index
    %c0_129 = arith.constant 0 : index
    %331 = vector.load %arg9[%c0_127, %c0_128, %c0_129] : memref<1x1x32xf32, #tpu.memory_space<vmem>>, vector<1x1x32xf32>
    %332 = vector.shape_cast %331 : vector<1x1x32xf32> to vector<1x32xf32>
    %c0_130 = arith.constant 0 : index
    %c0_131 = arith.constant 0 : index
    %c0_132 = arith.constant 0 : index
    %333 = vector.load %arg10[%c0_130, %c0_131, %c0_132] : memref<1x1x32xf32, #tpu.memory_space<vmem>>, vector<1x1x32xf32>
    %334 = vector.shape_cast %333 : vector<1x1x32xf32> to vector<1x32xf32>
    %cst_133 = arith.constant dense<0.000000e+00> : vector<8xf32>
    %335 = vector.multi_reduction <add>, %330, %cst_133 [1] : vector<8x32xf32> to vector<8xf32>
    %336 = vector.shape_cast %335 : vector<8xf32> to vector<8x1xf32>
    %cst_134 = arith.constant 3.200000e+01 : f32
    %337 = vector.broadcast %cst_134 : f32 to vector<8x1xf32>
    %338 = arith.divf %336, %337 : vector<8x1xf32>
    %339 = vector.broadcast %338 : vector<8x1xf32> to vector<8x32xf32>
    %340 = arith.subf %330, %339 : vector<8x32xf32>
    %341 = arith.mulf %340, %340 : vector<8x32xf32>
    %cst_135 = arith.constant dense<0.000000e+00> : vector<8xf32>
    %342 = vector.multi_reduction <add>, %341, %cst_135 [1] : vector<8x32xf32> to vector<8xf32>
    %343 = vector.shape_cast %342 : vector<8xf32> to vector<8x1xf32>
    %cst_136 = arith.constant 3.200000e+01 : f32
    %344 = vector.broadcast %cst_136 : f32 to vector<8x1xf32>
    %345 = arith.divf %343, %344 : vector<8x1xf32>
    %346 = vector.broadcast %338 : vector<8x1xf32> to vector<8x32xf32>
    %347 = arith.subf %330, %346 : vector<8x32xf32>
    %cst_137 = arith.constant 9.99999974E-6 : f32
    %348 = vector.broadcast %cst_137 : f32 to vector<8x1xf32>
    %349 = arith.addf %345, %348 : vector<8x1xf32>
    %350 = math.rsqrt %349 : vector<8x1xf32>
    %351 = vector.broadcast %350 : vector<8x1xf32> to vector<8x32xf32>
    %352 = arith.mulf %347, %351 : vector<8x32xf32>
    %353 = vector.broadcast %332 : vector<1x32xf32> to vector<8x32xf32>
    %354 = arith.mulf %352, %353 : vector<8x32xf32>
    %355 = vector.broadcast %334 : vector<1x32xf32> to vector<8x32xf32>
    %356 = arith.addf %354, %355 : vector<8x32xf32>
    %c0_138 = arith.constant 0 : index
    %c0_139 = arith.constant 0 : index
    %c0_140 = arith.constant 0 : index
    %357 = vector.load %arg11[%c0_138, %c0_139, %c0_140] : memref<1x32x128xbf16, #tpu.memory_space<vmem>>, vector<1x32x128xbf16>
    %358 = vector.shape_cast %357 : vector<1x32x128xbf16> to vector<32x128xbf16>
    %359 = arith.truncf %356 : vector<8x32xf32> to vector<8x32xbf16>
    %cst_141 = arith.constant dense<0.000000e+00> : vector<8x128xf32>
    %360 = tpu.matmul %359, %358, %cst_141 {dimension_numbers = #tpu.dot_dimension_numbers<[1], [0], [0], [1], [0, 0, 1, 1], [], []>} : vector<8x32xbf16>, vector<32x128xbf16>, vector<8x128xf32> -> vector<8x128xf32>
    %c0_142 = arith.constant 0 : index
    %c0_143 = arith.constant 0 : index
    %c0_144 = arith.constant 0 : index
    %361 = vector.load %arg12[%c0_142, %c0_143, %c0_144] : memref<1x1x128xf32, #tpu.memory_space<vmem>>, vector<1x1x128xf32>
    %362 = vector.shape_cast %361 : vector<1x1x128xf32> to vector<1x128xf32>
    %363 = vector.broadcast %362 : vector<1x128xf32> to vector<8x128xf32>
    %364 = arith.addf %360, %363 : vector<8x128xf32>
    %cst_145 = arith.constant -1.702000e+00 : f32
    %365 = vector.broadcast %cst_145 : f32 to vector<8x128xf32>
    %366 = arith.mulf %365, %364 : vector<8x128xf32>
    %367 = math.exp %366 : vector<8x128xf32>
    %cst_146 = arith.constant 1.000000e+00 : f32
    %368 = vector.broadcast %cst_146 : f32 to vector<8x128xf32>
    %369 = arith.addf %368, %367 : vector<8x128xf32>
    %cst_147 = arith.constant 1.000000e+00 : f32
    %370 = vector.broadcast %cst_147 : f32 to vector<8x128xf32>
    %371 = arith.divf %370, %369 : vector<8x128xf32>
    %372 = arith.mulf %364, %371 : vector<8x128xf32>
    %c0_148 = arith.constant 0 : index
    %c0_149 = arith.constant 0 : index
    %c0_150 = arith.constant 0 : index
    %373 = vector.load %arg13[%c0_148, %c0_149, %c0_150] : memref<1x128x32xbf16, #tpu.memory_space<vmem>>, vector<1x128x32xbf16>
    %374 = vector.shape_cast %373 : vector<1x128x32xbf16> to vector<128x32xbf16>
    %375 = arith.truncf %372 : vector<8x128xf32> to vector<8x128xbf16>
    %cst_151 = arith.constant dense<0.000000e+00> : vector<8x32xf32>
    %376 = tpu.matmul %375, %374, %cst_151 {dimension_numbers = #tpu.dot_dimension_numbers<[1], [0], [0], [1], [0, 0, 1, 1], [], []>} : vector<8x128xbf16>, vector<128x32xbf16>, vector<8x32xf32> -> vector<8x32xf32>
    %c0_152 = arith.constant 0 : index
    %c0_153 = arith.constant 0 : index
    %c0_154 = arith.constant 0 : index
    %377 = vector.load %arg14[%c0_152, %c0_153, %c0_154] : memref<1x1x32xf32, #tpu.memory_space<vmem>>, vector<1x1x32xf32>
    %378 = vector.shape_cast %377 : vector<1x1x32xf32> to vector<1x32xf32>
    %379 = vector.broadcast %378 : vector<1x32xf32> to vector<8x32xf32>
    %380 = arith.addf %376, %379 : vector<8x32xf32>
    %381 = arith.addf %330, %380 : vector<8x32xf32>
    %c1_155 = arith.constant 1 : index
    %c0_156 = arith.constant 0 : index
    %c0_157 = arith.constant 0 : index
    %382 = vector.load %arg16[%c1_155, %c0_156, %c0_157] : memref<2x8x32xf32, #tpu.memory_space<vmem>>, vector<1x8x32xf32>
    %383 = vector.shape_cast %382 : vector<1x8x32xf32> to vector<8x32xf32>
    %384 = vector.shape_cast %381 : vector<8x32xf32> to vector<1x8x32xf32>
    tpu.vector_store %arg16[%c1_155, %c0_156, %c0_157], %384 {strides = array<i32>} : memref<2x8x32xf32, #tpu.memory_space<vmem>>, vector<1x8x32xf32>,
    %c0_158 = arith.constant 0 : index
    %c0_159 = arith.constant 0 : index
    %c0_160 = arith.constant 0 : index
    %385 = vector.load %arg16[%c0_158, %c0_159, %c0_160] : memref<2x8x32xf32, #tpu.memory_space<vmem>>, vector<2x8x32xf32>
    %c0_161 = arith.constant 0 : index
    %c0_162 = arith.constant 0 : index
    %c0_163 = arith.constant 0 : index
    %386 = vector.load %arg15[%c0_161, %c0_162, %c0_163] : memref<2x8x32xf32, #tpu.memory_space<vmem>>, vector<2x8x32xf32>
    tpu.vector_store %arg15[%c0_161, %c0_162, %c0_163], %385 {strides = array<i32>} : memref<2x8x32xf32, #tpu.memory_space<vmem>>, vector<2x8x32xf32>,
    return
  }
  func.func @transform_0(%arg0: i32, %arg1: i32) -> (i32, i32, i32) {
    %c0_i32 = arith.constant 0 : i32
    %c0_i32_0 = arith.constant 0 : i32
    %c0_i32_1 = arith.constant 0 : i32
    return %arg0, %c0_i32, %c0_i32_0 : i32, i32, i32
  }
  func.func @transform_1(%arg0: i32, %arg1: i32) -> (i32, i32, i32) {
    %c0_i32 = arith.constant 0 : i32
    %c0_i32_0 = arith.constant 0 : i32
    %c0_i32_1 = arith.constant 0 : i32
    return %arg1, %c0_i32, %c0_i32_0 : i32, i32, i32
  }
  func.func @transform_2(%arg0: i32, %arg1: i32) -> (i32, i32, i32) {
    %c0_i32 = arith.constant 0 : i32
    %c0_i32_0 = arith.constant 0 : i32
    %c0_i32_1 = arith.constant 0 : i32
    return %arg1, %c0_i32, %c0_i32_0 : i32, i32, i32
  }
  func.func @transform_3(%arg0: i32, %arg1: i32) -> (i32, i32, i32) {
    %c0_i32 = arith.constant 0 : i32
    %c0_i32_0 = arith.constant 0 : i32
    %c0_i32_1 = arith.constant 0 : i32
    return %arg1, %c0_i32, %c0_i32_0 : i32, i32, i32
  }
  func.func @transform_4(%arg0: i32, %arg1: i32) -> (i32, i32, i32) {
    %c0_i32 = arith.constant 0 : i32
    %c0_i32_0 = arith.constant 0 : i32
    %c0_i32_1 = arith.constant 0 : i32
    return %arg1, %c0_i32, %c0_i32_0 : i32, i32, i32
  }
  func.func @transform_5(%arg0: i32, %arg1: i32) -> (i32, i32, i32) {
    %c0_i32 = arith.constant 0 : i32
    %c0_i32_0 = arith.constant 0 : i32
    %c0_i32_1 = arith.constant 0 : i32
    return %arg1, %c0_i32, %c0_i32_0 : i32, i32, i32
  }
  func.func @transform_6(%arg0: i32, %arg1: i32) -> (i32, i32, i32) {
    %c0_i32 = arith.constant 0 : i32
    %c0_i32_0 = arith.constant 0 : i32
    %c0_i32_1 = arith.constant 0 : i32
    return %arg1, %c0_i32, %c0_i32_0 : i32, i32, i32
  }
  func.func @transform_7(%arg0: i32, %arg1: i32) -> (i32, i32, i32) {
    %c0_i32 = arith.constant 0 : i32
    %c0_i32_0 = arith.constant 0 : i32
    %c0_i32_1 = arith.constant 0 : i32
    return %arg1, %c0_i32, %c0_i32_0 : i32, i32, i32
  }
  func.func @transform_8(%arg0: i32, %arg1: i32) -> (i32, i32, i32) {
    %c0_i32 = arith.constant 0 : i32
    %c0_i32_0 = arith.constant 0 : i32
    %c0_i32_1 = arith.constant 0 : i32
    return %arg1, %c0_i32, %c0_i32_0 : i32, i32, i32
  }
  func.func @transform_9(%arg0: i32, %arg1: i32) -> (i32, i32, i32) {
    %c0_i32 = arith.constant 0 : i32
    %c0_i32_0 = arith.constant 0 : i32
    %c0_i32_1 = arith.constant 0 : i32
    return %arg1, %c0_i32, %c0_i32_0 : i32, i32, i32
  }
  func.func @transform_10(%arg0: i32, %arg1: i32) -> (i32, i32, i32) {
    %c0_i32 = arith.constant 0 : i32
    %c0_i32_0 = arith.constant 0 : i32
    %c0_i32_1 = arith.constant 0 : i32
    return %arg1, %c0_i32, %c0_i32_0 : i32, i32, i32
  }
  func.func @transform_11(%arg0: i32, %arg1: i32) -> (i32, i32, i32) {
    %c0_i32 = arith.constant 0 : i32
    %c0_i32_0 = arith.constant 0 : i32
    %c0_i32_1 = arith.constant 0 : i32
    return %arg1, %c0_i32, %c0_i32_0 : i32, i32, i32
  }
  func.func @transform_12(%arg0: i32, %arg1: i32) -> (i32, i32, i32) {
    %c0_i32 = arith.constant 0 : i32
    %c0_i32_0 = arith.constant 0 : i32
    %c0_i32_1 = arith.constant 0 : i32
    return %arg1, %c0_i32, %c0_i32_0 : i32, i32, i32
  }
  func.func @transform_13(%arg0: i32, %arg1: i32) -> (i32, i32, i32) {
    %c0_i32 = arith.constant 0 : i32
    %c0_i32_0 = arith.constant 0 : i32
    %c0_i32_1 = arith.constant 0 : i32
    return %arg0, %c0_i32, %c0_i32_0 : i32, i32, i32
  }
}

module attributes {stable_mosaic.version = 11 : i64} {
  func.func @_linear_kernel(%arg0: i32, %arg1: memref<32x192xf32, #tpu.memory_space<vmem>>, %arg2: memref<192x32xbf16, #tpu.memory_space<vmem>>, %arg3: memref<1x32xf32, #tpu.memory_space<vmem>>, %arg4: memref<32x32xf32, #tpu.memory_space<vmem>>) attributes {dimension_semantics = [#tpu.dimension_semantics<arbitrary>], iteration_bounds = array<i64: 1>, scalar_prefetch = 0 : i64, scratch_operands = 0 : i64, tpu.core_type = #tpu.core_type<tc>, window_params = [{pipeline_mode = #tpu.pipeline_mode<synchronous>, transform_indices = @transform_0, window_bounds = array<i64: 32, 192>}, {pipeline_mode = #tpu.pipeline_mode<synchronous>, transform_indices = @transform_1, window_bounds = array<i64: 192, 32>}, {pipeline_mode = #tpu.pipeline_mode<synchronous>, transform_indices = @transform_2, window_bounds = array<i64: 1, 32>}, {pipeline_mode = #tpu.pipeline_mode<synchronous>, transform_indices = @transform_3, window_bounds = array<i64: 32, 32>}]} {
    %c0 = arith.constant 0 : index
    %c0_0 = arith.constant 0 : index
    %0 = vector.load %arg1[%c0, %c0_0] : memref<32x192xf32, #tpu.memory_space<vmem>>, vector<32x192xf32>
    %c0_1 = arith.constant 0 : index
    %c0_2 = arith.constant 0 : index
    %1 = vector.load %arg2[%c0_1, %c0_2] : memref<192x32xbf16, #tpu.memory_space<vmem>>, vector<192x32xbf16>
    %2 = arith.truncf %0 : vector<32x192xf32> to vector<32x192xbf16>
    %cst = arith.constant dense<0.000000e+00> : vector<32x32xf32>
    %3 = tpu.matmul %2, %1, %cst {dimension_numbers = #tpu.dot_dimension_numbers<[1], [0], [0], [1], [0, 0, 1, 1], [], []>} : vector<32x192xbf16>, vector<192x32xbf16>, vector<32x32xf32> -> vector<32x32xf32>
    %c0_3 = arith.constant 0 : index
    %c0_4 = arith.constant 0 : index
    %4 = vector.load %arg3[%c0_3, %c0_4] : memref<1x32xf32, #tpu.memory_space<vmem>>, vector<1x32xf32>
    %5 = vector.broadcast %4 : vector<1x32xf32> to vector<32x32xf32>
    %6 = arith.addf %3, %5 : vector<32x32xf32>
    %c0_5 = arith.constant 0 : index
    %c0_6 = arith.constant 0 : index
    %7 = vector.load %arg4[%c0_5, %c0_6] : memref<32x32xf32, #tpu.memory_space<vmem>>, vector<32x32xf32>
    tpu.vector_store %arg4[%c0_5, %c0_6], %6 {strides = array<i32>} : memref<32x32xf32, #tpu.memory_space<vmem>>, vector<32x32xf32>,
    return
  }
  func.func @transform_0(%arg0: i32) -> (i32, i32) {
    %c0_i32 = arith.constant 0 : i32
    %c0_i32_0 = arith.constant 0 : i32
    %c0_i32_1 = arith.constant 0 : i32
    return %c0_i32, %c0_i32_0 : i32, i32
  }
  func.func @transform_1(%arg0: i32) -> (i32, i32) {
    %c0_i32 = arith.constant 0 : i32
    %c0_i32_0 = arith.constant 0 : i32
    %c0_i32_1 = arith.constant 0 : i32
    return %c0_i32, %c0_i32_0 : i32, i32
  }
  func.func @transform_2(%arg0: i32) -> (i32, i32) {
    %c0_i32 = arith.constant 0 : i32
    %c0_i32_0 = arith.constant 0 : i32
    %c0_i32_1 = arith.constant 0 : i32
    return %c0_i32, %c0_i32_0 : i32, i32
  }
  func.func @transform_3(%arg0: i32) -> (i32, i32) {
    %c0_i32 = arith.constant 0 : i32
    %c0_i32_0 = arith.constant 0 : i32
    %c0_i32_1 = arith.constant 0 : i32
    return %c0_i32, %c0_i32_0 : i32, i32
  }
}

module attributes {stable_mosaic.version = 11 : i64} {
  func.func @_ln_linear_kernel(%arg0: i32, %arg1: memref<8x32xf32, #tpu.memory_space<vmem>>, %arg2: memref<1x32xf32, #tpu.memory_space<vmem>>, %arg3: memref<1x32xf32, #tpu.memory_space<vmem>>, %arg4: memref<32x32xbf16, #tpu.memory_space<vmem>>, %arg5: memref<1x32xf32, #tpu.memory_space<vmem>>, %arg6: memref<8x32xf32, #tpu.memory_space<vmem>>) attributes {dimension_semantics = [#tpu.dimension_semantics<arbitrary>], iteration_bounds = array<i64: 1>, scalar_prefetch = 0 : i64, scratch_operands = 0 : i64, tpu.core_type = #tpu.core_type<tc>, window_params = [{pipeline_mode = #tpu.pipeline_mode<synchronous>, transform_indices = @transform_0, window_bounds = array<i64: 8, 32>}, {pipeline_mode = #tpu.pipeline_mode<synchronous>, transform_indices = @transform_1, window_bounds = array<i64: 1, 32>}, {pipeline_mode = #tpu.pipeline_mode<synchronous>, transform_indices = @transform_2, window_bounds = array<i64: 1, 32>}, {pipeline_mode = #tpu.pipeline_mode<synchronous>, transform_indices = @transform_3, window_bounds = array<i64: 32, 32>}, {pipeline_mode = #tpu.pipeline_mode<synchronous>, transform_indices = @transform_4, window_bounds = array<i64: 1, 32>}, {pipeline_mode = #tpu.pipeline_mode<synchronous>, transform_indices = @transform_5, window_bounds = array<i64: 8, 32>}]} {
    %c0 = arith.constant 0 : index
    %c0_0 = arith.constant 0 : index
    %0 = vector.load %arg1[%c0, %c0_0] : memref<8x32xf32, #tpu.memory_space<vmem>>, vector<8x32xf32>
    %c0_1 = arith.constant 0 : index
    %c0_2 = arith.constant 0 : index
    %1 = vector.load %arg2[%c0_1, %c0_2] : memref<1x32xf32, #tpu.memory_space<vmem>>, vector<1x32xf32>
    %c0_3 = arith.constant 0 : index
    %c0_4 = arith.constant 0 : index
    %2 = vector.load %arg3[%c0_3, %c0_4] : memref<1x32xf32, #tpu.memory_space<vmem>>, vector<1x32xf32>
    %cst = arith.constant dense<0.000000e+00> : vector<8xf32>
    %3 = vector.multi_reduction <add>, %0, %cst [1] : vector<8x32xf32> to vector<8xf32>
    %4 = vector.shape_cast %3 : vector<8xf32> to vector<8x1xf32>
    %cst_5 = arith.constant 3.200000e+01 : f32
    %5 = vector.broadcast %cst_5 : f32 to vector<8x1xf32>
    %6 = arith.divf %4, %5 : vector<8x1xf32>
    %7 = vector.broadcast %6 : vector<8x1xf32> to vector<8x32xf32>
    %8 = arith.subf %0, %7 : vector<8x32xf32>
    %9 = arith.mulf %8, %8 : vector<8x32xf32>
    %cst_6 = arith.constant dense<0.000000e+00> : vector<8xf32>
    %10 = vector.multi_reduction <add>, %9, %cst_6 [1] : vector<8x32xf32> to vector<8xf32>
    %11 = vector.shape_cast %10 : vector<8xf32> to vector<8x1xf32>
    %cst_7 = arith.constant 3.200000e+01 : f32
    %12 = vector.broadcast %cst_7 : f32 to vector<8x1xf32>
    %13 = arith.divf %11, %12 : vector<8x1xf32>
    %14 = vector.broadcast %6 : vector<8x1xf32> to vector<8x32xf32>
    %15 = arith.subf %0, %14 : vector<8x32xf32>
    %cst_8 = arith.constant 9.99999974E-6 : f32
    %16 = vector.broadcast %cst_8 : f32 to vector<8x1xf32>
    %17 = arith.addf %13, %16 : vector<8x1xf32>
    %18 = math.rsqrt %17 : vector<8x1xf32>
    %19 = vector.broadcast %18 : vector<8x1xf32> to vector<8x32xf32>
    %20 = arith.mulf %15, %19 : vector<8x32xf32>
    %21 = vector.broadcast %1 : vector<1x32xf32> to vector<8x32xf32>
    %22 = arith.mulf %20, %21 : vector<8x32xf32>
    %23 = vector.broadcast %2 : vector<1x32xf32> to vector<8x32xf32>
    %24 = arith.addf %22, %23 : vector<8x32xf32>
    %c0_9 = arith.constant 0 : index
    %c0_10 = arith.constant 0 : index
    %25 = vector.load %arg4[%c0_9, %c0_10] : memref<32x32xbf16, #tpu.memory_space<vmem>>, vector<32x32xbf16>
    %26 = arith.truncf %24 : vector<8x32xf32> to vector<8x32xbf16>
    %cst_11 = arith.constant dense<0.000000e+00> : vector<8x32xf32>
    %27 = tpu.matmul %26, %25, %cst_11 {dimension_numbers = #tpu.dot_dimension_numbers<[1], [0], [0], [1], [0, 0, 1, 1], [], []>} : vector<8x32xbf16>, vector<32x32xbf16>, vector<8x32xf32> -> vector<8x32xf32>
    %c0_12 = arith.constant 0 : index
    %c0_13 = arith.constant 0 : index
    %28 = vector.load %arg5[%c0_12, %c0_13] : memref<1x32xf32, #tpu.memory_space<vmem>>, vector<1x32xf32>
    %29 = vector.broadcast %28 : vector<1x32xf32> to vector<8x32xf32>
    %30 = arith.addf %27, %29 : vector<8x32xf32>
    %c0_14 = arith.constant 0 : index
    %c0_15 = arith.constant 0 : index
    %31 = vector.load %arg6[%c0_14, %c0_15] : memref<8x32xf32, #tpu.memory_space<vmem>>, vector<8x32xf32>
    tpu.vector_store %arg6[%c0_14, %c0_15], %30 {strides = array<i32>} : memref<8x32xf32, #tpu.memory_space<vmem>>, vector<8x32xf32>,
    return
  }
  func.func @transform_0(%arg0: i32) -> (i32, i32) {
    %c0_i32 = arith.constant 0 : i32
    %c0_i32_0 = arith.constant 0 : i32
    %c0_i32_1 = arith.constant 0 : i32
    return %c0_i32, %c0_i32_0 : i32, i32
  }
  func.func @transform_1(%arg0: i32) -> (i32, i32) {
    %c0_i32 = arith.constant 0 : i32
    %c0_i32_0 = arith.constant 0 : i32
    %c0_i32_1 = arith.constant 0 : i32
    return %c0_i32, %c0_i32_0 : i32, i32
  }
  func.func @transform_2(%arg0: i32) -> (i32, i32) {
    %c0_i32 = arith.constant 0 : i32
    %c0_i32_0 = arith.constant 0 : i32
    %c0_i32_1 = arith.constant 0 : i32
    return %c0_i32, %c0_i32_0 : i32, i32
  }
  func.func @transform_3(%arg0: i32) -> (i32, i32) {
    %c0_i32 = arith.constant 0 : i32
    %c0_i32_0 = arith.constant 0 : i32
    %c0_i32_1 = arith.constant 0 : i32
    return %c0_i32, %c0_i32_0 : i32, i32
  }
  func.func @transform_4(%arg0: i32) -> (i32, i32) {
    %c0_i32 = arith.constant 0 : i32
    %c0_i32_0 = arith.constant 0 : i32
    %c0_i32_1 = arith.constant 0 : i32
    return %c0_i32, %c0_i32_0 : i32, i32
  }
  func.func @transform_5(%arg0: i32) -> (i32, i32) {
    %c0_i32 = arith.constant 0 : i32
    %c0_i32_0 = arith.constant 0 : i32
    %c0_i32_1 = arith.constant 0 : i32
    return %c0_i32, %c0_i32_0 : i32, i32
  }
}

module attributes {stable_mosaic.version = 11 : i64} {
  func.func @_pool_kernel(%arg0: i32, %arg1: memref<2x32xf32, #tpu.memory_space<vmem>>, %arg2: memref<8x32xf32, #tpu.memory_space<vmem>>, %arg3: memref<1x32xf32, #tpu.memory_space<vmem>>, %arg4: memref<1x32xf32, #tpu.memory_space<vmem>>, %arg5: memref<32x32xbf16, #tpu.memory_space<vmem>>, %arg6: memref<1x32xf32, #tpu.memory_space<vmem>>, %arg7: memref<32x32xbf16, #tpu.memory_space<vmem>>, %arg8: memref<1x32xf32, #tpu.memory_space<vmem>>, %arg9: memref<32x32xbf16, #tpu.memory_space<vmem>>, %arg10: memref<1x32xf32, #tpu.memory_space<vmem>>, %arg11: memref<32x32xbf16, #tpu.memory_space<vmem>>, %arg12: memref<1x32xf32, #tpu.memory_space<vmem>>, %arg13: memref<1x32xf32, #tpu.memory_space<vmem>>, %arg14: memref<1x32xf32, #tpu.memory_space<vmem>>, %arg15: memref<32x32xbf16, #tpu.memory_space<vmem>>, %arg16: memref<1x32xf32, #tpu.memory_space<vmem>>, %arg17: memref<1x32xf32, #tpu.memory_space<vmem>>, %arg18: memref<1x32xf32, #tpu.memory_space<vmem>>, %arg19: memref<2x64xf32, #tpu.memory_space<vmem>>) attributes {dimension_semantics = [#tpu.dimension_semantics<arbitrary>], iteration_bounds = array<i64: 1>, scalar_prefetch = 0 : i64, scratch_operands = 0 : i64, tpu.core_type = #tpu.core_type<tc>, window_params = [{pipeline_mode = #tpu.pipeline_mode<synchronous>, transform_indices = @transform_0, window_bounds = array<i64: 2, 32>}, {pipeline_mode = #tpu.pipeline_mode<synchronous>, transform_indices = @transform_1, window_bounds = array<i64: 8, 32>}, {pipeline_mode = #tpu.pipeline_mode<synchronous>, transform_indices = @transform_2, window_bounds = array<i64: 1, 32>}, {pipeline_mode = #tpu.pipeline_mode<synchronous>, transform_indices = @transform_3, window_bounds = array<i64: 1, 32>}, {pipeline_mode = #tpu.pipeline_mode<synchronous>, transform_indices = @transform_4, window_bounds = array<i64: 32, 32>}, {pipeline_mode = #tpu.pipeline_mode<synchronous>, transform_indices = @transform_5, window_bounds = array<i64: 1, 32>}, {pipeline_mode = #tpu.pipeline_mode<synchronous>, transform_indices = @transform_6, window_bounds = array<i64: 32, 32>}, {pipeline_mode = #tpu.pipeline_mode<synchronous>, transform_indices = @transform_7, window_bounds = array<i64: 1, 32>}, {pipeline_mode = #tpu.pipeline_mode<synchronous>, transform_indices = @transform_8, window_bounds = array<i64: 32, 32>}, {pipeline_mode = #tpu.pipeline_mode<synchronous>, transform_indices = @transform_9, window_bounds = array<i64: 1, 32>}, {pipeline_mode = #tpu.pipeline_mode<synchronous>, transform_indices = @transform_10, window_bounds = array<i64: 32, 32>}, {pipeline_mode = #tpu.pipeline_mode<synchronous>, transform_indices = @transform_11, window_bounds = array<i64: 1, 32>}, {pipeline_mode = #tpu.pipeline_mode<synchronous>, transform_indices = @transform_12, window_bounds = array<i64: 1, 32>}, {pipeline_mode = #tpu.pipeline_mode<synchronous>, transform_indices = @transform_13, window_bounds = array<i64: 1, 32>}, {pipeline_mode = #tpu.pipeline_mode<synchronous>, transform_indices = @transform_14, window_bounds = array<i64: 32, 32>}, {pipeline_mode = #tpu.pipeline_mode<synchronous>, transform_indices = @transform_15, window_bounds = array<i64: 1, 32>}, {pipeline_mode = #tpu.pipeline_mode<synchronous>, transform_indices = @transform_16, window_bounds = array<i64: 1, 32>}, {pipeline_mode = #tpu.pipeline_mode<synchronous>, transform_indices = @transform_17, window_bounds = array<i64: 1, 32>}, {pipeline_mode = #tpu.pipeline_mode<synchronous>, transform_indices = @transform_18, window_bounds = array<i64: 2, 64>}]} {
    %c0 = arith.constant 0 : index
    %c0_0 = arith.constant 0 : index
    %0 = vector.load %arg1[%c0, %c0_0] : memref<2x32xf32, #tpu.memory_space<vmem>>, vector<2x32xf32>
    %c0_1 = arith.constant 0 : index
    %c0_2 = arith.constant 0 : index
    %1 = vector.load %arg3[%c0_1, %c0_2] : memref<1x32xf32, #tpu.memory_space<vmem>>, vector<1x32xf32>
    %c0_3 = arith.constant 0 : index
    %c0_4 = arith.constant 0 : index
    %2 = vector.load %arg4[%c0_3, %c0_4] : memref<1x32xf32, #tpu.memory_space<vmem>>, vector<1x32xf32>
    %cst = arith.constant dense<0.000000e+00> : vector<2xf32>
    %3 = vector.multi_reduction <add>, %0, %cst [1] : vector<2x32xf32> to vector<2xf32>
    %4 = vector.shape_cast %3 : vector<2xf32> to vector<2x1xf32>
    %cst_5 = arith.constant 3.200000e+01 : f32
    %5 = vector.broadcast %cst_5 : f32 to vector<2x1xf32>
    %6 = arith.divf %4, %5 : vector<2x1xf32>
    %7 = vector.broadcast %6 : vector<2x1xf32> to vector<2x32xf32>
    %8 = arith.subf %0, %7 : vector<2x32xf32>
    %9 = arith.mulf %8, %8 : vector<2x32xf32>
    %cst_6 = arith.constant dense<0.000000e+00> : vector<2xf32>
    %10 = vector.multi_reduction <add>, %9, %cst_6 [1] : vector<2x32xf32> to vector<2xf32>
    %11 = vector.shape_cast %10 : vector<2xf32> to vector<2x1xf32>
    %cst_7 = arith.constant 3.200000e+01 : f32
    %12 = vector.broadcast %cst_7 : f32 to vector<2x1xf32>
    %13 = arith.divf %11, %12 : vector<2x1xf32>
    %14 = vector.broadcast %6 : vector<2x1xf32> to vector<2x32xf32>
    %15 = arith.subf %0, %14 : vector<2x32xf32>
    %cst_8 = arith.constant 9.99999974E-6 : f32
    %16 = vector.broadcast %cst_8 : f32 to vector<2x1xf32>
    %17 = arith.addf %13, %16 : vector<2x1xf32>
    %18 = math.rsqrt %17 : vector<2x1xf32>
    %19 = vector.broadcast %18 : vector<2x1xf32> to vector<2x32xf32>
    %20 = arith.mulf %15, %19 : vector<2x32xf32>
    %21 = vector.broadcast %1 : vector<1x32xf32> to vector<2x32xf32>
    %22 = arith.mulf %20, %21 : vector<2x32xf32>
    %23 = vector.broadcast %2 : vector<1x32xf32> to vector<2x32xf32>
    %24 = arith.addf %22, %23 : vector<2x32xf32>
    %c0_9 = arith.constant 0 : index
    %c0_10 = arith.constant 0 : index
    %25 = vector.load %arg5[%c0_9, %c0_10] : memref<32x32xbf16, #tpu.memory_space<vmem>>, vector<32x32xbf16>
    %26 = arith.truncf %24 : vector<2x32xf32> to vector<2x32xbf16>
    %cst_11 = arith.constant dense<0.000000e+00> : vector<2x32xf32>
    %27 = tpu.matmul %26, %25, %cst_11 {dimension_numbers = #tpu.dot_dimension_numbers<[1], [0], [0], [1], [0, 0, 1, 1], [], []>} : vector<2x32xbf16>, vector<32x32xbf16>, vector<2x32xf32> -> vector<2x32xf32>
    %c0_12 = arith.constant 0 : index
    %c0_13 = arith.constant 0 : index
    %28 = vector.load %arg6[%c0_12, %c0_13] : memref<1x32xf32, #tpu.memory_space<vmem>>, vector<1x32xf32>
    %29 = vector.broadcast %28 : vector<1x32xf32> to vector<2x32xf32>
    %30 = arith.addf %27, %29 : vector<2x32xf32>
    %c0_14 = arith.constant 0 : index
    %c0_15 = arith.constant 0 : index
    %31 = vector.load %arg2[%c0_14, %c0_15] : memref<8x32xf32, #tpu.memory_space<vmem>>, vector<8x32xf32>
    %c0_16 = arith.constant 0 : index
    %c0_17 = arith.constant 0 : index
    %32 = vector.load %arg3[%c0_16, %c0_17] : memref<1x32xf32, #tpu.memory_space<vmem>>, vector<1x32xf32>
    %c0_18 = arith.constant 0 : index
    %c0_19 = arith.constant 0 : index
    %33 = vector.load %arg4[%c0_18, %c0_19] : memref<1x32xf32, #tpu.memory_space<vmem>>, vector<1x32xf32>
    %cst_20 = arith.constant dense<0.000000e+00> : vector<8xf32>
    %34 = vector.multi_reduction <add>, %31, %cst_20 [1] : vector<8x32xf32> to vector<8xf32>
    %35 = vector.shape_cast %34 : vector<8xf32> to vector<8x1xf32>
    %cst_21 = arith.constant 3.200000e+01 : f32
    %36 = vector.broadcast %cst_21 : f32 to vector<8x1xf32>
    %37 = arith.divf %35, %36 : vector<8x1xf32>
    %38 = vector.broadcast %37 : vector<8x1xf32> to vector<8x32xf32>
    %39 = arith.subf %31, %38 : vector<8x32xf32>
    %40 = arith.mulf %39, %39 : vector<8x32xf32>
    %cst_22 = arith.constant dense<0.000000e+00> : vector<8xf32>
    %41 = vector.multi_reduction <add>, %40, %cst_22 [1] : vector<8x32xf32> to vector<8xf32>
    %42 = vector.shape_cast %41 : vector<8xf32> to vector<8x1xf32>
    %cst_23 = arith.constant 3.200000e+01 : f32
    %43 = vector.broadcast %cst_23 : f32 to vector<8x1xf32>
    %44 = arith.divf %42, %43 : vector<8x1xf32>
    %45 = vector.broadcast %37 : vector<8x1xf32> to vector<8x32xf32>
    %46 = arith.subf %31, %45 : vector<8x32xf32>
    %cst_24 = arith.constant 9.99999974E-6 : f32
    %47 = vector.broadcast %cst_24 : f32 to vector<8x1xf32>
    %48 = arith.addf %44, %47 : vector<8x1xf32>
    %49 = math.rsqrt %48 : vector<8x1xf32>
    %50 = vector.broadcast %49 : vector<8x1xf32> to vector<8x32xf32>
    %51 = arith.mulf %46, %50 : vector<8x32xf32>
    %52 = vector.broadcast %32 : vector<1x32xf32> to vector<8x32xf32>
    %53 = arith.mulf %51, %52 : vector<8x32xf32>
    %54 = vector.broadcast %33 : vector<1x32xf32> to vector<8x32xf32>
    %55 = arith.addf %53, %54 : vector<8x32xf32>
    %c0_25 = arith.constant 0 : index
    %c0_26 = arith.constant 0 : index
    %56 = vector.load %arg7[%c0_25, %c0_26] : memref<32x32xbf16, #tpu.memory_space<vmem>>, vector<32x32xbf16>
    %57 = arith.truncf %55 : vector<8x32xf32> to vector<8x32xbf16>
    %cst_27 = arith.constant dense<0.000000e+00> : vector<8x32xf32>
    %58 = tpu.matmul %57, %56, %cst_27 {dimension_numbers = #tpu.dot_dimension_numbers<[1], [0], [0], [1], [0, 0, 1, 1], [], []>} : vector<8x32xbf16>, vector<32x32xbf16>, vector<8x32xf32> -> vector<8x32xf32>
    %c0_28 = arith.constant 0 : index
    %c0_29 = arith.constant 0 : index
    %59 = vector.load %arg8[%c0_28, %c0_29] : memref<1x32xf32, #tpu.memory_space<vmem>>, vector<1x32xf32>
    %60 = vector.broadcast %59 : vector<1x32xf32> to vector<8x32xf32>
    %61 = arith.addf %58, %60 : vector<8x32xf32>
    %c0_30 = arith.constant 0 : index
    %c0_31 = arith.constant 0 : index
    %62 = vector.load %arg9[%c0_30, %c0_31] : memref<32x32xbf16, #tpu.memory_space<vmem>>, vector<32x32xbf16>
    %63 = arith.truncf %55 : vector<8x32xf32> to vector<8x32xbf16>
    %cst_32 = arith.constant dense<0.000000e+00> : vector<8x32xf32>
    %64 = tpu.matmul %63, %62, %cst_32 {dimension_numbers = #tpu.dot_dimension_numbers<[1], [0], [0], [1], [0, 0, 1, 1], [], []>} : vector<8x32xbf16>, vector<32x32xbf16>, vector<8x32xf32> -> vector<8x32xf32>
    %c0_33 = arith.constant 0 : index
    %c0_34 = arith.constant 0 : index
    %65 = vector.load %arg10[%c0_33, %c0_34] : memref<1x32xf32, #tpu.memory_space<vmem>>, vector<1x32xf32>
    %66 = vector.broadcast %65 : vector<1x32xf32> to vector<8x32xf32>
    %67 = arith.addf %64, %66 : vector<8x32xf32>
    %68 = vector.extract_strided_slice %61 {offsets = [0, 0], sizes = [4, 32], strides = [1, 1]} : vector<8x32xf32> to vector<4x32xf32>
    %69 = vector.extract_strided_slice %67 {offsets = [0, 0], sizes = [4, 32], strides = [1, 1]} : vector<8x32xf32> to vector<4x32xf32>
    %70 = arith.truncf %30 : vector<2x32xf32> to vector<2x32xbf16>
    %71 = arith.truncf %68 : vector<4x32xf32> to vector<4x32xbf16>
    %cst_35 = arith.constant dense<0.000000e+00> : vector<2x4xf32>
    %72 = tpu.matmul %70, %71, %cst_35 {dimension_numbers = #tpu.dot_dimension_numbers<[1], [1], [0], [0], [0, 0, 1, 0], [], []>} : vector<2x32xbf16>, vector<4x32xbf16>, vector<2x4xf32> -> vector<2x4xf32>
    %cst_36 = arith.constant 0.176776692 : f32
    %73 = vector.broadcast %cst_36 : f32 to vector<2x4xf32>
    %74 = arith.mulf %72, %73 : vector<2x4xf32>
    %cst_37 = arith.constant dense<0xFF800000> : vector<2xf32>
    %75 = vector.multi_reduction <maximumf>, %74, %cst_37 [1] : vector<2x4xf32> to vector<2xf32>
    %76 = vector.shape_cast %75 : vector<2xf32> to vector<2x1xf32>
    %77 = vector.broadcast %76 : vector<2x1xf32> to vector<2x4xf32>
    %78 = arith.subf %74, %77 : vector<2x4xf32>
    %79 = math.exp %78 : vector<2x4xf32>
    %cst_38 = arith.constant dense<0.000000e+00> : vector<2xf32>
    %80 = vector.multi_reduction <add>, %79, %cst_38 [1] : vector<2x4xf32> to vector<2xf32>
    %81 = vector.shape_cast %80 : vector<2xf32> to vector<2x1xf32>
    %82 = tpu.reciprocal %81 {approx = true} : vector<2x1xf32> -> vector<2x1xf32>
    %83 = vector.broadcast %82 : vector<2x1xf32> to vector<2x4xf32>
    %84 = arith.mulf %79, %83 : vector<2x4xf32>
    %85 = arith.truncf %84 : vector<2x4xf32> to vector<2x4xbf16>
    %86 = arith.truncf %69 : vector<4x32xf32> to vector<4x32xbf16>
    %cst_39 = arith.constant dense<0.000000e+00> : vector<2x32xf32>
    %87 = tpu.matmul %85, %86, %cst_39 {dimension_numbers = #tpu.dot_dimension_numbers<[1], [0], [0], [1], [0, 0, 1, 1], [], []>} : vector<2x4xbf16>, vector<4x32xbf16>, vector<2x32xf32> -> vector<2x32xf32>
    %c0_40 = arith.constant 0 : index
    %c0_41 = arith.constant 0 : index
    %88 = vector.load %arg11[%c0_40, %c0_41] : memref<32x32xbf16, #tpu.memory_space<vmem>>, vector<32x32xbf16>
    %89 = arith.truncf %87 : vector<2x32xf32> to vector<2x32xbf16>
    %cst_42 = arith.constant dense<0.000000e+00> : vector<2x32xf32>
    %90 = tpu.matmul %89, %88, %cst_42 {dimension_numbers = #tpu.dot_dimension_numbers<[1], [0], [0], [1], [0, 0, 1, 1], [], []>} : vector<2x32xbf16>, vector<32x32xbf16>, vector<2x32xf32> -> vector<2x32xf32>
    %c0_43 = arith.constant 0 : index
    %c0_44 = arith.constant 0 : index
    %91 = vector.load %arg12[%c0_43, %c0_44] : memref<1x32xf32, #tpu.memory_space<vmem>>, vector<1x32xf32>
    %92 = vector.broadcast %91 : vector<1x32xf32> to vector<2x32xf32>
    %93 = arith.addf %90, %92 : vector<2x32xf32>
    %c0_45 = arith.constant 0 : index
    %c0_46 = arith.constant 0 : index
    %94 = vector.load %arg13[%c0_45, %c0_46] : memref<1x32xf32, #tpu.memory_space<vmem>>, vector<1x32xf32>
    %c0_47 = arith.constant 0 : index
    %c0_48 = arith.constant 0 : index
    %95 = vector.load %arg14[%c0_47, %c0_48] : memref<1x32xf32, #tpu.memory_space<vmem>>, vector<1x32xf32>
    %cst_49 = arith.constant dense<0.000000e+00> : vector<2xf32>
    %96 = vector.multi_reduction <add>, %93, %cst_49 [1] : vector<2x32xf32> to vector<2xf32>
    %97 = vector.shape_cast %96 : vector<2xf32> to vector<2x1xf32>
    %cst_50 = arith.constant 3.200000e+01 : f32
    %98 = vector.broadcast %cst_50 : f32 to vector<2x1xf32>
    %99 = arith.divf %97, %98 : vector<2x1xf32>
    %100 = vector.broadcast %99 : vector<2x1xf32> to vector<2x32xf32>
    %101 = arith.subf %93, %100 : vector<2x32xf32>
    %102 = arith.mulf %101, %101 : vector<2x32xf32>
    %cst_51 = arith.constant dense<0.000000e+00> : vector<2xf32>
    %103 = vector.multi_reduction <add>, %102, %cst_51 [1] : vector<2x32xf32> to vector<2xf32>
    %104 = vector.shape_cast %103 : vector<2xf32> to vector<2x1xf32>
    %cst_52 = arith.constant 3.200000e+01 : f32
    %105 = vector.broadcast %cst_52 : f32 to vector<2x1xf32>
    %106 = arith.divf %104, %105 : vector<2x1xf32>
    %107 = vector.broadcast %99 : vector<2x1xf32> to vector<2x32xf32>
    %108 = arith.subf %93, %107 : vector<2x32xf32>
    %cst_53 = arith.constant 9.99999974E-6 : f32
    %109 = vector.broadcast %cst_53 : f32 to vector<2x1xf32>
    %110 = arith.addf %106, %109 : vector<2x1xf32>
    %111 = math.rsqrt %110 : vector<2x1xf32>
    %112 = vector.broadcast %111 : vector<2x1xf32> to vector<2x32xf32>
    %113 = arith.mulf %108, %112 : vector<2x32xf32>
    %114 = vector.broadcast %94 : vector<1x32xf32> to vector<2x32xf32>
    %115 = arith.mulf %113, %114 : vector<2x32xf32>
    %116 = vector.broadcast %95 : vector<1x32xf32> to vector<2x32xf32>
    %117 = arith.addf %115, %116 : vector<2x32xf32>
    %c0_54 = arith.constant 0 : index
    %c0_55 = arith.constant 0 : index
    %118 = vector.load %arg15[%c0_54, %c0_55] : memref<32x32xbf16, #tpu.memory_space<vmem>>, vector<32x32xbf16>
    %119 = arith.truncf %117 : vector<2x32xf32> to vector<2x32xbf16>
    %cst_56 = arith.constant dense<0.000000e+00> : vector<2x32xf32>
    %120 = tpu.matmul %119, %118, %cst_56 {dimension_numbers = #tpu.dot_dimension_numbers<[1], [0], [0], [1], [0, 0, 1, 1], [], []>} : vector<2x32xbf16>, vector<32x32xbf16>, vector<2x32xf32> -> vector<2x32xf32>
    %121 = arith.addf %117, %120 : vector<2x32xf32>
    %c0_57 = arith.constant 0 : index
    %c0_58 = arith.constant 0 : index
    %122 = vector.load %arg16[%c0_57, %c0_58] : memref<1x32xf32, #tpu.memory_space<vmem>>, vector<1x32xf32>
    %123 = vector.broadcast %122 : vector<1x32xf32> to vector<2x32xf32>
    %124 = arith.addf %121, %123 : vector<2x32xf32>
    %c0_59 = arith.constant 0 : index
    %c0_60 = arith.constant 0 : index
    %125 = vector.load %arg17[%c0_59, %c0_60] : memref<1x32xf32, #tpu.memory_space<vmem>>, vector<1x32xf32>
    %c0_61 = arith.constant 0 : index
    %c0_62 = arith.constant 0 : index
    %126 = vector.load %arg18[%c0_61, %c0_62] : memref<1x32xf32, #tpu.memory_space<vmem>>, vector<1x32xf32>
    %cst_63 = arith.constant dense<0.000000e+00> : vector<2xf32>
    %127 = vector.multi_reduction <add>, %124, %cst_63 [1] : vector<2x32xf32> to vector<2xf32>
    %128 = vector.shape_cast %127 : vector<2xf32> to vector<2x1xf32>
    %cst_64 = arith.constant 3.200000e+01 : f32
    %129 = vector.broadcast %cst_64 : f32 to vector<2x1xf32>
    %130 = arith.divf %128, %129 : vector<2x1xf32>
    %131 = vector.broadcast %130 : vector<2x1xf32> to vector<2x32xf32>
    %132 = arith.subf %124, %131 : vector<2x32xf32>
    %133 = arith.mulf %132, %132 : vector<2x32xf32>
    %cst_65 = arith.constant dense<0.000000e+00> : vector<2xf32>
    %134 = vector.multi_reduction <add>, %133, %cst_65 [1] : vector<2x32xf32> to vector<2xf32>
    %135 = vector.shape_cast %134 : vector<2xf32> to vector<2x1xf32>
    %cst_66 = arith.constant 3.200000e+01 : f32
    %136 = vector.broadcast %cst_66 : f32 to vector<2x1xf32>
    %137 = arith.divf %135, %136 : vector<2x1xf32>
    %138 = vector.broadcast %130 : vector<2x1xf32> to vector<2x32xf32>
    %139 = arith.subf %124, %138 : vector<2x32xf32>
    %cst_67 = arith.constant 9.99999974E-6 : f32
    %140 = vector.broadcast %cst_67 : f32 to vector<2x1xf32>
    %141 = arith.addf %137, %140 : vector<2x1xf32>
    %142 = math.rsqrt %141 : vector<2x1xf32>
    %143 = vector.broadcast %142 : vector<2x1xf32> to vector<2x32xf32>
    %144 = arith.mulf %139, %143 : vector<2x32xf32>
    %145 = vector.broadcast %125 : vector<1x32xf32> to vector<2x32xf32>
    %146 = arith.mulf %144, %145 : vector<2x32xf32>
    %147 = vector.broadcast %126 : vector<1x32xf32> to vector<2x32xf32>
    %148 = arith.addf %146, %147 : vector<2x32xf32>
    %149 = vector.extract_strided_slice %61 {offsets = [4, 0], sizes = [4, 32], strides = [1, 1]} : vector<8x32xf32> to vector<4x32xf32>
    %150 = vector.extract_strided_slice %67 {offsets = [4, 0], sizes = [4, 32], strides = [1, 1]} : vector<8x32xf32> to vector<4x32xf32>
    %151 = arith.truncf %30 : vector<2x32xf32> to vector<2x32xbf16>
    %152 = arith.truncf %149 : vector<4x32xf32> to vector<4x32xbf16>
    %cst_68 = arith.constant dense<0.000000e+00> : vector<2x4xf32>
    %153 = tpu.matmul %151, %152, %cst_68 {dimension_numbers = #tpu.dot_dimension_numbers<[1], [1], [0], [0], [0, 0, 1, 0], [], []>} : vector<2x32xbf16>, vector<4x32xbf16>, vector<2x4xf32> -> vector<2x4xf32>
    %cst_69 = arith.constant 0.176776692 : f32
    %154 = vector.broadcast %cst_69 : f32 to vector<2x4xf32>
    %155 = arith.mulf %153, %154 : vector<2x4xf32>
    %cst_70 = arith.constant dense<0xFF800000> : vector<2xf32>
    %156 = vector.multi_reduction <maximumf>, %155, %cst_70 [1] : vector<2x4xf32> to vector<2xf32>
    %157 = vector.shape_cast %156 : vector<2xf32> to vector<2x1xf32>
    %158 = vector.broadcast %157 : vector<2x1xf32> to vector<2x4xf32>
    %159 = arith.subf %155, %158 : vector<2x4xf32>
    %160 = math.exp %159 : vector<2x4xf32>
    %cst_71 = arith.constant dense<0.000000e+00> : vector<2xf32>
    %161 = vector.multi_reduction <add>, %160, %cst_71 [1] : vector<2x4xf32> to vector<2xf32>
    %162 = vector.shape_cast %161 : vector<2xf32> to vector<2x1xf32>
    %163 = tpu.reciprocal %162 {approx = true} : vector<2x1xf32> -> vector<2x1xf32>
    %164 = vector.broadcast %163 : vector<2x1xf32> to vector<2x4xf32>
    %165 = arith.mulf %160, %164 : vector<2x4xf32>
    %166 = arith.truncf %165 : vector<2x4xf32> to vector<2x4xbf16>
    %167 = arith.truncf %150 : vector<4x32xf32> to vector<4x32xbf16>
    %cst_72 = arith.constant dense<0.000000e+00> : vector<2x32xf32>
    %168 = tpu.matmul %166, %167, %cst_72 {dimension_numbers = #tpu.dot_dimension_numbers<[1], [0], [0], [1], [0, 0, 1, 1], [], []>} : vector<2x4xbf16>, vector<4x32xbf16>, vector<2x32xf32> -> vector<2x32xf32>
    %c0_73 = arith.constant 0 : index
    %c0_74 = arith.constant 0 : index
    %169 = vector.load %arg11[%c0_73, %c0_74] : memref<32x32xbf16, #tpu.memory_space<vmem>>, vector<32x32xbf16>
    %170 = arith.truncf %168 : vector<2x32xf32> to vector<2x32xbf16>
    %cst_75 = arith.constant dense<0.000000e+00> : vector<2x32xf32>
    %171 = tpu.matmul %170, %169, %cst_75 {dimension_numbers = #tpu.dot_dimension_numbers<[1], [0], [0], [1], [0, 0, 1, 1], [], []>} : vector<2x32xbf16>, vector<32x32xbf16>, vector<2x32xf32> -> vector<2x32xf32>
    %c0_76 = arith.constant 0 : index
    %c0_77 = arith.constant 0 : index
    %172 = vector.load %arg12[%c0_76, %c0_77] : memref<1x32xf32, #tpu.memory_space<vmem>>, vector<1x32xf32>
    %173 = vector.broadcast %172 : vector<1x32xf32> to vector<2x32xf32>
    %174 = arith.addf %171, %173 : vector<2x32xf32>
    %c0_78 = arith.constant 0 : index
    %c0_79 = arith.constant 0 : index
    %175 = vector.load %arg13[%c0_78, %c0_79] : memref<1x32xf32, #tpu.memory_space<vmem>>, vector<1x32xf32>
    %c0_80 = arith.constant 0 : index
    %c0_81 = arith.constant 0 : index
    %176 = vector.load %arg14[%c0_80, %c0_81] : memref<1x32xf32, #tpu.memory_space<vmem>>, vector<1x32xf32>
    %cst_82 = arith.constant dense<0.000000e+00> : vector<2xf32>
    %177 = vector.multi_reduction <add>, %174, %cst_82 [1] : vector<2x32xf32> to vector<2xf32>
    %178 = vector.shape_cast %177 : vector<2xf32> to vector<2x1xf32>
    %cst_83 = arith.constant 3.200000e+01 : f32
    %179 = vector.broadcast %cst_83 : f32 to vector<2x1xf32>
    %180 = arith.divf %178, %179 : vector<2x1xf32>
    %181 = vector.broadcast %180 : vector<2x1xf32> to vector<2x32xf32>
    %182 = arith.subf %174, %181 : vector<2x32xf32>
    %183 = arith.mulf %182, %182 : vector<2x32xf32>
    %cst_84 = arith.constant dense<0.000000e+00> : vector<2xf32>
    %184 = vector.multi_reduction <add>, %183, %cst_84 [1] : vector<2x32xf32> to vector<2xf32>
    %185 = vector.shape_cast %184 : vector<2xf32> to vector<2x1xf32>
    %cst_85 = arith.constant 3.200000e+01 : f32
    %186 = vector.broadcast %cst_85 : f32 to vector<2x1xf32>
    %187 = arith.divf %185, %186 : vector<2x1xf32>
    %188 = vector.broadcast %180 : vector<2x1xf32> to vector<2x32xf32>
    %189 = arith.subf %174, %188 : vector<2x32xf32>
    %cst_86 = arith.constant 9.99999974E-6 : f32
    %190 = vector.broadcast %cst_86 : f32 to vector<2x1xf32>
    %191 = arith.addf %187, %190 : vector<2x1xf32>
    %192 = math.rsqrt %191 : vector<2x1xf32>
    %193 = vector.broadcast %192 : vector<2x1xf32> to vector<2x32xf32>
    %194 = arith.mulf %189, %193 : vector<2x32xf32>
    %195 = vector.broadcast %175 : vector<1x32xf32> to vector<2x32xf32>
    %196 = arith.mulf %194, %195 : vector<2x32xf32>
    %197 = vector.broadcast %176 : vector<1x32xf32> to vector<2x32xf32>
    %198 = arith.addf %196, %197 : vector<2x32xf32>
    %c0_87 = arith.constant 0 : index
    %c0_88 = arith.constant 0 : index
    %199 = vector.load %arg15[%c0_87, %c0_88] : memref<32x32xbf16, #tpu.memory_space<vmem>>, vector<32x32xbf16>
    %200 = arith.truncf %198 : vector<2x32xf32> to vector<2x32xbf16>
    %cst_89 = arith.constant dense<0.000000e+00> : vector<2x32xf32>
    %201 = tpu.matmul %200, %199, %cst_89 {dimension_numbers = #tpu.dot_dimension_numbers<[1], [0], [0], [1], [0, 0, 1, 1], [], []>} : vector<2x32xbf16>, vector<32x32xbf16>, vector<2x32xf32> -> vector<2x32xf32>
    %202 = arith.addf %198, %201 : vector<2x32xf32>
    %c0_90 = arith.constant 0 : index
    %c0_91 = arith.constant 0 : index
    %203 = vector.load %arg16[%c0_90, %c0_91] : memref<1x32xf32, #tpu.memory_space<vmem>>, vector<1x32xf32>
    %204 = vector.broadcast %203 : vector<1x32xf32> to vector<2x32xf32>
    %205 = arith.addf %202, %204 : vector<2x32xf32>
    %c0_92 = arith.constant 0 : index
    %c0_93 = arith.constant 0 : index
    %206 = vector.load %arg17[%c0_92, %c0_93] : memref<1x32xf32, #tpu.memory_space<vmem>>, vector<1x32xf32>
    %c0_94 = arith.constant 0 : index
    %c0_95 = arith.constant 0 : index
    %207 = vector.load %arg18[%c0_94, %c0_95] : memref<1x32xf32, #tpu.memory_space<vmem>>, vector<1x32xf32>
    %cst_96 = arith.constant dense<0.000000e+00> : vector<2xf32>
    %208 = vector.multi_reduction <add>, %205, %cst_96 [1] : vector<2x32xf32> to vector<2xf32>
    %209 = vector.shape_cast %208 : vector<2xf32> to vector<2x1xf32>
    %cst_97 = arith.constant 3.200000e+01 : f32
    %210 = vector.broadcast %cst_97 : f32 to vector<2x1xf32>
    %211 = arith.divf %209, %210 : vector<2x1xf32>
    %212 = vector.broadcast %211 : vector<2x1xf32> to vector<2x32xf32>
    %213 = arith.subf %205, %212 : vector<2x32xf32>
    %214 = arith.mulf %213, %213 : vector<2x32xf32>
    %cst_98 = arith.constant dense<0.000000e+00> : vector<2xf32>
    %215 = vector.multi_reduction <add>, %214, %cst_98 [1] : vector<2x32xf32> to vector<2xf32>
    %216 = vector.shape_cast %215 : vector<2xf32> to vector<2x1xf32>
    %cst_99 = arith.constant 3.200000e+01 : f32
    %217 = vector.broadcast %cst_99 : f32 to vector<2x1xf32>
    %218 = arith.divf %216, %217 : vector<2x1xf32>
    %219 = vector.broadcast %211 : vector<2x1xf32> to vector<2x32xf32>
    %220 = arith.subf %205, %219 : vector<2x32xf32>
    %cst_100 = arith.constant 9.99999974E-6 : f32
    %221 = vector.broadcast %cst_100 : f32 to vector<2x1xf32>
    %222 = arith.addf %218, %221 : vector<2x1xf32>
    %223 = math.rsqrt %222 : vector<2x1xf32>
    %224 = vector.broadcast %223 : vector<2x1xf32> to vector<2x32xf32>
    %225 = arith.mulf %220, %224 : vector<2x32xf32>
    %226 = vector.broadcast %206 : vector<1x32xf32> to vector<2x32xf32>
    %227 = arith.mulf %225, %226 : vector<2x32xf32>
    %228 = vector.broadcast %207 : vector<1x32xf32> to vector<2x32xf32>
    %229 = arith.addf %227, %228 : vector<2x32xf32>
    %230 = tpu.concatenate %148, %229 in 1 : vector<2x32xf32>, vector<2x32xf32> -> vector<2x64xf32>
    %c0_101 = arith.constant 0 : index
    %c0_102 = arith.constant 0 : index
    %231 = vector.load %arg19[%c0_101, %c0_102] : memref<2x64xf32, #tpu.memory_space<vmem>>, vector<2x64xf32>
    tpu.vector_store %arg19[%c0_101, %c0_102], %230 {strides = array<i32>} : memref<2x64xf32, #tpu.memory_space<vmem>>, vector<2x64xf32>,
    return
  }
  func.func @transform_0(%arg0: i32) -> (i32, i32) {
    %c0_i32 = arith.constant 0 : i32
    %c0_i32_0 = arith.constant 0 : i32
    %c0_i32_1 = arith.constant 0 : i32
    return %c0_i32, %c0_i32_0 : i32, i32
  }
  func.func @transform_1(%arg0: i32) -> (i32, i32) {
    %c0_i32 = arith.constant 0 : i32
    %c0_i32_0 = arith.constant 0 : i32
    %c0_i32_1 = arith.constant 0 : i32
    return %c0_i32, %c0_i32_0 : i32, i32
  }
  func.func @transform_2(%arg0: i32) -> (i32, i32) {
    %c0_i32 = arith.constant 0 : i32
    %c0_i32_0 = arith.constant 0 : i32
    %c0_i32_1 = arith.constant 0 : i32
    return %c0_i32, %c0_i32_0 : i32, i32
  }
  func.func @transform_3(%arg0: i32) -> (i32, i32) {
    %c0_i32 = arith.constant 0 : i32
    %c0_i32_0 = arith.constant 0 : i32
    %c0_i32_1 = arith.constant 0 : i32
    return %c0_i32, %c0_i32_0 : i32, i32
  }
  func.func @transform_4(%arg0: i32) -> (i32, i32) {
    %c0_i32 = arith.constant 0 : i32
    %c0_i32_0 = arith.constant 0 : i32
    %c0_i32_1 = arith.constant 0 : i32
    return %c0_i32, %c0_i32_0 : i32, i32
  }
  func.func @transform_5(%arg0: i32) -> (i32, i32) {
    %c0_i32 = arith.constant 0 : i32
    %c0_i32_0 = arith.constant 0 : i32
    %c0_i32_1 = arith.constant 0 : i32
    return %c0_i32, %c0_i32_0 : i32, i32
  }
  func.func @transform_6(%arg0: i32) -> (i32, i32) {
    %c0_i32 = arith.constant 0 : i32
    %c0_i32_0 = arith.constant 0 : i32
    %c0_i32_1 = arith.constant 0 : i32
    return %c0_i32, %c0_i32_0 : i32, i32
  }
  func.func @transform_7(%arg0: i32) -> (i32, i32) {
    %c0_i32 = arith.constant 0 : i32
    %c0_i32_0 = arith.constant 0 : i32
    %c0_i32_1 = arith.constant 0 : i32
    return %c0_i32, %c0_i32_0 : i32, i32
  }
  func.func @transform_8(%arg0: i32) -> (i32, i32) {
    %c0_i32 = arith.constant 0 : i32
    %c0_i32_0 = arith.constant 0 : i32
    %c0_i32_1 = arith.constant 0 : i32
    return %c0_i32, %c0_i32_0 : i32, i32
  }
  func.func @transform_9(%arg0: i32) -> (i32, i32) {
    %c0_i32 = arith.constant 0 : i32
    %c0_i32_0 = arith.constant 0 : i32
    %c0_i32_1 = arith.constant 0 : i32
    return %c0_i32, %c0_i32_0 : i32, i32
  }
  func.func @transform_10(%arg0: i32) -> (i32, i32) {
    %c0_i32 = arith.constant 0 : i32
    %c0_i32_0 = arith.constant 0 : i32
    %c0_i32_1 = arith.constant 0 : i32
    return %c0_i32, %c0_i32_0 : i32, i32
  }
  func.func @transform_11(%arg0: i32) -> (i32, i32) {
    %c0_i32 = arith.constant 0 : i32
    %c0_i32_0 = arith.constant 0 : i32
    %c0_i32_1 = arith.constant 0 : i32
    return %c0_i32, %c0_i32_0 : i32, i32
  }
  func.func @transform_12(%arg0: i32) -> (i32, i32) {
    %c0_i32 = arith.constant 0 : i32
    %c0_i32_0 = arith.constant 0 : i32
    %c0_i32_1 = arith.constant 0 : i32
    return %c0_i32, %c0_i32_0 : i32, i32
  }
  func.func @transform_13(%arg0: i32) -> (i32, i32) {
    %c0_i32 = arith.constant 0 : i32
    %c0_i32_0 = arith.constant 0 : i32
    %c0_i32_1 = arith.constant 0 : i32
    return %c0_i32, %c0_i32_0 : i32, i32
  }
  func.func @transform_14(%arg0: i32) -> (i32, i32) {
    %c0_i32 = arith.constant 0 : i32
    %c0_i32_0 = arith.constant 0 : i32
    %c0_i32_1 = arith.constant 0 : i32
    return %c0_i32, %c0_i32_0 : i32, i32
  }
  func.func @transform_15(%arg0: i32) -> (i32, i32) {
    %c0_i32 = arith.constant 0 : i32
    %c0_i32_0 = arith.constant 0 : i32
    %c0_i32_1 = arith.constant 0 : i32
    return %c0_i32, %c0_i32_0 : i32, i32
  }
  func.func @transform_16(%arg0: i32) -> (i32, i32) {
    %c0_i32 = arith.constant 0 : i32
    %c0_i32_0 = arith.constant 0 : i32
    %c0_i32_1 = arith.constant 0 : i32
    return %c0_i32, %c0_i32_0 : i32, i32
  }
  func.func @transform_17(%arg0: i32) -> (i32, i32) {
    %c0_i32 = arith.constant 0 : i32
    %c0_i32_0 = arith.constant 0 : i32
    %c0_i32_1 = arith.constant 0 : i32
    return %c0_i32, %c0_i32_0 : i32, i32
  }
  func.func @transform_18(%arg0: i32) -> (i32, i32) {
    %c0_i32 = arith.constant 0 : i32
    %c0_i32_0 = arith.constant 0 : i32
    %c0_i32_1 = arith.constant 0 : i32
    return %c0_i32, %c0_i32_0 : i32, i32
  }
}

module attributes {stable_mosaic.version = 11 : i64} {
  func.func @_encoder_kernel(%arg0: i32, %arg1: i32, %arg2: memref<4x5x32xf32, #tpu.memory_space<vmem>>, %arg3: memref<1x1x32xf32, #tpu.memory_space<vmem>>, %arg4: memref<1x1x32xf32, #tpu.memory_space<vmem>>, %arg5: memref<1x32x96xbf16, #tpu.memory_space<vmem>>, %arg6: memref<1x1x96xf32, #tpu.memory_space<vmem>>, %arg7: memref<1x32x32xbf16, #tpu.memory_space<vmem>>, %arg8: memref<1x1x32xf32, #tpu.memory_space<vmem>>, %arg9: memref<1x1x32xf32, #tpu.memory_space<vmem>>, %arg10: memref<1x1x32xf32, #tpu.memory_space<vmem>>, %arg11: memref<1x32x128xbf16, #tpu.memory_space<vmem>>, %arg12: memref<1x1x128xf32, #tpu.memory_space<vmem>>, %arg13: memref<1x128x32xbf16, #tpu.memory_space<vmem>>, %arg14: memref<1x1x32xf32, #tpu.memory_space<vmem>>, %arg15: memref<4x5x32xf32, #tpu.memory_space<vmem>>, %arg16: memref<4x5x32xf32, #tpu.memory_space<vmem>>) attributes {dimension_semantics = [#tpu.dimension_semantics<parallel>, #tpu.dimension_semantics<arbitrary>], iteration_bounds = array<i64: 2, 2>, scalar_prefetch = 0 : i64, scratch_operands = 1 : i64, tpu.core_type = #tpu.core_type<tc>, window_params = [{transform_indices = @transform_0, window_bounds = array<i64: 4, 5, 32>}, {transform_indices = @transform_1, window_bounds = array<i64: 1, 1, 32>}, {transform_indices = @transform_2, window_bounds = array<i64: 1, 1, 32>}, {transform_indices = @transform_3, window_bounds = array<i64: 1, 32, 96>}, {transform_indices = @transform_4, window_bounds = array<i64: 1, 1, 96>}, {transform_indices = @transform_5, window_bounds = array<i64: 1, 32, 32>}, {transform_indices = @transform_6, window_bounds = array<i64: 1, 1, 32>}, {transform_indices = @transform_7, window_bounds = array<i64: 1, 1, 32>}, {transform_indices = @transform_8, window_bounds = array<i64: 1, 1, 32>}, {transform_indices = @transform_9, window_bounds = array<i64: 1, 32, 128>}, {transform_indices = @transform_10, window_bounds = array<i64: 1, 1, 128>}, {transform_indices = @transform_11, window_bounds = array<i64: 1, 128, 32>}, {transform_indices = @transform_12, window_bounds = array<i64: 1, 1, 32>}, {transform_indices = @transform_13, window_bounds = array<i64: 4, 5, 32>}]} {
    %c0_i32 = arith.constant 0 : i32
    %0 = arith.cmpi eq, %arg1, %c0_i32 : i32
    %1 = arith.extui %0 : i1 to i32
    %c0_i32_0 = arith.constant 0 : i32
    %2 = arith.cmpi ne, %1, %c0_i32_0 : i32
    scf.if %2 {
      %c0_318 = arith.constant 0 : index
      %c0_319 = arith.constant 0 : index
      %c0_320 = arith.constant 0 : index
      %741 = vector.load %arg2[%c0_318, %c0_319, %c0_320] : memref<4x5x32xf32, #tpu.memory_space<vmem>>, vector<4x5x32xf32>
      %c0_321 = arith.constant 0 : index
      %c0_322 = arith.constant 0 : index
      %c0_323 = arith.constant 0 : index
      %742 = vector.load %arg16[%c0_321, %c0_322, %c0_323] : memref<4x5x32xf32, #tpu.memory_space<vmem>>, vector<4x5x32xf32>
      tpu.vector_store %arg16[%c0_321, %c0_322, %c0_323], %741 {strides = array<i32>} : memref<4x5x32xf32, #tpu.memory_space<vmem>>, vector<4x5x32xf32>,
    } else {
    }
    %c0 = arith.constant 0 : index
    %c0_1 = arith.constant 0 : index
    %c0_2 = arith.constant 0 : index
    %3 = vector.load %arg16[%c0, %c0_1, %c0_2] : memref<4x5x32xf32, #tpu.memory_space<vmem>>, vector<1x5x32xf32>
    %4 = vector.shape_cast %3 : vector<1x5x32xf32> to vector<5x32xf32>
    %c0_3 = arith.constant 0 : index
    %c0_4 = arith.constant 0 : index
    %c0_5 = arith.constant 0 : index
    %5 = vector.load %arg3[%c0_3, %c0_4, %c0_5] : memref<1x1x32xf32, #tpu.memory_space<vmem>>, vector<1x1x32xf32>
    %6 = vector.shape_cast %5 : vector<1x1x32xf32> to vector<1x32xf32>
    %c0_6 = arith.constant 0 : index
    %c0_7 = arith.constant 0 : index
    %c0_8 = arith.constant 0 : index
    %7 = vector.load %arg4[%c0_6, %c0_7, %c0_8] : memref<1x1x32xf32, #tpu.memory_space<vmem>>, vector<1x1x32xf32>
    %8 = vector.shape_cast %7 : vector<1x1x32xf32> to vector<1x32xf32>
    %cst = arith.constant dense<0.000000e+00> : vector<5xf32>
    %9 = vector.multi_reduction <add>, %4, %cst [1] : vector<5x32xf32> to vector<5xf32>
    %10 = vector.shape_cast %9 : vector<5xf32> to vector<5x1xf32>
    %cst_9 = arith.constant 3.200000e+01 : f32
    %11 = vector.broadcast %cst_9 : f32 to vector<5x1xf32>
    %12 = arith.divf %10, %11 : vector<5x1xf32>
    %13 = vector.broadcast %12 : vector<5x1xf32> to vector<5x32xf32>
    %14 = arith.subf %4, %13 : vector<5x32xf32>
    %15 = arith.mulf %14, %14 : vector<5x32xf32>
    %cst_10 = arith.constant dense<0.000000e+00> : vector<5xf32>
    %16 = vector.multi_reduction <add>, %15, %cst_10 [1] : vector<5x32xf32> to vector<5xf32>
    %17 = vector.shape_cast %16 : vector<5xf32> to vector<5x1xf32>
    %cst_11 = arith.constant 3.200000e+01 : f32
    %18 = vector.broadcast %cst_11 : f32 to vector<5x1xf32>
    %19 = arith.divf %17, %18 : vector<5x1xf32>
    %20 = vector.broadcast %12 : vector<5x1xf32> to vector<5x32xf32>
    %21 = arith.subf %4, %20 : vector<5x32xf32>
    %cst_12 = arith.constant 9.99999974E-6 : f32
    %22 = vector.broadcast %cst_12 : f32 to vector<5x1xf32>
    %23 = arith.addf %19, %22 : vector<5x1xf32>
    %24 = math.rsqrt %23 : vector<5x1xf32>
    %25 = vector.broadcast %24 : vector<5x1xf32> to vector<5x32xf32>
    %26 = arith.mulf %21, %25 : vector<5x32xf32>
    %27 = vector.broadcast %6 : vector<1x32xf32> to vector<5x32xf32>
    %28 = arith.mulf %26, %27 : vector<5x32xf32>
    %29 = vector.broadcast %8 : vector<1x32xf32> to vector<5x32xf32>
    %30 = arith.addf %28, %29 : vector<5x32xf32>
    %c0_13 = arith.constant 0 : index
    %c0_14 = arith.constant 0 : index
    %c0_15 = arith.constant 0 : index
    %31 = vector.load %arg5[%c0_13, %c0_14, %c0_15] : memref<1x32x96xbf16, #tpu.memory_space<vmem>>, vector<1x32x96xbf16>
    %32 = vector.shape_cast %31 : vector<1x32x96xbf16> to vector<32x96xbf16>
    %33 = arith.truncf %30 : vector<5x32xf32> to vector<5x32xbf16>
    %cst_16 = arith.constant dense<0.000000e+00> : vector<5x96xf32>
    %34 = tpu.matmul %33, %32, %cst_16 {dimension_numbers = #tpu.dot_dimension_numbers<[1], [0], [0], [1], [0, 0, 1, 1], [], []>} : vector<5x32xbf16>, vector<32x96xbf16>, vector<5x96xf32> -> vector<5x96xf32>
    %c0_17 = arith.constant 0 : index
    %c0_18 = arith.constant 0 : index
    %c0_19 = arith.constant 0 : index
    %35 = vector.load %arg6[%c0_17, %c0_18, %c0_19] : memref<1x1x96xf32, #tpu.memory_space<vmem>>, vector<1x1x96xf32>
    %36 = vector.shape_cast %35 : vector<1x1x96xf32> to vector<1x96xf32>
    %37 = vector.broadcast %36 : vector<1x96xf32> to vector<5x96xf32>
    %38 = arith.addf %34, %37 : vector<5x96xf32>
    %39 = vector.extract_strided_slice %38 {offsets = [0, 0], sizes = [5, 8], strides = [1, 1]} : vector<5x96xf32> to vector<5x8xf32>
    %40 = vector.extract_strided_slice %38 {offsets = [0, 32], sizes = [5, 8], strides = [1, 1]} : vector<5x96xf32> to vector<5x8xf32>
    %41 = vector.extract_strided_slice %38 {offsets = [0, 64], sizes = [5, 8], strides = [1, 1]} : vector<5x96xf32> to vector<5x8xf32>
    %42 = arith.truncf %39 : vector<5x8xf32> to vector<5x8xbf16>
    %43 = arith.truncf %40 : vector<5x8xf32> to vector<5x8xbf16>
    %cst_20 = arith.constant dense<0.000000e+00> : vector<5x5xf32>
    %44 = tpu.matmul %42, %43, %cst_20 {dimension_numbers = #tpu.dot_dimension_numbers<[1], [1], [0], [0], [0, 0, 1, 0], [], []>} : vector<5x8xbf16>, vector<5x8xbf16>, vector<5x5xf32> -> vector<5x5xf32>
    %cst_21 = arith.constant 0.353553385 : f32
    %45 = vector.broadcast %cst_21 : f32 to vector<5x5xf32>
    %46 = arith.mulf %44, %45 : vector<5x5xf32>
    %cst_22 = arith.constant dense<0xFF800000> : vector<5xf32>
    %47 = vector.multi_reduction <maximumf>, %46, %cst_22 [1] : vector<5x5xf32> to vector<5xf32>
    %48 = vector.shape_cast %47 : vector<5xf32> to vector<5x1xf32>
    %49 = vector.broadcast %48 : vector<5x1xf32> to vector<5x5xf32>
    %50 = arith.subf %46, %49 : vector<5x5xf32>
    %51 = math.exp %50 : vector<5x5xf32>
    %cst_23 = arith.constant dense<0.000000e+00> : vector<5xf32>
    %52 = vector.multi_reduction <add>, %51, %cst_23 [1] : vector<5x5xf32> to vector<5xf32>
    %53 = vector.shape_cast %52 : vector<5xf32> to vector<5x1xf32>
    %54 = tpu.reciprocal %53 {approx = true} : vector<5x1xf32> -> vector<5x1xf32>
    %55 = vector.broadcast %54 : vector<5x1xf32> to vector<5x5xf32>
    %56 = arith.mulf %51, %55 : vector<5x5xf32>
    %57 = arith.truncf %56 : vector<5x5xf32> to vector<5x5xbf16>
    %58 = arith.truncf %41 : vector<5x8xf32> to vector<5x8xbf16>
    %cst_24 = arith.constant dense<0.000000e+00> : vector<5x8xf32>
    %59 = tpu.matmul %57, %58, %cst_24 {dimension_numbers = #tpu.dot_dimension_numbers<[1], [0], [0], [1], [0, 0, 1, 1], [], []>} : vector<5x5xbf16>, vector<5x8xbf16>, vector<5x8xf32> -> vector<5x8xf32>
    %60 = vector.extract_strided_slice %38 {offsets = [0, 8], sizes = [5, 8], strides = [1, 1]} : vector<5x96xf32> to vector<5x8xf32>
    %61 = vector.extract_strided_slice %38 {offsets = [0, 40], sizes = [5, 8], strides = [1, 1]} : vector<5x96xf32> to vector<5x8xf32>
    %62 = vector.extract_strided_slice %38 {offsets = [0, 72], sizes = [5, 8], strides = [1, 1]} : vector<5x96xf32> to vector<5x8xf32>
    %63 = arith.truncf %60 : vector<5x8xf32> to vector<5x8xbf16>
    %64 = arith.truncf %61 : vector<5x8xf32> to vector<5x8xbf16>
    %cst_25 = arith.constant dense<0.000000e+00> : vector<5x5xf32>
    %65 = tpu.matmul %63, %64, %cst_25 {dimension_numbers = #tpu.dot_dimension_numbers<[1], [1], [0], [0], [0, 0, 1, 0], [], []>} : vector<5x8xbf16>, vector<5x8xbf16>, vector<5x5xf32> -> vector<5x5xf32>
    %cst_26 = arith.constant 0.353553385 : f32
    %66 = vector.broadcast %cst_26 : f32 to vector<5x5xf32>
    %67 = arith.mulf %65, %66 : vector<5x5xf32>
    %cst_27 = arith.constant dense<0xFF800000> : vector<5xf32>
    %68 = vector.multi_reduction <maximumf>, %67, %cst_27 [1] : vector<5x5xf32> to vector<5xf32>
    %69 = vector.shape_cast %68 : vector<5xf32> to vector<5x1xf32>
    %70 = vector.broadcast %69 : vector<5x1xf32> to vector<5x5xf32>
    %71 = arith.subf %67, %70 : vector<5x5xf32>
    %72 = math.exp %71 : vector<5x5xf32>
    %cst_28 = arith.constant dense<0.000000e+00> : vector<5xf32>
    %73 = vector.multi_reduction <add>, %72, %cst_28 [1] : vector<5x5xf32> to vector<5xf32>
    %74 = vector.shape_cast %73 : vector<5xf32> to vector<5x1xf32>
    %75 = tpu.reciprocal %74 {approx = true} : vector<5x1xf32> -> vector<5x1xf32>
    %76 = vector.broadcast %75 : vector<5x1xf32> to vector<5x5xf32>
    %77 = arith.mulf %72, %76 : vector<5x5xf32>
    %78 = arith.truncf %77 : vector<5x5xf32> to vector<5x5xbf16>
    %79 = arith.truncf %62 : vector<5x8xf32> to vector<5x8xbf16>
    %cst_29 = arith.constant dense<0.000000e+00> : vector<5x8xf32>
    %80 = tpu.matmul %78, %79, %cst_29 {dimension_numbers = #tpu.dot_dimension_numbers<[1], [0], [0], [1], [0, 0, 1, 1], [], []>} : vector<5x5xbf16>, vector<5x8xbf16>, vector<5x8xf32> -> vector<5x8xf32>
    %81 = vector.extract_strided_slice %38 {offsets = [0, 16], sizes = [5, 8], strides = [1, 1]} : vector<5x96xf32> to vector<5x8xf32>
    %82 = vector.extract_strided_slice %38 {offsets = [0, 48], sizes = [5, 8], strides = [1, 1]} : vector<5x96xf32> to vector<5x8xf32>
    %83 = vector.extract_strided_slice %38 {offsets = [0, 80], sizes = [5, 8], strides = [1, 1]} : vector<5x96xf32> to vector<5x8xf32>
    %84 = arith.truncf %81 : vector<5x8xf32> to vector<5x8xbf16>
    %85 = arith.truncf %82 : vector<5x8xf32> to vector<5x8xbf16>
    %cst_30 = arith.constant dense<0.000000e+00> : vector<5x5xf32>
    %86 = tpu.matmul %84, %85, %cst_30 {dimension_numbers = #tpu.dot_dimension_numbers<[1], [1], [0], [0], [0, 0, 1, 0], [], []>} : vector<5x8xbf16>, vector<5x8xbf16>, vector<5x5xf32> -> vector<5x5xf32>
    %cst_31 = arith.constant 0.353553385 : f32
    %87 = vector.broadcast %cst_31 : f32 to vector<5x5xf32>
    %88 = arith.mulf %86, %87 : vector<5x5xf32>
    %cst_32 = arith.constant dense<0xFF800000> : vector<5xf32>
    %89 = vector.multi_reduction <maximumf>, %88, %cst_32 [1] : vector<5x5xf32> to vector<5xf32>
    %90 = vector.shape_cast %89 : vector<5xf32> to vector<5x1xf32>
    %91 = vector.broadcast %90 : vector<5x1xf32> to vector<5x5xf32>
    %92 = arith.subf %88, %91 : vector<5x5xf32>
    %93 = math.exp %92 : vector<5x5xf32>
    %cst_33 = arith.constant dense<0.000000e+00> : vector<5xf32>
    %94 = vector.multi_reduction <add>, %93, %cst_33 [1] : vector<5x5xf32> to vector<5xf32>
    %95 = vector.shape_cast %94 : vector<5xf32> to vector<5x1xf32>
    %96 = tpu.reciprocal %95 {approx = true} : vector<5x1xf32> -> vector<5x1xf32>
    %97 = vector.broadcast %96 : vector<5x1xf32> to vector<5x5xf32>
    %98 = arith.mulf %93, %97 : vector<5x5xf32>
    %99 = arith.truncf %98 : vector<5x5xf32> to vector<5x5xbf16>
    %100 = arith.truncf %83 : vector<5x8xf32> to vector<5x8xbf16>
    %cst_34 = arith.constant dense<0.000000e+00> : vector<5x8xf32>
    %101 = tpu.matmul %99, %100, %cst_34 {dimension_numbers = #tpu.dot_dimension_numbers<[1], [0], [0], [1], [0, 0, 1, 1], [], []>} : vector<5x5xbf16>, vector<5x8xbf16>, vector<5x8xf32> -> vector<5x8xf32>
    %102 = vector.extract_strided_slice %38 {offsets = [0, 24], sizes = [5, 8], strides = [1, 1]} : vector<5x96xf32> to vector<5x8xf32>
    %103 = vector.extract_strided_slice %38 {offsets = [0, 56], sizes = [5, 8], strides = [1, 1]} : vector<5x96xf32> to vector<5x8xf32>
    %104 = vector.extract_strided_slice %38 {offsets = [0, 88], sizes = [5, 8], strides = [1, 1]} : vector<5x96xf32> to vector<5x8xf32>
    %105 = arith.truncf %102 : vector<5x8xf32> to vector<5x8xbf16>
    %106 = arith.truncf %103 : vector<5x8xf32> to vector<5x8xbf16>
    %cst_35 = arith.constant dense<0.000000e+00> : vector<5x5xf32>
    %107 = tpu.matmul %105, %106, %cst_35 {dimension_numbers = #tpu.dot_dimension_numbers<[1], [1], [0], [0], [0, 0, 1, 0], [], []>} : vector<5x8xbf16>, vector<5x8xbf16>, vector<5x5xf32> -> vector<5x5xf32>
    %cst_36 = arith.constant 0.353553385 : f32
    %108 = vector.broadcast %cst_36 : f32 to vector<5x5xf32>
    %109 = arith.mulf %107, %108 : vector<5x5xf32>
    %cst_37 = arith.constant dense<0xFF800000> : vector<5xf32>
    %110 = vector.multi_reduction <maximumf>, %109, %cst_37 [1] : vector<5x5xf32> to vector<5xf32>
    %111 = vector.shape_cast %110 : vector<5xf32> to vector<5x1xf32>
    %112 = vector.broadcast %111 : vector<5x1xf32> to vector<5x5xf32>
    %113 = arith.subf %109, %112 : vector<5x5xf32>
    %114 = math.exp %113 : vector<5x5xf32>
    %cst_38 = arith.constant dense<0.000000e+00> : vector<5xf32>
    %115 = vector.multi_reduction <add>, %114, %cst_38 [1] : vector<5x5xf32> to vector<5xf32>
    %116 = vector.shape_cast %115 : vector<5xf32> to vector<5x1xf32>
    %117 = tpu.reciprocal %116 {approx = true} : vector<5x1xf32> -> vector<5x1xf32>
    %118 = vector.broadcast %117 : vector<5x1xf32> to vector<5x5xf32>
    %119 = arith.mulf %114, %118 : vector<5x5xf32>
    %120 = arith.truncf %119 : vector<5x5xf32> to vector<5x5xbf16>
    %121 = arith.truncf %104 : vector<5x8xf32> to vector<5x8xbf16>
    %cst_39 = arith.constant dense<0.000000e+00> : vector<5x8xf32>
    %122 = tpu.matmul %120, %121, %cst_39 {dimension_numbers = #tpu.dot_dimension_numbers<[1], [0], [0], [1], [0, 0, 1, 1], [], []>} : vector<5x5xbf16>, vector<5x8xbf16>, vector<5x8xf32> -> vector<5x8xf32>
    %123 = tpu.concatenate %59, %80, %101, %122 in 1 : vector<5x8xf32>, vector<5x8xf32>, vector<5x8xf32>, vector<5x8xf32> -> vector<5x32xf32>
    %c0_40 = arith.constant 0 : index
    %c0_41 = arith.constant 0 : index
    %c0_42 = arith.constant 0 : index
    %124 = vector.load %arg7[%c0_40, %c0_41, %c0_42] : memref<1x32x32xbf16, #tpu.memory_space<vmem>>, vector<1x32x32xbf16>
    %125 = vector.shape_cast %124 : vector<1x32x32xbf16> to vector<32x32xbf16>
    %126 = arith.truncf %123 : vector<5x32xf32> to vector<5x32xbf16>
    %cst_43 = arith.constant dense<0.000000e+00> : vector<5x32xf32>
    %127 = tpu.matmul %126, %125, %cst_43 {dimension_numbers = #tpu.dot_dimension_numbers<[1], [0], [0], [1], [0, 0, 1, 1], [], []>} : vector<5x32xbf16>, vector<32x32xbf16>, vector<5x32xf32> -> vector<5x32xf32>
    %128 = arith.addf %4, %127 : vector<5x32xf32>
    %c0_44 = arith.constant 0 : index
    %c0_45 = arith.constant 0 : index
    %c0_46 = arith.constant 0 : index
    %129 = vector.load %arg8[%c0_44, %c0_45, %c0_46] : memref<1x1x32xf32, #tpu.memory_space<vmem>>, vector<1x1x32xf32>
    %130 = vector.shape_cast %129 : vector<1x1x32xf32> to vector<1x32xf32>
    %131 = vector.broadcast %130 : vector<1x32xf32> to vector<5x32xf32>
    %132 = arith.addf %128, %131 : vector<5x32xf32>
    %c0_47 = arith.constant 0 : index
    %c0_48 = arith.constant 0 : index
    %c0_49 = arith.constant 0 : index
    %133 = vector.load %arg9[%c0_47, %c0_48, %c0_49] : memref<1x1x32xf32, #tpu.memory_space<vmem>>, vector<1x1x32xf32>
    %134 = vector.shape_cast %133 : vector<1x1x32xf32> to vector<1x32xf32>
    %c0_50 = arith.constant 0 : index
    %c0_51 = arith.constant 0 : index
    %c0_52 = arith.constant 0 : index
    %135 = vector.load %arg10[%c0_50, %c0_51, %c0_52] : memref<1x1x32xf32, #tpu.memory_space<vmem>>, vector<1x1x32xf32>
    %136 = vector.shape_cast %135 : vector<1x1x32xf32> to vector<1x32xf32>
    %cst_53 = arith.constant dense<0.000000e+00> : vector<5xf32>
    %137 = vector.multi_reduction <add>, %132, %cst_53 [1] : vector<5x32xf32> to vector<5xf32>
    %138 = vector.shape_cast %137 : vector<5xf32> to vector<5x1xf32>
    %cst_54 = arith.constant 3.200000e+01 : f32
    %139 = vector.broadcast %cst_54 : f32 to vector<5x1xf32>
    %140 = arith.divf %138, %139 : vector<5x1xf32>
    %141 = vector.broadcast %140 : vector<5x1xf32> to vector<5x32xf32>
    %142 = arith.subf %132, %141 : vector<5x32xf32>
    %143 = arith.mulf %142, %142 : vector<5x32xf32>
    %cst_55 = arith.constant dense<0.000000e+00> : vector<5xf32>
    %144 = vector.multi_reduction <add>, %143, %cst_55 [1] : vector<5x32xf32> to vector<5xf32>
    %145 = vector.shape_cast %144 : vector<5xf32> to vector<5x1xf32>
    %cst_56 = arith.constant 3.200000e+01 : f32
    %146 = vector.broadcast %cst_56 : f32 to vector<5x1xf32>
    %147 = arith.divf %145, %146 : vector<5x1xf32>
    %148 = vector.broadcast %140 : vector<5x1xf32> to vector<5x32xf32>
    %149 = arith.subf %132, %148 : vector<5x32xf32>
    %cst_57 = arith.constant 9.99999974E-6 : f32
    %150 = vector.broadcast %cst_57 : f32 to vector<5x1xf32>
    %151 = arith.addf %147, %150 : vector<5x1xf32>
    %152 = math.rsqrt %151 : vector<5x1xf32>
    %153 = vector.broadcast %152 : vector<5x1xf32> to vector<5x32xf32>
    %154 = arith.mulf %149, %153 : vector<5x32xf32>
    %155 = vector.broadcast %134 : vector<1x32xf32> to vector<5x32xf32>
    %156 = arith.mulf %154, %155 : vector<5x32xf32>
    %157 = vector.broadcast %136 : vector<1x32xf32> to vector<5x32xf32>
    %158 = arith.addf %156, %157 : vector<5x32xf32>
    %c0_58 = arith.constant 0 : index
    %c0_59 = arith.constant 0 : index
    %c0_60 = arith.constant 0 : index
    %159 = vector.load %arg11[%c0_58, %c0_59, %c0_60] : memref<1x32x128xbf16, #tpu.memory_space<vmem>>, vector<1x32x128xbf16>
    %160 = vector.shape_cast %159 : vector<1x32x128xbf16> to vector<32x128xbf16>
    %161 = arith.truncf %158 : vector<5x32xf32> to vector<5x32xbf16>
    %cst_61 = arith.constant dense<0.000000e+00> : vector<5x128xf32>
    %162 = tpu.matmul %161, %160, %cst_61 {dimension_numbers = #tpu.dot_dimension_numbers<[1], [0], [0], [1], [0, 0, 1, 1], [], []>} : vector<5x32xbf16>, vector<32x128xbf16>, vector<5x128xf32> -> vector<5x128xf32>
    %c0_62 = arith.constant 0 : index
    %c0_63 = arith.constant 0 : index
    %c0_64 = arith.constant 0 : index
    %163 = vector.load %arg12[%c0_62, %c0_63, %c0_64] : memref<1x1x128xf32, #tpu.memory_space<vmem>>, vector<1x1x128xf32>
    %164 = vector.shape_cast %163 : vector<1x1x128xf32> to vector<1x128xf32>
    %165 = vector.broadcast %164 : vector<1x128xf32> to vector<5x128xf32>
    %166 = arith.addf %162, %165 : vector<5x128xf32>
    %cst_65 = arith.constant -1.702000e+00 : f32
    %167 = vector.broadcast %cst_65 : f32 to vector<5x128xf32>
    %168 = arith.mulf %167, %166 : vector<5x128xf32>
    %169 = math.exp %168 : vector<5x128xf32>
    %cst_66 = arith.constant 1.000000e+00 : f32
    %170 = vector.broadcast %cst_66 : f32 to vector<5x128xf32>
    %171 = arith.addf %170, %169 : vector<5x128xf32>
    %cst_67 = arith.constant 1.000000e+00 : f32
    %172 = vector.broadcast %cst_67 : f32 to vector<5x128xf32>
    %173 = arith.divf %172, %171 : vector<5x128xf32>
    %174 = arith.mulf %166, %173 : vector<5x128xf32>
    %c0_68 = arith.constant 0 : index
    %c0_69 = arith.constant 0 : index
    %c0_70 = arith.constant 0 : index
    %175 = vector.load %arg13[%c0_68, %c0_69, %c0_70] : memref<1x128x32xbf16, #tpu.memory_space<vmem>>, vector<1x128x32xbf16>
    %176 = vector.shape_cast %175 : vector<1x128x32xbf16> to vector<128x32xbf16>
    %177 = arith.truncf %174 : vector<5x128xf32> to vector<5x128xbf16>
    %cst_71 = arith.constant dense<0.000000e+00> : vector<5x32xf32>
    %178 = tpu.matmul %177, %176, %cst_71 {dimension_numbers = #tpu.dot_dimension_numbers<[1], [0], [0], [1], [0, 0, 1, 1], [], []>} : vector<5x128xbf16>, vector<128x32xbf16>, vector<5x32xf32> -> vector<5x32xf32>
    %c0_72 = arith.constant 0 : index
    %c0_73 = arith.constant 0 : index
    %c0_74 = arith.constant 0 : index
    %179 = vector.load %arg14[%c0_72, %c0_73, %c0_74] : memref<1x1x32xf32, #tpu.memory_space<vmem>>, vector<1x1x32xf32>
    %180 = vector.shape_cast %179 : vector<1x1x32xf32> to vector<1x32xf32>
    %181 = vector.broadcast %180 : vector<1x32xf32> to vector<5x32xf32>
    %182 = arith.addf %178, %181 : vector<5x32xf32>
    %183 = arith.addf %132, %182 : vector<5x32xf32>
    %c0_75 = arith.constant 0 : index
    %c0_76 = arith.constant 0 : index
    %c0_77 = arith.constant 0 : index
    %184 = vector.load %arg16[%c0_75, %c0_76, %c0_77] : memref<4x5x32xf32, #tpu.memory_space<vmem>>, vector<1x5x32xf32>
    %185 = vector.shape_cast %184 : vector<1x5x32xf32> to vector<5x32xf32>
    %186 = vector.shape_cast %183 : vector<5x32xf32> to vector<1x5x32xf32>
    tpu.vector_store %arg16[%c0_75, %c0_76, %c0_77], %186 {strides = array<i32>} : memref<4x5x32xf32, #tpu.memory_space<vmem>>, vector<1x5x32xf32>,
    %c1 = arith.constant 1 : index
    %c0_78 = arith.constant 0 : index
    %c0_79 = arith.constant 0 : index
    %187 = vector.load %arg16[%c1, %c0_78, %c0_79] : memref<4x5x32xf32, #tpu.memory_space<vmem>>, vector<1x5x32xf32>
    %188 = vector.shape_cast %187 : vector<1x5x32xf32> to vector<5x32xf32>
    %c0_80 = arith.constant 0 : index
    %c0_81 = arith.constant 0 : index
    %c0_82 = arith.constant 0 : index
    %189 = vector.load %arg3[%c0_80, %c0_81, %c0_82] : memref<1x1x32xf32, #tpu.memory_space<vmem>>, vector<1x1x32xf32>
    %190 = vector.shape_cast %189 : vector<1x1x32xf32> to vector<1x32xf32>
    %c0_83 = arith.constant 0 : index
    %c0_84 = arith.constant 0 : index
    %c0_85 = arith.constant 0 : index
    %191 = vector.load %arg4[%c0_83, %c0_84, %c0_85] : memref<1x1x32xf32, #tpu.memory_space<vmem>>, vector<1x1x32xf32>
    %192 = vector.shape_cast %191 : vector<1x1x32xf32> to vector<1x32xf32>
    %cst_86 = arith.constant dense<0.000000e+00> : vector<5xf32>
    %193 = vector.multi_reduction <add>, %188, %cst_86 [1] : vector<5x32xf32> to vector<5xf32>
    %194 = vector.shape_cast %193 : vector<5xf32> to vector<5x1xf32>
    %cst_87 = arith.constant 3.200000e+01 : f32
    %195 = vector.broadcast %cst_87 : f32 to vector<5x1xf32>
    %196 = arith.divf %194, %195 : vector<5x1xf32>
    %197 = vector.broadcast %196 : vector<5x1xf32> to vector<5x32xf32>
    %198 = arith.subf %188, %197 : vector<5x32xf32>
    %199 = arith.mulf %198, %198 : vector<5x32xf32>
    %cst_88 = arith.constant dense<0.000000e+00> : vector<5xf32>
    %200 = vector.multi_reduction <add>, %199, %cst_88 [1] : vector<5x32xf32> to vector<5xf32>
    %201 = vector.shape_cast %200 : vector<5xf32> to vector<5x1xf32>
    %cst_89 = arith.constant 3.200000e+01 : f32
    %202 = vector.broadcast %cst_89 : f32 to vector<5x1xf32>
    %203 = arith.divf %201, %202 : vector<5x1xf32>
    %204 = vector.broadcast %196 : vector<5x1xf32> to vector<5x32xf32>
    %205 = arith.subf %188, %204 : vector<5x32xf32>
    %cst_90 = arith.constant 9.99999974E-6 : f32
    %206 = vector.broadcast %cst_90 : f32 to vector<5x1xf32>
    %207 = arith.addf %203, %206 : vector<5x1xf32>
    %208 = math.rsqrt %207 : vector<5x1xf32>
    %209 = vector.broadcast %208 : vector<5x1xf32> to vector<5x32xf32>
    %210 = arith.mulf %205, %209 : vector<5x32xf32>
    %211 = vector.broadcast %190 : vector<1x32xf32> to vector<5x32xf32>
    %212 = arith.mulf %210, %211 : vector<5x32xf32>
    %213 = vector.broadcast %192 : vector<1x32xf32> to vector<5x32xf32>
    %214 = arith.addf %212, %213 : vector<5x32xf32>
    %c0_91 = arith.constant 0 : index
    %c0_92 = arith.constant 0 : index
    %c0_93 = arith.constant 0 : index
    %215 = vector.load %arg5[%c0_91, %c0_92, %c0_93] : memref<1x32x96xbf16, #tpu.memory_space<vmem>>, vector<1x32x96xbf16>
    %216 = vector.shape_cast %215 : vector<1x32x96xbf16> to vector<32x96xbf16>
    %217 = arith.truncf %214 : vector<5x32xf32> to vector<5x32xbf16>
    %cst_94 = arith.constant dense<0.000000e+00> : vector<5x96xf32>
    %218 = tpu.matmul %217, %216, %cst_94 {dimension_numbers = #tpu.dot_dimension_numbers<[1], [0], [0], [1], [0, 0, 1, 1], [], []>} : vector<5x32xbf16>, vector<32x96xbf16>, vector<5x96xf32> -> vector<5x96xf32>
    %c0_95 = arith.constant 0 : index
    %c0_96 = arith.constant 0 : index
    %c0_97 = arith.constant 0 : index
    %219 = vector.load %arg6[%c0_95, %c0_96, %c0_97] : memref<1x1x96xf32, #tpu.memory_space<vmem>>, vector<1x1x96xf32>
    %220 = vector.shape_cast %219 : vector<1x1x96xf32> to vector<1x96xf32>
    %221 = vector.broadcast %220 : vector<1x96xf32> to vector<5x96xf32>
    %222 = arith.addf %218, %221 : vector<5x96xf32>
    %223 = vector.extract_strided_slice %222 {offsets = [0, 0], sizes = [5, 8], strides = [1, 1]} : vector<5x96xf32> to vector<5x8xf32>
    %224 = vector.extract_strided_slice %222 {offsets = [0, 32], sizes = [5, 8], strides = [1, 1]} : vector<5x96xf32> to vector<5x8xf32>
    %225 = vector.extract_strided_slice %222 {offsets = [0, 64], sizes = [5, 8], strides = [1, 1]} : vector<5x96xf32> to vector<5x8xf32>
    %226 = arith.truncf %223 : vector<5x8xf32> to vector<5x8xbf16>
    %227 = arith.truncf %224 : vector<5x8xf32> to vector<5x8xbf16>
    %cst_98 = arith.constant dense<0.000000e+00> : vector<5x5xf32>
    %228 = tpu.matmul %226, %227, %cst_98 {dimension_numbers = #tpu.dot_dimension_numbers<[1], [1], [0], [0], [0, 0, 1, 0], [], []>} : vector<5x8xbf16>, vector<5x8xbf16>, vector<5x5xf32> -> vector<5x5xf32>
    %cst_99 = arith.constant 0.353553385 : f32
    %229 = vector.broadcast %cst_99 : f32 to vector<5x5xf32>
    %230 = arith.mulf %228, %229 : vector<5x5xf32>
    %cst_100 = arith.constant dense<0xFF800000> : vector<5xf32>
    %231 = vector.multi_reduction <maximumf>, %230, %cst_100 [1] : vector<5x5xf32> to vector<5xf32>
    %232 = vector.shape_cast %231 : vector<5xf32> to vector<5x1xf32>
    %233 = vector.broadcast %232 : vector<5x1xf32> to vector<5x5xf32>
    %234 = arith.subf %230, %233 : vector<5x5xf32>
    %235 = math.exp %234 : vector<5x5xf32>
    %cst_101 = arith.constant dense<0.000000e+00> : vector<5xf32>
    %236 = vector.multi_reduction <add>, %235, %cst_101 [1] : vector<5x5xf32> to vector<5xf32>
    %237 = vector.shape_cast %236 : vector<5xf32> to vector<5x1xf32>
    %238 = tpu.reciprocal %237 {approx = true} : vector<5x1xf32> -> vector<5x1xf32>
    %239 = vector.broadcast %238 : vector<5x1xf32> to vector<5x5xf32>
    %240 = arith.mulf %235, %239 : vector<5x5xf32>
    %241 = arith.truncf %240 : vector<5x5xf32> to vector<5x5xbf16>
    %242 = arith.truncf %225 : vector<5x8xf32> to vector<5x8xbf16>
    %cst_102 = arith.constant dense<0.000000e+00> : vector<5x8xf32>
    %243 = tpu.matmul %241, %242, %cst_102 {dimension_numbers = #tpu.dot_dimension_numbers<[1], [0], [0], [1], [0, 0, 1, 1], [], []>} : vector<5x5xbf16>, vector<5x8xbf16>, vector<5x8xf32> -> vector<5x8xf32>
    %244 = vector.extract_strided_slice %222 {offsets = [0, 8], sizes = [5, 8], strides = [1, 1]} : vector<5x96xf32> to vector<5x8xf32>
    %245 = vector.extract_strided_slice %222 {offsets = [0, 40], sizes = [5, 8], strides = [1, 1]} : vector<5x96xf32> to vector<5x8xf32>
    %246 = vector.extract_strided_slice %222 {offsets = [0, 72], sizes = [5, 8], strides = [1, 1]} : vector<5x96xf32> to vector<5x8xf32>
    %247 = arith.truncf %244 : vector<5x8xf32> to vector<5x8xbf16>
    %248 = arith.truncf %245 : vector<5x8xf32> to vector<5x8xbf16>
    %cst_103 = arith.constant dense<0.000000e+00> : vector<5x5xf32>
    %249 = tpu.matmul %247, %248, %cst_103 {dimension_numbers = #tpu.dot_dimension_numbers<[1], [1], [0], [0], [0, 0, 1, 0], [], []>} : vector<5x8xbf16>, vector<5x8xbf16>, vector<5x5xf32> -> vector<5x5xf32>
    %cst_104 = arith.constant 0.353553385 : f32
    %250 = vector.broadcast %cst_104 : f32 to vector<5x5xf32>
    %251 = arith.mulf %249, %250 : vector<5x5xf32>
    %cst_105 = arith.constant dense<0xFF800000> : vector<5xf32>
    %252 = vector.multi_reduction <maximumf>, %251, %cst_105 [1] : vector<5x5xf32> to vector<5xf32>
    %253 = vector.shape_cast %252 : vector<5xf32> to vector<5x1xf32>
    %254 = vector.broadcast %253 : vector<5x1xf32> to vector<5x5xf32>
    %255 = arith.subf %251, %254 : vector<5x5xf32>
    %256 = math.exp %255 : vector<5x5xf32>
    %cst_106 = arith.constant dense<0.000000e+00> : vector<5xf32>
    %257 = vector.multi_reduction <add>, %256, %cst_106 [1] : vector<5x5xf32> to vector<5xf32>
    %258 = vector.shape_cast %257 : vector<5xf32> to vector<5x1xf32>
    %259 = tpu.reciprocal %258 {approx = true} : vector<5x1xf32> -> vector<5x1xf32>
    %260 = vector.broadcast %259 : vector<5x1xf32> to vector<5x5xf32>
    %261 = arith.mulf %256, %260 : vector<5x5xf32>
    %262 = arith.truncf %261 : vector<5x5xf32> to vector<5x5xbf16>
    %263 = arith.truncf %246 : vector<5x8xf32> to vector<5x8xbf16>
    %cst_107 = arith.constant dense<0.000000e+00> : vector<5x8xf32>
    %264 = tpu.matmul %262, %263, %cst_107 {dimension_numbers = #tpu.dot_dimension_numbers<[1], [0], [0], [1], [0, 0, 1, 1], [], []>} : vector<5x5xbf16>, vector<5x8xbf16>, vector<5x8xf32> -> vector<5x8xf32>
    %265 = vector.extract_strided_slice %222 {offsets = [0, 16], sizes = [5, 8], strides = [1, 1]} : vector<5x96xf32> to vector<5x8xf32>
    %266 = vector.extract_strided_slice %222 {offsets = [0, 48], sizes = [5, 8], strides = [1, 1]} : vector<5x96xf32> to vector<5x8xf32>
    %267 = vector.extract_strided_slice %222 {offsets = [0, 80], sizes = [5, 8], strides = [1, 1]} : vector<5x96xf32> to vector<5x8xf32>
    %268 = arith.truncf %265 : vector<5x8xf32> to vector<5x8xbf16>
    %269 = arith.truncf %266 : vector<5x8xf32> to vector<5x8xbf16>
    %cst_108 = arith.constant dense<0.000000e+00> : vector<5x5xf32>
    %270 = tpu.matmul %268, %269, %cst_108 {dimension_numbers = #tpu.dot_dimension_numbers<[1], [1], [0], [0], [0, 0, 1, 0], [], []>} : vector<5x8xbf16>, vector<5x8xbf16>, vector<5x5xf32> -> vector<5x5xf32>
    %cst_109 = arith.constant 0.353553385 : f32
    %271 = vector.broadcast %cst_109 : f32 to vector<5x5xf32>
    %272 = arith.mulf %270, %271 : vector<5x5xf32>
    %cst_110 = arith.constant dense<0xFF800000> : vector<5xf32>
    %273 = vector.multi_reduction <maximumf>, %272, %cst_110 [1] : vector<5x5xf32> to vector<5xf32>
    %274 = vector.shape_cast %273 : vector<5xf32> to vector<5x1xf32>
    %275 = vector.broadcast %274 : vector<5x1xf32> to vector<5x5xf32>
    %276 = arith.subf %272, %275 : vector<5x5xf32>
    %277 = math.exp %276 : vector<5x5xf32>
    %cst_111 = arith.constant dense<0.000000e+00> : vector<5xf32>
    %278 = vector.multi_reduction <add>, %277, %cst_111 [1] : vector<5x5xf32> to vector<5xf32>
    %279 = vector.shape_cast %278 : vector<5xf32> to vector<5x1xf32>
    %280 = tpu.reciprocal %279 {approx = true} : vector<5x1xf32> -> vector<5x1xf32>
    %281 = vector.broadcast %280 : vector<5x1xf32> to vector<5x5xf32>
    %282 = arith.mulf %277, %281 : vector<5x5xf32>
    %283 = arith.truncf %282 : vector<5x5xf32> to vector<5x5xbf16>
    %284 = arith.truncf %267 : vector<5x8xf32> to vector<5x8xbf16>
    %cst_112 = arith.constant dense<0.000000e+00> : vector<5x8xf32>
    %285 = tpu.matmul %283, %284, %cst_112 {dimension_numbers = #tpu.dot_dimension_numbers<[1], [0], [0], [1], [0, 0, 1, 1], [], []>} : vector<5x5xbf16>, vector<5x8xbf16>, vector<5x8xf32> -> vector<5x8xf32>
    %286 = vector.extract_strided_slice %222 {offsets = [0, 24], sizes = [5, 8], strides = [1, 1]} : vector<5x96xf32> to vector<5x8xf32>
    %287 = vector.extract_strided_slice %222 {offsets = [0, 56], sizes = [5, 8], strides = [1, 1]} : vector<5x96xf32> to vector<5x8xf32>
    %288 = vector.extract_strided_slice %222 {offsets = [0, 88], sizes = [5, 8], strides = [1, 1]} : vector<5x96xf32> to vector<5x8xf32>
    %289 = arith.truncf %286 : vector<5x8xf32> to vector<5x8xbf16>
    %290 = arith.truncf %287 : vector<5x8xf32> to vector<5x8xbf16>
    %cst_113 = arith.constant dense<0.000000e+00> : vector<5x5xf32>
    %291 = tpu.matmul %289, %290, %cst_113 {dimension_numbers = #tpu.dot_dimension_numbers<[1], [1], [0], [0], [0, 0, 1, 0], [], []>} : vector<5x8xbf16>, vector<5x8xbf16>, vector<5x5xf32> -> vector<5x5xf32>
    %cst_114 = arith.constant 0.353553385 : f32
    %292 = vector.broadcast %cst_114 : f32 to vector<5x5xf32>
    %293 = arith.mulf %291, %292 : vector<5x5xf32>
    %cst_115 = arith.constant dense<0xFF800000> : vector<5xf32>
    %294 = vector.multi_reduction <maximumf>, %293, %cst_115 [1] : vector<5x5xf32> to vector<5xf32>
    %295 = vector.shape_cast %294 : vector<5xf32> to vector<5x1xf32>
    %296 = vector.broadcast %295 : vector<5x1xf32> to vector<5x5xf32>
    %297 = arith.subf %293, %296 : vector<5x5xf32>
    %298 = math.exp %297 : vector<5x5xf32>
    %cst_116 = arith.constant dense<0.000000e+00> : vector<5xf32>
    %299 = vector.multi_reduction <add>, %298, %cst_116 [1] : vector<5x5xf32> to vector<5xf32>
    %300 = vector.shape_cast %299 : vector<5xf32> to vector<5x1xf32>
    %301 = tpu.reciprocal %300 {approx = true} : vector<5x1xf32> -> vector<5x1xf32>
    %302 = vector.broadcast %301 : vector<5x1xf32> to vector<5x5xf32>
    %303 = arith.mulf %298, %302 : vector<5x5xf32>
    %304 = arith.truncf %303 : vector<5x5xf32> to vector<5x5xbf16>
    %305 = arith.truncf %288 : vector<5x8xf32> to vector<5x8xbf16>
    %cst_117 = arith.constant dense<0.000000e+00> : vector<5x8xf32>
    %306 = tpu.matmul %304, %305, %cst_117 {dimension_numbers = #tpu.dot_dimension_numbers<[1], [0], [0], [1], [0, 0, 1, 1], [], []>} : vector<5x5xbf16>, vector<5x8xbf16>, vector<5x8xf32> -> vector<5x8xf32>
    %307 = tpu.concatenate %243, %264, %285, %306 in 1 : vector<5x8xf32>, vector<5x8xf32>, vector<5x8xf32>, vector<5x8xf32> -> vector<5x32xf32>
    %c0_118 = arith.constant 0 : index
    %c0_119 = arith.constant 0 : index
    %c0_120 = arith.constant 0 : index
    %308 = vector.load %arg7[%c0_118, %c0_119, %c0_120] : memref<1x32x32xbf16, #tpu.memory_space<vmem>>, vector<1x32x32xbf16>
    %309 = vector.shape_cast %308 : vector<1x32x32xbf16> to vector<32x32xbf16>
    %310 = arith.truncf %307 : vector<5x32xf32> to vector<5x32xbf16>
    %cst_121 = arith.constant dense<0.000000e+00> : vector<5x32xf32>
    %311 = tpu.matmul %310, %309, %cst_121 {dimension_numbers = #tpu.dot_dimension_numbers<[1], [0], [0], [1], [0, 0, 1, 1], [], []>} : vector<5x32xbf16>, vector<32x32xbf16>, vector<5x32xf32> -> vector<5x32xf32>
    %312 = arith.addf %188, %311 : vector<5x32xf32>
    %c0_122 = arith.constant 0 : index
    %c0_123 = arith.constant 0 : index
    %c0_124 = arith.constant 0 : index
    %313 = vector.load %arg8[%c0_122, %c0_123, %c0_124] : memref<1x1x32xf32, #tpu.memory_space<vmem>>, vector<1x1x32xf32>
    %314 = vector.shape_cast %313 : vector<1x1x32xf32> to vector<1x32xf32>
    %315 = vector.broadcast %314 : vector<1x32xf32> to vector<5x32xf32>
    %316 = arith.addf %312, %315 : vector<5x32xf32>
    %c0_125 = arith.constant 0 : index
    %c0_126 = arith.constant 0 : index
    %c0_127 = arith.constant 0 : index
    %317 = vector.load %arg9[%c0_125, %c0_126, %c0_127] : memref<1x1x32xf32, #tpu.memory_space<vmem>>, vector<1x1x32xf32>
    %318 = vector.shape_cast %317 : vector<1x1x32xf32> to vector<1x32xf32>
    %c0_128 = arith.constant 0 : index
    %c0_129 = arith.constant 0 : index
    %c0_130 = arith.constant 0 : index
    %319 = vector.load %arg10[%c0_128, %c0_129, %c0_130] : memref<1x1x32xf32, #tpu.memory_space<vmem>>, vector<1x1x32xf32>
    %320 = vector.shape_cast %319 : vector<1x1x32xf32> to vector<1x32xf32>
    %cst_131 = arith.constant dense<0.000000e+00> : vector<5xf32>
    %321 = vector.multi_reduction <add>, %316, %cst_131 [1] : vector<5x32xf32> to vector<5xf32>
    %322 = vector.shape_cast %321 : vector<5xf32> to vector<5x1xf32>
    %cst_132 = arith.constant 3.200000e+01 : f32
    %323 = vector.broadcast %cst_132 : f32 to vector<5x1xf32>
    %324 = arith.divf %322, %323 : vector<5x1xf32>
    %325 = vector.broadcast %324 : vector<5x1xf32> to vector<5x32xf32>
    %326 = arith.subf %316, %325 : vector<5x32xf32>
    %327 = arith.mulf %326, %326 : vector<5x32xf32>
    %cst_133 = arith.constant dense<0.000000e+00> : vector<5xf32>
    %328 = vector.multi_reduction <add>, %327, %cst_133 [1] : vector<5x32xf32> to vector<5xf32>
    %329 = vector.shape_cast %328 : vector<5xf32> to vector<5x1xf32>
    %cst_134 = arith.constant 3.200000e+01 : f32
    %330 = vector.broadcast %cst_134 : f32 to vector<5x1xf32>
    %331 = arith.divf %329, %330 : vector<5x1xf32>
    %332 = vector.broadcast %324 : vector<5x1xf32> to vector<5x32xf32>
    %333 = arith.subf %316, %332 : vector<5x32xf32>
    %cst_135 = arith.constant 9.99999974E-6 : f32
    %334 = vector.broadcast %cst_135 : f32 to vector<5x1xf32>
    %335 = arith.addf %331, %334 : vector<5x1xf32>
    %336 = math.rsqrt %335 : vector<5x1xf32>
    %337 = vector.broadcast %336 : vector<5x1xf32> to vector<5x32xf32>
    %338 = arith.mulf %333, %337 : vector<5x32xf32>
    %339 = vector.broadcast %318 : vector<1x32xf32> to vector<5x32xf32>
    %340 = arith.mulf %338, %339 : vector<5x32xf32>
    %341 = vector.broadcast %320 : vector<1x32xf32> to vector<5x32xf32>
    %342 = arith.addf %340, %341 : vector<5x32xf32>
    %c0_136 = arith.constant 0 : index
    %c0_137 = arith.constant 0 : index
    %c0_138 = arith.constant 0 : index
    %343 = vector.load %arg11[%c0_136, %c0_137, %c0_138] : memref<1x32x128xbf16, #tpu.memory_space<vmem>>, vector<1x32x128xbf16>
    %344 = vector.shape_cast %343 : vector<1x32x128xbf16> to vector<32x128xbf16>
    %345 = arith.truncf %342 : vector<5x32xf32> to vector<5x32xbf16>
    %cst_139 = arith.constant dense<0.000000e+00> : vector<5x128xf32>
    %346 = tpu.matmul %345, %344, %cst_139 {dimension_numbers = #tpu.dot_dimension_numbers<[1], [0], [0], [1], [0, 0, 1, 1], [], []>} : vector<5x32xbf16>, vector<32x128xbf16>, vector<5x128xf32> -> vector<5x128xf32>
    %c0_140 = arith.constant 0 : index
    %c0_141 = arith.constant 0 : index
    %c0_142 = arith.constant 0 : index
    %347 = vector.load %arg12[%c0_140, %c0_141, %c0_142] : memref<1x1x128xf32, #tpu.memory_space<vmem>>, vector<1x1x128xf32>
    %348 = vector.shape_cast %347 : vector<1x1x128xf32> to vector<1x128xf32>
    %349 = vector.broadcast %348 : vector<1x128xf32> to vector<5x128xf32>
    %350 = arith.addf %346, %349 : vector<5x128xf32>
    %cst_143 = arith.constant -1.702000e+00 : f32
    %351 = vector.broadcast %cst_143 : f32 to vector<5x128xf32>
    %352 = arith.mulf %351, %350 : vector<5x128xf32>
    %353 = math.exp %352 : vector<5x128xf32>
    %cst_144 = arith.constant 1.000000e+00 : f32
    %354 = vector.broadcast %cst_144 : f32 to vector<5x128xf32>
    %355 = arith.addf %354, %353 : vector<5x128xf32>
    %cst_145 = arith.constant 1.000000e+00 : f32
    %356 = vector.broadcast %cst_145 : f32 to vector<5x128xf32>
    %357 = arith.divf %356, %355 : vector<5x128xf32>
    %358 = arith.mulf %350, %357 : vector<5x128xf32>
    %c0_146 = arith.constant 0 : index
    %c0_147 = arith.constant 0 : index
    %c0_148 = arith.constant 0 : index
    %359 = vector.load %arg13[%c0_146, %c0_147, %c0_148] : memref<1x128x32xbf16, #tpu.memory_space<vmem>>, vector<1x128x32xbf16>
    %360 = vector.shape_cast %359 : vector<1x128x32xbf16> to vector<128x32xbf16>
    %361 = arith.truncf %358 : vector<5x128xf32> to vector<5x128xbf16>
    %cst_149 = arith.constant dense<0.000000e+00> : vector<5x32xf32>
    %362 = tpu.matmul %361, %360, %cst_149 {dimension_numbers = #tpu.dot_dimension_numbers<[1], [0], [0], [1], [0, 0, 1, 1], [], []>} : vector<5x128xbf16>, vector<128x32xbf16>, vector<5x32xf32> -> vector<5x32xf32>
    %c0_150 = arith.constant 0 : index
    %c0_151 = arith.constant 0 : index
    %c0_152 = arith.constant 0 : index
    %363 = vector.load %arg14[%c0_150, %c0_151, %c0_152] : memref<1x1x32xf32, #tpu.memory_space<vmem>>, vector<1x1x32xf32>
    %364 = vector.shape_cast %363 : vector<1x1x32xf32> to vector<1x32xf32>
    %365 = vector.broadcast %364 : vector<1x32xf32> to vector<5x32xf32>
    %366 = arith.addf %362, %365 : vector<5x32xf32>
    %367 = arith.addf %316, %366 : vector<5x32xf32>
    %c1_153 = arith.constant 1 : index
    %c0_154 = arith.constant 0 : index
    %c0_155 = arith.constant 0 : index
    %368 = vector.load %arg16[%c1_153, %c0_154, %c0_155] : memref<4x5x32xf32, #tpu.memory_space<vmem>>, vector<1x5x32xf32>
    %369 = vector.shape_cast %368 : vector<1x5x32xf32> to vector<5x32xf32>
    %370 = vector.shape_cast %367 : vector<5x32xf32> to vector<1x5x32xf32>
    tpu.vector_store %arg16[%c1_153, %c0_154, %c0_155], %370 {strides = array<i32>} : memref<4x5x32xf32, #tpu.memory_space<vmem>>, vector<1x5x32xf32>,
    %c2 = arith.constant 2 : index
    %c0_156 = arith.constant 0 : index
    %c0_157 = arith.constant 0 : index
    %371 = vector.load %arg16[%c2, %c0_156, %c0_157] : memref<4x5x32xf32, #tpu.memory_space<vmem>>, vector<1x5x32xf32>
    %372 = vector.shape_cast %371 : vector<1x5x32xf32> to vector<5x32xf32>
    %c0_158 = arith.constant 0 : index
    %c0_159 = arith.constant 0 : index
    %c0_160 = arith.constant 0 : index
    %373 = vector.load %arg3[%c0_158, %c0_159, %c0_160] : memref<1x1x32xf32, #tpu.memory_space<vmem>>, vector<1x1x32xf32>
    %374 = vector.shape_cast %373 : vector<1x1x32xf32> to vector<1x32xf32>
    %c0_161 = arith.constant 0 : index
    %c0_162 = arith.constant 0 : index
    %c0_163 = arith.constant 0 : index
    %375 = vector.load %arg4[%c0_161, %c0_162, %c0_163] : memref<1x1x32xf32, #tpu.memory_space<vmem>>, vector<1x1x32xf32>
    %376 = vector.shape_cast %375 : vector<1x1x32xf32> to vector<1x32xf32>
    %cst_164 = arith.constant dense<0.000000e+00> : vector<5xf32>
    %377 = vector.multi_reduction <add>, %372, %cst_164 [1] : vector<5x32xf32> to vector<5xf32>
    %378 = vector.shape_cast %377 : vector<5xf32> to vector<5x1xf32>
    %cst_165 = arith.constant 3.200000e+01 : f32
    %379 = vector.broadcast %cst_165 : f32 to vector<5x1xf32>
    %380 = arith.divf %378, %379 : vector<5x1xf32>
    %381 = vector.broadcast %380 : vector<5x1xf32> to vector<5x32xf32>
    %382 = arith.subf %372, %381 : vector<5x32xf32>
    %383 = arith.mulf %382, %382 : vector<5x32xf32>
    %cst_166 = arith.constant dense<0.000000e+00> : vector<5xf32>
    %384 = vector.multi_reduction <add>, %383, %cst_166 [1] : vector<5x32xf32> to vector<5xf32>
    %385 = vector.shape_cast %384 : vector<5xf32> to vector<5x1xf32>
    %cst_167 = arith.constant 3.200000e+01 : f32
    %386 = vector.broadcast %cst_167 : f32 to vector<5x1xf32>
    %387 = arith.divf %385, %386 : vector<5x1xf32>
    %388 = vector.broadcast %380 : vector<5x1xf32> to vector<5x32xf32>
    %389 = arith.subf %372, %388 : vector<5x32xf32>
    %cst_168 = arith.constant 9.99999974E-6 : f32
    %390 = vector.broadcast %cst_168 : f32 to vector<5x1xf32>
    %391 = arith.addf %387, %390 : vector<5x1xf32>
    %392 = math.rsqrt %391 : vector<5x1xf32>
    %393 = vector.broadcast %392 : vector<5x1xf32> to vector<5x32xf32>
    %394 = arith.mulf %389, %393 : vector<5x32xf32>
    %395 = vector.broadcast %374 : vector<1x32xf32> to vector<5x32xf32>
    %396 = arith.mulf %394, %395 : vector<5x32xf32>
    %397 = vector.broadcast %376 : vector<1x32xf32> to vector<5x32xf32>
    %398 = arith.addf %396, %397 : vector<5x32xf32>
    %c0_169 = arith.constant 0 : index
    %c0_170 = arith.constant 0 : index
    %c0_171 = arith.constant 0 : index
    %399 = vector.load %arg5[%c0_169, %c0_170, %c0_171] : memref<1x32x96xbf16, #tpu.memory_space<vmem>>, vector<1x32x96xbf16>
    %400 = vector.shape_cast %399 : vector<1x32x96xbf16> to vector<32x96xbf16>
    %401 = arith.truncf %398 : vector<5x32xf32> to vector<5x32xbf16>
    %cst_172 = arith.constant dense<0.000000e+00> : vector<5x96xf32>
    %402 = tpu.matmul %401, %400, %cst_172 {dimension_numbers = #tpu.dot_dimension_numbers<[1], [0], [0], [1], [0, 0, 1, 1], [], []>} : vector<5x32xbf16>, vector<32x96xbf16>, vector<5x96xf32> -> vector<5x96xf32>
    %c0_173 = arith.constant 0 : index
    %c0_174 = arith.constant 0 : index
    %c0_175 = arith.constant 0 : index
    %403 = vector.load %arg6[%c0_173, %c0_174, %c0_175] : memref<1x1x96xf32, #tpu.memory_space<vmem>>, vector<1x1x96xf32>
    %404 = vector.shape_cast %403 : vector<1x1x96xf32> to vector<1x96xf32>
    %405 = vector.broadcast %404 : vector<1x96xf32> to vector<5x96xf32>
    %406 = arith.addf %402, %405 : vector<5x96xf32>
    %407 = vector.extract_strided_slice %406 {offsets = [0, 0], sizes = [5, 8], strides = [1, 1]} : vector<5x96xf32> to vector<5x8xf32>
    %408 = vector.extract_strided_slice %406 {offsets = [0, 32], sizes = [5, 8], strides = [1, 1]} : vector<5x96xf32> to vector<5x8xf32>
    %409 = vector.extract_strided_slice %406 {offsets = [0, 64], sizes = [5, 8], strides = [1, 1]} : vector<5x96xf32> to vector<5x8xf32>
    %410 = arith.truncf %407 : vector<5x8xf32> to vector<5x8xbf16>
    %411 = arith.truncf %408 : vector<5x8xf32> to vector<5x8xbf16>
    %cst_176 = arith.constant dense<0.000000e+00> : vector<5x5xf32>
    %412 = tpu.matmul %410, %411, %cst_176 {dimension_numbers = #tpu.dot_dimension_numbers<[1], [1], [0], [0], [0, 0, 1, 0], [], []>} : vector<5x8xbf16>, vector<5x8xbf16>, vector<5x5xf32> -> vector<5x5xf32>
    %cst_177 = arith.constant 0.353553385 : f32
    %413 = vector.broadcast %cst_177 : f32 to vector<5x5xf32>
    %414 = arith.mulf %412, %413 : vector<5x5xf32>
    %cst_178 = arith.constant dense<0xFF800000> : vector<5xf32>
    %415 = vector.multi_reduction <maximumf>, %414, %cst_178 [1] : vector<5x5xf32> to vector<5xf32>
    %416 = vector.shape_cast %415 : vector<5xf32> to vector<5x1xf32>
    %417 = vector.broadcast %416 : vector<5x1xf32> to vector<5x5xf32>
    %418 = arith.subf %414, %417 : vector<5x5xf32>
    %419 = math.exp %418 : vector<5x5xf32>
    %cst_179 = arith.constant dense<0.000000e+00> : vector<5xf32>
    %420 = vector.multi_reduction <add>, %419, %cst_179 [1] : vector<5x5xf32> to vector<5xf32>
    %421 = vector.shape_cast %420 : vector<5xf32> to vector<5x1xf32>
    %422 = tpu.reciprocal %421 {approx = true} : vector<5x1xf32> -> vector<5x1xf32>
    %423 = vector.broadcast %422 : vector<5x1xf32> to vector<5x5xf32>
    %424 = arith.mulf %419, %423 : vector<5x5xf32>
    %425 = arith.truncf %424 : vector<5x5xf32> to vector<5x5xbf16>
    %426 = arith.truncf %409 : vector<5x8xf32> to vector<5x8xbf16>
    %cst_180 = arith.constant dense<0.000000e+00> : vector<5x8xf32>
    %427 = tpu.matmul %425, %426, %cst_180 {dimension_numbers = #tpu.dot_dimension_numbers<[1], [0], [0], [1], [0, 0, 1, 1], [], []>} : vector<5x5xbf16>, vector<5x8xbf16>, vector<5x8xf32> -> vector<5x8xf32>
    %428 = vector.extract_strided_slice %406 {offsets = [0, 8], sizes = [5, 8], strides = [1, 1]} : vector<5x96xf32> to vector<5x8xf32>
    %429 = vector.extract_strided_slice %406 {offsets = [0, 40], sizes = [5, 8], strides = [1, 1]} : vector<5x96xf32> to vector<5x8xf32>
    %430 = vector.extract_strided_slice %406 {offsets = [0, 72], sizes = [5, 8], strides = [1, 1]} : vector<5x96xf32> to vector<5x8xf32>
    %431 = arith.truncf %428 : vector<5x8xf32> to vector<5x8xbf16>
    %432 = arith.truncf %429 : vector<5x8xf32> to vector<5x8xbf16>
    %cst_181 = arith.constant dense<0.000000e+00> : vector<5x5xf32>
    %433 = tpu.matmul %431, %432, %cst_181 {dimension_numbers = #tpu.dot_dimension_numbers<[1], [1], [0], [0], [0, 0, 1, 0], [], []>} : vector<5x8xbf16>, vector<5x8xbf16>, vector<5x5xf32> -> vector<5x5xf32>
    %cst_182 = arith.constant 0.353553385 : f32
    %434 = vector.broadcast %cst_182 : f32 to vector<5x5xf32>
    %435 = arith.mulf %433, %434 : vector<5x5xf32>
    %cst_183 = arith.constant dense<0xFF800000> : vector<5xf32>
    %436 = vector.multi_reduction <maximumf>, %435, %cst_183 [1] : vector<5x5xf32> to vector<5xf32>
    %437 = vector.shape_cast %436 : vector<5xf32> to vector<5x1xf32>
    %438 = vector.broadcast %437 : vector<5x1xf32> to vector<5x5xf32>
    %439 = arith.subf %435, %438 : vector<5x5xf32>
    %440 = math.exp %439 : vector<5x5xf32>
    %cst_184 = arith.constant dense<0.000000e+00> : vector<5xf32>
    %441 = vector.multi_reduction <add>, %440, %cst_184 [1] : vector<5x5xf32> to vector<5xf32>
    %442 = vector.shape_cast %441 : vector<5xf32> to vector<5x1xf32>
    %443 = tpu.reciprocal %442 {approx = true} : vector<5x1xf32> -> vector<5x1xf32>
    %444 = vector.broadcast %443 : vector<5x1xf32> to vector<5x5xf32>
    %445 = arith.mulf %440, %444 : vector<5x5xf32>
    %446 = arith.truncf %445 : vector<5x5xf32> to vector<5x5xbf16>
    %447 = arith.truncf %430 : vector<5x8xf32> to vector<5x8xbf16>
    %cst_185 = arith.constant dense<0.000000e+00> : vector<5x8xf32>
    %448 = tpu.matmul %446, %447, %cst_185 {dimension_numbers = #tpu.dot_dimension_numbers<[1], [0], [0], [1], [0, 0, 1, 1], [], []>} : vector<5x5xbf16>, vector<5x8xbf16>, vector<5x8xf32> -> vector<5x8xf32>
    %449 = vector.extract_strided_slice %406 {offsets = [0, 16], sizes = [5, 8], strides = [1, 1]} : vector<5x96xf32> to vector<5x8xf32>
    %450 = vector.extract_strided_slice %406 {offsets = [0, 48], sizes = [5, 8], strides = [1, 1]} : vector<5x96xf32> to vector<5x8xf32>
    %451 = vector.extract_strided_slice %406 {offsets = [0, 80], sizes = [5, 8], strides = [1, 1]} : vector<5x96xf32> to vector<5x8xf32>
    %452 = arith.truncf %449 : vector<5x8xf32> to vector<5x8xbf16>
    %453 = arith.truncf %450 : vector<5x8xf32> to vector<5x8xbf16>
    %cst_186 = arith.constant dense<0.000000e+00> : vector<5x5xf32>
    %454 = tpu.matmul %452, %453, %cst_186 {dimension_numbers = #tpu.dot_dimension_numbers<[1], [1], [0], [0], [0, 0, 1, 0], [], []>} : vector<5x8xbf16>, vector<5x8xbf16>, vector<5x5xf32> -> vector<5x5xf32>
    %cst_187 = arith.constant 0.353553385 : f32
    %455 = vector.broadcast %cst_187 : f32 to vector<5x5xf32>
    %456 = arith.mulf %454, %455 : vector<5x5xf32>
    %cst_188 = arith.constant dense<0xFF800000> : vector<5xf32>
    %457 = vector.multi_reduction <maximumf>, %456, %cst_188 [1] : vector<5x5xf32> to vector<5xf32>
    %458 = vector.shape_cast %457 : vector<5xf32> to vector<5x1xf32>
    %459 = vector.broadcast %458 : vector<5x1xf32> to vector<5x5xf32>
    %460 = arith.subf %456, %459 : vector<5x5xf32>
    %461 = math.exp %460 : vector<5x5xf32>
    %cst_189 = arith.constant dense<0.000000e+00> : vector<5xf32>
    %462 = vector.multi_reduction <add>, %461, %cst_189 [1] : vector<5x5xf32> to vector<5xf32>
    %463 = vector.shape_cast %462 : vector<5xf32> to vector<5x1xf32>
    %464 = tpu.reciprocal %463 {approx = true} : vector<5x1xf32> -> vector<5x1xf32>
    %465 = vector.broadcast %464 : vector<5x1xf32> to vector<5x5xf32>
    %466 = arith.mulf %461, %465 : vector<5x5xf32>
    %467 = arith.truncf %466 : vector<5x5xf32> to vector<5x5xbf16>
    %468 = arith.truncf %451 : vector<5x8xf32> to vector<5x8xbf16>
    %cst_190 = arith.constant dense<0.000000e+00> : vector<5x8xf32>
    %469 = tpu.matmul %467, %468, %cst_190 {dimension_numbers = #tpu.dot_dimension_numbers<[1], [0], [0], [1], [0, 0, 1, 1], [], []>} : vector<5x5xbf16>, vector<5x8xbf16>, vector<5x8xf32> -> vector<5x8xf32>
    %470 = vector.extract_strided_slice %406 {offsets = [0, 24], sizes = [5, 8], strides = [1, 1]} : vector<5x96xf32> to vector<5x8xf32>
    %471 = vector.extract_strided_slice %406 {offsets = [0, 56], sizes = [5, 8], strides = [1, 1]} : vector<5x96xf32> to vector<5x8xf32>
    %472 = vector.extract_strided_slice %406 {offsets = [0, 88], sizes = [5, 8], strides = [1, 1]} : vector<5x96xf32> to vector<5x8xf32>
    %473 = arith.truncf %470 : vector<5x8xf32> to vector<5x8xbf16>
    %474 = arith.truncf %471 : vector<5x8xf32> to vector<5x8xbf16>
    %cst_191 = arith.constant dense<0.000000e+00> : vector<5x5xf32>
    %475 = tpu.matmul %473, %474, %cst_191 {dimension_numbers = #tpu.dot_dimension_numbers<[1], [1], [0], [0], [0, 0, 1, 0], [], []>} : vector<5x8xbf16>, vector<5x8xbf16>, vector<5x5xf32> -> vector<5x5xf32>
    %cst_192 = arith.constant 0.353553385 : f32
    %476 = vector.broadcast %cst_192 : f32 to vector<5x5xf32>
    %477 = arith.mulf %475, %476 : vector<5x5xf32>
    %cst_193 = arith.constant dense<0xFF800000> : vector<5xf32>
    %478 = vector.multi_reduction <maximumf>, %477, %cst_193 [1] : vector<5x5xf32> to vector<5xf32>
    %479 = vector.shape_cast %478 : vector<5xf32> to vector<5x1xf32>
    %480 = vector.broadcast %479 : vector<5x1xf32> to vector<5x5xf32>
    %481 = arith.subf %477, %480 : vector<5x5xf32>
    %482 = math.exp %481 : vector<5x5xf32>
    %cst_194 = arith.constant dense<0.000000e+00> : vector<5xf32>
    %483 = vector.multi_reduction <add>, %482, %cst_194 [1] : vector<5x5xf32> to vector<5xf32>
    %484 = vector.shape_cast %483 : vector<5xf32> to vector<5x1xf32>
    %485 = tpu.reciprocal %484 {approx = true} : vector<5x1xf32> -> vector<5x1xf32>
    %486 = vector.broadcast %485 : vector<5x1xf32> to vector<5x5xf32>
    %487 = arith.mulf %482, %486 : vector<5x5xf32>
    %488 = arith.truncf %487 : vector<5x5xf32> to vector<5x5xbf16>
    %489 = arith.truncf %472 : vector<5x8xf32> to vector<5x8xbf16>
    %cst_195 = arith.constant dense<0.000000e+00> : vector<5x8xf32>
    %490 = tpu.matmul %488, %489, %cst_195 {dimension_numbers = #tpu.dot_dimension_numbers<[1], [0], [0], [1], [0, 0, 1, 1], [], []>} : vector<5x5xbf16>, vector<5x8xbf16>, vector<5x8xf32> -> vector<5x8xf32>
    %491 = tpu.concatenate %427, %448, %469, %490 in 1 : vector<5x8xf32>, vector<5x8xf32>, vector<5x8xf32>, vector<5x8xf32> -> vector<5x32xf32>
    %c0_196 = arith.constant 0 : index
    %c0_197 = arith.constant 0 : index
    %c0_198 = arith.constant 0 : index
    %492 = vector.load %arg7[%c0_196, %c0_197, %c0_198] : memref<1x32x32xbf16, #tpu.memory_space<vmem>>, vector<1x32x32xbf16>
    %493 = vector.shape_cast %492 : vector<1x32x32xbf16> to vector<32x32xbf16>
    %494 = arith.truncf %491 : vector<5x32xf32> to vector<5x32xbf16>
    %cst_199 = arith.constant dense<0.000000e+00> : vector<5x32xf32>
    %495 = tpu.matmul %494, %493, %cst_199 {dimension_numbers = #tpu.dot_dimension_numbers<[1], [0], [0], [1], [0, 0, 1, 1], [], []>} : vector<5x32xbf16>, vector<32x32xbf16>, vector<5x32xf32> -> vector<5x32xf32>
    %496 = arith.addf %372, %495 : vector<5x32xf32>
    %c0_200 = arith.constant 0 : index
    %c0_201 = arith.constant 0 : index
    %c0_202 = arith.constant 0 : index
    %497 = vector.load %arg8[%c0_200, %c0_201, %c0_202] : memref<1x1x32xf32, #tpu.memory_space<vmem>>, vector<1x1x32xf32>
    %498 = vector.shape_cast %497 : vector<1x1x32xf32> to vector<1x32xf32>
    %499 = vector.broadcast %498 : vector<1x32xf32> to vector<5x32xf32>
    %500 = arith.addf %496, %499 : vector<5x32xf32>
    %c0_203 = arith.constant 0 : index
    %c0_204 = arith.constant 0 : index
    %c0_205 = arith.constant 0 : index
    %501 = vector.load %arg9[%c0_203, %c0_204, %c0_205] : memref<1x1x32xf32, #tpu.memory_space<vmem>>, vector<1x1x32xf32>
    %502 = vector.shape_cast %501 : vector<1x1x32xf32> to vector<1x32xf32>
    %c0_206 = arith.constant 0 : index
    %c0_207 = arith.constant 0 : index
    %c0_208 = arith.constant 0 : index
    %503 = vector.load %arg10[%c0_206, %c0_207, %c0_208] : memref<1x1x32xf32, #tpu.memory_space<vmem>>, vector<1x1x32xf32>
    %504 = vector.shape_cast %503 : vector<1x1x32xf32> to vector<1x32xf32>
    %cst_209 = arith.constant dense<0.000000e+00> : vector<5xf32>
    %505 = vector.multi_reduction <add>, %500, %cst_209 [1] : vector<5x32xf32> to vector<5xf32>
    %506 = vector.shape_cast %505 : vector<5xf32> to vector<5x1xf32>
    %cst_210 = arith.constant 3.200000e+01 : f32
    %507 = vector.broadcast %cst_210 : f32 to vector<5x1xf32>
    %508 = arith.divf %506, %507 : vector<5x1xf32>
    %509 = vector.broadcast %508 : vector<5x1xf32> to vector<5x32xf32>
    %510 = arith.subf %500, %509 : vector<5x32xf32>
    %511 = arith.mulf %510, %510 : vector<5x32xf32>
    %cst_211 = arith.constant dense<0.000000e+00> : vector<5xf32>
    %512 = vector.multi_reduction <add>, %511, %cst_211 [1] : vector<5x32xf32> to vector<5xf32>
    %513 = vector.shape_cast %512 : vector<5xf32> to vector<5x1xf32>
    %cst_212 = arith.constant 3.200000e+01 : f32
    %514 = vector.broadcast %cst_212 : f32 to vector<5x1xf32>
    %515 = arith.divf %513, %514 : vector<5x1xf32>
    %516 = vector.broadcast %508 : vector<5x1xf32> to vector<5x32xf32>
    %517 = arith.subf %500, %516 : vector<5x32xf32>
    %cst_213 = arith.constant 9.99999974E-6 : f32
    %518 = vector.broadcast %cst_213 : f32 to vector<5x1xf32>
    %519 = arith.addf %515, %518 : vector<5x1xf32>
    %520 = math.rsqrt %519 : vector<5x1xf32>
    %521 = vector.broadcast %520 : vector<5x1xf32> to vector<5x32xf32>
    %522 = arith.mulf %517, %521 : vector<5x32xf32>
    %523 = vector.broadcast %502 : vector<1x32xf32> to vector<5x32xf32>
    %524 = arith.mulf %522, %523 : vector<5x32xf32>
    %525 = vector.broadcast %504 : vector<1x32xf32> to vector<5x32xf32>
    %526 = arith.addf %524, %525 : vector<5x32xf32>
    %c0_214 = arith.constant 0 : index
    %c0_215 = arith.constant 0 : index
    %c0_216 = arith.constant 0 : index
    %527 = vector.load %arg11[%c0_214, %c0_215, %c0_216] : memref<1x32x128xbf16, #tpu.memory_space<vmem>>, vector<1x32x128xbf16>
    %528 = vector.shape_cast %527 : vector<1x32x128xbf16> to vector<32x128xbf16>
    %529 = arith.truncf %526 : vector<5x32xf32> to vector<5x32xbf16>
    %cst_217 = arith.constant dense<0.000000e+00> : vector<5x128xf32>
    %530 = tpu.matmul %529, %528, %cst_217 {dimension_numbers = #tpu.dot_dimension_numbers<[1], [0], [0], [1], [0, 0, 1, 1], [], []>} : vector<5x32xbf16>, vector<32x128xbf16>, vector<5x128xf32> -> vector<5x128xf32>
    %c0_218 = arith.constant 0 : index
    %c0_219 = arith.constant 0 : index
    %c0_220 = arith.constant 0 : index
    %531 = vector.load %arg12[%c0_218, %c0_219, %c0_220] : memref<1x1x128xf32, #tpu.memory_space<vmem>>, vector<1x1x128xf32>
    %532 = vector.shape_cast %531 : vector<1x1x128xf32> to vector<1x128xf32>
    %533 = vector.broadcast %532 : vector<1x128xf32> to vector<5x128xf32>
    %534 = arith.addf %530, %533 : vector<5x128xf32>
    %cst_221 = arith.constant -1.702000e+00 : f32
    %535 = vector.broadcast %cst_221 : f32 to vector<5x128xf32>
    %536 = arith.mulf %535, %534 : vector<5x128xf32>
    %537 = math.exp %536 : vector<5x128xf32>
    %cst_222 = arith.constant 1.000000e+00 : f32
    %538 = vector.broadcast %cst_222 : f32 to vector<5x128xf32>
    %539 = arith.addf %538, %537 : vector<5x128xf32>
    %cst_223 = arith.constant 1.000000e+00 : f32
    %540 = vector.broadcast %cst_223 : f32 to vector<5x128xf32>
    %541 = arith.divf %540, %539 : vector<5x128xf32>
    %542 = arith.mulf %534, %541 : vector<5x128xf32>
    %c0_224 = arith.constant 0 : index
    %c0_225 = arith.constant 0 : index
    %c0_226 = arith.constant 0 : index
    %543 = vector.load %arg13[%c0_224, %c0_225, %c0_226] : memref<1x128x32xbf16, #tpu.memory_space<vmem>>, vector<1x128x32xbf16>
    %544 = vector.shape_cast %543 : vector<1x128x32xbf16> to vector<128x32xbf16>
    %545 = arith.truncf %542 : vector<5x128xf32> to vector<5x128xbf16>
    %cst_227 = arith.constant dense<0.000000e+00> : vector<5x32xf32>
    %546 = tpu.matmul %545, %544, %cst_227 {dimension_numbers = #tpu.dot_dimension_numbers<[1], [0], [0], [1], [0, 0, 1, 1], [], []>} : vector<5x128xbf16>, vector<128x32xbf16>, vector<5x32xf32> -> vector<5x32xf32>
    %c0_228 = arith.constant 0 : index
    %c0_229 = arith.constant 0 : index
    %c0_230 = arith.constant 0 : index
    %547 = vector.load %arg14[%c0_228, %c0_229, %c0_230] : memref<1x1x32xf32, #tpu.memory_space<vmem>>, vector<1x1x32xf32>
    %548 = vector.shape_cast %547 : vector<1x1x32xf32> to vector<1x32xf32>
    %549 = vector.broadcast %548 : vector<1x32xf32> to vector<5x32xf32>
    %550 = arith.addf %546, %549 : vector<5x32xf32>
    %551 = arith.addf %500, %550 : vector<5x32xf32>
    %c2_231 = arith.constant 2 : index
    %c0_232 = arith.constant 0 : index
    %c0_233 = arith.constant 0 : index
    %552 = vector.load %arg16[%c2_231, %c0_232, %c0_233] : memref<4x5x32xf32, #tpu.memory_space<vmem>>, vector<1x5x32xf32>
    %553 = vector.shape_cast %552 : vector<1x5x32xf32> to vector<5x32xf32>
    %554 = vector.shape_cast %551 : vector<5x32xf32> to vector<1x5x32xf32>
    tpu.vector_store %arg16[%c2_231, %c0_232, %c0_233], %554 {strides = array<i32>} : memref<4x5x32xf32, #tpu.memory_space<vmem>>, vector<1x5x32xf32>,
    %c3 = arith.constant 3 : index
    %c0_234 = arith.constant 0 : index
    %c0_235 = arith.constant 0 : index
    %555 = vector.load %arg16[%c3, %c0_234, %c0_235] : memref<4x5x32xf32, #tpu.memory_space<vmem>>, vector<1x5x32xf32>
    %556 = vector.shape_cast %555 : vector<1x5x32xf32> to vector<5x32xf32>
    %c0_236 = arith.constant 0 : index
    %c0_237 = arith.constant 0 : index
    %c0_238 = arith.constant 0 : index
    %557 = vector.load %arg3[%c0_236, %c0_237, %c0_238] : memref<1x1x32xf32, #tpu.memory_space<vmem>>, vector<1x1x32xf32>
    %558 = vector.shape_cast %557 : vector<1x1x32xf32> to vector<1x32xf32>
    %c0_239 = arith.constant 0 : index
    %c0_240 = arith.constant 0 : index
    %c0_241 = arith.constant 0 : index
    %559 = vector.load %arg4[%c0_239, %c0_240, %c0_241] : memref<1x1x32xf32, #tpu.memory_space<vmem>>, vector<1x1x32xf32>
    %560 = vector.shape_cast %559 : vector<1x1x32xf32> to vector<1x32xf32>
    %cst_242 = arith.constant dense<0.000000e+00> : vector<5xf32>
    %561 = vector.multi_reduction <add>, %556, %cst_242 [1] : vector<5x32xf32> to vector<5xf32>
    %562 = vector.shape_cast %561 : vector<5xf32> to vector<5x1xf32>
    %cst_243 = arith.constant 3.200000e+01 : f32
    %563 = vector.broadcast %cst_243 : f32 to vector<5x1xf32>
    %564 = arith.divf %562, %563 : vector<5x1xf32>
    %565 = vector.broadcast %564 : vector<5x1xf32> to vector<5x32xf32>
    %566 = arith.subf %556, %565 : vector<5x32xf32>
    %567 = arith.mulf %566, %566 : vector<5x32xf32>
    %cst_244 = arith.constant dense<0.000000e+00> : vector<5xf32>
    %568 = vector.multi_reduction <add>, %567, %cst_244 [1] : vector<5x32xf32> to vector<5xf32>
    %569 = vector.shape_cast %568 : vector<5xf32> to vector<5x1xf32>
    %cst_245 = arith.constant 3.200000e+01 : f32
    %570 = vector.broadcast %cst_245 : f32 to vector<5x1xf32>
    %571 = arith.divf %569, %570 : vector<5x1xf32>
    %572 = vector.broadcast %564 : vector<5x1xf32> to vector<5x32xf32>
    %573 = arith.subf %556, %572 : vector<5x32xf32>
    %cst_246 = arith.constant 9.99999974E-6 : f32
    %574 = vector.broadcast %cst_246 : f32 to vector<5x1xf32>
    %575 = arith.addf %571, %574 : vector<5x1xf32>
    %576 = math.rsqrt %575 : vector<5x1xf32>
    %577 = vector.broadcast %576 : vector<5x1xf32> to vector<5x32xf32>
    %578 = arith.mulf %573, %577 : vector<5x32xf32>
    %579 = vector.broadcast %558 : vector<1x32xf32> to vector<5x32xf32>
    %580 = arith.mulf %578, %579 : vector<5x32xf32>
    %581 = vector.broadcast %560 : vector<1x32xf32> to vector<5x32xf32>
    %582 = arith.addf %580, %581 : vector<5x32xf32>
    %c0_247 = arith.constant 0 : index
    %c0_248 = arith.constant 0 : index
    %c0_249 = arith.constant 0 : index
    %583 = vector.load %arg5[%c0_247, %c0_248, %c0_249] : memref<1x32x96xbf16, #tpu.memory_space<vmem>>, vector<1x32x96xbf16>
    %584 = vector.shape_cast %583 : vector<1x32x96xbf16> to vector<32x96xbf16>
    %585 = arith.truncf %582 : vector<5x32xf32> to vector<5x32xbf16>
    %cst_250 = arith.constant dense<0.000000e+00> : vector<5x96xf32>
    %586 = tpu.matmul %585, %584, %cst_250 {dimension_numbers = #tpu.dot_dimension_numbers<[1], [0], [0], [1], [0, 0, 1, 1], [], []>} : vector<5x32xbf16>, vector<32x96xbf16>, vector<5x96xf32> -> vector<5x96xf32>
    %c0_251 = arith.constant 0 : index
    %c0_252 = arith.constant 0 : index
    %c0_253 = arith.constant 0 : index
    %587 = vector.load %arg6[%c0_251, %c0_252, %c0_253] : memref<1x1x96xf32, #tpu.memory_space<vmem>>, vector<1x1x96xf32>
    %588 = vector.shape_cast %587 : vector<1x1x96xf32> to vector<1x96xf32>
    %589 = vector.broadcast %588 : vector<1x96xf32> to vector<5x96xf32>
    %590 = arith.addf %586, %589 : vector<5x96xf32>
    %591 = vector.extract_strided_slice %590 {offsets = [0, 0], sizes = [5, 8], strides = [1, 1]} : vector<5x96xf32> to vector<5x8xf32>
    %592 = vector.extract_strided_slice %590 {offsets = [0, 32], sizes = [5, 8], strides = [1, 1]} : vector<5x96xf32> to vector<5x8xf32>
    %593 = vector.extract_strided_slice %590 {offsets = [0, 64], sizes = [5, 8], strides = [1, 1]} : vector<5x96xf32> to vector<5x8xf32>
    %594 = arith.truncf %591 : vector<5x8xf32> to vector<5x8xbf16>
    %595 = arith.truncf %592 : vector<5x8xf32> to vector<5x8xbf16>
    %cst_254 = arith.constant dense<0.000000e+00> : vector<5x5xf32>
    %596 = tpu.matmul %594, %595, %cst_254 {dimension_numbers = #tpu.dot_dimension_numbers<[1], [1], [0], [0], [0, 0, 1, 0], [], []>} : vector<5x8xbf16>, vector<5x8xbf16>, vector<5x5xf32> -> vector<5x5xf32>
    %cst_255 = arith.constant 0.353553385 : f32
    %597 = vector.broadcast %cst_255 : f32 to vector<5x5xf32>
    %598 = arith.mulf %596, %597 : vector<5x5xf32>
    %cst_256 = arith.constant dense<0xFF800000> : vector<5xf32>
    %599 = vector.multi_reduction <maximumf>, %598, %cst_256 [1] : vector<5x5xf32> to vector<5xf32>
    %600 = vector.shape_cast %599 : vector<5xf32> to vector<5x1xf32>
    %601 = vector.broadcast %600 : vector<5x1xf32> to vector<5x5xf32>
    %602 = arith.subf %598, %601 : vector<5x5xf32>
    %603 = math.exp %602 : vector<5x5xf32>
    %cst_257 = arith.constant dense<0.000000e+00> : vector<5xf32>
    %604 = vector.multi_reduction <add>, %603, %cst_257 [1] : vector<5x5xf32> to vector<5xf32>
    %605 = vector.shape_cast %604 : vector<5xf32> to vector<5x1xf32>
    %606 = tpu.reciprocal %605 {approx = true} : vector<5x1xf32> -> vector<5x1xf32>
    %607 = vector.broadcast %606 : vector<5x1xf32> to vector<5x5xf32>
    %608 = arith.mulf %603, %607 : vector<5x5xf32>
    %609 = arith.truncf %608 : vector<5x5xf32> to vector<5x5xbf16>
    %610 = arith.truncf %593 : vector<5x8xf32> to vector<5x8xbf16>
    %cst_258 = arith.constant dense<0.000000e+00> : vector<5x8xf32>
    %611 = tpu.matmul %609, %610, %cst_258 {dimension_numbers = #tpu.dot_dimension_numbers<[1], [0], [0], [1], [0, 0, 1, 1], [], []>} : vector<5x5xbf16>, vector<5x8xbf16>, vector<5x8xf32> -> vector<5x8xf32>
    %612 = vector.extract_strided_slice %590 {offsets = [0, 8], sizes = [5, 8], strides = [1, 1]} : vector<5x96xf32> to vector<5x8xf32>
    %613 = vector.extract_strided_slice %590 {offsets = [0, 40], sizes = [5, 8], strides = [1, 1]} : vector<5x96xf32> to vector<5x8xf32>
    %614 = vector.extract_strided_slice %590 {offsets = [0, 72], sizes = [5, 8], strides = [1, 1]} : vector<5x96xf32> to vector<5x8xf32>
    %615 = arith.truncf %612 : vector<5x8xf32> to vector<5x8xbf16>
    %616 = arith.truncf %613 : vector<5x8xf32> to vector<5x8xbf16>
    %cst_259 = arith.constant dense<0.000000e+00> : vector<5x5xf32>
    %617 = tpu.matmul %615, %616, %cst_259 {dimension_numbers = #tpu.dot_dimension_numbers<[1], [1], [0], [0], [0, 0, 1, 0], [], []>} : vector<5x8xbf16>, vector<5x8xbf16>, vector<5x5xf32> -> vector<5x5xf32>
    %cst_260 = arith.constant 0.353553385 : f32
    %618 = vector.broadcast %cst_260 : f32 to vector<5x5xf32>
    %619 = arith.mulf %617, %618 : vector<5x5xf32>
    %cst_261 = arith.constant dense<0xFF800000> : vector<5xf32>
    %620 = vector.multi_reduction <maximumf>, %619, %cst_261 [1] : vector<5x5xf32> to vector<5xf32>
    %621 = vector.shape_cast %620 : vector<5xf32> to vector<5x1xf32>
    %622 = vector.broadcast %621 : vector<5x1xf32> to vector<5x5xf32>
    %623 = arith.subf %619, %622 : vector<5x5xf32>
    %624 = math.exp %623 : vector<5x5xf32>
    %cst_262 = arith.constant dense<0.000000e+00> : vector<5xf32>
    %625 = vector.multi_reduction <add>, %624, %cst_262 [1] : vector<5x5xf32> to vector<5xf32>
    %626 = vector.shape_cast %625 : vector<5xf32> to vector<5x1xf32>
    %627 = tpu.reciprocal %626 {approx = true} : vector<5x1xf32> -> vector<5x1xf32>
    %628 = vector.broadcast %627 : vector<5x1xf32> to vector<5x5xf32>
    %629 = arith.mulf %624, %628 : vector<5x5xf32>
    %630 = arith.truncf %629 : vector<5x5xf32> to vector<5x5xbf16>
    %631 = arith.truncf %614 : vector<5x8xf32> to vector<5x8xbf16>
    %cst_263 = arith.constant dense<0.000000e+00> : vector<5x8xf32>
    %632 = tpu.matmul %630, %631, %cst_263 {dimension_numbers = #tpu.dot_dimension_numbers<[1], [0], [0], [1], [0, 0, 1, 1], [], []>} : vector<5x5xbf16>, vector<5x8xbf16>, vector<5x8xf32> -> vector<5x8xf32>
    %633 = vector.extract_strided_slice %590 {offsets = [0, 16], sizes = [5, 8], strides = [1, 1]} : vector<5x96xf32> to vector<5x8xf32>
    %634 = vector.extract_strided_slice %590 {offsets = [0, 48], sizes = [5, 8], strides = [1, 1]} : vector<5x96xf32> to vector<5x8xf32>
    %635 = vector.extract_strided_slice %590 {offsets = [0, 80], sizes = [5, 8], strides = [1, 1]} : vector<5x96xf32> to vector<5x8xf32>
    %636 = arith.truncf %633 : vector<5x8xf32> to vector<5x8xbf16>
    %637 = arith.truncf %634 : vector<5x8xf32> to vector<5x8xbf16>
    %cst_264 = arith.constant dense<0.000000e+00> : vector<5x5xf32>
    %638 = tpu.matmul %636, %637, %cst_264 {dimension_numbers = #tpu.dot_dimension_numbers<[1], [1], [0], [0], [0, 0, 1, 0], [], []>} : vector<5x8xbf16>, vector<5x8xbf16>, vector<5x5xf32> -> vector<5x5xf32>
    %cst_265 = arith.constant 0.353553385 : f32
    %639 = vector.broadcast %cst_265 : f32 to vector<5x5xf32>
    %640 = arith.mulf %638, %639 : vector<5x5xf32>
    %cst_266 = arith.constant dense<0xFF800000> : vector<5xf32>
    %641 = vector.multi_reduction <maximumf>, %640, %cst_266 [1] : vector<5x5xf32> to vector<5xf32>
    %642 = vector.shape_cast %641 : vector<5xf32> to vector<5x1xf32>
    %643 = vector.broadcast %642 : vector<5x1xf32> to vector<5x5xf32>
    %644 = arith.subf %640, %643 : vector<5x5xf32>
    %645 = math.exp %644 : vector<5x5xf32>
    %cst_267 = arith.constant dense<0.000000e+00> : vector<5xf32>
    %646 = vector.multi_reduction <add>, %645, %cst_267 [1] : vector<5x5xf32> to vector<5xf32>
    %647 = vector.shape_cast %646 : vector<5xf32> to vector<5x1xf32>
    %648 = tpu.reciprocal %647 {approx = true} : vector<5x1xf32> -> vector<5x1xf32>
    %649 = vector.broadcast %648 : vector<5x1xf32> to vector<5x5xf32>
    %650 = arith.mulf %645, %649 : vector<5x5xf32>
    %651 = arith.truncf %650 : vector<5x5xf32> to vector<5x5xbf16>
    %652 = arith.truncf %635 : vector<5x8xf32> to vector<5x8xbf16>
    %cst_268 = arith.constant dense<0.000000e+00> : vector<5x8xf32>
    %653 = tpu.matmul %651, %652, %cst_268 {dimension_numbers = #tpu.dot_dimension_numbers<[1], [0], [0], [1], [0, 0, 1, 1], [], []>} : vector<5x5xbf16>, vector<5x8xbf16>, vector<5x8xf32> -> vector<5x8xf32>
    %654 = vector.extract_strided_slice %590 {offsets = [0, 24], sizes = [5, 8], strides = [1, 1]} : vector<5x96xf32> to vector<5x8xf32>
    %655 = vector.extract_strided_slice %590 {offsets = [0, 56], sizes = [5, 8], strides = [1, 1]} : vector<5x96xf32> to vector<5x8xf32>
    %656 = vector.extract_strided_slice %590 {offsets = [0, 88], sizes = [5, 8], strides = [1, 1]} : vector<5x96xf32> to vector<5x8xf32>
    %657 = arith.truncf %654 : vector<5x8xf32> to vector<5x8xbf16>
    %658 = arith.truncf %655 : vector<5x8xf32> to vector<5x8xbf16>
    %cst_269 = arith.constant dense<0.000000e+00> : vector<5x5xf32>
    %659 = tpu.matmul %657, %658, %cst_269 {dimension_numbers = #tpu.dot_dimension_numbers<[1], [1], [0], [0], [0, 0, 1, 0], [], []>} : vector<5x8xbf16>, vector<5x8xbf16>, vector<5x5xf32> -> vector<5x5xf32>
    %cst_270 = arith.constant 0.353553385 : f32
    %660 = vector.broadcast %cst_270 : f32 to vector<5x5xf32>
    %661 = arith.mulf %659, %660 : vector<5x5xf32>
    %cst_271 = arith.constant dense<0xFF800000> : vector<5xf32>
    %662 = vector.multi_reduction <maximumf>, %661, %cst_271 [1] : vector<5x5xf32> to vector<5xf32>
    %663 = vector.shape_cast %662 : vector<5xf32> to vector<5x1xf32>
    %664 = vector.broadcast %663 : vector<5x1xf32> to vector<5x5xf32>
    %665 = arith.subf %661, %664 : vector<5x5xf32>
    %666 = math.exp %665 : vector<5x5xf32>
    %cst_272 = arith.constant dense<0.000000e+00> : vector<5xf32>
    %667 = vector.multi_reduction <add>, %666, %cst_272 [1] : vector<5x5xf32> to vector<5xf32>
    %668 = vector.shape_cast %667 : vector<5xf32> to vector<5x1xf32>
    %669 = tpu.reciprocal %668 {approx = true} : vector<5x1xf32> -> vector<5x1xf32>
    %670 = vector.broadcast %669 : vector<5x1xf32> to vector<5x5xf32>
    %671 = arith.mulf %666, %670 : vector<5x5xf32>
    %672 = arith.truncf %671 : vector<5x5xf32> to vector<5x5xbf16>
    %673 = arith.truncf %656 : vector<5x8xf32> to vector<5x8xbf16>
    %cst_273 = arith.constant dense<0.000000e+00> : vector<5x8xf32>
    %674 = tpu.matmul %672, %673, %cst_273 {dimension_numbers = #tpu.dot_dimension_numbers<[1], [0], [0], [1], [0, 0, 1, 1], [], []>} : vector<5x5xbf16>, vector<5x8xbf16>, vector<5x8xf32> -> vector<5x8xf32>
    %675 = tpu.concatenate %611, %632, %653, %674 in 1 : vector<5x8xf32>, vector<5x8xf32>, vector<5x8xf32>, vector<5x8xf32> -> vector<5x32xf32>
    %c0_274 = arith.constant 0 : index
    %c0_275 = arith.constant 0 : index
    %c0_276 = arith.constant 0 : index
    %676 = vector.load %arg7[%c0_274, %c0_275, %c0_276] : memref<1x32x32xbf16, #tpu.memory_space<vmem>>, vector<1x32x32xbf16>
    %677 = vector.shape_cast %676 : vector<1x32x32xbf16> to vector<32x32xbf16>
    %678 = arith.truncf %675 : vector<5x32xf32> to vector<5x32xbf16>
    %cst_277 = arith.constant dense<0.000000e+00> : vector<5x32xf32>
    %679 = tpu.matmul %678, %677, %cst_277 {dimension_numbers = #tpu.dot_dimension_numbers<[1], [0], [0], [1], [0, 0, 1, 1], [], []>} : vector<5x32xbf16>, vector<32x32xbf16>, vector<5x32xf32> -> vector<5x32xf32>
    %680 = arith.addf %556, %679 : vector<5x32xf32>
    %c0_278 = arith.constant 0 : index
    %c0_279 = arith.constant 0 : index
    %c0_280 = arith.constant 0 : index
    %681 = vector.load %arg8[%c0_278, %c0_279, %c0_280] : memref<1x1x32xf32, #tpu.memory_space<vmem>>, vector<1x1x32xf32>
    %682 = vector.shape_cast %681 : vector<1x1x32xf32> to vector<1x32xf32>
    %683 = vector.broadcast %682 : vector<1x32xf32> to vector<5x32xf32>
    %684 = arith.addf %680, %683 : vector<5x32xf32>
    %c0_281 = arith.constant 0 : index
    %c0_282 = arith.constant 0 : index
    %c0_283 = arith.constant 0 : index
    %685 = vector.load %arg9[%c0_281, %c0_282, %c0_283] : memref<1x1x32xf32, #tpu.memory_space<vmem>>, vector<1x1x32xf32>
    %686 = vector.shape_cast %685 : vector<1x1x32xf32> to vector<1x32xf32>
    %c0_284 = arith.constant 0 : index
    %c0_285 = arith.constant 0 : index
    %c0_286 = arith.constant 0 : index
    %687 = vector.load %arg10[%c0_284, %c0_285, %c0_286] : memref<1x1x32xf32, #tpu.memory_space<vmem>>, vector<1x1x32xf32>
    %688 = vector.shape_cast %687 : vector<1x1x32xf32> to vector<1x32xf32>
    %cst_287 = arith.constant dense<0.000000e+00> : vector<5xf32>
    %689 = vector.multi_reduction <add>, %684, %cst_287 [1] : vector<5x32xf32> to vector<5xf32>
    %690 = vector.shape_cast %689 : vector<5xf32> to vector<5x1xf32>
    %cst_288 = arith.constant 3.200000e+01 : f32
    %691 = vector.broadcast %cst_288 : f32 to vector<5x1xf32>
    %692 = arith.divf %690, %691 : vector<5x1xf32>
    %693 = vector.broadcast %692 : vector<5x1xf32> to vector<5x32xf32>
    %694 = arith.subf %684, %693 : vector<5x32xf32>
    %695 = arith.mulf %694, %694 : vector<5x32xf32>
    %cst_289 = arith.constant dense<0.000000e+00> : vector<5xf32>
    %696 = vector.multi_reduction <add>, %695, %cst_289 [1] : vector<5x32xf32> to vector<5xf32>
    %697 = vector.shape_cast %696 : vector<5xf32> to vector<5x1xf32>
    %cst_290 = arith.constant 3.200000e+01 : f32
    %698 = vector.broadcast %cst_290 : f32 to vector<5x1xf32>
    %699 = arith.divf %697, %698 : vector<5x1xf32>
    %700 = vector.broadcast %692 : vector<5x1xf32> to vector<5x32xf32>
    %701 = arith.subf %684, %700 : vector<5x32xf32>
    %cst_291 = arith.constant 9.99999974E-6 : f32
    %702 = vector.broadcast %cst_291 : f32 to vector<5x1xf32>
    %703 = arith.addf %699, %702 : vector<5x1xf32>
    %704 = math.rsqrt %703 : vector<5x1xf32>
    %705 = vector.broadcast %704 : vector<5x1xf32> to vector<5x32xf32>
    %706 = arith.mulf %701, %705 : vector<5x32xf32>
    %707 = vector.broadcast %686 : vector<1x32xf32> to vector<5x32xf32>
    %708 = arith.mulf %706, %707 : vector<5x32xf32>
    %709 = vector.broadcast %688 : vector<1x32xf32> to vector<5x32xf32>
    %710 = arith.addf %708, %709 : vector<5x32xf32>
    %c0_292 = arith.constant 0 : index
    %c0_293 = arith.constant 0 : index
    %c0_294 = arith.constant 0 : index
    %711 = vector.load %arg11[%c0_292, %c0_293, %c0_294] : memref<1x32x128xbf16, #tpu.memory_space<vmem>>, vector<1x32x128xbf16>
    %712 = vector.shape_cast %711 : vector<1x32x128xbf16> to vector<32x128xbf16>
    %713 = arith.truncf %710 : vector<5x32xf32> to vector<5x32xbf16>
    %cst_295 = arith.constant dense<0.000000e+00> : vector<5x128xf32>
    %714 = tpu.matmul %713, %712, %cst_295 {dimension_numbers = #tpu.dot_dimension_numbers<[1], [0], [0], [1], [0, 0, 1, 1], [], []>} : vector<5x32xbf16>, vector<32x128xbf16>, vector<5x128xf32> -> vector<5x128xf32>
    %c0_296 = arith.constant 0 : index
    %c0_297 = arith.constant 0 : index
    %c0_298 = arith.constant 0 : index
    %715 = vector.load %arg12[%c0_296, %c0_297, %c0_298] : memref<1x1x128xf32, #tpu.memory_space<vmem>>, vector<1x1x128xf32>
    %716 = vector.shape_cast %715 : vector<1x1x128xf32> to vector<1x128xf32>
    %717 = vector.broadcast %716 : vector<1x128xf32> to vector<5x128xf32>
    %718 = arith.addf %714, %717 : vector<5x128xf32>
    %cst_299 = arith.constant -1.702000e+00 : f32
    %719 = vector.broadcast %cst_299 : f32 to vector<5x128xf32>
    %720 = arith.mulf %719, %718 : vector<5x128xf32>
    %721 = math.exp %720 : vector<5x128xf32>
    %cst_300 = arith.constant 1.000000e+00 : f32
    %722 = vector.broadcast %cst_300 : f32 to vector<5x128xf32>
    %723 = arith.addf %722, %721 : vector<5x128xf32>
    %cst_301 = arith.constant 1.000000e+00 : f32
    %724 = vector.broadcast %cst_301 : f32 to vector<5x128xf32>
    %725 = arith.divf %724, %723 : vector<5x128xf32>
    %726 = arith.mulf %718, %725 : vector<5x128xf32>
    %c0_302 = arith.constant 0 : index
    %c0_303 = arith.constant 0 : index
    %c0_304 = arith.constant 0 : index
    %727 = vector.load %arg13[%c0_302, %c0_303, %c0_304] : memref<1x128x32xbf16, #tpu.memory_space<vmem>>, vector<1x128x32xbf16>
    %728 = vector.shape_cast %727 : vector<1x128x32xbf16> to vector<128x32xbf16>
    %729 = arith.truncf %726 : vector<5x128xf32> to vector<5x128xbf16>
    %cst_305 = arith.constant dense<0.000000e+00> : vector<5x32xf32>
    %730 = tpu.matmul %729, %728, %cst_305 {dimension_numbers = #tpu.dot_dimension_numbers<[1], [0], [0], [1], [0, 0, 1, 1], [], []>} : vector<5x128xbf16>, vector<128x32xbf16>, vector<5x32xf32> -> vector<5x32xf32>
    %c0_306 = arith.constant 0 : index
    %c0_307 = arith.constant 0 : index
    %c0_308 = arith.constant 0 : index
    %731 = vector.load %arg14[%c0_306, %c0_307, %c0_308] : memref<1x1x32xf32, #tpu.memory_space<vmem>>, vector<1x1x32xf32>
    %732 = vector.shape_cast %731 : vector<1x1x32xf32> to vector<1x32xf32>
    %733 = vector.broadcast %732 : vector<1x32xf32> to vector<5x32xf32>
    %734 = arith.addf %730, %733 : vector<5x32xf32>
    %735 = arith.addf %684, %734 : vector<5x32xf32>
    %c3_309 = arith.constant 3 : index
    %c0_310 = arith.constant 0 : index
    %c0_311 = arith.constant 0 : index
    %736 = vector.load %arg16[%c3_309, %c0_310, %c0_311] : memref<4x5x32xf32, #tpu.memory_space<vmem>>, vector<1x5x32xf32>
    %737 = vector.shape_cast %736 : vector<1x5x32xf32> to vector<5x32xf32>
    %738 = vector.shape_cast %735 : vector<5x32xf32> to vector<1x5x32xf32>
    tpu.vector_store %arg16[%c3_309, %c0_310, %c0_311], %738 {strides = array<i32>} : memref<4x5x32xf32, #tpu.memory_space<vmem>>, vector<1x5x32xf32>,
    %c0_312 = arith.constant 0 : index
    %c0_313 = arith.constant 0 : index
    %c0_314 = arith.constant 0 : index
    %739 = vector.load %arg16[%c0_312, %c0_313, %c0_314] : memref<4x5x32xf32, #tpu.memory_space<vmem>>, vector<4x5x32xf32>
    %c0_315 = arith.constant 0 : index
    %c0_316 = arith.constant 0 : index
    %c0_317 = arith.constant 0 : index
    %740 = vector.load %arg15[%c0_315, %c0_316, %c0_317] : memref<4x5x32xf32, #tpu.memory_space<vmem>>, vector<4x5x32xf32>
    tpu.vector_store %arg15[%c0_315, %c0_316, %c0_317], %739 {strides = array<i32>} : memref<4x5x32xf32, #tpu.memory_space<vmem>>, vector<4x5x32xf32>,
    return
  }
  func.func @transform_0(%arg0: i32, %arg1: i32) -> (i32, i32, i32) {
    %c0_i32 = arith.constant 0 : i32
    %c0_i32_0 = arith.constant 0 : i32
    %c0_i32_1 = arith.constant 0 : i32
    return %arg0, %c0_i32, %c0_i32_0 : i32, i32, i32
  }
  func.func @transform_1(%arg0: i32, %arg1: i32) -> (i32, i32, i32) {
    %c0_i32 = arith.constant 0 : i32
    %c0_i32_0 = arith.constant 0 : i32
    %c0_i32_1 = arith.constant 0 : i32
    return %arg1, %c0_i32, %c0_i32_0 : i32, i32, i32
  }
  func.func @transform_2(%arg0: i32, %arg1: i32) -> (i32, i32, i32) {
    %c0_i32 = arith.constant 0 : i32
    %c0_i32_0 = arith.constant 0 : i32
    %c0_i32_1 = arith.constant 0 : i32
    return %arg1, %c0_i32, %c0_i32_0 : i32, i32, i32
  }
  func.func @transform_3(%arg0: i32, %arg1: i32) -> (i32, i32, i32) {
    %c0_i32 = arith.constant 0 : i32
    %c0_i32_0 = arith.constant 0 : i32
    %c0_i32_1 = arith.constant 0 : i32
    return %arg1, %c0_i32, %c0_i32_0 : i32, i32, i32
  }
  func.func @transform_4(%arg0: i32, %arg1: i32) -> (i32, i32, i32) {
    %c0_i32 = arith.constant 0 : i32
    %c0_i32_0 = arith.constant 0 : i32
    %c0_i32_1 = arith.constant 0 : i32
    return %arg1, %c0_i32, %c0_i32_0 : i32, i32, i32
  }
  func.func @transform_5(%arg0: i32, %arg1: i32) -> (i32, i32, i32) {
    %c0_i32 = arith.constant 0 : i32
    %c0_i32_0 = arith.constant 0 : i32
    %c0_i32_1 = arith.constant 0 : i32
    return %arg1, %c0_i32, %c0_i32_0 : i32, i32, i32
  }
  func.func @transform_6(%arg0: i32, %arg1: i32) -> (i32, i32, i32) {
    %c0_i32 = arith.constant 0 : i32
    %c0_i32_0 = arith.constant 0 : i32
    %c0_i32_1 = arith.constant 0 : i32
    return %arg1, %c0_i32, %c0_i32_0 : i32, i32, i32
  }
  func.func @transform_7(%arg0: i32, %arg1: i32) -> (i32, i32, i32) {
    %c0_i32 = arith.constant 0 : i32
    %c0_i32_0 = arith.constant 0 : i32
    %c0_i32_1 = arith.constant 0 : i32
    return %arg1, %c0_i32, %c0_i32_0 : i32, i32, i32
  }
  func.func @transform_8(%arg0: i32, %arg1: i32) -> (i32, i32, i32) {
    %c0_i32 = arith.constant 0 : i32
    %c0_i32_0 = arith.constant 0 : i32
    %c0_i32_1 = arith.constant 0 : i32
    return %arg1, %c0_i32, %c0_i32_0 : i32, i32, i32
  }
  func.func @transform_9(%arg0: i32, %arg1: i32) -> (i32, i32, i32) {
    %c0_i32 = arith.constant 0 : i32
    %c0_i32_0 = arith.constant 0 : i32
    %c0_i32_1 = arith.constant 0 : i32
    return %arg1, %c0_i32, %c0_i32_0 : i32, i32, i32
  }
  func.func @transform_10(%arg0: i32, %arg1: i32) -> (i32, i32, i32) {
    %c0_i32 = arith.constant 0 : i32
    %c0_i32_0 = arith.constant 0 : i32
    %c0_i32_1 = arith.constant 0 : i32
    return %arg1, %c0_i32, %c0_i32_0 : i32, i32, i32
  }
  func.func @transform_11(%arg0: i32, %arg1: i32) -> (i32, i32, i32) {
    %c0_i32 = arith.constant 0 : i32
    %c0_i32_0 = arith.constant 0 : i32
    %c0_i32_1 = arith.constant 0 : i32
    return %arg1, %c0_i32, %c0_i32_0 : i32, i32, i32
  }
  func.func @transform_12(%arg0: i32, %arg1: i32) -> (i32, i32, i32) {
    %c0_i32 = arith.constant 0 : i32
    %c0_i32_0 = arith.constant 0 : i32
    %c0_i32_1 = arith.constant 0 : i32
    return %arg1, %c0_i32, %c0_i32_0 : i32, i32, i32
  }
  func.func @transform_13(%arg0: i32, %arg1: i32) -> (i32, i32, i32) {
    %c0_i32 = arith.constant 0 : i32
    %c0_i32_0 = arith.constant 0 : i32
    %c0_i32_1 = arith.constant 0 : i32
    return %arg0, %c0_i32, %c0_i32_0 : i32, i32, i32
  }
}

module attributes {stable_mosaic.version = 11 : i64} {
  func.func @_stoch_kernel(%arg0: i32, %arg1: memref<2x32xf32, #tpu.memory_space<vmem>>, %arg2: memref<2x32xf32, #tpu.memory_space<vmem>>, %arg3: memref<32x32xbf16, #tpu.memory_space<vmem>>, %arg4: memref<32x32xbf16, #tpu.memory_space<vmem>>, %arg5: memref<1x32xf32, #tpu.memory_space<vmem>>, %arg6: memref<2x32xf32, #tpu.memory_space<vmem>>, %arg7: memref<2x32xf32, #tpu.memory_space<vmem>>, %arg8: memref<2x32xf32, #tpu.memory_space<vmem>>) attributes {dimension_semantics = [#tpu.dimension_semantics<arbitrary>], iteration_bounds = array<i64: 1>, scalar_prefetch = 0 : i64, scratch_operands = 0 : i64, tpu.core_type = #tpu.core_type<tc>, window_params = [{pipeline_mode = #tpu.pipeline_mode<synchronous>, transform_indices = @transform_0, window_bounds = array<i64: 2, 32>}, {pipeline_mode = #tpu.pipeline_mode<synchronous>, transform_indices = @transform_1, window_bounds = array<i64: 2, 32>}, {pipeline_mode = #tpu.pipeline_mode<synchronous>, transform_indices = @transform_2, window_bounds = array<i64: 32, 32>}, {pipeline_mode = #tpu.pipeline_mode<synchronous>, transform_indices = @transform_3, window_bounds = array<i64: 32, 32>}, {pipeline_mode = #tpu.pipeline_mode<synchronous>, transform_indices = @transform_4, window_bounds = array<i64: 1, 32>}, {pipeline_mode = #tpu.pipeline_mode<synchronous>, transform_indices = @transform_5, window_bounds = array<i64: 2, 32>}, {pipeline_mode = #tpu.pipeline_mode<synchronous>, transform_indices = @transform_6, window_bounds = array<i64: 2, 32>}, {pipeline_mode = #tpu.pipeline_mode<synchronous>, transform_indices = @transform_7, window_bounds = array<i64: 2, 32>}]} {
    %c0 = arith.constant 0 : index
    %c0_0 = arith.constant 0 : index
    %0 = vector.load %arg1[%c0, %c0_0] : memref<2x32xf32, #tpu.memory_space<vmem>>, vector<2x32xf32>
    %c0_1 = arith.constant 0 : index
    %c0_2 = arith.constant 0 : index
    %1 = vector.load %arg3[%c0_1, %c0_2] : memref<32x32xbf16, #tpu.memory_space<vmem>>, vector<32x32xbf16>
    %2 = arith.truncf %0 : vector<2x32xf32> to vector<2x32xbf16>
    %cst = arith.constant dense<0.000000e+00> : vector<2x32xf32>
    %3 = tpu.matmul %2, %1, %cst {dimension_numbers = #tpu.dot_dimension_numbers<[1], [0], [0], [1], [0, 0, 1, 1], [], []>} : vector<2x32xbf16>, vector<32x32xbf16>, vector<2x32xf32> -> vector<2x32xf32>
    %c0_3 = arith.constant 0 : index
    %c0_4 = arith.constant 0 : index
    %4 = vector.load %arg2[%c0_3, %c0_4] : memref<2x32xf32, #tpu.memory_space<vmem>>, vector<2x32xf32>
    %c0_5 = arith.constant 0 : index
    %c0_6 = arith.constant 0 : index
    %5 = vector.load %arg4[%c0_5, %c0_6] : memref<32x32xbf16, #tpu.memory_space<vmem>>, vector<32x32xbf16>
    %6 = arith.truncf %4 : vector<2x32xf32> to vector<2x32xbf16>
    %cst_7 = arith.constant dense<0.000000e+00> : vector<2x32xf32>
    %7 = tpu.matmul %6, %5, %cst_7 {dimension_numbers = #tpu.dot_dimension_numbers<[1], [0], [0], [1], [0, 0, 1, 1], [], []>} : vector<2x32xbf16>, vector<32x32xbf16>, vector<2x32xf32> -> vector<2x32xf32>
    %8 = arith.addf %3, %7 : vector<2x32xf32>
    %c0_8 = arith.constant 0 : index
    %c0_9 = arith.constant 0 : index
    %9 = vector.load %arg5[%c0_8, %c0_9] : memref<1x32xf32, #tpu.memory_space<vmem>>, vector<1x32xf32>
    %10 = vector.broadcast %9 : vector<1x32xf32> to vector<2x32xf32>
    %11 = arith.addf %8, %10 : vector<2x32xf32>
    %c0_10 = arith.constant 0 : index
    %c0_11 = arith.constant 0 : index
    %12 = vector.load %arg8[%c0_10, %c0_11] : memref<2x32xf32, #tpu.memory_space<vmem>>, vector<2x32xf32>
    tpu.vector_store %arg8[%c0_10, %c0_11], %11 {strides = array<i32>} : memref<2x32xf32, #tpu.memory_space<vmem>>, vector<2x32xf32>,
    %13 = math.exp %11 : vector<2x32xf32>
    %c0_12 = arith.constant 0 : index
    %c0_13 = arith.constant 0 : index
    %14 = vector.load %arg6[%c0_12, %c0_13] : memref<2x32xf32, #tpu.memory_space<vmem>>, vector<2x32xf32>
    %15 = arith.mulf %13, %14 : vector<2x32xf32>
    %16 = arith.addf %0, %15 : vector<2x32xf32>
    %c0_14 = arith.constant 0 : index
    %c0_15 = arith.constant 0 : index
    %17 = vector.load %arg7[%c0_14, %c0_15] : memref<2x32xf32, #tpu.memory_space<vmem>>, vector<2x32xf32>
    tpu.vector_store %arg7[%c0_14, %c0_15], %16 {strides = array<i32>} : memref<2x32xf32, #tpu.memory_space<vmem>>, vector<2x32xf32>,
    return
  }
  func.func @transform_0(%arg0: i32) -> (i32, i32) {
    %c0_i32 = arith.constant 0 : i32
    %c0_i32_0 = arith.constant 0 : i32
    %c0_i32_1 = arith.constant 0 : i32
    return %c0_i32, %c0_i32_0 : i32, i32
  }
  func.func @transform_1(%arg0: i32) -> (i32, i32) {
    %c0_i32 = arith.constant 0 : i32
    %c0_i32_0 = arith.constant 0 : i32
    %c0_i32_1 = arith.constant 0 : i32
    return %c0_i32, %c0_i32_0 : i32, i32
  }
  func.func @transform_2(%arg0: i32) -> (i32, i32) {
    %c0_i32 = arith.constant 0 : i32
    %c0_i32_0 = arith.constant 0 : i32
    %c0_i32_1 = arith.constant 0 : i32
    return %c0_i32, %c0_i32_0 : i32, i32
  }
  func.func @transform_3(%arg0: i32) -> (i32, i32) {
    %c0_i32 = arith.constant 0 : i32
    %c0_i32_0 = arith.constant 0 : i32
    %c0_i32_1 = arith.constant 0 : i32
    return %c0_i32, %c0_i32_0 : i32, i32
  }
  func.func @transform_4(%arg0: i32) -> (i32, i32) {
    %c0_i32 = arith.constant 0 : i32
    %c0_i32_0 = arith.constant 0 : i32
    %c0_i32_1 = arith.constant 0 : i32
    return %c0_i32, %c0_i32_0 : i32, i32
  }
  func.func @transform_5(%arg0: i32) -> (i32, i32) {
    %c0_i32 = arith.constant 0 : i32
    %c0_i32_0 = arith.constant 0 : i32
    %c0_i32_1 = arith.constant 0 : i32
    return %c0_i32, %c0_i32_0 : i32, i32
  }
  func.func @transform_6(%arg0: i32) -> (i32, i32) {
    %c0_i32 = arith.constant 0 : i32
    %c0_i32_0 = arith.constant 0 : i32
    %c0_i32_1 = arith.constant 0 : i32
    return %c0_i32, %c0_i32_0 : i32, i32
  }
  func.func @transform_7(%arg0: i32) -> (i32, i32) {
    %c0_i32 = arith.constant 0 : i32
    %c0_i32_0 = arith.constant 0 : i32
    %c0_i32_1 = arith.constant 0 : i32
    return %c0_i32, %c0_i32_0 : i32, i32
  }
}

</mosaic_0001>

<bundles_post_ra>
// kernel: clip_stochastic_forward.10
= control target key start
LH: loop header
LB: loop body
LE: loop exit
PB: predicated region body
PF: predicated region fallthrough
CT: control target
= control target key end

     0   :  { %vm24_vm0 = vcmask 254976   ;;  %v149_v8 = vmov 0.0   ;;  %vm150_vm1 = vmmov 0   ;;  %vm77_vm2 = vcmask 261120   ;;  %s205_s0 = inlined_call_operand.vmem [shape: f32[2,32], index: 0, kind: input, shape index: {}]   ;;  %s206_s3 = inlined_call_operand.vmem [shape: bf16[32,32], index: 3, kind: input, shape index: {}]   ;;  %s207_s1 = inlined_call_operand.vmem [shape: f32[1,32], index: 1, kind: input, shape index: {}]   ;;  %s208_s2 = inlined_call_operand.vmem [shape: f32[1,32], index: 2, kind: input, shape index: {}]   ;;  %s209_s4 = inlined_call_operand.vmem [shape: f32[1,32], index: 4, kind: input, shape index: {}]   ;;  %s210_s5 = inlined_call_operand.vmem [shape: f32[2,32], index: 5, kind: output, shape index: {}]  }
   0x1   :  { %v21_v0 = vld [vmem:[%s205_s0] sm:$0x3]  ;;  %135 = vmatprep.subr.bf16.mxu0 %v149_v8  ;;  %v146_v9 = vld [vmem:[%s206_s3 + $0x8] sm:$0xff]   ;;  %139 = vmatprep.mubr.msk.bf16.mxu0 %vm150_vm1, %v149_v8 }
   0x2   :  { %v25_v1 = vsel %vm24_vm0, %v21_v0, 0.0  ;;  %v145_v7 = vld [vmem:[%s206_s3] sm:$0xff]  }
   0x3   :  { %26 = vadd.xlane.f32.xlu0 %v25_v1  ;;  %136 = vmatpush3.bf16.msra.mxu0 %v145_v7  ;;  %v126_v14 = vld [vmem:[%s207_s1] ss:$0 sm:$0xff] }
   0x4   :  { %137 = vmatprep.subr.bf16.mxu0 %v149_v8  ;;  %v127_v16 = vld [vmem:[%s208_s2] ss:$0 sm:$0xff] }
   0x5   :  { %v128_v20 = vld [vmem:[%s209_s4] ss:$0 sm:$0xff] }
   0x7   :  { %138 = vmatpush3.bf16.msra.mxu0 %v146_v9 }
  0x90   :  { %v27_v2 = vpop.xlane.xlu0 %26 }
  0x91   :  { %v29_v3 = vmul.f32 0.03125, %v27_v2 }
  0x93   :  { %v30_v4 = vsub.f32 %v21_v0, %v29_v3 }
  0x95   :  { %v31_v5 = vmul.f32 %v30_v4, %v30_v4 }
  0x97   :  { %v32_v6 = vsel %vm24_vm0, %v31_v5, 0.0 }
  0x98   :  { %33 = vadd.xlane.f32.xlu0 %v32_v6 }
 0x125   :  { %v34_v10 = vpop.xlane.xlu0 %33 }
 0x126   :  { %v35_v11 = vmul.f32 0.03125, %v34_v10 }
 0x128   :  { %v36_v12 = vadd.f32 1e-05, %v35_v11 }
 0x12a   :  { %147 = vrsqrt.f32 %v36_v12 }
 0x134   :  { %v148_v13 = vpop.eup %147 }
 0x135   :  { %v38_v15 = vmul.f32 %v148_v13, %v30_v4 }
 0x137   :  { %v45_v17 = vmul.f32 %v126_v14, %v38_v15 }
 0x139   :  { %v52_v18 = vadd.f32 %v127_v16, %v45_v17 }
 0x13b   :  { %v57_v19 = vpack.c.bf16 %v52_v18, %v52_v18 }
 0x13d   :  { %140 = vmatmul.mubr.msk.bf16.vlgmr.msra.gmra.mrb[0].mxu0 %vm77_vm2, %v57_v19 }
 0x210   :  { %v115_v21 = vpop.f32.mrb[0].mxu0 }
 0x211   :  { %v116_v22 = vadd.f32 %v128_v20, %v115_v21  ;;  %v141_v23 = vpop.f32.mrb[1].mxu0 }
 0x212   :  { %v118_v24 = vpop.f32.mrb[2].mxu0 }
 0x213   :  { %121 = vst.msk [vmem:[%s210_s5] sm:$0x3] %vm24_vm0, %v116_v22  ;;  %v142_v25 = vpop.f32.mrb[3].mxu0 }

// kernel: clip_stochastic_forward.8
= control target key start
LH: loop header
LB: loop body
LE: loop exit
PB: predicated region body
PF: predicated region fallthrough
CT: control target
= control target key end

     0   :  { %s1246_s12 = smov 0   ;;  %s1417_s0 = inlined_call_operand.vmem [shape: f32[24,12,12], index: 0, kind: input, shape index: {}]   ;;  %s1418_s1 = inlined_call_operand.vmem [shape: f32[16,12], index: 1, kind: input, shape index: {}]   ;;  %s1419_s2 = inlined_call_operand.vmem [shape: f32[12,16], index: 2, kind: input, shape index: {}]   ;;  %s1420_s3 = inlined_call_operand.vmem [shape: f32[24,16,16], index: 3, kind: output, shape index: {}]  }
   0x1 LB: > { %s1019_s13 = sadd.s32 4294967295, %s1222_s12   ;;  %p1023_p0 = scmp.ge.s32.totalorder %s1222_s12, 1  ;;  %s1222_s12 = sphi %s1246_s12, %s13_s12  }
   0x2   : > { %p139_p1 = scmp.lt.s32.totalorder %s1222_s12, 4 }
   0x4   : > { %p140_p2 = pnand %p1023_p0, %p139_p1 }
   0x5   : > { %s1024_s14 = sshll.u32 (!%p140_p2), %s1019_s13, 3  ;;  %v1224_v0 = vmov (!%p140_p2), 0.0   ;;  %vm1225_vm0 = vmmov (!%p140_p2), 0   ;;  %v180_v1 = vld [vmem:[%s1418_s1] sm:$0xff] (!%p140_p2)  ;;  %v181_v2 = vld [vmem:[%s1418_s1 + $0x8] sm:$0xff] (!%p140_p2)  ;;  %vm193_vm1 = vcmask (!%p140_p2), 1045504  }
   0x6   : > { %143 = sbr.rel (%p140_p2) target bundleno = 510 (0x1fe), region = 32  ;;  %1110 = vmatprep.subr.bf16.mxu0 (!%p140_p2), %v1224_v0  ;;  %p166_p3 = scmp.lt.s32.totalorder (!%p140_p2), %s1024_s14, 23  ;;  %1112 = vmatprep.mubr.msk.bf16.mxu0 (!%p140_p2), %vm1225_vm0, %v1224_v0  ;;  %v182_v10 = vpack.c.bf16 (!%p140_p2), %v181_v2, %v180_v1  ;;  %vm189_vm2 = vcmask (!%p140_p2), 97280   ;;  %v183_v36 = vld [vmem:[%s1419_s2] sm:$0xff] (!%p140_p2)  ;;  %v184_v37 = vld [vmem:[%s1419_s2 + $0x8] sm:$0xf] (!%p140_p2) }
   0x7   : > { %1116 = vmatprep.subr.bf16.mxu1 (!%p140_p2), %v1224_v0  ;;  %1118 = vmatprep.mubr.msk.bf16.mxu1 (!%p140_p2), %vm1225_vm0, %v1224_v0  ;;  %v185_v38 = vpack.c.bf16 (!%p140_p2), %v184_v37, %v183_v36  ;;  %vm286_vm3 = vcmask (!%p140_p2), 130048  }
   0x9   : > { %v1336_v39 = vsel (!%p140_p2), %vm193_vm1, %v185_v38, 0 }
   0xa   : > { %1117 = vmatpush3.bf16.msra.mxu1 (!%p140_p2), %v1336_v39 }
   0xb   : > { %1128 = vmatprep.subr.bf16.mxu1 (!%p140_p2), %v1224_v0 }
   0xd   : > { %s1422_s14 = smov (!%p166_p3, %s1024_s14), 23 }
   0xe   : > { %s1076_s15 = sshll.u32 %s1422_s14, 4 }
   0xf   : > { %s1268_s18 = scalar_lea.vmem %s1417_s0, %s1076_s15  ;;  %s1380_s29 = scalar_lea.vmem %s1420_s3, %s1076_s15 }
  0x10   : > { %v186_v3 = vld [vmem:[%s1268_s18] sm:$0xff]  ;;  %v187_v4 = vld [vmem:[%s1268_s18 + $0x8] sm:$0xf]  ;;  %v1032_v5 = vld [vmem:[%s1268_s18 + $0x10] sm:$0xff] }
  0x11   : > { %v188_v6 = vpack.c.bf16 %v187_v4, %v186_v3  ;;  %v1033_v7 = vld [vmem:[%s1268_s18 + $0x18] sm:$0xf]  ;;  %v1038_v12 = vld [vmem:[%s1268_s18 + $0x20] sm:$0xff]  ;;  %v1039_v13 = vld [vmem:[%s1268_s18 + $0x28] sm:$0xf] }
  0x12   : > { %v292_v8 = vpack.c.bf16 %v1033_v7, %v1032_v5  ;;  %v388_v14 = vpack.c.bf16 %v1039_v13, %v1038_v12  ;;  %v1044_v16 = vld [vmem:[%s1268_s18 + $0x30] sm:$0xff]  ;;  %v1045_v17 = vld [vmem:[%s1268_s18 + $0x38] sm:$0xf]  ;;  %v1050_v20 = vld [vmem:[%s1268_s18 + $0x40] sm:$0xff] }
  0x13   : > { %v195_v9 = vsel %vm193_vm1, %v188_v6, 0  ;;  %v484_v18 = vpack.c.bf16 %v1045_v17, %v1044_v16  ;;  %v1051_v21 = vld [vmem:[%s1268_s18 + $0x48] sm:$0xf]  ;;  %v1056_v24 = vld [vmem:[%s1268_s18 + $0x50] sm:$0xff]  ;;  %v1057_v25 = vld [vmem:[%s1268_s18 + $0x58] sm:$0xf] }
  0x14   : > { %1111 = vmatpush3.bf16.msra.mxu0 %v195_v9  ;;  %v294_v11 = vsel %vm193_vm1, %v292_v8, 0  ;;  %v390_v15 = vsel %vm193_vm1, %v388_v14, 0  ;;  %v580_v22 = vpack.c.bf16 %v1051_v21, %v1050_v20  ;;  %v676_v26 = vpack.c.bf16 %v1057_v25, %v1056_v24  ;;  %v1062_v28 = vld [vmem:[%s1268_s18 + $0x60] sm:$0xff]  ;;  %v1063_v29 = vld [vmem:[%s1268_s18 + $0x68] sm:$0xf]  ;;  %v1068_v32 = vld [vmem:[%s1268_s18 + $0x70] sm:$0xff] }
  0x15   : > { %1122 = vmatprep.subr.bf16.mxu0 %v1224_v0  ;;  %v486_v19 = vsel %vm193_vm1, %v484_v18, 0  ;;  %v772_v30 = vpack.c.bf16 %v1063_v29, %v1062_v28  ;;  %v1069_v33 = vld [vmem:[%s1268_s18 + $0x78] sm:$0xf] }
  0x16   : > { %v582_v23 = vsel %vm193_vm1, %v580_v22, 0  ;;  %v678_v27 = vsel %vm193_vm1, %v676_v26, 0  ;;  %v868_v34 = vpack.c.bf16 %v1069_v33, %v1068_v32 }
  0x17   : > { %1113 = vmatmul.mubr.msk.bf16.vlgmr.msra.gmra.mrb[0].mxu0 %vm189_vm2, %v182_v10  ;;  %v774_v31 = vsel %vm193_vm1, %v772_v30, 0 }
  0x18   : > { %1123 = vmatpush3.bf16.msra.mxu0 %v294_v11  ;;  %1124 = vmatprep.mubr.msk.bf16.mxu0 %vm1225_vm0, %v1224_v0  ;;  %v870_v35 = vsel %vm193_vm1, %v868_v34, 0 }
  0x19   : > { %1134 = vmatprep.subr.bf16.mxu0 %v1224_v0 }
  0x1f   : > { %1125 = vmatmul.mubr.msk.bf16.vlgmr.msra.gmra.mrb[4].mxu0 %vm189_vm2, %v182_v10 }
  0x20   : > { %1135 = vmatpush3.bf16.msra.mxu0 %v390_v15  ;;  %1136 = vmatprep.mubr.msk.bf16.mxu0 %vm1225_vm0, %v1224_v0 }
  0x21   : > { %1146 = vmatprep.subr.bf16.mxu0 %v1224_v0 }
  0x27   : > { %1137 = vmatmul.mubr.msk.bf16.vlgmr.msra.gmra.mrb[8].mxu0 %vm189_vm2, %v182_v10 }
  0x28   : > { %1147 = vmatpush3.bf16.msra.mxu0 %v486_v19  ;;  %1148 = vmatprep.mubr.msk.bf16.mxu0 %vm1225_vm0, %v1224_v0 }
  0x29   : > { %1158 = vmatprep.subr.bf16.mxu0 %v1224_v0 }
  0x2f   : > { %1149 = vmatmul.mubr.msk.bf16.vlgmr.msra.gmra.mrb[12].mxu0 %vm189_vm2, %v182_v10 }
  0x30   : > { %1159 = vmatpush3.bf16.msra.mxu0 %v582_v23  ;;  %1160 = vmatprep.mubr.msk.bf16.mxu0 %vm1225_vm0, %v1224_v0 }
  0x31   : > { %1170 = vmatprep.subr.bf16.mxu0 %v1224_v0 }
  0x37   : > { %1161 = vmatmul.mubr.msk.bf16.vlgmr.msra.gmra.mrb[16].mxu0 %vm189_vm2, %v182_v10 }
  0x38   : > { %1171 = vmatpush3.bf16.msra.mxu0 %v678_v27  ;;  %1172 = vmatprep.mubr.msk.bf16.mxu0 %vm1225_vm0, %v1224_v0 }
  0x39   : > { %1182 = vmatprep.subr.bf16.mxu0 %v1224_v0 }
  0x3f   : > { %1173 = vmatmul.mubr.msk.bf16.vlgmr.msra.gmra.mrb[20].mxu0 %vm189_vm2, %v182_v10 }
  0x40   : > { %1183 = vmatpush3.bf16.msra.mxu0 %v774_v31  ;;  %1184 = vmatprep.mubr.msk.bf16.mxu0 %vm1225_vm0, %v1224_v0 }
  0x41   : > { %1194 = vmatprep.subr.bf16.mxu0 %v1224_v0 }
  0x47   : > { %1185 = vmatmul.mubr.msk.bf16.vlgmr.msra.gmra.mrb[24].mxu0 %vm189_vm2, %v182_v10 }
  0x48   : > { %1195 = vmatpush3.bf16.msra.mxu0 %v870_v35  ;;  %1196 = vmatprep.mubr.msk.bf16.mxu0 %vm1225_vm0, %v1224_v0 }
  0x4f   : > { %1197 = vmatmul.mubr.msk.bf16.vlgmr.msra.gmra.mrb[28].mxu0 %vm189_vm2, %v182_v10 }
  0xea   : > { %v231_v40 = vpop.f32.mrb[0].mxu0 }
  0xeb   : > { %v1114_v41 = vpop.f32.mrb[1].mxu0 }
  0xec   : > { %v234_v42 = vpop.f32.mrb[2].mxu0 }
  0xed   : > { %v238_v43 = vpack.c.bf16 %v234_v42, %v231_v40  ;;  %v1115_v44 = vpop.f32.mrb[3].mxu0 }
  0xef   : > { %1119 = vmatmul.mubr.msk.bf16.vlgmr.msra.gmra.mrb[0].mxu1 %vm189_vm2, %v238_v43 }
  0xf0   : > { %1129 = vmatpush3.bf16.msra.mxu1 %v1336_v39  ;;  %1130 = vmatprep.mubr.msk.bf16.mxu1 %vm1225_vm0, %v1224_v0 }
  0xf1   : > { %1140 = vmatprep.subr.bf16.mxu1 %v1224_v0 }
  0xf2   : > { %v330_v45 = vpop.f32.mrb[4].mxu0 }
  0xf3   : > { %v1126_v46 = vpop.f32.mrb[5].mxu0 }
  0xf4   : > { %v333_v47 = vpop.f32.mrb[6].mxu0 }
  0xf5   : > { %v337_v48 = vpack.c.bf16 %v333_v47, %v330_v45  ;;  %v1127_v49 = vpop.f32.mrb[7].mxu0 }
  0xf7   : > { %1131 = vmatmul.mubr.msk.bf16.vlgmr.msra.gmra.mrb[4].mxu1 %vm189_vm2, %v337_v48 }
  0xf8   : > { %1141 = vmatpush3.bf16.msra.mxu1 %v1336_v39  ;;  %1142 = vmatprep.mubr.msk.bf16.mxu1 %vm1225_vm0, %v1224_v0 }
  0xf9   : > { %1152 = vmatprep.subr.bf16.mxu1 %v1224_v0 }
  0xfa   : > { %v426_v50 = vpop.f32.mrb[8].mxu0 }
  0xfb   : > { %v1138_v51 = vpop.f32.mrb[9].mxu0 }
  0xfc   : > { %v429_v52 = vpop.f32.mrb[10].mxu0 }
  0xfd   : > { %v433_v53 = vpack.c.bf16 %v429_v52, %v426_v50  ;;  %v1139_v54 = vpop.f32.mrb[11].mxu0 }
  0xff   : > { %1143 = vmatmul.mubr.msk.bf16.vlgmr.msra.gmra.mrb[8].mxu1 %vm189_vm2, %v433_v53 }
 0x100   : > { %1153 = vmatpush3.bf16.msra.mxu1 %v1336_v39  ;;  %1154 = vmatprep.mubr.msk.bf16.mxu1 %vm1225_vm0, %v1224_v0 }
 0x101   : > { %1164 = vmatprep.subr.bf16.mxu1 %v1224_v0 }
 0x102   : > { %v522_v55 = vpop.f32.mrb[12].mxu0 }
 0x103   : > { %v1150_v56 = vpop.f32.mrb[13].mxu0 }
 0x104   : > { %v525_v57 = vpop.f32.mrb[14].mxu0 }
 0x105   : > { %v529_v58 = vpack.c.bf16 %v525_v57, %v522_v55  ;;  %v1151_v59 = vpop.f32.mrb[15].mxu0 }
 0x107   : > { %1155 = vmatmul.mubr.msk.bf16.vlgmr.msra.gmra.mrb[12].mxu1 %vm189_vm2, %v529_v58 }
 0x108   : > { %1165 = vmatpush3.bf16.msra.mxu1 %v1336_v39  ;;  %1166 = vmatprep.mubr.msk.bf16.mxu1 %vm1225_vm0, %v1224_v0 }
 0x109   : > { %1176 = vmatprep.subr.bf16.mxu1 %v1224_v0 }
 0x10a   : > { %v618_v60 = vpop.f32.mrb[16].mxu0 }
 0x10b   : > { %v1162_v61 = vpop.f32.mrb[17].mxu0 }
 0x10c   : > { %v621_v62 = vpop.f32.mrb[18].mxu0 }
 0x10d   : > { %v625_v63 = vpack.c.bf16 %v621_v62, %v618_v60  ;;  %v1163_v1 = vpop.f32.mrb[19].mxu0 }
 0x10f   : > { %1167 = vmatmul.mubr.msk.bf16.vlgmr.msra.gmra.mrb[16].mxu1 %vm189_vm2, %v625_v63 }
 0x110   : > { %1177 = vmatpush3.bf16.msra.mxu1 %v1336_v39  ;;  %1178 = vmatprep.mubr.msk.bf16.mxu1 %vm1225_vm0, %v1224_v0 }
 0x111   : > { %1188 = vmatprep.subr.bf16.mxu1 %v1224_v0 }
 0x112   : > { %v714_v2 = vpop.f32.mrb[20].mxu0 }
 0x113   : > { %v1174_v3 = vpop.f32.mrb[21].mxu0 }
 0x114   : > { %v717_v4 = vpop.f32.mrb[22].mxu0 }
 0x115   : > { %v721_v5 = vpack.c.bf16 %v717_v4, %v714_v2  ;;  %v1175_v6 = vpop.f32.mrb[23].mxu0 }
 0x117   : > { %1179 = vmatmul.mubr.msk.bf16.vlgmr.msra.gmra.mrb[20].mxu1 %vm189_vm2, %v721_v5 }
 0x118   : > { %1189 = vmatpush3.bf16.msra.mxu1 %v1336_v39  ;;  %1190 = vmatprep.mubr.msk.bf16.mxu1 %vm1225_vm0, %v1224_v0 }
 0x119   : > { %1200 = vmatprep.subr.bf16.mxu1 %v1224_v0 }
 0x11a   : > { %v810_v7 = vpop.f32.mrb[24].mxu0 }
 0x11b   : > { %v1186_v8 = vpop.f32.mrb[25].mxu0 }
 0x11c   : > { %v813_v9 = vpop.f32.mrb[26].mxu0 }
 0x11d   : > { %v817_v10 = vpack.c.bf16 %v813_v9, %v810_v7  ;;  %v1187_v11 = vpop.f32.mrb[27].mxu0 }
 0x11f   : > { %1191 = vmatmul.mubr.msk.bf16.vlgmr.msra.gmra.mrb[24].mxu1 %vm189_vm2, %v817_v10 }
 0x120   : > { %1201 = vmatpush3.bf16.msra.mxu1 %v1336_v39  ;;  %1202 = vmatprep.mubr.msk.bf16.mxu1 %vm1225_vm0, %v1224_v0 }
 0x122   : > { %v906_v12 = vpop.f32.mrb[28].mxu0 }
 0x123   : > { %v1198_v13 = vpop.f32.mrb[29].mxu0 }
 0x124   : > { %v909_v14 = vpop.f32.mrb[30].mxu0 }
 0x125   : > { %v913_v15 = vpack.c.bf16 %v909_v14, %v906_v12  ;;  %v1199_v16 = vpop.f32.mrb[31].mxu0 }
 0x127   : > { %1203 = vmatmul.mubr.msk.bf16.vlgmr.msra.gmra.mrb[28].mxu1 %vm189_vm2, %v913_v15 }
 0x1c2   : > { %v279_v0 = vpop.f32.mrb[0].mxu1 }
 0x1c3   : > { %287 = vst.msk [vmem:[%s1380_s29] sm:$0xff] %vm286_vm3, %v279_v0  ;;  %v1120_v17 = vpop.f32.mrb[1].mxu1 }
 0x1c4   : > { %v282_v18 = vpop.f32.mrb[2].mxu1 }
 0x1c5   : > { %288 = vst.msk [vmem:[%s1380_s29 + $0x8] sm:$0xff] %vm286_vm3, %v282_v18  ;;  %v1121_v19 = vpop.f32.mrb[3].mxu1 }
 0x1ca   : > { %v375_v20 = vpop.f32.mrb[4].mxu1 }
 0x1cb   : > { %1036 = vst.msk [vmem:[%s1380_s29 + $0x10] sm:$0xff] %vm286_vm3, %v375_v20  ;;  %v1132_v21 = vpop.f32.mrb[5].mxu1 }
 0x1cc   : > { %v378_v22 = vpop.f32.mrb[6].mxu1 }
 0x1cd   : > { %1037 = vst.msk [vmem:[%s1380_s29 + $0x18] sm:$0xff] %vm286_vm3, %v378_v22  ;;  %v1133_v23 = vpop.f32.mrb[7].mxu1 }
 0x1d2   : > { %v471_v24 = vpop.f32.mrb[8].mxu1 }
 0x1d3   : > { %1042 = vst.msk [vmem:[%s1380_s29 + $0x20] sm:$0xff] %vm286_vm3, %v471_v24  ;;  %v1144_v25 = vpop.f32.mrb[9].mxu1 }
 0x1d4   : > { %v474_v26 = vpop.f32.mrb[10].mxu1 }
 0x1d5   : > { %1043 = vst.msk [vmem:[%s1380_s29 + $0x28] sm:$0xff] %vm286_vm3, %v474_v26  ;;  %v1145_v27 = vpop.f32.mrb[11].mxu1 }
 0x1da   : > { %v567_v28 = vpop.f32.mrb[12].mxu1 }
 0x1db   : > { %1048 = vst.msk [vmem:[%s1380_s29 + $0x30] sm:$0xff] %vm286_vm3, %v567_v28  ;;  %v1156_v29 = vpop.f32.mrb[13].mxu1 }
 0x1dc   : > { %v570_v30 = vpop.f32.mrb[14].mxu1 }
 0x1dd   : > { %1049 = vst.msk [vmem:[%s1380_s29 + $0x38] sm:$0xff] %vm286_vm3, %v570_v30  ;;  %v1157_v31 = vpop.f32.mrb[15].mxu1 }
 0x1e2   : > { %v663_v32 = vpop.f32.mrb[16].mxu1 }
 0x1e3   : > { %1054 = vst.msk [vmem:[%s1380_s29 + $0x40] sm:$0xff] %vm286_vm3, %v663_v32  ;;  %v1168_v33 = vpop.f32.mrb[17].mxu1 }
 0x1e4   : > { %v666_v34 = vpop.f32.mrb[18].mxu1 }
 0x1e5   : > { %1055 = vst.msk [vmem:[%s1380_s29 + $0x48] sm:$0xff] %vm286_vm3, %v666_v34  ;;  %v1169_v35 = vpop.f32.mrb[19].mxu1 }
 0x1ea   : > { %v759_v36 = vpop.f32.mrb[20].mxu1 }
 0x1eb   : > { %1060 = vst.msk [vmem:[%s1380_s29 + $0x50] sm:$0xff] %vm286_vm3, %v759_v36  ;;  %v1180_v37 = vpop.f32.mrb[21].mxu1 }
 0x1ec   : > { %v762_v38 = vpop.f32.mrb[22].mxu1 }
 0x1ed   : > { %1061 = vst.msk [vmem:[%s1380_s29 + $0x58] sm:$0xff] %vm286_vm3, %v762_v38  ;;  %v1181_v39 = vpop.f32.mrb[23].mxu1 }
 0x1f2   : > { %v855_v40 = vpop.f32.mrb[24].mxu1 }
 0x1f3   : > { %1066 = vst.msk [vmem:[%s1380_s29 + $0x60] sm:$0xff] %vm286_vm3, %v855_v40  ;;  %v1192_v41 = vpop.f32.mrb[25].mxu1 }
 0x1f4   : > { %v858_v42 = vpop.f32.mrb[26].mxu1 }
 0x1f5   : > { %1067 = vst.msk [vmem:[%s1380_s29 + $0x68] sm:$0xff] %vm286_vm3, %v858_v42  ;;  %v1193_v43 = vpop.f32.mrb[27].mxu1 }
 0x1fa   : > { %v951_v44 = vpop.f32.mrb[28].mxu1 }
 0x1fb   : > { %1072 = vst.msk [vmem:[%s1380_s29 + $0x70] sm:$0xff] %vm286_vm3, %v951_v44  ;;  %v1204_v45 = vpop.f32.mrb[29].mxu1 }
 0x1fc   : > { %v954_v46 = vpop.f32.mrb[30].mxu1 }
 0x1fd   : > { %1073 = vst.msk [vmem:[%s1380_s29 + $0x78] sm:$0xff] %vm286_vm3, %v954_v46  ;;  %v1205_v47 = vpop.f32.mrb[31].mxu1 }
 0x1fe PF: > { %s13_s12 = sadd.s32 1, %s1222_s12  }
 0x1ff   : > { %p10_p4 = scmp.ge.s32.totalorder %s13_s12, 5  }
 0x201   :  { %12 = sbr.rel (!%p10_p4) target bundleno = 1 (0x1), region = 76 }

// kernel: clip_stochastic_forward.11
= control target key start
LH: loop header
LB: loop body
LE: loop exit
PB: predicated region body
PF: predicated region fallthrough
CT: control target
= control target key end

     0   :  { %v247_v0 = vmov 0   ;;  %vm130_vm0 = vcmask 523264   ;;  %vm186_vm1 = vcmask 261120   ;;  %s367_s1 = inlined_call_operand.vmem [shape: bf16[192,32], index: 1, kind: input, shape index: {}]   ;;  %s368_s0 = inlined_call_operand.vmem [shape: f32[32,192], index: 0, kind: input, shape index: {}]   ;;  %s369_s2 = inlined_call_operand.vmem [shape: f32[1,32], index: 2, kind: input, shape index: {}]   ;;  %s370_s3 = inlined_call_operand.vmem [shape: f32[32,32], index: 3, kind: output, shape index: {}]  }
   0x1   :  { %137 = vmatprep.subr.bf16.mxu0 %v247_v0  ;;  %210 = vmatprep.subr.bf16.mxu1 %v247_v0  ;;  %v235_v1 = vld [vmem:[%s367_s1] sm:$0xff]   ;;  %v236_v2 = vld [vmem:[%s367_s1 + $0x8] sm:$0xff]   ;;  %v237_v3 = vld [vmem:[%s367_s1 + $0x10] sm:$0xff]  }
   0x2   :  { %138 = vmatpush1.bf16.msra.mxu0 %v235_v1  ;;  %222 = vmatpush1.bf16.msra.mxu1 %v235_v1  ;;  %v238_v4 = vld [vmem:[%s367_s1 + $0x18] sm:$0xff]   ;;  %v16_v5 = vld [vmem:[%s368_s0 + $0x8] sm:$0xff]  ;;  %v239_v10 = vld [vmem:[%s367_s1 + $0x20] sm:$0xff]  }
   0x3   :  { %139 = vmatprep.subr.bf16.mxu0 %v247_v0  ;;  %211 = vmatprep.subr.bf16.mxu1 %v247_v0  ;;  %v18_v6 = vld [vmem:[%s368_s0 + $0x18] sm:$0xff]  ;;  %v20_v7 = vld [vmem:[%s368_s0 + $0x28] sm:$0xff]  ;;  %v241_v13 = vld [vmem:[%s367_s1 + $0x30] sm:$0xff]  }
   0x4   :  { %v48_v8 = vpack.c.bf16 %v18_v6, %v16_v5  ;;  %v22_v9 = vld [vmem:[%s368_s0 + $0x38] sm:$0xff]  ;;  %v240_v12 = vld [vmem:[%s367_s1 + $0x28] sm:$0xff]   ;;  %v243_v15 = vld [vmem:[%s367_s1 + $0x40] sm:$0xff]  }
   0x5   :  { %v50_v11 = vpack.c.bf16 %v22_v9, %v20_v7  ;;  %v242_v14 = vld [vmem:[%s367_s1 + $0x38] sm:$0xff]   ;;  %v244_v16 = vld [vmem:[%s367_s1 + $0x48] sm:$0xff]   ;;  %v245_v17 = vld [vmem:[%s367_s1 + $0x50] sm:$0xff]  }
   0x6   :  { %140 = vmatpush1.bf16.msra.mxu0 %v236_v2  ;;  %223 = vmatpush1.bf16.msra.mxu1 %v236_v2  ;;  %v246_v18 = vld [vmem:[%s367_s1 + $0x58] sm:$0xff]   ;;  %v15_v19 = vld [vmem:[%s368_s0] sm:$0xff]  ;;  %v17_v20 = vld [vmem:[%s368_s0 + $0x10] sm:$0xff] }
   0x7   :  { %141 = vmatprep.subr.bf16.mxu0 %v247_v0  ;;  %212 = vmatprep.subr.bf16.mxu1 %v247_v0  ;;  %v19_v21 = vld [vmem:[%s368_s0 + $0x20] sm:$0xff]  ;;  %v21_v22 = vld [vmem:[%s368_s0 + $0x30] sm:$0xff]  ;;  %v47_v23 = vpack.c.bf16 %v17_v20, %v15_v19 }
   0x8   :  { %208 = vmatprep.mubr.msk.bf16.mxu0 %vm130_vm0, %v48_v8  ;;  %209 = vmatprep.mubr.msk.bf16.mxu1 %vm130_vm0, %v50_v11  ;;  %v49_v24 = vpack.c.bf16 %v21_v22, %v19_v21  ;;  %v195_v25 = vld [vmem:[%s369_s2] ss:$0 sm:$0xff] }
   0xa   :  { %142 = vmatpush1.bf16.msra.mxu0 %v237_v3  ;;  %224 = vmatpush1.bf16.msra.mxu1 %v237_v3 }
   0xb   :  { %143 = vmatprep.subr.bf16.mxu0 %v247_v0  ;;  %213 = vmatprep.subr.bf16.mxu1 %v247_v0 }
   0xe   :  { %144 = vmatpush1.bf16.msra.mxu0 %v238_v4  ;;  %225 = vmatpush1.bf16.msra.mxu1 %v238_v4 }
   0xf   :  { %145 = vmatprep.subr.bf16.mxu0 %v247_v0  ;;  %214 = vmatprep.subr.bf16.mxu1 %v247_v0 }
  0x12   :  { %146 = vmatpush1.bf16.msra.mxu0 %v239_v10  ;;  %226 = vmatpush1.bf16.msra.mxu1 %v239_v10 }
  0x13   :  { %147 = vmatprep.subr.bf16.mxu0 %v247_v0  ;;  %215 = vmatprep.subr.bf16.mxu1 %v247_v0 }
  0x16   :  { %148 = vmatpush1.bf16.msra.mxu0 %v240_v12  ;;  %227 = vmatpush1.bf16.msra.mxu1 %v240_v12 }
  0x17   :  { %149 = vmatprep.subr.bf16.mxu0 %v247_v0  ;;  %216 = vmatprep.subr.bf16.mxu1 %v247_v0 }
  0x1a   :  { %150 = vmatpush1.bf16.msra.mxu0 %v241_v13  ;;  %228 = vmatpush1.bf16.msra.mxu1 %v241_v13 }
  0x1b   :  { %151 = vmatprep.subr.bf16.mxu0 %v247_v0  ;;  %217 = vmatprep.subr.bf16.mxu1 %v247_v0 }
  0x1e   :  { %152 = vmatpush1.bf16.msra.mxu0 %v242_v14  ;;  %229 = vmatpush1.bf16.msra.mxu1 %v242_v14 }
  0x1f   :  { %153 = vmatprep.subr.bf16.mxu0 %v247_v0  ;;  %218 = vmatprep.subr.bf16.mxu1 %v247_v0 }
  0x22   :  { %154 = vmatpush1.bf16.msra.mxu0 %v243_v15  ;;  %230 = vmatpush1.bf16.msra.mxu1 %v243_v15 }
  0x23   :  { %155 = vmatprep.subr.bf16.mxu0 %v247_v0  ;;  %219 = vmatprep.subr.bf16.mxu1 %v247_v0 }
  0x26   :  { %156 = vmatpush1.bf16.msra.mxu0 %v244_v16  ;;  %231 = vmatpush1.bf16.msra.mxu1 %v244_v16 }
  0x27   :  { %157 = vmatprep.subr.bf16.mxu0 %v247_v0  ;;  %220 = vmatprep.subr.bf16.mxu1 %v247_v0 }
  0x2a   :  { %158 = vmatpush1.bf16.msra.mxu0 %v245_v17  ;;  %232 = vmatpush1.bf16.msra.mxu1 %v245_v17 }
  0x2b   :  { %159 = vmatprep.subr.bf16.mxu0 %v247_v0  ;;  %221 = vmatprep.subr.bf16.mxu1 %v247_v0 }
  0x2e   :  { %160 = vmatpush1.bf16.msra.mxu0 %v246_v18  ;;  %233 = vmatpush1.bf16.msra.mxu1 %v246_v18 }
  0x31   :  { %170 = vmatmul.mubr.bf16.vlgmr.msra.gmra.mrb[0].mxu0 %v47_v23  ;;  %178 = vmatmul.mubr.bf16.vlgmr.msra.gmra.mrb[0].mxu1 %v49_v24 }
 0x104   :  { %v171_v26 = vpop.f32.mrb[0].mxu0  ;;  %v179_v27 = vpop.f32.mrb[0].mxu1 }
 0x105   :  { %v172_v28 = vadd.f32 %v195_v25, %v171_v26  ;;  %v180_v29 = vadd.f32 %v195_v25, %v179_v27  ;;  %v173_v30 = vpop.f32.mrb[1].mxu0  ;;  %v181_v31 = vpop.f32.mrb[1].mxu1 }
 0x106   :  { %v174_v32 = vpop.f32.mrb[2].mxu0  ;;  %v182_v33 = vpop.f32.mrb[2].mxu1 }
 0x107   :  { %187 = vst.msk [vmem:[%s370_s3] sm:$0xff] %vm186_vm1, %v172_v28  ;;  %189 = vst.msk [vmem:[%s370_s3 + $0x10] sm:$0xff] %vm186_vm1, %v180_v29  ;;  %v175_v34 = vadd.f32 %v195_v25, %v174_v32  ;;  %v183_v35 = vadd.f32 %v195_v25, %v182_v33  ;;  %v176_v36 = vpop.f32.mrb[3].mxu0  ;;  %v184_v37 = vpop.f32.mrb[3].mxu1 }
 0x109   :  { %188 = vst.msk [vmem:[%s370_s3 + $0x8] sm:$0xff] %vm186_vm1, %v175_v34  ;;  %190 = vst.msk [vmem:[%s370_s3 + $0x18] sm:$0xff] %vm186_vm1, %v183_v35 }

// kernel: clip_stochastic_forward.9
= control target key start
LH: loop header
LB: loop body
LE: loop exit
PB: predicated region body
PF: predicated region fallthrough
CT: control target
= control target key end

     0   :  { %s3120_s25 = smov 0   ;;  %s3122_s26 = smov 0   ;;  %s3571_s0 = inlined_call_operand.vmem [shape: f32[2,8,32], index: 0, kind: input, shape index: {}]   ;;  %s3572_s1 = inlined_call_operand.vmem [shape: f32[2,1,32], index: 1, kind: input, shape index: {}]   ;;  %s3573_s2 = inlined_call_operand.vmem [shape: f32[2,1,32], index: 2, kind: input, shape index: {}]   ;;  %s3574_s3 = inlined_call_operand.vmem [shape: bf16[2,32,96], index: 3, kind: input, shape index: {}]   ;;  %s3575_s4 = inlined_call_operand.vmem [shape: f32[2,1,96], index: 4, kind: input, shape index: {}]   ;;  %s3576_s5 = inlined_call_operand.vmem [shape: bf16[2,32,32], index: 5, kind: input, shape index: {}]   ;;  %s3577_s6 = inlined_call_operand.vmem [shape: f32[2,1,32], index: 6, kind: input, shape index: {}]   ;;  %s3578_s7 = inlined_call_operand.vmem [shape: f32[2,1,32], index: 7, kind: input, shape index: {}]   ;;  %s3579_s8 = inlined_call_operand.vmem [shape: f32[2,1,32], index: 8, kind: input, shape index: {}]   ;;  %s3580_s9 = inlined_call_operand.vmem [shape: bf16[2,32,128], index: 9, kind: input, shape index: {}]   ;;  %s3581_s10 = inlined_call_operand.vmem [shape: f32[2,1,128], index: 10, kind: input, shape index: {}]   ;;  %s3582_s11 = inlined_call_operand.vmem [shape: bf16[2,128,32], index: 11, kind: input, shape index: {}]   ;;  %s3583_s12 = inlined_call_operand.vmem [shape: f32[2,1,32], index: 12, kind: input, shape index: {}]   ;;  %s3584_s13 = inlined_call_operand.vmem [shape: f32[2,8,32], index: 13, kind: output, shape index: {}]  }
   0x1   :  { %3596 = sst [smem:[#allocation7_spill]] %s3574_s3  ;;  %s3124_s27 = smov 0  }
   0x2   :  { %3597 = sst [smem:[#allocation8_spill]] %s3576_s5 }
   0x3   :  { %3598 = sst [smem:[#allocation9_spill]] %s3584_s13 }
   0x4 LB: > { %3599 = sst [smem:[#allocation3_spill]] %s3027_s26  ;;  %s32_s28 = sadd.s32 1, %s3027_s26  ;;  %s3031_s27 = sphi %s3124_s27, %s23_s27   ;;  %s3027_s26 = sphi %s3122_s26, %s3621_s26   ;;  %s3023_s25 = sphi %s3120_s25, %s3620_s25  }
   0x5   : > { %3600 = sst [smem:[#allocation4_spill]] %s3031_s27  ;;  %p2556_p0 = scmp.ge.s32.totalorder %s3031_s27, 1 }
   0x6   : > { %p33_p1 = scmp.ge.s32.totalorder %s32_s28, 2  ;;  %p504_p2 = scmp.lt.s32.totalorder %s3031_s27, 3 }
   0x8   : > { %s3623_s28 = smov (%p33_p1, %s32_s28), 0  ;;  %p505_p3 = pnand %p2556_p0, %p504_p2 }
   0x9   : > { %3601 = sst [smem:[#allocation5_spill]] %s3623_s28 }
   0xa   : > { %508 = sbr.rel (%p505_p3) target bundleno = 5401 (0x1519), region = 72 }
  0x11   : > { %p598_p4 = scmp.lt.s32.totalorder %s3023_s25, 1  ;;  %s3602_s3 = sld [smem:[#allocation7_spill]] }
  0x12   : > { %s3603_s5 = sld [smem:[#allocation8_spill]]  ;;  %p2565_p5 = scmp.ne.s32.totalorder %s3023_s25, 0 }
  0x13   : > { %s3138_s29 = scalar_select %p598_p4, %s3023_s25, 1 }
  0x14   : > { %652 = sbr.rel (%p2565_p5) target bundleno = 27 (0x1b), region = 76  ;;  %v653_v0 = vld [vmem:[%s3571_s0] sm:$0xff] (!%p2565_p5)  ;;  %vm655_vm0 = vcmask (!%p2565_p5), 261120   ;;  %v654_v1 = vld [vmem:[%s3571_s0 + $0x8] sm:$0xff] (!%p2565_p5) }
  0x15   : > { %s2636_s19 = sshll.u32 %s3138_s29, 4  ;;  %s622_s13 = scalar_lea.vmem %s3578_s7, %s3138_s29  ;;  %656 = vst.msk [vmem:[#allocation2] sm:$0xff] (!%p2565_p5), %vm655_vm0, %v653_v0  ;;  %657 = vst.msk [vmem:[#allocation2 + $0x8] sm:$0xff] (!%p2565_p5), %vm655_vm0, %v654_v1 }
  0x16   : > { %s625_s22 = scalar_lea.vmem %s3579_s8, %s3138_s29  ;;  %s641_s20 = scalar_lea.vmem %s3583_s12, %s3138_s29 }
  0x17   : > { %s3156_s30 = scalar_lea.vmem %s3602_s3, %s2636_s19  ;;  %s3178_s3 = scalar_lea.vmem %s3580_s9, %s2636_s19 }
  0x18   : > { %s3161_s26 = scalar_lea.vmem %s3603_s5, %s2636_s19  ;;  %s633_s5 = scalar_lea.vmem %s3581_s10, %s3138_s29 }
  0x19   : > { %3604 = sst [smem:[#allocation6_spill]] %s3161_s26  ;;  %s2639_s26 = sshll.u32 %s3138_s29, 6 }
  0x1a   : > { %s3188_s16 = scalar_lea.vmem %s3582_s11, %s2639_s26 }
  0x1b PF: > { %vm667_vm1 = vcmask 261120   ;;  %v2933_v9 = vld [vmem:[%s3156_s30] sm:$0xff]   ;;  %v3033_v10 = vmov 0.0   ;;  %vm3034_vm2 = vmmov 0   ;;  %v2934_v11 = vld [vmem:[%s3156_s30 + $0x8] sm:$0xff]   ;;  %s3605_s28 = scalar_lea.vmem %s3572_s1, %s3138_s29  ;;  %s3606_s15 = scalar_lea.vmem %s3573_s2, %s3138_s29  ;;  %vm767_vm3 = vcmask 64512  }
  0x1c   : > { %v3200_v2 = vld [vmem:[#allocation2] sm:$0xff]  ;;  %2708 = vmatprep.subr.bf16.mxu1 %v3033_v10  ;;  %2712 = vmatprep.mubr.msk.bf16.mxu1 %vm3034_vm2, %v3033_v10  ;;  %s3607_s21 = scalar_lea.vmem %s3575_s4, %s3138_s29  ;;  %s3035_s23 = smov 64   ;;  %vm833_vm4 = vcmask 1043456   ;;  %v658_v33 = vlaneseq  ;;  %v3037_v37 = vmov -1e+09   ;;  %vm1226_vm6 = vcmask 130048  }
  0x1d   : > { %v668_v3 = vsel %vm667_vm1, %v3200_v2, 0.0  ;;  %2709 = vmatpush3.bf16.msra.mxu1 %v2933_v9  ;;  %2734 = vmatprep.subr.bf16.mxu0 %v3033_v10  ;;  %v3221_v16 = vld [vmem:[%s3605_s28] ss:$0 sm:$0xff]  ;;  %s3036_s19 = smov 96   ;;  %s3038_s24 = smov 80   ;;  %vm1228_vm7 = vcmask 195584  }
  0x1e   : > { %669 = vadd.xlane.f32.xlu0 %v668_v3  ;;  %2710 = vmatprep.subr.bf16.mxu1 %v3033_v10  ;;  %v3228_v18 = vld [vmem:[%s3606_s15] ss:$0 sm:$0xff]  ;;  %v659_v34 = vshrl.u32 %v658_v33, 7  ;;  %v661_v35 = vand.u32 127, %v658_v33  ;;  %s3039_s25 = smov 88   ;;  %s3040_s26 = smov 120  }
  0x1f   : > { %2736 = vmatprep.mubr.msk.bf16.mxu0 %vm3034_vm2, %v3033_v10  ;;  %v3240_v22 = vld [vmem:[%s3607_s21] ss:$0 sm:$0xff]  ;;  %s3041_s28 = smov 112   ;;  %s3042_s14 = smov 72  }
  0x20   : > { %vm662_vm5 = vcmp.le.s32.totalorder %v661_v35, %v659_v34  ;;  %s3595_s27 = smov 104   ;;  %s3591_s15 = smov 48  }
  0x21   : > { %2711 = vmatpush3.bf16.msra.mxu1 %v2934_v11  ;;  %v3257_v38 = vsel %vm662_vm5, 0.0, %v3037_v37  ;;  %s3590_s18 = smov 56   ;;  %s3589_s17 = smov 40  }
  0x22   : > { %2716 = vmatprep.subr.bf16.mxu1 %v3033_v10  ;;  %s3608_s21 = sld [smem:[#allocation6_spill]] }
  0xab   : > { %v670_v4 = vpop.xlane.xlu0 %669 }
  0xac   : > { %v672_v5 = vmul.f32 0.03125, %v670_v4 }
  0xae   : > { %v673_v6 = vsub.f32 %v3200_v2, %v672_v5 }
  0xb0   : > { %v674_v7 = vmul.f32 %v673_v6, %v673_v6 }
  0xb2   : > { %v675_v8 = vsel %vm667_vm1, %v674_v7, 0.0 }
  0xb3   : > { %676 = vadd.xlane.f32.xlu0 %v675_v8 }
 0x140   : > { %v677_v12 = vpop.xlane.xlu0 %676 }
 0x141   : > { %v678_v13 = vmul.f32 0.03125, %v677_v12 }
 0x143   : > { %v679_v14 = vadd.f32 1e-05, %v678_v13 }
 0x145   : > { %2961 = vrsqrt.f32 %v679_v14 }
 0x14f   : > { %v2962_v15 = vpop.eup %2961 }
 0x150   : > { %v681_v17 = vmul.f32 %v2962_v15, %v673_v6 }
 0x152   : > { %v688_v19 = vmul.f32 %v3221_v16, %v681_v17 }
 0x154   : > { %v695_v20 = vadd.f32 %v3228_v18, %v688_v19 }
 0x156   : > { %v700_v21 = vpack.c.bf16 %v695_v20, %v695_v20 }
 0x158   : > { %2713 = vmatmul.mubr.msk.bf16.vlgmr.msra.gmra.mrb[0].mxu1 %vm667_vm1, %v700_v21 }
 0x159   : > { %2718 = vmatprep.mubr.msk.bf16.mxu1 %vm3034_vm2, %v3033_v10 }
 0x22b   : > { %v757_v23 = vpop.f32.mrb[0].mxu1 }
 0x22c   : > { %v758_v24 = vadd.f32 %v3240_v22, %v757_v23  ;;  %v2714_v25 = vpop.f32.mrb[1].mxu1 }
 0x22d   : > { %v760_v26 = vpop.f32.mrb[2].mxu1 }
 0x22e   : > { %v3243_v27 = vpack.c.bf16 %v758_v24, %v758_v24  ;;  %v2715_v28 = vpop.f32.mrb[3].mxu1 }
 0x230   : > { %828 = vrot.lane.b32.xlu0 %v3243_v27, %s3035_s23  ;;  %765 = vrot.lane.b32.xlu1 %v3243_v27, %s3036_s19 }
 0x2a2   : > { %v766_v29 = vpop.permute.xlu1 %765  ;;  %v829_v31 = vpop.permute.xlu0 %828 }
 0x2a3   : > { %v772_v30 = vsel %vm767_vm3, %v766_v29, 0  ;;  %v835_v32 = vsel %vm833_vm4, %v829_v31, 0 }
 0x2a4   : > { %2717 = vmatpush3.bf16.xpose.msra.mxu1 %v772_v30 }
 0x2a5   : > { %2722 = vmatprep.subr.bf16.mxu1 %v3033_v10 }
 0x2ab   : > { %2719 = vmatmul.mubr.msk.bf16.vlgmr.msra.gmra.mrb[4].mxu1 %vm767_vm3, %v3243_v27 }
 0x2ac   : > { %2723 = vmatpush3.bf16.msra.mxu1 %v835_v32  ;;  %2724 = vmatprep.mubr.msk.bf16.mxu1 %vm3034_vm2, %v3033_v10 }
 0x2ad   : > { %2728 = vmatprep.subr.bf16.mxu1 %v3033_v10 }
 0x37e   : > { %v808_v36 = vpop.f32.mrb[4].mxu1 }
 0x37f   : > { %v814_v39 = vmul.f32 0.35355338, %v808_v36  ;;  %v2720_v40 = vpop.f32.mrb[5].mxu1 }
 0x380   : > { %v811_v41 = vpop.f32.mrb[6].mxu1 }
 0x381   : > { %v2721_v42 = vpop.f32.mrb[7].mxu1  ;;  %v815_v43 = vadd.f32 %v814_v39, %v3257_v38 }
 0x383   : > { %v816_v44 = vsel %vm767_vm3, %v815_v43, -inf }
 0x384   : > { %817 = vmax.xlane.f32.xlu1 %v816_v44 }
 0x395   : > { %991 = vrot.lane.b32.xlu1 %v3243_v27, %s3038_s24 }
 0x411   : > { %v818_v45 = vpop.xlane.xlu1 %817 }
 0x412   : > { %v819_v46 = vsub.f32 %v815_v43, %v818_v45 }
 0x414   : > { %v820_v47 = vmul.f32 1.442695, %v819_v46 }
 0x415   : > { %v992_v57 = vpop.permute.xlu1 %991 }
 0x416   : > { %2963 = vpow2.f32 %v820_v47  ;;  %v997_v59 = vsel %vm767_vm3, %v992_v57, 0 }
 0x420   : > { %v2964_v48 = vpop.eup %2963 }
 0x421   : > { %v822_v49 = vsel %vm767_vm3, %v2964_v48, 0.0 }
 0x422   : > { %823 = vadd.xlane.f32.xlu0 %v822_v49 }
 0x438   : > { %879 = vrot.lane.b32.xlu0 %v3243_v27, %s3039_s25 }
 0x43c   : > { %877 = vrot.lane.b32.xlu0 %v3243_v27, %s3040_s26 }
 0x440   : > { %989 = vrot.lane.b32.xlu0 %v3243_v27, %s3041_s28 }
 0x444   : > { %1103 = vrot.lane.b32.xlu0 %v3243_v27, %s3042_s14 }
 0x448   : > { %1101 = vrot.lane.b32.xlu0 %v3243_v27, %s3595_s27  ;;  %s3617_s27 = smov 16  }
 0x4af   : > { %v824_v50 = vpop.xlane.xlu0 %823 }
 0x4b0   : > { %2965 = vrcp.f32 %v824_v50 }
 0x4b3   : > { %v880_v52 = vpop.permute.xlu0 %879 }
 0x4b4   : > { %v885_v55 = vsel %vm767_vm3, %v880_v52, 0 }
 0x4b7   : > { %v878_v56 = vpop.permute.xlu0 %877 }
 0x4ba   : > { %v2966_v51 = vpop.eup %2965 }
 0x4bb   : > { %v826_v53 = vmul.f32 %v2966_v51, %v2964_v48  ;;  %v990_v58 = vpop.permute.xlu0 %989 }
 0x4bd   : > { %v827_v54 = vpack.c.bf16 %v826_v53, %v826_v53 }
 0x4bf   : > { %2725 = vmatmul.mubr.msk.bf16.vlgmr.msra.gmra.mrb[8].mxu1 %vm767_vm3, %v827_v54  ;;  %v1104_v60 = vpop.permute.xlu0 %1103 }
 0x4c0   : > { %2729 = vmatpush3.bf16.xpose.msra.mxu1 %v885_v55  ;;  %2730 = vmatprep.mubr.msk.bf16.mxu1 %vm3034_vm2, %v3033_v10  ;;  %v1109_v61 = vsel %vm767_vm3, %v1104_v60, 0 }
 0x4c1   : > { %2740 = vmatprep.subr.bf16.mxu1 %v3033_v10 }
 0x4c3   : > { %v1102_v62 = vpop.permute.xlu0 %1101 }
 0x4c7   : > { %2731 = vmatmul.mubr.msk.bf16.vlgmr.msra.gmra.mrb[12].mxu1 %vm767_vm3, %v878_v56 }
 0x4c8   : > { %2741 = vmatpush3.bf16.xpose.msra.mxu1 %v997_v59  ;;  %2742 = vmatprep.mubr.msk.bf16.mxu1 %vm3034_vm2, %v3033_v10 }
 0x4c9   : > { %2752 = vmatprep.subr.bf16.mxu1 %v3033_v10 }
 0x4cf   : > { %2743 = vmatmul.mubr.msk.bf16.vlgmr.msra.gmra.mrb[16].mxu1 %vm767_vm3, %v990_v58 }
 0x4d0   : > { %2753 = vmatpush3.bf16.xpose.msra.mxu1 %v1109_v61  ;;  %2754 = vmatprep.mubr.msk.bf16.mxu1 %vm3034_vm2, %v3033_v10 }
 0x4d1   : > { %2764 = vmatprep.subr.bf16.mxu1 %v3033_v10 }
 0x4d7   : > { %2755 = vmatmul.mubr.msk.bf16.vlgmr.msra.gmra.mrb[20].mxu1 %vm767_vm3, %v1102_v62 }
 0x4d8   : > { %2768 = vmatprep.mubr.msk.bf16.mxu1 %vm3034_vm2, %v3033_v10 }
 0x592   : > { %v3292_v63 = vpop.f32.mrb[8].mxu1 }
 0x593   : > { %v2726_v0 = vpop.f32.mrb[9].mxu1 }
 0x594   : > { %v874_v1 = vpop.f32.mrb[10].mxu1  ;;  %v2935_v0 = vld [vmem:[%s3608_s21] sm:$0xff]  }
 0x595   : > { %v2727_v3 = vpop.f32.mrb[11].mxu1  ;;  %2765 = vmatpush3.bf16.msra.mxu1 %v2935_v0 }
 0x596   : > { %2766 = vmatprep.subr.bf16.mxu1 %v3033_v10 }
 0x59a   : > { %v921_v4 = vpop.f32.mrb[12].mxu1 }
 0x59b   : > { %v927_v5 = vmul.f32 0.35355338, %v921_v4  ;;  %v2732_v6 = vpop.f32.mrb[13].mxu1 }
 0x59c   : > { %v924_v7 = vpop.f32.mrb[14].mxu1  ;;  %v2936_v6 = vld [vmem:[%s3608_s21 + $0x8] sm:$0xff]  }
 0x59d   : > { %v2733_v8 = vpop.f32.mrb[15].mxu1  ;;  %v928_v9 = vadd.f32 %v927_v5, %v3257_v38  ;;  %2767 = vmatpush3.bf16.msra.mxu1 %v2936_v6  ;;  %v2944_v6 = vld [vmem:[%s3188_s16 + $0x18] sm:$0xff]  }
 0x59e   : > { %2780 = vmatprep.subr.bf16.mxu1 %v3033_v10 }
 0x59f   : > { %v929_v11 = vsel %vm767_vm3, %v928_v9, -inf }
 0x5a0   : > { %930 = vmax.xlane.f32.xlu0 %v929_v11 }
 0x5a2   : > { %v1033_v12 = vpop.f32.mrb[16].mxu1 }
 0x5a3   : > { %v1039_v13 = vmul.f32 0.35355338, %v1033_v12  ;;  %v2744_v14 = vpop.f32.mrb[17].mxu1 }
 0x5a4   : > { %v1036_v15 = vpop.f32.mrb[18].mxu1 }
 0x5a5   : > { %v2745_v17 = vpop.f32.mrb[19].mxu1  ;;  %v1040_v19 = vadd.f32 %v1039_v13, %v3257_v38 }
 0x5a7   : > { %v1041_v20 = vsel %vm767_vm3, %v1040_v19, -inf }
 0x5a8   : > { %1042 = vmax.xlane.f32.xlu1 %v1041_v20 }
 0x5aa   : > { %v1145_v21 = vpop.f32.mrb[20].mxu1 }
 0x5ab   : > { %v1151_v23 = vmul.f32 0.35355338, %v1145_v21  ;;  %v2756_v24 = vpop.f32.mrb[21].mxu1 }
 0x5ac   : > { %v1148_v25 = vpop.f32.mrb[22].mxu1 }
 0x5ad   : > { %v2757_v26 = vpop.f32.mrb[23].mxu1  ;;  %v1152_v28 = vadd.f32 %v1151_v23, %v3257_v38 }
 0x5ae   : > { %v3338_v26 = vld [vmem:[#allocation2 + $0x8] sm:$0xff] }
 0x5af   : > { %v1153_v29 = vsel %vm767_vm3, %v1152_v28, -inf }
 0x5b0   : > { %1154 = vmax.xlane.f32.xlu0 %v1153_v29 }
 0x5b9   : > { %1053 = vrot.lane.b32.xlu1 %v3243_v27, %s3591_s15  ;;  %s3592_s15 = smov 24  }
 0x62d   : > { %v931_v30 = vpop.xlane.xlu0 %930 }
 0x62e   : > { %v932_v31 = vsub.f32 %v928_v9, %v931_v30 }
 0x630   : > { %v933_v32 = vmul.f32 1.442695, %v932_v31 }
 0x632   : > { %2967 = vpow2.f32 %v933_v32 }
 0x635   : > { %v1043_v33 = vpop.xlane.xlu1 %1042 }
 0x636   : > { %v1044_v34 = vsub.f32 %v1040_v19, %v1043_v33 }
 0x638   : > { %v1045_v35 = vmul.f32 1.442695, %v1044_v34 }
 0x639   : > { %v1054_v49 = vpop.permute.xlu1 %1053 }
 0x63a   : > { %2969 = vpow2.f32 %v1045_v35  ;;  %v1059_v55 = vsel %vm833_vm4, %v1054_v49, 0 }
 0x63c   : > { %v2968_v36 = vpop.eup %2967 }
 0x63d   : > { %v1155_v37 = vpop.xlane.xlu0 %1154  ;;  %v935_v39 = vsel %vm767_vm3, %v2968_v36, 0.0 }
 0x63e   : > { %v1156_v40 = vsub.f32 %v1152_v28, %v1155_v37  ;;  %936 = vadd.xlane.f32.xlu0 %v935_v39  ;;  %v1520_v28 = vsel %vm667_vm1, %v3338_v26, 0.0 }
 0x640   : > { %v1157_v41 = vmul.f32 1.442695, %v1156_v40 }
 0x642   : > { %2971 = vpow2.f32 %v1157_v41 }
 0x644   : > { %v2970_v42 = vpop.eup %2969 }
 0x645   : > { %v1047_v43 = vsel %vm767_vm3, %v2970_v42, 0.0 }
 0x646   : > { %1048 = vadd.xlane.f32.xlu0 %v1047_v43 }
 0x64c   : > { %v2972_v44 = vpop.eup %2971 }
 0x64d   : > { %v1159_v45 = vsel %vm767_vm3, %v2972_v44, 0.0 }
 0x64e   : > { %1160 = vadd.xlane.f32.xlu1 %v1159_v45 }
 0x65c   : > { %941 = vrot.lane.b32.xlu0 %v3243_v27, %s3590_s18  ;;  %s3593_s18 = smov 16  }
 0x65f   : > { %1165 = vrot.lane.b32.xlu1 %v3243_v27, %s3589_s17  ;;  %s3594_s17 = smov 8  }
 0x6cb   : > { %v937_v46 = vpop.xlane.xlu0 %936 }
 0x6cc   : > { %2973 = vrcp.f32 %v937_v46  ;;  %v2937_v46 = vld [vmem:[%s3178_s3] sm:$0xff]  }
 0x6d3   : > { %v1049_v47 = vpop.xlane.xlu0 %1048 }
 0x6d4   : > { %2975 = vrcp.f32 %v1049_v47  ;;  %v2938_v47 = vld [vmem:[%s3178_s3 + $0x8] sm:$0xff]  }
 0x6d6   : > { %v2974_v48 = vpop.eup %2973 }
 0x6d7   : > { %v942_v50 = vpop.permute.xlu0 %941  ;;  %v939_v51 = vmul.f32 %v2974_v48, %v2968_v36 }
 0x6d8   : > { %v947_v52 = vsel %vm833_vm4, %v942_v50, 0 }
 0x6d9   : > { %2735 = vmatpush3.bf16.msra.mxu0 %v947_v52  ;;  %v940_v53 = vpack.c.bf16 %v939_v51, %v939_v51 }
 0x6da   : > { %2746 = vmatprep.subr.bf16.mxu0 %v3033_v10 }
 0x6db   : > { %v1161_v54 = vpop.xlane.xlu1 %1160 }
 0x6dc   : > { %2977 = vrcp.f32 %v1161_v54  ;;  %2737 = vmatmul.mubr.msk.bf16.vlgmr.msra.gmra.mrb[0].mxu0 %vm767_vm3, %v940_v53 }
 0x6dd   : > { %2747 = vmatpush3.bf16.msra.mxu0 %v1059_v55  ;;  %2748 = vmatprep.mubr.msk.bf16.mxu0 %vm3034_vm2, %v3033_v10  ;;  %v3368_v55 = vld [vmem:[%s622_s13] ss:$0 sm:$0xff] }
 0x6de   : > { %v2976_v27 = vpop.eup %2975  ;;  %2758 = vmatprep.subr.bf16.mxu0 %v3033_v10 }
 0x6df   : > { %v1051_v56 = vmul.f32 %v2976_v27, %v2970_v42  ;;  %v1166_v57 = vpop.permute.xlu1 %1165 }
 0x6e0   : > { %v1171_v59 = vsel %vm833_vm4, %v1166_v57, 0 }
 0x6e1   : > { %v1052_v58 = vpack.c.bf16 %v1051_v56, %v1051_v56  ;;  %v3375_v56 = vld [vmem:[%s625_s22] ss:$0 sm:$0xff] }
 0x6e4   : > { %2749 = vmatmul.mubr.msk.bf16.vlgmr.msra.gmra.mrb[4].mxu0 %vm767_vm3, %v1052_v58 }
 0x6e5   : > { %2759 = vmatpush3.bf16.msra.mxu0 %v1171_v59  ;;  %2760 = vmatprep.mubr.msk.bf16.mxu0 %vm3034_vm2, %v3033_v10 }
 0x6e6   : > { %v2978_v60 = vpop.eup %2977  ;;  %2772 = vmatprep.subr.bf16.mxu0 %v3033_v10 }
 0x6e7   : > { %v1163_v61 = vmul.f32 %v2978_v60, %v2972_v44 }
 0x6e9   : > { %v1164_v62 = vpack.c.bf16 %v1163_v61, %v1163_v61  ;;  %v2939_v61 = vld [vmem:[%s3156_s30] sm:$0xff]  }
 0x6ec   : > { %2761 = vmatmul.mubr.msk.bf16.vlgmr.msra.gmra.mrb[8].mxu0 %vm767_vm3, %v1164_v62 }
 0x6ed   : > { %2776 = vmatprep.mubr.msk.bf16.mxu0 %vm3034_vm2, %v3033_v10  ;;  %2773 = vmatpush3.bf16.msra.mxu0 %v2937_v46 }
 0x6ee   : > { %2774 = vmatprep.subr.bf16.mxu0 %v3033_v10 }
 0x6f1   : > { %2775 = vmatpush3.bf16.msra.mxu0 %v2938_v47 }
 0x6f2   : > { %2800 = vmatprep.subr.bf16.mxu0 %v3033_v10 }
 0x7af   : > { %v983_v1 = vpop.f32.mrb[0].mxu0 }
 0x7b0   : > { %1214 = vrot.lane.b32.xlu1 %v983_v1, %s3594_s17  ;;  %v2738_v3 = vpop.f32.mrb[1].mxu0  ;;  %s3609_s17 = scalar_lea.vmem %s3577_s6, %s3138_s29  ;;  %v2940_v1 = vld [vmem:[%s3156_s30 + $0x8] sm:$0xff]   ;;  %s3612_s29 = smov 104  }
 0x7b1   : > { %v986_v4 = vpop.f32.mrb[2].mxu0 }
 0x7b2   : > { %v2739_v5 = vpop.f32.mrb[3].mxu0 }
 0x7b3   : > { %v2942_v5 = vld [vmem:[%s3188_s16 + $0x8] sm:$0xff]  }
 0x7b7   : > { %v1095_v7 = vpop.f32.mrb[4].mxu0 }
 0x7b8   : > { %1218 = vrot.lane.b32.xlu0 %v1095_v7, %s3593_s18  ;;  %v2750_v8 = vpop.f32.mrb[5].mxu0  ;;  %v2945_v7 = vld [vmem:[%s3188_s16 + $0x20] sm:$0xff]  }
 0x7b9   : > { %v1098_v9 = vpop.f32.mrb[6].mxu0  ;;  %v2946_v8 = vld [vmem:[%s3188_s16 + $0x28] sm:$0xff]  }
 0x7ba   : > { %v2751_v11 = vpop.f32.mrb[7].mxu0  ;;  %v2947_v9 = vld [vmem:[%s3188_s16 + $0x30] sm:$0xff]  }
 0x7bb   : > { %v2948_v11 = vld [vmem:[%s3188_s16 + $0x38] sm:$0xff]  }
 0x7bf   : > { %v1207_v12 = vpop.f32.mrb[8].mxu0 }
 0x7c0   : > { %1222 = vrot.lane.b32.xlu1 %v1207_v12, %s3592_s15  ;;  %v2762_v13 = vpop.f32.mrb[9].mxu0  ;;  %v3412_v12 = vld [vmem:[%s633_s5] ss:$0 sm:$0xff]  ;;  %s3618_s15 = smov 24  }
 0x7c1   : > { %v1210_v14 = vpop.f32.mrb[10].mxu0 }
 0x7c2   : > { %v2763_v15 = vpop.f32.mrb[11].mxu0 }
 0x7e4   : > { %1521 = vadd.xlane.f32.xlu1 %v1520_v28 }
 0x822   : > { %v1215_v17 = vpop.permute.xlu1 %1214 }
 0x823   : > { %v1225_v20 = vsel %vm767_vm3, %v3292_v63, %v1215_v17  ;;  %v3347_v63 = vld [vmem:[%s3609_s17] ss:$0 sm:$0xff] }
 0x82a   : > { %v1219_v19 = vpop.permute.xlu0 %1218 }
 0x82b   : > { %v1227_v21 = vsel %vm1226_vm6, %v1225_v20, %v1219_v19 }
 0x832   : > { %v1223_v23 = vpop.permute.xlu1 %1222 }
 0x833   : > { %v1229_v24 = vsel %vm1228_vm7, %v1227_v21, %v1223_v23 }
 0x834   : > { %v1234_v25 = vpack.c.bf16 %v1229_v24, %v1229_v24 }
 0x836   : > { %2769 = vmatmul.mubr.msk.bf16.vlgmr.msra.gmra.mrb[24].mxu1 %vm667_vm1, %v1234_v25 }
 0x837   : > { %2796 = vmatprep.mubr.msk.bf16.mxu1 %vm3034_vm2, %v3033_v10 }
 0x871   : > { %v1522_v36 = vpop.xlane.xlu1 %1521 }
 0x872   : > { %v1523_v37 = vmul.f32 0.03125, %v1522_v36 }
 0x874   : > { %v1524_v41 = vsub.f32 %v3338_v26, %v1523_v37 }
 0x876   : > { %v1525_v43 = vmul.f32 %v1524_v41, %v1524_v41 }
 0x878   : > { %v1526_v45 = vsel %vm667_vm1, %v1525_v43, 0.0 }
 0x909   : > { %v1284_v29 = vpop.f32.mrb[24].mxu1 }
 0x90a   : > { %v1290_v30 = vadd.f32 %v1284_v29, %v3200_v2  ;;  %v2770_v31 = vpop.f32.mrb[25].mxu1 }
 0x90b   : > { %v1287_v32 = vpop.f32.mrb[26].mxu1 }
 0x90c   : > { %v3351_v33 = vadd.f32 %v3347_v63, %v1290_v30  ;;  %v2771_v34 = vpop.f32.mrb[27].mxu1 }
 0x90e   : > { %v1301_v35 = vsel %vm667_vm1, %v3351_v33, 0.0 }
 0x90f   : > { %1302 = vadd.xlane.f32.xlu0 %v1301_v35 }
 0x99c   : > { %v1303_v39 = vpop.xlane.xlu0 %1302 }
 0x99d   : > { %v1304_v40 = vmul.f32 0.03125, %v1303_v39  ;;  %v3439_v39 = vld [vmem:[%s641_s20] ss:$0 sm:$0xff]  ;;  %s3613_s20 = smov 48  }
 0x99f   : > { %v1305_v2 = vsub.f32 %v3351_v33, %v1304_v40 }
 0x9a1   : > { %v1306_v42 = vmul.f32 %v1305_v2, %v1305_v2 }
 0x9a3   : > { %v1307_v44 = vsel %vm667_vm1, %v1306_v42, 0.0 }
 0x9a4   : > { %1308 = vadd.xlane.f32.xlu0 %v1307_v44 }
 0x9a8   : > { %1527 = vadd.xlane.f32.xlu0 %v1526_v45 }
 0xa31   : > { %v1309_v48 = vpop.xlane.xlu0 %1308 }
 0xa32   : > { %v1310_v49 = vmul.f32 0.03125, %v1309_v48 }
 0xa34   : > { %v1311_v50 = vadd.f32 1e-05, %v1310_v49 }
 0xa35   : > { %v1528_v51 = vpop.xlane.xlu0 %1527 }
 0xa36   : > { %2979 = vrsqrt.f32 %v1311_v50  ;;  %v1529_v52 = vmul.f32 0.03125, %v1528_v51 }
 0xa38   : > { %v1530_v53 = vadd.f32 1e-05, %v1529_v52 }
 0xa3a   : > { %2981 = vrsqrt.f32 %v1530_v53 }
 0xa40   : > { %v2980_v54 = vpop.eup %2979 }
 0xa41   : > { %v1313_v27 = vmul.f32 %v2980_v54, %v1305_v2 }
 0xa43   : > { %v1320_v57 = vmul.f32 %v3368_v55, %v1313_v27 }
 0xa44   : > { %v2982_v58 = vpop.eup %2981 }
 0xa45   : > { %v1532_v59 = vmul.f32 %v2982_v58, %v1524_v41  ;;  %v1327_v60 = vadd.f32 %v3375_v56, %v1320_v57 }
 0xa47   : > { %v1332_v62 = vpack.c.bf16 %v1327_v60, %v1327_v60  ;;  %v1539_v0 = vmul.f32 %v3221_v16, %v1532_v59  ;;  %v2941_v16 = vld [vmem:[%s3188_s16] sm:$0xff]  }
 0xa48   : > { %2781 = vmatpush3.bf16.msra.mxu1 %v2941_v16 }
 0xa49   : > { %2777 = vmatmul.mubr.msk.bf16.vlgmr.msra.gmra.mrb[12].mxu0 %vm667_vm1, %v1332_v62  ;;  %v1546_v3 = vadd.f32 %v3228_v18, %v1539_v0  ;;  %2782 = vmatprep.subr.bf16.mxu1 %v3033_v10  ;;  %v2943_v18 = vld [vmem:[%s3188_s16 + $0x10] sm:$0xff]  }
 0xa4a   : > { %2801 = vmatpush3.bf16.msra.mxu0 %v2939_v61  ;;  %2804 = vmatprep.mubr.msk.bf16.mxu0 %vm3034_vm2, %v3033_v10 }
 0xa4b   : > { %2802 = vmatprep.subr.bf16.mxu0 %v3033_v10  ;;  %v1551_v4 = vpack.c.bf16 %v1546_v3, %v1546_v3 }
 0xa4c   : > { %2783 = vmatpush3.bf16.msra.mxu1 %v2942_v5 }
 0xa4d   : > { %2784 = vmatprep.subr.bf16.mxu1 %v3033_v10 }
 0xa4e   : > { %2803 = vmatpush3.bf16.msra.mxu0 %v2940_v1 }
 0xa4f   : > { %2808 = vmatprep.subr.bf16.mxu0 %v3033_v10 }
 0xa50   : > { %2785 = vmatpush3.bf16.msra.mxu1 %v2943_v18 }
 0xa51   : > { %2805 = vmatmul.mubr.msk.bf16.vlgmr.msra.gmra.mrb[16].mxu0 %vm667_vm1, %v1551_v4  ;;  %2786 = vmatprep.subr.bf16.mxu1 %v3033_v10 }
 0xa52   : > { %2810 = vmatprep.mubr.msk.bf16.mxu0 %vm3034_vm2, %v3033_v10 }
 0xa54   : > { %2787 = vmatpush3.bf16.msra.mxu1 %v2944_v6 }
 0xa55   : > { %2788 = vmatprep.subr.bf16.mxu1 %v3033_v10 }
 0xa58   : > { %2789 = vmatpush3.bf16.msra.mxu1 %v2945_v7 }
 0xa59   : > { %2790 = vmatprep.subr.bf16.mxu1 %v3033_v10 }
 0xa5c   : > { %2791 = vmatpush3.bf16.msra.mxu1 %v2946_v8 }
 0xa5d   : > { %2792 = vmatprep.subr.bf16.mxu1 %v3033_v10 }
 0xa60   : > { %2793 = vmatpush3.bf16.msra.mxu1 %v2947_v9 }
 0xa61   : > { %2794 = vmatprep.subr.bf16.mxu1 %v3033_v10 }
 0xa64   : > { %2795 = vmatpush3.bf16.msra.mxu1 %v2948_v11 }
 0xa65   : > { %2826 = vmatprep.subr.bf16.mxu1 %v3033_v10 }
 0xb1c   : > { %v1389_v13 = vpop.f32.mrb[12].mxu0 }
 0xb1d   : > { %v1390_v14 = vadd.f32 %v3412_v12, %v1389_v13  ;;  %v2778_v15 = vpop.f32.mrb[13].mxu0 }
 0xb1e   : > { %v1392_v17 = vpop.f32.mrb[14].mxu0 }
 0xb1f   : > { %v1395_v19 = vmul.f32 -1.702, %v1390_v14  ;;  %v2779_v20 = vpop.f32.mrb[15].mxu0 }
 0xb21   : > { %v1396_v21 = vmul.f32 1.442695, %v1395_v19 }
 0xb23   : > { %2983 = vpow2.f32 %v1396_v21 }
 0xb24   : > { %v1608_v23 = vpop.f32.mrb[16].mxu0 }
 0xb25   : > { %v1609_v24 = vadd.f32 %v3240_v22, %v1608_v23  ;;  %v2806_v25 = vpop.f32.mrb[17].mxu0 }
 0xb26   : > { %v1611_v28 = vpop.f32.mrb[18].mxu0 }
 0xb27   : > { %v3416_v29 = vpack.c.bf16 %v1609_v24, %v1609_v24  ;;  %v2807_v30 = vpop.f32.mrb[19].mxu0 }
 0xb29   : > { %1616 = vrot.lane.b32.xlu0 %v3416_v29, %s3036_s19 }
 0xb2d   : > { %v2984_v31 = vpop.eup %2983  ;;  %1728 = vrot.lane.b32.xlu0 %v3416_v29, %s3039_s25  ;;  %s3610_s25 = sld [smem:[#allocation9_spill]] }
 0xb2e   : > { %v1398_v32 = vadd.f32 1.0, %v2984_v31 }
 0xb30   : > { %2985 = vrcp.f32 %v1398_v32 }
 0xb31   : > { %1840 = vrot.lane.b32.xlu0 %v3416_v29, %s3038_s24 }
 0xb35   : > { %1952 = vrot.lane.b32.xlu0 %v3416_v29, %s3042_s14  ;;  %s3611_s14 = smov %s3610_s25 }
 0xb3a   : > { %v2986_v22 = vpop.eup %2985 }
 0xb3b   : > { %v1401_v34 = vmul.f32 %v2986_v22, %v1390_v14 }
 0xb3d   : > { %v1418_v35 = vpack.c.bf16 %v1401_v34, %v1401_v34 }
 0xb3f   : > { %2797 = vmatmul.mubr.bf16.vlgmr.msra.gmra.mrb[28].mxu1 %v1418_v35 }
 0xb40   : > { %2828 = vmatprep.mubr.msk.bf16.mxu1 %vm3034_vm2, %v3033_v10 }
 0xb9b   : > { %v1617_v36 = vpop.permute.xlu0 %1616 }
 0xb9c   : > { %v1622_v37 = vsel %vm767_vm3, %v1617_v36, 0 }
 0xb9d   : > { %2809 = vmatpush3.bf16.xpose.msra.mxu0 %v1622_v37 }
 0xb9e   : > { %2814 = vmatprep.subr.bf16.mxu0 %v3033_v10 }
 0xb9f   : > { %v1729_v0 = vpop.permute.xlu0 %1728 }
 0xba0   : > { %v1734_v3 = vsel %vm767_vm3, %v1729_v0, 0 }
 0xba3   : > { %v1841_v4 = vpop.permute.xlu0 %1840 }
 0xba4   : > { %2811 = vmatmul.mubr.msk.bf16.vlgmr.msra.gmra.mrb[20].mxu0 %vm767_vm3, %v3416_v29  ;;  %v1846_v5 = vsel %vm767_vm3, %v1841_v4, 0 }
 0xba5   : > { %2816 = vmatprep.mubr.msk.bf16.mxu0 %vm3034_vm2, %v3033_v10 }
 0xba7   : > { %v1953_v18 = vpop.permute.xlu0 %1952 }
 0xba8   : > { %v1958_v7 = vsel %vm767_vm3, %v1953_v18, 0 }
 0xc12   : > { %v1508_v40 = vpop.f32.mrb[28].mxu1 }
 0xc13   : > { %v1509_v41 = vadd.f32 %v3439_v39, %v1508_v40  ;;  %v2798_v2 = vpop.f32.mrb[29].mxu1 }
 0xc14   : > { %v1511_v42 = vpop.f32.mrb[30].mxu1 }
 0xc15   : > { %v1514_v43 = vadd.f32 %v1509_v41, %v3351_v33  ;;  %v2799_v44 = vpop.f32.mrb[31].mxu1 }
 0xc17   : > { %1515 = vst.msk [vmem:[#allocation2] sm:$0xff] %vm667_vm1, %v1514_v43 }
 0xc1e   : > { %v2363_v45 = vld [vmem:[#allocation2] sm:$0xff] }
 0xc1f   : > { %2365 = vst.msk [vmem:[%s3610_s25] sm:$0xff] %vm667_vm1, %v2363_v45 }
 0xc77   : > { %v1658_v46 = vpop.f32.mrb[20].mxu0 }
 0xc78   : > { %v1664_v47 = vmul.f32 0.35355338, %v1658_v46  ;;  %v2812_v48 = vpop.f32.mrb[21].mxu0 }
 0xc79   : > { %v1661_v49 = vpop.f32.mrb[22].mxu0 }
 0xc7a   : > { %v2813_v50 = vpop.f32.mrb[23].mxu0  ;;  %v1665_v51 = vadd.f32 %v1664_v47, %v3257_v38 }
 0xc7c   : > { %v1666_v52 = vsel %vm767_vm3, %v1665_v51, -inf }
 0xc7d   : > { %1667 = vmax.xlane.f32.xlu1 %v1666_v52 }
 0xd0a   : > { %v1668_v33 = vpop.xlane.xlu1 %1667 }
 0xd0b   : > { %v1669_v53 = vsub.f32 %v1665_v51, %v1668_v33 }
 0xd0d   : > { %v1670_v54 = vmul.f32 1.442695, %v1669_v53 }
 0xd0f   : > { %2987 = vpow2.f32 %v1670_v54 }
 0xd19   : > { %v2988_v27 = vpop.eup %2987 }
 0xd1a   : > { %v1672_v57 = vsel %vm767_vm3, %v2988_v27, 0.0 }
 0xd1b   : > { %1673 = vadd.xlane.f32.xlu1 %v1672_v57 }
 0xd2c   : > { %1678 = vrot.lane.b32.xlu1 %v3416_v29, %s3035_s23  ;;  %s3614_s23 = smov 56  }
 0xd30   : > { %1726 = vrot.lane.b32.xlu1 %v3416_v29, %s3040_s26  ;;  %s3615_s26 = smov 40  }
 0xd34   : > { %1838 = vrot.lane.b32.xlu1 %v3416_v29, %s3041_s28  ;;  %s3616_s28 = smov 8  }
 0xd38   : > { %1950 = vrot.lane.b32.xlu1 %v3416_v29, %s3612_s29 }
 0xda8   : > { %v1674_v58 = vpop.xlane.xlu1 %1673 }
 0xda9   : > { %2989 = vrcp.f32 %v1674_v58 }
 0xdac   : > { %v1679_v59 = vpop.permute.xlu1 %1678 }
 0xdad   : > { %v1684_v60 = vsel %vm833_vm4, %v1679_v59, 0 }
 0xdae   : > { %2815 = vmatpush3.bf16.msra.mxu0 %v1684_v60 }
 0xdaf   : > { %2820 = vmatprep.subr.bf16.mxu0 %v3033_v10 }
 0xdb0   : > { %v1727_v16 = vpop.permute.xlu1 %1726 }
 0xdb3   : > { %v2990_v61 = vpop.eup %2989 }
 0xdb4   : > { %v1676_v62 = vmul.f32 %v2990_v61, %v2988_v27  ;;  %v1839_v6 = vpop.permute.xlu1 %1838 }
 0xdb6   : > { %v1677_v1 = vpack.c.bf16 %v1676_v62, %v1676_v62 }
 0xdb8   : > { %2817 = vmatmul.mubr.msk.bf16.vlgmr.msra.gmra.mrb[24].mxu0 %vm767_vm3, %v1677_v1  ;;  %v1951_v8 = vpop.permute.xlu1 %1950 }
 0xdb9   : > { %2821 = vmatpush3.bf16.xpose.msra.mxu0 %v1734_v3  ;;  %2822 = vmatprep.mubr.msk.bf16.mxu0 %vm3034_vm2, %v3033_v10 }
 0xdba   : > { %2832 = vmatprep.subr.bf16.mxu0 %v3033_v10 }
 0xdc0   : > { %2823 = vmatmul.mubr.msk.bf16.vlgmr.msra.gmra.mrb[28].mxu0 %vm767_vm3, %v1727_v16 }
 0xdc1   : > { %2833 = vmatpush3.bf16.xpose.msra.mxu0 %v1846_v5  ;;  %2834 = vmatprep.mubr.msk.bf16.mxu0 %vm3034_vm2, %v3033_v10 }
 0xdc2   : > { %2844 = vmatprep.subr.bf16.mxu0 %v3033_v10 }
 0xdc8   : > { %2835 = vmatmul.mubr.msk.bf16.vlgmr.msra.gmra.mrb[32].mxu0 %vm767_vm3, %v1839_v6 }
 0xdc9   : > { %2845 = vmatpush3.bf16.xpose.msra.mxu0 %v1958_v7  ;;  %2846 = vmatprep.mubr.msk.bf16.mxu0 %vm3034_vm2, %v3033_v10 }
 0xdca   : > { %2856 = vmatprep.subr.bf16.mxu0 %v3033_v10 }
 0xdd0   : > { %2847 = vmatmul.mubr.msk.bf16.vlgmr.msra.gmra.mrb[36].mxu0 %vm767_vm3, %v1951_v8 }
 0xdd1   : > { %2860 = vmatprep.mubr.msk.bf16.mxu0 %vm3034_vm2, %v3033_v10 }
 0xe8b   : > { %v3479_v9 = vpop.f32.mrb[24].mxu0 }
 0xe8c   : > { %v2818_v11 = vpop.f32.mrb[25].mxu0 }
 0xe8d   : > { %v1723_v13 = vpop.f32.mrb[26].mxu0 }
 0xe8e   : > { %v2819_v14 = vpop.f32.mrb[27].mxu0  ;;  %v2949_v13 = vld [vmem:[%s3608_s21] sm:$0xff]  }
 0xe8f   : > { %2857 = vmatpush3.bf16.msra.mxu0 %v2949_v13 }
 0xe90   : > { %2858 = vmatprep.subr.bf16.mxu0 %v3033_v10 }
 0xe93   : > { %v1770_v15 = vpop.f32.mrb[28].mxu0 }
 0xe94   : > { %v1776_v17 = vmul.f32 0.35355338, %v1770_v15  ;;  %v2824_v19 = vpop.f32.mrb[29].mxu0 }
 0xe95   : > { %v1773_v20 = vpop.f32.mrb[30].mxu0 }
 0xe96   : > { %v2825_v21 = vpop.f32.mrb[31].mxu0  ;;  %v1777_v23 = vadd.f32 %v1776_v17, %v3257_v38  ;;  %v2950_v20 = vld [vmem:[%s3608_s21 + $0x8] sm:$0xff]  }
 0xe97   : > { %2859 = vmatpush3.bf16.msra.mxu0 %v2950_v20 }
 0xe98   : > { %v1778_v24 = vsel %vm767_vm3, %v1777_v23, -inf  ;;  %2872 = vmatprep.subr.bf16.mxu0 %v3033_v10 }
 0xe99   : > { %1779 = vmax.xlane.f32.xlu0 %v1778_v24 }
 0xe9b   : > { %v1882_v25 = vpop.f32.mrb[32].mxu0 }
 0xe9c   : > { %v1888_v28 = vmul.f32 0.35355338, %v1882_v25  ;;  %v2836_v30 = vpop.f32.mrb[33].mxu0 }
 0xe9d   : > { %v1885_v31 = vpop.f32.mrb[34].mxu0 }
 0xe9e   : > { %v2837_v32 = vpop.f32.mrb[35].mxu0  ;;  %v1889_v22 = vadd.f32 %v1888_v28, %v3257_v38 }
 0xea0   : > { %v1890_v34 = vsel %vm767_vm3, %v1889_v22, -inf }
 0xea1   : > { %1891 = vmax.xlane.f32.xlu1 %v1890_v34 }
 0xea3   : > { %v1994_v35 = vpop.f32.mrb[36].mxu0 }
 0xea4   : > { %v2000_v36 = vmul.f32 0.35355338, %v1994_v35  ;;  %v2848_v37 = vpop.f32.mrb[37].mxu0 }
 0xea5   : > { %v1997_v40 = vpop.f32.mrb[38].mxu0 }
 0xea6   : > { %v2849_v41 = vpop.f32.mrb[39].mxu0  ;;  %v2001_v2 = vadd.f32 %v2000_v36, %v3257_v38 }
 0xea8   : > { %v2002_v42 = vsel %vm767_vm3, %v2001_v2, -inf }
 0xea9   : > { %2003 = vmax.xlane.f32.xlu0 %v2002_v42 }
 0xeb2   : > { %1902 = vrot.lane.b32.xlu1 %v3416_v29, %s3613_s20 }
 0xf26   : > { %v1780_v43 = vpop.xlane.xlu0 %1779 }
 0xf27   : > { %v1781_v44 = vsub.f32 %v1777_v23, %v1780_v43 }
 0xf29   : > { %v1782_v45 = vmul.f32 1.442695, %v1781_v44 }
 0xf2b   : > { %2991 = vpow2.f32 %v1782_v45 }
 0xf2e   : > { %v1892_v46 = vpop.xlane.xlu1 %1891 }
 0xf2f   : > { %v1893_v47 = vsub.f32 %v1889_v22, %v1892_v46 }
 0xf31   : > { %v1894_v48 = vmul.f32 1.442695, %v1893_v47 }
 0xf32   : > { %v1903_v60 = vpop.permute.xlu1 %1902 }
 0xf33   : > { %2993 = vpow2.f32 %v1894_v48  ;;  %v1908_v4 = vsel %vm833_vm4, %v1903_v60, 0  ;;  %v2954_v60 = vld [vmem:[%s3188_s16 + $0x8] sm:$0xff]  }
 0xf35   : > { %v2992_v49 = vpop.eup %2991 }
 0xf36   : > { %v2004_v50 = vpop.xlane.xlu0 %2003  ;;  %v1784_v51 = vsel %vm767_vm3, %v2992_v49, 0.0 }
 0xf37   : > { %v2005_v52 = vsub.f32 %v2001_v2, %v2004_v50  ;;  %1785 = vadd.xlane.f32.xlu0 %v1784_v51 }
 0xf39   : > { %v2006_v38 = vmul.f32 1.442695, %v2005_v52  ;;  %v2952_v52 = vld [vmem:[%s3178_s3 + $0x8] sm:$0xff]  }
 0xf3b   : > { %2995 = vpow2.f32 %v2006_v38 }
 0xf3d   : > { %v2994_v33 = vpop.eup %2993 }
 0xf3e   : > { %v1896_v53 = vsel %vm767_vm3, %v2994_v33, 0.0 }
 0xf3f   : > { %1897 = vadd.xlane.f32.xlu0 %v1896_v53 }
 0xf45   : > { %v2996_v54 = vpop.eup %2995 }
 0xf46   : > { %v2008_v27 = vsel %vm767_vm3, %v2996_v54, 0.0 }
 0xf47   : > { %2009 = vadd.xlane.f32.xlu1 %v2008_v27 }
 0xf55   : > { %1790 = vrot.lane.b32.xlu0 %v3416_v29, %s3614_s23 }
 0xf58   : > { %2014 = vrot.lane.b32.xlu1 %v3416_v29, %s3615_s26 }
 0xfc4   : > { %v1786_v57 = vpop.xlane.xlu0 %1785 }
 0xfc5   : > { %2997 = vrcp.f32 %v1786_v57 }
 0xfcc   : > { %v1898_v58 = vpop.xlane.xlu0 %1897 }
 0xfcd   : > { %2999 = vrcp.f32 %v1898_v58 }
 0xfcf   : > { %v2998_v59 = vpop.eup %2997 }
 0xfd0   : > { %v1788_v61 = vmul.f32 %v2998_v59, %v2992_v49  ;;  %v1791_v62 = vpop.permute.xlu0 %1790  ;;  %v2953_v59 = vld [vmem:[%s3188_s16] sm:$0xff]  }
 0xfd1   : > { %v1796_v0 = vsel %vm833_vm4, %v1791_v62, 0  ;;  %v2958_v62 = vld [vmem:[%s3188_s16 + $0x28] sm:$0xff]  }
 0xfd2   : > { %2827 = vmatpush3.bf16.msra.mxu1 %v1796_v0  ;;  %v1789_v1 = vpack.c.bf16 %v1788_v61, %v1788_v61  ;;  %v2955_v61 = vld [vmem:[%s3188_s16 + $0x10] sm:$0xff]  }
 0xfd3   : > { %2838 = vmatprep.subr.bf16.mxu1 %v3033_v10  ;;  %v2959_v0 = vld [vmem:[%s3188_s16 + $0x30] sm:$0xff]  }
 0xfd4   : > { %v2010_v3 = vpop.xlane.xlu1 %2009 }
 0xfd5   : > { %3001 = vrcp.f32 %v2010_v3  ;;  %2829 = vmatmul.mubr.msk.bf16.vlgmr.msra.gmra.mrb[32].mxu1 %vm767_vm3, %v1789_v1  ;;  %v2960_v1 = vld [vmem:[%s3188_s16 + $0x38] sm:$0xff]  }
 0xfd6   : > { %2839 = vmatpush3.bf16.msra.mxu1 %v1908_v4  ;;  %2840 = vmatprep.mubr.msk.bf16.mxu1 %vm3034_vm2, %v3033_v10 }
 0xfd7   : > { %v3000_v29 = vpop.eup %2999  ;;  %2850 = vmatprep.subr.bf16.mxu1 %v3033_v10 }
 0xfd8   : > { %v1900_v16 = vmul.f32 %v3000_v29, %v2994_v33  ;;  %v2015_v5 = vpop.permute.xlu1 %2014 }
 0xfd9   : > { %v2020_v6 = vsel %vm833_vm4, %v2015_v5, 0 }
 0xfda   : > { %v1901_v18 = vpack.c.bf16 %v1900_v16, %v1900_v16 }
 0xfdd   : > { %2841 = vmatmul.mubr.msk.bf16.vlgmr.msra.gmra.mrb[36].mxu1 %vm767_vm3, %v1901_v18 }
 0xfde   : > { %2851 = vmatpush3.bf16.msra.mxu1 %v2020_v6  ;;  %2852 = vmatprep.mubr.msk.bf16.mxu1 %vm3034_vm2, %v3033_v10 }
 0xfdf   : > { %v3002_v7 = vpop.eup %3001  ;;  %2864 = vmatprep.subr.bf16.mxu1 %v3033_v10 }
 0xfe0   : > { %v2012_v8 = vmul.f32 %v3002_v7, %v2996_v54 }
 0xfe2   : > { %v2013_v11 = vpack.c.bf16 %v2012_v8, %v2012_v8 }
 0xfe5   : > { %2853 = vmatmul.mubr.msk.bf16.vlgmr.msra.gmra.mrb[40].mxu1 %vm767_vm3, %v2013_v11 }
 0xfe6   : > { %2868 = vmatprep.mubr.msk.bf16.mxu1 %vm3034_vm2, %v3033_v10 }
0x10a8   : > { %v1832_v14 = vpop.f32.mrb[32].mxu1 }
0x10a9   : > { %2063 = vrot.lane.b32.xlu1 %v1832_v14, %s3616_s28  ;;  %v2830_v15 = vpop.f32.mrb[33].mxu1 }
0x10aa   : > { %v1835_v17 = vpop.f32.mrb[34].mxu1 }
0x10ab   : > { %v2831_v19 = vpop.f32.mrb[35].mxu1 }
0x10b0   : > { %v1944_v21 = vpop.f32.mrb[36].mxu1 }
0x10b1   : > { %2067 = vrot.lane.b32.xlu0 %v1944_v21, %s3617_s27  ;;  %v2842_v23 = vpop.f32.mrb[37].mxu1 }
0x10b2   : > { %v1947_v24 = vpop.f32.mrb[38].mxu1 }
0x10b3   : > { %v2843_v25 = vpop.f32.mrb[39].mxu1 }
0x10b8   : > { %v2056_v28 = vpop.f32.mrb[40].mxu1 }
0x10b9   : > { %2071 = vrot.lane.b32.xlu1 %v2056_v28, %s3618_s15  ;;  %v2854_v30 = vpop.f32.mrb[41].mxu1 }
0x10ba   : > { %v2059_v31 = vpop.f32.mrb[42].mxu1 }
0x10bb   : > { %v2855_v32 = vpop.f32.mrb[43].mxu1 }
0x111b   : > { %v2064_v22 = vpop.permute.xlu1 %2063 }
0x111c   : > { %v2074_v35 = vsel %vm767_vm3, %v3479_v9, %v2064_v22 }
0x1123   : > { %v2068_v34 = vpop.permute.xlu0 %2067 }
0x1124   : > { %v2075_v36 = vsel %vm1226_vm6, %v2074_v35, %v2068_v34 }
0x112b   : > { %v2072_v37 = vpop.permute.xlu1 %2071 }
0x112c   : > { %v2076_v40 = vsel %vm1228_vm7, %v2075_v36, %v2072_v37 }
0x112d   : > { %v2081_v41 = vpack.c.bf16 %v2076_v40, %v2076_v40 }
0x112f   : > { %2861 = vmatmul.mubr.msk.bf16.vlgmr.msra.gmra.mrb[40].mxu0 %vm667_vm1, %v2081_v41 }
0x1130   : > { %2888 = vmatprep.mubr.msk.bf16.mxu0 %vm3034_vm2, %v3033_v10  ;;  %2873 = vmatpush3.bf16.msra.mxu0 %v2953_v59 }
0x1131   : > { %2874 = vmatprep.subr.bf16.mxu0 %v3033_v10 }
0x1134   : > { %2875 = vmatpush3.bf16.msra.mxu0 %v2954_v60 }
0x1135   : > { %2876 = vmatprep.subr.bf16.mxu0 %v3033_v10 }
0x1138   : > { %2877 = vmatpush3.bf16.msra.mxu0 %v2955_v61 }
0x1139   : > { %2878 = vmatprep.subr.bf16.mxu0 %v3033_v10 }
0x1202   : > { %v2131_v2 = vpop.f32.mrb[40].mxu0 }
0x1203   : > { %v2137_v42 = vadd.f32 %v2131_v2, %v3338_v26  ;;  %v2862_v43 = vpop.f32.mrb[41].mxu0  ;;  %v2951_v26 = vld [vmem:[%s3178_s3] sm:$0xff]  }
0x1204   : > { %v2134_v44 = vpop.f32.mrb[42].mxu0  ;;  %2865 = vmatpush3.bf16.msra.mxu1 %v2951_v26 }
0x1205   : > { %v3527_v9 = vadd.f32 %v3347_v63, %v2137_v42  ;;  %v2863_v45 = vpop.f32.mrb[43].mxu0  ;;  %2866 = vmatprep.subr.bf16.mxu1 %v3033_v10 }
0x1207   : > { %v2148_v46 = vsel %vm667_vm1, %v3527_v9, 0.0 }
0x1208   : > { %2149 = vadd.xlane.f32.xlu0 %v2148_v46  ;;  %2867 = vmatpush3.bf16.msra.mxu1 %v2952_v52 }
0x1295   : > { %v2150_v47 = vpop.xlane.xlu0 %2149 }
0x1296   : > { %v2151_v48 = vmul.f32 0.03125, %v2150_v47 }
0x1298   : > { %v2152_v49 = vsub.f32 %v3527_v9, %v2151_v48 }
0x129a   : > { %v2153_v50 = vmul.f32 %v2152_v49, %v2152_v49 }
0x129c   : > { %v2154_v51 = vsel %vm667_vm1, %v2153_v50, 0.0 }
0x129d   : > { %2155 = vadd.xlane.f32.xlu1 %v2154_v51 }
0x132a   : > { %v2156_v63 = vpop.xlane.xlu1 %2155 }
0x132b   : > { %v2157_v38 = vmul.f32 0.03125, %v2156_v63 }
0x132d   : > { %v2158_v33 = vadd.f32 1e-05, %v2157_v38 }
0x132f   : > { %3003 = vrsqrt.f32 %v2158_v33 }
0x1339   : > { %v3004_v53 = vpop.eup %3003 }
0x133a   : > { %v2160_v54 = vmul.f32 %v3004_v53, %v2152_v49 }
0x133c   : > { %v2167_v27 = vmul.f32 %v3368_v55, %v2160_v54  ;;  %v2956_v55 = vld [vmem:[%s3188_s16 + $0x18] sm:$0xff]  }
0x133d   : > { %2879 = vmatpush3.bf16.msra.mxu0 %v2956_v55 }
0x133e   : > { %v2174_v57 = vadd.f32 %v3375_v56, %v2167_v27  ;;  %2880 = vmatprep.subr.bf16.mxu0 %v3033_v10  ;;  %v2957_v56 = vld [vmem:[%s3188_s16 + $0x20] sm:$0xff]  }
0x1340   : > { %v2179_v58 = vpack.c.bf16 %v2174_v57, %v2174_v57 }
0x1341   : > { %2881 = vmatpush3.bf16.msra.mxu0 %v2957_v56 }
0x1342   : > { %2869 = vmatmul.mubr.msk.bf16.vlgmr.msra.gmra.mrb[44].mxu1 %vm667_vm1, %v2179_v58  ;;  %2882 = vmatprep.subr.bf16.mxu0 %v3033_v10 }
0x1345   : > { %2883 = vmatpush3.bf16.msra.mxu0 %v2958_v62 }
0x1346   : > { %2884 = vmatprep.subr.bf16.mxu0 %v3033_v10 }
0x1349   : > { %2885 = vmatpush3.bf16.msra.mxu0 %v2959_v0 }
0x134a   : > { %2886 = vmatprep.subr.bf16.mxu0 %v3033_v10 }
0x134d   : > { %2887 = vmatpush3.bf16.msra.mxu0 %v2960_v1 }
0x1415   : > { %v2236_v3 = vpop.f32.mrb[44].mxu1 }
0x1416   : > { %v2237_v4 = vadd.f32 %v3412_v12, %v2236_v3  ;;  %v2870_v29 = vpop.f32.mrb[45].mxu1 }
0x1417   : > { %v2239_v16 = vpop.f32.mrb[46].mxu1 }
0x1418   : > { %v2242_v5 = vmul.f32 -1.702, %v2237_v4  ;;  %v2871_v18 = vpop.f32.mrb[47].mxu1 }
0x141a   : > { %v2243_v6 = vmul.f32 1.442695, %v2242_v5 }
0x141c   : > { %3005 = vpow2.f32 %v2243_v6 }
0x1426   : > { %v3006_v7 = vpop.eup %3005 }
0x1427   : > { %v2245_v8 = vadd.f32 1.0, %v3006_v7 }
0x1429   : > { %3007 = vrcp.f32 %v2245_v8 }
0x1433   : > { %v3008_v11 = vpop.eup %3007 }
0x1434   : > { %v2248_v13 = vmul.f32 %v3008_v11, %v2237_v4 }
0x1436   : > { %v2265_v14 = vpack.c.bf16 %v2248_v13, %v2248_v13 }
0x1438   : > { %2889 = vmatmul.mubr.bf16.vlgmr.msra.gmra.mrb[44].mxu0 %v2265_v14 }
0x150b   : > { %v2355_v15 = vpop.f32.mrb[44].mxu0 }
0x150c   : > { %v2356_v10 = vadd.f32 %v3439_v39, %v2355_v15  ;;  %v2890_v17 = vpop.f32.mrb[45].mxu0 }
0x150d   : > { %v2358_v19 = vpop.f32.mrb[46].mxu0 }
0x150e   : > { %v2361_v12 = vadd.f32 %v2356_v10, %v3527_v9  ;;  %v2891_v20 = vpop.f32.mrb[47].mxu0 }
0x1510   : > { %2362 = vst.msk [vmem:[#allocation2 + $0x8] sm:$0xff] %vm667_vm1, %v2361_v12 }
0x1517   : > { %v2364_v21 = vld [vmem:[#allocation2 + $0x8] sm:$0xff] }
0x1518   : > { %2366 = vst.msk [vmem:[%s3611_s14 + $0x8] sm:$0xff] %vm667_vm1, %v2364_v21 }
0x1519 PF: > { %s3619_s21 = sld [smem:[#allocation4_spill]]  ;;  %s3620_s25 = sld [smem:[#allocation3_spill]] }
0x151a   : > { %s3621_s26 = sld [smem:[#allocation5_spill]] }
0x151f   : > { %s23_s27 = sadd.s32 1, %s3619_s21  }
0x1520   : > { %p20_p6 = scmp.ge.s32.totalorder %s23_s27, 4  }
0x1522   :  { %22 = sbr.rel (!%p20_p6) target bundleno = 4 (0x4), region = 143 }

// kernel: clip_stochastic_forward.13
= control target key start
LH: loop header
LB: loop body
LE: loop exit
PB: predicated region body
PF: predicated region fallthrough
CT: control target
= control target key end

     0   :  { %vm24_vm0 = vcmask 261120   ;;  %v148_v8 = vmov 0.0   ;;  %vm149_vm1 = vmmov 0   ;;  %s205_s0 = inlined_call_operand.vmem [shape: f32[8,32], index: 0, kind: input, shape index: {}]   ;;  %s206_s3 = inlined_call_operand.vmem [shape: bf16[32,32], index: 3, kind: input, shape index: {}]   ;;  %s207_s1 = inlined_call_operand.vmem [shape: f32[1,32], index: 1, kind: input, shape index: {}]   ;;  %s208_s2 = inlined_call_operand.vmem [shape: f32[1,32], index: 2, kind: input, shape index: {}]   ;;  %s209_s4 = inlined_call_operand.vmem [shape: f32[1,32], index: 4, kind: input, shape index: {}]   ;;  %s210_s5 = inlined_call_operand.vmem [shape: f32[8,32], index: 5, kind: output, shape index: {}]  }
   0x1   :  { %v21_v0 = vld [vmem:[%s205_s0] sm:$0xff]  ;;  %134 = vmatprep.subr.bf16.mxu0 %v148_v8  ;;  %v145_v9 = vld [vmem:[%s206_s3 + $0x8] sm:$0xff]   ;;  %138 = vmatprep.mubr.msk.bf16.mxu0 %vm149_vm1, %v148_v8 }
   0x2   :  { %v25_v1 = vsel %vm24_vm0, %v21_v0, 0.0  ;;  %v144_v7 = vld [vmem:[%s206_s3] sm:$0xff]  }
   0x3   :  { %26 = vadd.xlane.f32.xlu0 %v25_v1  ;;  %135 = vmatpush3.bf16.msra.mxu0 %v144_v7  ;;  %v125_v14 = vld [vmem:[%s207_s1] ss:$0 sm:$0xff] }
   0x4   :  { %136 = vmatprep.subr.bf16.mxu0 %v148_v8  ;;  %v126_v16 = vld [vmem:[%s208_s2] ss:$0 sm:$0xff] }
   0x5   :  { %v127_v20 = vld [vmem:[%s209_s4] ss:$0 sm:$0xff] }
   0x7   :  { %137 = vmatpush3.bf16.msra.mxu0 %v145_v9 }
  0x90   :  { %v27_v2 = vpop.xlane.xlu0 %26 }
  0x91   :  { %v29_v3 = vmul.f32 0.03125, %v27_v2 }
  0x93   :  { %v30_v4 = vsub.f32 %v21_v0, %v29_v3 }
  0x95   :  { %v31_v5 = vmul.f32 %v30_v4, %v30_v4 }
  0x97   :  { %v32_v6 = vsel %vm24_vm0, %v31_v5, 0.0 }
  0x98   :  { %33 = vadd.xlane.f32.xlu0 %v32_v6 }
 0x125   :  { %v34_v10 = vpop.xlane.xlu0 %33 }
 0x126   :  { %v35_v11 = vmul.f32 0.03125, %v34_v10 }
 0x128   :  { %v36_v12 = vadd.f32 1e-05, %v35_v11 }
 0x12a   :  { %146 = vrsqrt.f32 %v36_v12 }
 0x134   :  { %v147_v13 = vpop.eup %146 }
 0x135   :  { %v38_v15 = vmul.f32 %v147_v13, %v30_v4 }
 0x137   :  { %v45_v17 = vmul.f32 %v125_v14, %v38_v15 }
 0x139   :  { %v52_v18 = vadd.f32 %v126_v16, %v45_v17 }
 0x13b   :  { %v57_v19 = vpack.c.bf16 %v52_v18, %v52_v18 }
 0x13d   :  { %139 = vmatmul.mubr.msk.bf16.vlgmr.msra.gmra.mrb[0].mxu0 %vm24_vm0, %v57_v19 }
 0x210   :  { %v114_v21 = vpop.f32.mrb[0].mxu0 }
 0x211   :  { %v115_v22 = vadd.f32 %v127_v20, %v114_v21  ;;  %v140_v23 = vpop.f32.mrb[1].mxu0 }
 0x212   :  { %v117_v24 = vpop.f32.mrb[2].mxu0 }
 0x213   :  { %120 = vst.msk [vmem:[%s210_s5] sm:$0xff] %vm24_vm0, %v115_v22  ;;  %v141_v25 = vpop.f32.mrb[3].mxu0 }

// kernel: clip_stochastic_forward.14
= control target key start
LH: loop header
LB: loop body
LE: loop exit
PB: predicated region body
PF: predicated region fallthrough
CT: control target
= control target key end

     0   :  { %vm116_vm0 = vcmask 261120   ;;  %vm63_vm1 = vcmask 254976   ;;  %v1022_v14 = vmov 0.0   ;;  %vm1023_vm2 = vmmov 0   ;;  %s1273_s1 = inlined_call_operand.vmem [shape: f32[8,32], index: 1, kind: input, shape index: {}]   ;;  %s1274_s0 = inlined_call_operand.vmem [shape: f32[2,32], index: 0, kind: input, shape index: {}]   ;;  %s1275_s6 = inlined_call_operand.vmem [shape: bf16[32,32], index: 6, kind: input, shape index: {}]   ;;  %s1276_s4 = inlined_call_operand.vmem [shape: bf16[32,32], index: 4, kind: input, shape index: {}]   ;;  %s1277_s8 = inlined_call_operand.vmem [shape: bf16[32,32], index: 8, kind: input, shape index: {}]   ;;  %s1278_s2 = inlined_call_operand.vmem [shape: f32[1,32], index: 2, kind: input, shape index: {}]   ;;  %s1279_s3 = inlined_call_operand.vmem [shape: f32[1,32], index: 3, kind: input, shape index: {}]   ;;  %s1280_s7 = inlined_call_operand.vmem [shape: f32[1,32], index: 7, kind: input, shape index: {}]   ;;  %s1281_s5 = inlined_call_operand.vmem [shape: f32[1,32], index: 5, kind: input, shape index: {}]   ;;  %s1282_s9 = inlined_call_operand.vmem [shape: f32[1,32], index: 9, kind: input, shape index: {}]   ;;  %s1283_s10 = inlined_call_operand.vmem [shape: bf16[32,32], index: 10, kind: input, shape index: {}]   ;;  %s1284_s11 = inlined_call_operand.vmem [shape: f32[1,32], index: 11, kind: input, shape index: {}]   ;;  %s1285_s14 = inlined_call_operand.vmem [shape: bf16[32,32], index: 14, kind: input, shape index: {}]   ;;  %s1286_s12 = inlined_call_operand.vmem [shape: f32[1,32], index: 12, kind: input, shape index: {}]   ;;  %s1287_s13 = inlined_call_operand.vmem [shape: f32[1,32], index: 13, kind: input, shape index: {}]   ;;  %s1288_s15 = inlined_call_operand.vmem [shape: f32[1,32], index: 15, kind: input, shape index: {}]   ;;  %s1289_s16 = inlined_call_operand.vmem [shape: f32[1,32], index: 16, kind: input, shape index: {}]   ;;  %s1290_s17 = inlined_call_operand.vmem [shape: f32[1,32], index: 17, kind: input, shape index: {}]   ;;  %s1291_s18 = inlined_call_operand.vmem [shape: f32[2,64], index: 18, kind: output, shape index: {}]  }
   0x1   :  { %1293 = sst [smem:[#allocation2_spill]] %s1273_s1  ;;  %917 = vmatprep.subr.bf16.mxu1 %v1022_v14  ;;  %909 = vmatprep.subr.bf16.mxu0 %v1022_v14  ;;  %v993_v16 = vld [vmem:[%s1276_s4] sm:$0xff]   ;;  %v995_v18 = vld [vmem:[%s1276_s4 + $0x8] sm:$0xff]   ;;  %vm373_vm3 = vcmask 1041408   ;;  %vm355_vm4 = vcmask 25600   ;;  %vm369_vm5 = vcmask 31744  }
   0x2   :  { %1294 = sst [smem:[#allocation3_spill]] %s1274_s0  ;;  %s1296_s29 = sld [smem:[#allocation2_spill]]  ;;  %921 = vmatprep.mubr.msk.bf16.mxu1 %vm1023_vm2, %v1022_v14  ;;  %913 = vmatprep.mubr.msk.bf16.mxu0 %vm1023_vm2, %v1022_v14  ;;  %v848_v26 = vld [vmem:[%s1278_s2] ss:$0 sm:$0xff]  ;;  %v997_v38 = vld [vmem:[%s1277_s8 + $0x8] sm:$0xff]   ;;  %vm842_vm6 = vcmask 517120  }
   0x3   :  { %1295 = sst [smem:[#allocation4_spill]] %s1275_s6  ;;  %s1297_s19 = sld [smem:[#allocation3_spill]]  ;;  %910 = vmatpush3.bf16.msra.mxu0 %v993_v16  ;;  %v849_v28 = vld [vmem:[%s1279_s3] ss:$0 sm:$0xff] }
   0x4   :  { %s1298_s21 = sld [smem:[#allocation4_spill]]  ;;  %911 = vmatprep.subr.bf16.mxu0 %v1022_v14  ;;  %v996_v36 = vld [vmem:[%s1277_s8] sm:$0xff]   ;;  %s1024_s2 = smov 32  }
   0x5   :  { %v854_v39 = vld [vmem:[%s1280_s7] ss:$0 sm:$0xff] }
   0x6   :  { %v850_v46 = vld [vmem:[%s1281_s5] ss:$0 sm:$0xff] }
   0x7   :  { %912 = vmatpush3.bf16.msra.mxu0 %v995_v18  ;;  %v858_v53 = vld [vmem:[%s1282_s9] ss:$0 sm:$0xff] }
   0x8   :  { %v160_v0 = vld [vmem:[%s1296_s29] sm:$0xff]  ;;  %925 = vmatprep.subr.bf16.mxu0 %v1022_v14 }
   0x9   :  { %v60_v1 = vld [vmem:[%s1297_s19] sm:$0x3]  ;;  %v161_v2 = vsel %vm116_vm0, %v160_v0, 0.0 }
   0xa   :  { %162 = vadd.xlane.f32.xlu0 %v161_v2  ;;  %v64_v3 = vsel %vm63_vm1, %v60_v1, 0.0  ;;  %v992_v15 = vld [vmem:[%s1298_s21] sm:$0xff]   ;;  %v994_v17 = vld [vmem:[%s1298_s21 + $0x8] sm:$0xff]  }
   0xb   :  { %918 = vmatpush3.bf16.msra.mxu1 %v992_v15 }
   0xc   :  { %919 = vmatprep.subr.bf16.mxu1 %v1022_v14 }
   0xe   :  { %65 = vadd.xlane.f32.xlu0 %v64_v3 }
   0xf   :  { %920 = vmatpush3.bf16.msra.mxu1 %v994_v17 }
  0x10   :  { %933 = vmatprep.subr.bf16.mxu1 %v1022_v14 }
  0x97   :  { %v163_v4 = vpop.xlane.xlu0 %162 }
  0x98   :  { %v164_v5 = vmul.f32 0.03125, %v163_v4 }
  0x9a   :  { %v165_v6 = vsub.f32 %v160_v0, %v164_v5 }
  0x9b   :  { %v66_v7 = vpop.xlane.xlu0 %65 }
  0x9c   :  { %v68_v8 = vmul.f32 0.03125, %v66_v7  ;;  %v166_v9 = vmul.f32 %v165_v6, %v165_v6 }
  0x9e   :  { %v69_v10 = vsub.f32 %v60_v1, %v68_v8  ;;  %v167_v11 = vsel %vm116_vm0, %v166_v9, 0.0 }
  0x9f   :  { %168 = vadd.xlane.f32.xlu1 %v167_v11  ;;  %v998_v11 = vld [vmem:[%s1283_s10] sm:$0xff]  }
  0xa0   :  { %v70_v12 = vmul.f32 %v69_v10, %v69_v10 }
  0xa2   :  { %v71_v13 = vsel %vm63_vm1, %v70_v12, 0.0  ;;  %v999_v12 = vld [vmem:[%s1283_s10 + $0x8] sm:$0xff]  }
  0xa3   :  { %72 = vadd.xlane.f32.xlu1 %v71_v13 }
 0x12c   :  { %v169_v19 = vpop.xlane.xlu1 %168 }
 0x12d   :  { %v170_v20 = vmul.f32 0.03125, %v169_v19 }
 0x12f   :  { %v171_v21 = vadd.f32 1e-05, %v170_v20 }
 0x130   :  { %v73_v22 = vpop.xlane.xlu1 %72 }
 0x131   :  { %1002 = vrsqrt.f32 %v171_v21  ;;  %v74_v23 = vmul.f32 0.03125, %v73_v22 }
 0x133   :  { %v75_v24 = vadd.f32 1e-05, %v74_v23 }
 0x135   :  { %1004 = vrsqrt.f32 %v75_v24 }
 0x13b   :  { %v1003_v25 = vpop.eup %1002 }
 0x13c   :  { %v173_v27 = vmul.f32 %v1003_v25, %v165_v6  ;;  %v1221_v25 = vld [vmem:[%s1284_s11] ss:$0 sm:$0xff] }
 0x13e   :  { %v174_v29 = vmul.f32 %v848_v26, %v173_v27 }
 0x13f   :  { %v1005_v30 = vpop.eup %1004 }
 0x140   :  { %v175_v31 = vadd.f32 %v849_v28, %v174_v29  ;;  %v77_v32 = vmul.f32 %v1005_v30, %v69_v10 }
 0x142   :  { %v180_v33 = vpack.c.bf16 %v175_v31, %v175_v31  ;;  %v84_v34 = vmul.f32 %v848_v26, %v77_v32 }
 0x144   :  { %922 = vmatmul.mubr.msk.bf16.vlgmr.msra.gmra.mrb[0].mxu1 %vm116_vm0, %v180_v33  ;;  %v91_v35 = vadd.f32 %v849_v28, %v84_v34 }
 0x145   :  { %935 = vmatprep.mubr.msk.bf16.mxu1 %vm1023_vm2, %v1022_v14 }
 0x146   :  { %v96_v37 = vpack.c.bf16 %v91_v35, %v91_v35 }
 0x148   :  { %914 = vmatmul.mubr.msk.bf16.vlgmr.msra.gmra.mrb[0].mxu0 %vm116_vm0, %v96_v37 }
 0x149   :  { %926 = vmatpush3.bf16.msra.mxu0 %v996_v36  ;;  %929 = vmatprep.mubr.msk.bf16.mxu0 %vm1023_vm2, %v1022_v14 }
 0x14a   :  { %927 = vmatprep.subr.bf16.mxu0 %v1022_v14 }
 0x14d   :  { %928 = vmatpush3.bf16.msra.mxu0 %v997_v38 }
 0x14e   :  { %939 = vmatprep.subr.bf16.mxu0 %v1022_v14 }
 0x150   :  { %930 = vmatmul.mubr.msk.bf16.vlgmr.msra.gmra.mrb[4].mxu0 %vm116_vm0, %v180_v33 }
 0x151   :  { %941 = vmatprep.mubr.msk.bf16.mxu0 %vm1023_vm2, %v1022_v14 }
 0x217   :  { %v237_v40 = vpop.f32.mrb[0].mxu1 }
 0x218   :  { %v238_v41 = vadd.f32 %v854_v39, %v237_v40  ;;  %v923_v42 = vpop.f32.mrb[1].mxu1 }
 0x219   :  { %v240_v43 = vpop.f32.mrb[2].mxu1 }
 0x21a   :  { %v1178_v44 = vpack.c.bf16 %v238_v41, %v238_v41  ;;  %v924_v45 = vpop.f32.mrb[3].mxu1 }
 0x21b   :  { %v154_v47 = vpop.f32.mrb[0].mxu0 }
 0x21c   :  { %v312_v48 = vsel %vm116_vm0, %v1178_v44, 0  ;;  %v915_v49 = vpop.f32.mrb[1].mxu0  ;;  %v155_v51 = vadd.f32 %v850_v46, %v154_v47  ;;  %v612_v18 = vrot.slane %v1178_v44, 2 }
 0x21d   :  { %v157_v50 = vpop.f32.mrb[2].mxu0  ;;  %934 = vmatpush3.bf16.xpose.msra.mxu1 %v312_v48  ;;  %v1000_v48 = vld [vmem:[%s1285_s14] sm:$0xff]   ;;  %v1001_v49 = vld [vmem:[%s1285_s14 + $0x8] sm:$0xff]  }
 0x21e   :  { %v916_v52 = vpop.f32.mrb[3].mxu0  ;;  %945 = vmatprep.subr.bf16.mxu1 %v1022_v14  ;;  %v306_v54 = vpack.c.bf16 %v155_v51, %v155_v51  ;;  %v614_v24 = vsel %vm116_vm0, %v612_v18, 0 }
 0x223   :  { %v300_v55 = vpop.f32.mrb[4].mxu0 }
 0x224   :  { %v301_v56 = vadd.f32 %v858_v53, %v300_v55  ;;  %v931_v57 = vpop.f32.mrb[5].mxu0  ;;  %936 = vmatmul.mubr.msk.bf16.vlgmr.msra.gmra.mrb[4].mxu1 %vm116_vm0, %v306_v54 }
 0x225   :  { %v303_v58 = vpop.f32.mrb[6].mxu0  ;;  %949 = vmatprep.mubr.msk.bf16.mxu1 %vm1023_vm2, %v1022_v14  ;;  %946 = vmatpush3.bf16.msra.mxu1 %v998_v11  ;;  %v869_v57 = vld [vmem:[%s1287_s13] ss:$0 sm:$0xff] }
 0x226   :  { %v368_v59 = vpack.c.bf16 %v301_v56, %v301_v56  ;;  %v932_v60 = vpop.f32.mrb[7].mxu0  ;;  %947 = vmatprep.subr.bf16.mxu1 %v1022_v14 }
 0x228   :  { %v375_v61 = vsel %vm373_vm3, %v368_v59, 0  ;;  %v670_v62 = vrot.slane %v368_v59, 2 }
 0x229   :  { %940 = vmatpush3.bf16.msra.mxu0 %v375_v61  ;;  %948 = vmatpush3.bf16.msra.mxu1 %v999_v12 }
 0x22a   :  { %953 = vmatprep.subr.bf16.mxu0 %v1022_v14  ;;  %v1193_v63 = vsel %vm373_vm3, %v670_v62, 0  ;;  %961 = vmatprep.subr.bf16.mxu1 %v1022_v14 }
 0x2f7   :  { %v348_v0 = vpop.f32.mrb[4].mxu1 }
 0x2f8   :  { %v354_v1 = vmul.f32 0.17677669, %v348_v0  ;;  %v937_v2 = vpop.f32.mrb[5].mxu1 }
 0x2f9   :  { %v351_v3 = vpop.f32.mrb[6].mxu1 }
 0x2fa   :  { %v938_v4 = vpop.f32.mrb[7].mxu1  ;;  %v356_v5 = vsel %vm355_vm4, %v354_v1, -inf }
 0x2fb   :  { %357 = vmax.xlane.f32.xlu0 %v356_v5 }
 0x388   :  { %v358_v6 = vpop.xlane.xlu0 %357 }
 0x389   :  { %v359_v7 = vsub.f32 %v354_v1, %v358_v6 }
 0x38b   :  { %v360_v8 = vmul.f32 1.442695, %v359_v7 }
 0x38d   :  { %1006 = vpow2.f32 %v360_v8 }
 0x397   :  { %v1007_v9 = vpop.eup %1006 }
 0x398   :  { %v362_v10 = vsel %vm355_vm4, %v1007_v9, 0.0 }
 0x399   :  { %363 = vadd.xlane.f32.xlu1 %v362_v10 }
 0x426   :  { %v364_v13 = vpop.xlane.xlu1 %363 }
 0x427   :  { %1008 = vrcp.f32 %v364_v13 }
 0x431   :  { %v1009_v15 = vpop.eup %1008 }
 0x432   :  { %v366_v16 = vmul.f32 %v1009_v15, %v1007_v9 }
 0x434   :  { %v367_v17 = vpack.c.bf16 %v366_v16, %v366_v16 }
 0x436   :  { %942 = vmatmul.mubr.msk.bf16.vlgmr.msra.gmra.mrb[8].mxu0 %vm369_vm5, %v367_v17 }
 0x437   :  { %957 = vmatprep.mubr.msk.bf16.mxu0 %vm1023_vm2, %v1022_v14  ;;  %954 = vmatpush3.bf16.msra.mxu0 %v1000_v48 }
 0x438   :  { %955 = vmatprep.subr.bf16.mxu0 %v1022_v14 }
 0x43b   :  { %956 = vmatpush3.bf16.msra.mxu0 %v1001_v49 }
 0x43c   :  { %967 = vmatprep.subr.bf16.mxu0 %v1022_v14 }
 0x509   :  { %v411_v19 = vpop.f32.mrb[8].mxu0 }
 0x50a   :  { %v421_v20 = vpack.c.bf16 %v411_v19, %v411_v19  ;;  %v943_v21 = vpop.f32.mrb[9].mxu0  ;;  %v873_v19 = vld [vmem:[%s1288_s15] ss:$0 sm:$0xff] }
 0x50b   :  { %v414_v22 = vpop.f32.mrb[10].mxu0 }
 0x50c   :  { %v944_v23 = vpop.f32.mrb[11].mxu0  ;;  %950 = vmatmul.mubr.msk.bf16.vlgmr.msra.gmra.mrb[8].mxu1 %vm116_vm0, %v421_v20 }
 0x50d   :  { %962 = vmatpush3.bf16.xpose.msra.mxu1 %v614_v24  ;;  %963 = vmatprep.mubr.msk.bf16.mxu1 %vm1023_vm2, %v1022_v14 }
 0x50e   :  { %973 = vmatprep.subr.bf16.mxu1 %v1022_v14 }
 0x514   :  { %964 = vmatmul.mubr.msk.bf16.vlgmr.msra.gmra.mrb[12].mxu1 %vm116_vm0, %v306_v54  ;;  %v868_v54 = vld [vmem:[%s1286_s12] ss:$0 sm:$0xff] }
 0x515   :  { %974 = vmatpush3.bf16.msra.mxu1 %v998_v11  ;;  %977 = vmatprep.mubr.msk.bf16.mxu1 %vm1023_vm2, %v1022_v14 }
 0x516   :  { %975 = vmatprep.subr.bf16.mxu1 %v1022_v14 }
 0x519   :  { %976 = vmatpush3.bf16.msra.mxu1 %v999_v12 }
 0x5df   :  { %v478_v26 = vpop.f32.mrb[8].mxu1 }
 0x5e0   :  { %v479_v27 = vadd.f32 %v1221_v25, %v478_v26  ;;  %v951_v28 = vpop.f32.mrb[9].mxu1 }
 0x5e1   :  { %v481_v29 = vpop.f32.mrb[10].mxu1 }
 0x5e2   :  { %v952_v30 = vpop.f32.mrb[11].mxu1  ;;  %v486_v31 = vsel %vm63_vm1, %v479_v27, 0.0 }
 0x5e3   :  { %487 = vadd.xlane.f32.xlu0 %v486_v31 }
 0x5e7   :  { %v650_v32 = vpop.f32.mrb[12].mxu1 }
 0x5e8   :  { %v656_v33 = vmul.f32 0.17677669, %v650_v32  ;;  %v965_v34 = vpop.f32.mrb[13].mxu1 }
 0x5e9   :  { %v653_v35 = vpop.f32.mrb[14].mxu1 }
 0x5ea   :  { %v966_v36 = vpop.f32.mrb[15].mxu1  ;;  %v657_v37 = vsel %vm355_vm4, %v656_v33, -inf }
 0x5eb   :  { %658 = vmax.xlane.f32.xlu1 %v657_v37 }
 0x670   :  { %v488_v38 = vpop.xlane.xlu0 %487 }
 0x671   :  { %v489_v39 = vmul.f32 0.03125, %v488_v38 }
 0x673   :  { %v490_v40 = vsub.f32 %v479_v27, %v489_v39 }
 0x675   :  { %v491_v41 = vmul.f32 %v490_v40, %v490_v40 }
 0x677   :  { %v492_v42 = vsel %vm63_vm1, %v491_v41, 0.0 }
 0x678   :  { %493 = vadd.xlane.f32.xlu0 %v492_v42  ;;  %v659_v43 = vpop.xlane.xlu1 %658 }
 0x679   :  { %v660_v44 = vsub.f32 %v656_v33, %v659_v43 }
 0x67b   :  { %v661_v45 = vmul.f32 1.442695, %v660_v44 }
 0x67d   :  { %1010 = vpow2.f32 %v661_v45 }
 0x687   :  { %v1011_v46 = vpop.eup %1010 }
 0x688   :  { %v663_v47 = vsel %vm355_vm4, %v1011_v46, 0.0 }
 0x689   :  { %664 = vadd.xlane.f32.xlu1 %v663_v47 }
 0x705   :  { %v494_v50 = vpop.xlane.xlu0 %493 }
 0x706   :  { %v495_v51 = vmul.f32 0.03125, %v494_v50 }
 0x708   :  { %v496_v52 = vadd.f32 1e-05, %v495_v51 }
 0x70a   :  { %1012 = vrsqrt.f32 %v496_v52 }
 0x714   :  { %v1013_v53 = vpop.eup %1012 }
 0x715   :  { %v498_v55 = vmul.f32 %v1013_v53, %v490_v40 }
 0x716   :  { %v665_v56 = vpop.xlane.xlu1 %664 }
 0x717   :  { %v505_v58 = vmul.f32 %v868_v54, %v498_v55  ;;  %1014 = vrcp.f32 %v665_v56  ;;  %v875_v56 = vld [vmem:[%s1290_s17] ss:$0 sm:$0xff] }
 0x719   :  { %v512_v59 = vadd.f32 %v869_v57, %v505_v58 }
 0x71b   :  { %v517_v60 = vpack.c.bf16 %v512_v59, %v512_v59 }
 0x71d   :  { %958 = vmatmul.mubr.msk.bf16.vlgmr.msra.gmra.mrb[12].mxu0 %vm116_vm0, %v517_v60 }
 0x71e   :  { %968 = vmatpush3.bf16.msra.mxu0 %v1193_v63  ;;  %969 = vmatprep.mubr.msk.bf16.mxu0 %vm1023_vm2, %v1022_v14 }
 0x71f   :  { %981 = vmatprep.subr.bf16.mxu0 %v1022_v14 }
 0x721   :  { %v1015_v61 = vpop.eup %1014 }
 0x722   :  { %v667_v62 = vmul.f32 %v1015_v61, %v1011_v46 }
 0x724   :  { %v668_v0 = vpack.c.bf16 %v667_v62, %v667_v62 }
 0x726   :  { %970 = vmatmul.mubr.msk.bf16.vlgmr.msra.gmra.mrb[16].mxu0 %vm369_vm5, %v668_v0 }
 0x727   :  { %982 = vmatpush3.bf16.msra.mxu0 %v1000_v48  ;;  %985 = vmatprep.mubr.msk.bf16.mxu0 %vm1023_vm2, %v1022_v14 }
 0x728   :  { %983 = vmatprep.subr.bf16.mxu0 %v1022_v14 }
 0x72b   :  { %984 = vmatpush3.bf16.msra.mxu0 %v1001_v49 }
 0x7f0   :  { %v567_v1 = vpop.f32.mrb[12].mxu0 }
 0x7f1   :  { %v959_v2 = vpop.f32.mrb[13].mxu0  ;;  %v573_v17 = vadd.f32 %v567_v1, %v512_v59 }
 0x7f2   :  { %v570_v63 = vpop.f32.mrb[14].mxu0 }
 0x7f3   :  { %v960_v3 = vpop.f32.mrb[15].mxu0  ;;  %v581_v22 = vadd.f32 %v873_v19, %v573_v17 }
 0x7f5   :  { %v584_v23 = vsel %vm63_vm1, %v581_v22, 0.0 }
 0x7f9   :  { %v711_v4 = vpop.f32.mrb[16].mxu0 }
 0x7fa   :  { %v717_v5 = vpack.c.bf16 %v711_v4, %v711_v4  ;;  %v971_v6 = vpop.f32.mrb[17].mxu0 }
 0x7fb   :  { %v714_v7 = vpop.f32.mrb[18].mxu0 }
 0x7fc   :  { %v972_v8 = vpop.f32.mrb[19].mxu0  ;;  %978 = vmatmul.mubr.msk.bf16.vlgmr.msra.gmra.mrb[16].mxu1 %vm116_vm0, %v717_v5 }
 0x8cf   :  { %v755_v9 = vpop.f32.mrb[16].mxu1 }
 0x8d0   :  { %v756_v10 = vadd.f32 %v1221_v25, %v755_v9  ;;  %v979_v11 = vpop.f32.mrb[17].mxu1 }
 0x8d1   :  { %v758_v12 = vpop.f32.mrb[18].mxu1 }
 0x8d2   :  { %v980_v13 = vpop.f32.mrb[19].mxu1  ;;  %v761_v14 = vsel %vm63_vm1, %v756_v10, 0.0 }
 0x8d3   :  { %762 = vadd.xlane.f32.xlu0 %v761_v14 }
 0x960   :  { %v763_v15 = vpop.xlane.xlu0 %762 }
 0x961   :  { %v764_v16 = vmul.f32 0.03125, %v763_v15 }
 0x963   :  { %v765_v18 = vsub.f32 %v756_v10, %v764_v16 }
 0x965   :  { %v766_v20 = vmul.f32 %v765_v18, %v765_v18 }
 0x967   :  { %v767_v21 = vsel %vm63_vm1, %v766_v20, 0.0 }
 0x968   :  { %768 = vadd.xlane.f32.xlu1 %v767_v21 }
 0x96c   :  { %585 = vadd.xlane.f32.xlu1 %v584_v23 }
 0x9f5   :  { %v769_v24 = vpop.xlane.xlu1 %768 }
 0x9f6   :  { %v770_v25 = vmul.f32 0.03125, %v769_v24 }
 0x9f8   :  { %v771_v26 = vadd.f32 1e-05, %v770_v25 }
 0x9f9   :  { %v586_v27 = vpop.xlane.xlu1 %585 }
 0x9fa   :  { %1016 = vrsqrt.f32 %v771_v26  ;;  %v587_v28 = vmul.f32 0.03125, %v586_v27 }
 0x9fc   :  { %v588_v29 = vsub.f32 %v581_v22, %v587_v28 }
 0x9fe   :  { %v589_v30 = vmul.f32 %v588_v29, %v588_v29 }
 0xa00   :  { %v590_v31 = vsel %vm63_vm1, %v589_v30, 0.0 }
 0xa01   :  { %591 = vadd.xlane.f32.xlu1 %v590_v31 }
 0xa04   :  { %v1017_v32 = vpop.eup %1016 }
 0xa05   :  { %v773_v33 = vmul.f32 %v1017_v32, %v765_v18 }
 0xa07   :  { %v774_v34 = vmul.f32 %v868_v54, %v773_v33  ;;  %v874_v54 = vld [vmem:[%s1289_s16] ss:$0 sm:$0xff] }
 0xa09   :  { %v775_v35 = vadd.f32 %v869_v57, %v774_v34 }
 0xa0b   :  { %v776_v36 = vpack.c.bf16 %v775_v35, %v775_v35 }
 0xa0d   :  { %986 = vmatmul.mubr.msk.bf16.vlgmr.msra.gmra.mrb[20].mxu0 %vm116_vm0, %v776_v36 }
 0xa8e   :  { %v592_v58 = vpop.xlane.xlu1 %591 }
 0xa8f   :  { %v593_v59 = vmul.f32 0.03125, %v592_v58 }
 0xa91   :  { %v594_v60 = vadd.f32 1e-05, %v593_v59 }
 0xae0   :  { %v814_v37 = vpop.f32.mrb[20].mxu0 }
 0xae1   :  { %v820_v38 = vadd.f32 %v814_v37, %v775_v35  ;;  %v987_v39 = vpop.f32.mrb[21].mxu0 }
 0xae2   :  { %v817_v40 = vpop.f32.mrb[22].mxu0 }
 0xae3   :  { %v988_v41 = vpop.f32.mrb[23].mxu0  ;;  %v821_v42 = vadd.f32 %v873_v19, %v820_v38 }
 0xae5   :  { %v822_v43 = vsel %vm63_vm1, %v821_v42, 0.0 }
 0xae6   :  { %823 = vadd.xlane.f32.xlu0 %v822_v43 }
 0xb73   :  { %v824_v44 = vpop.xlane.xlu0 %823 }
 0xb74   :  { %v825_v45 = vmul.f32 0.03125, %v824_v44 }
 0xb76   :  { %v826_v46 = vsub.f32 %v821_v42, %v825_v45 }
 0xb78   :  { %v827_v47 = vmul.f32 %v826_v46, %v826_v46 }
 0xb7a   :  { %v828_v48 = vsel %vm63_vm1, %v827_v47, 0.0 }
 0xb7b   :  { %829 = vadd.xlane.f32.xlu0 %v828_v48 }
 0xc08   :  { %v830_v49 = vpop.xlane.xlu0 %829 }
 0xc09   :  { %v831_v50 = vmul.f32 0.03125, %v830_v49 }
 0xc0b   :  { %v832_v51 = vadd.f32 1e-05, %v831_v50 }
 0xc0d   :  { %1018 = vrsqrt.f32 %v832_v51 }
 0xc0e   :  { %1020 = vrsqrt.f32 %v594_v60 }
 0xc17   :  { %v1019_v52 = vpop.eup %1018 }
 0xc18   :  { %v834_v53 = vmul.f32 %v1019_v52, %v826_v46  ;;  %v1021_v61 = vpop.eup %1020 }
 0xc19   :  { %v596_v62 = vmul.f32 %v1021_v61, %v588_v29 }
 0xc1a   :  { %v835_v55 = vmul.f32 %v874_v54, %v834_v53 }
 0xc1b   :  { %v603_v0 = vmul.f32 %v874_v54, %v596_v62 }
 0xc1c   :  { %v836_v57 = vadd.f32 %v875_v56, %v835_v55 }
 0xc1d   :  { %v610_v1 = vadd.f32 %v875_v56, %v603_v0 }
 0xc1e   :  { %838 = vrot.lane.b32.xlu0 %v836_v57, %s1024_s2 }
 0xc90   :  { %v839_v2 = vpop.permute.xlu0 %838 }
 0xc91   :  { %v841_v63 = vsel %vm116_vm0, %v610_v1, %v839_v2 }
 0xc92   :  { %843 = vst.msk [vmem:[%s1291_s18] sm:$0x3] %vm842_vm6, %v841_v63 }

// kernel: clip_stochastic_forward.15
= control target key start
LH: loop header
LB: loop body
LE: loop exit
PB: predicated region body
PF: predicated region fallthrough
CT: control target
= control target key end

     0   :  { %13 = vsyncpa [#allocation3], 0  ;;  %v282_v1 = vmov 0.0   ;;  %vm283_vm0 = vmmov 0   ;;  %s376_s0 = inlined_call_operand.vmem [shape: f32[2,32], index: 0, kind: input, shape index: {}]   ;;  %s377_s1 = inlined_call_operand.vmem [shape: f32[2,32], index: 1, kind: input, shape index: {}]   ;;  %s378_s2 = inlined_call_operand.vmem [shape: bf16[32,32], index: 2, kind: input, shape index: {}]   ;;  %s379_s3 = inlined_call_operand.vmem [shape: bf16[32,32], index: 3, kind: input, shape index: {}]   ;;  %s380_s4 = inlined_call_operand.vmem [shape: f32[1,32], index: 4, kind: input, shape index: {}]   ;;  %s381_s5 = inlined_call_operand.vmem [shape: f32[2,32], index: 5, kind: input, shape index: {}]   ;;  %s382_s6 = inlined_call_operand.hbm [shape: f32[2,32], index: 6, kind: output, shape index: {0}]   ;;  %s383_s7 = inlined_call_operand.hbm [shape: f32[2,32], index: 7, kind: output, shape index: {1}]  }
   0x1   :  { %v228_v0 = vld [vmem:[%s379_s3] sm:$0xff]   ;;  %208 = vmatprep.subr.bf16.mxu0 %v282_v1  ;;  %216 = vmatprep.subr.bf16.mxu1 %v282_v1  ;;  %v230_v3 = vld [vmem:[%s379_s3 + $0x8] sm:$0xff]  }
   0x2   :  { %v229_v2 = vld [vmem:[%s378_s2] sm:$0xff]   ;;  %209 = vmatpush3.bf16.msra.mxu0 %v228_v0  ;;  %212 = vmatprep.mubr.msk.bf16.mxu0 %vm283_vm0, %v282_v1  ;;  %v231_v4 = vld [vmem:[%s378_s2 + $0x8] sm:$0xff]  }
   0x3   :  { %217 = vmatpush3.bf16.msra.mxu1 %v229_v2  ;;  %210 = vmatprep.subr.bf16.mxu0 %v282_v1  ;;  %v34_v5 = vld [vmem:[%s377_s1] sm:$0x3] }
   0x4   :  { %218 = vmatprep.subr.bf16.mxu1 %v282_v1  ;;  %220 = vmatprep.mubr.msk.bf16.mxu1 %vm283_vm0, %v282_v1  ;;  %v28_v6 = vld [vmem:[%s376_s0] sm:$0x3] }
   0x5   :  { %14 = vsyncpa [#allocation5], 0  ;;  %v39_v7 = vpack.c.bf16 %v34_v5, %v34_v5  ;;  %vm52_vm1 = vcmask 261120   ;;  %v33_v8 = vpack.c.bf16 %v28_v6, %v28_v6  ;;  %v201_v11 = vld [vmem:[%s380_s4] ss:$0 sm:$0xff]  ;;  %s284_s1 = smov [#allocation4]  }
   0x6   :  { %211 = vmatpush3.bf16.msra.mxu0 %v230_v3  ;;  %s183_s13 = sshll.u32 %s284_s1, 4  ;;  %vm159_vm2 = vcmask 254976   ;;  %s184_s13 = int_to_ptr.vmem [resolvable:$true] %s183_s13 }
   0x7   :  { %219 = vmatpush3.bf16.msra.mxu1 %v231_v4  ;;  %s234_s0 = scalar_lea.vmem %s184_s13, 32  ;;  %p239_p1 = scmp.lt.s32.totalorder %s184_s13, %s184_s13 }
   0x8   :  { %p235_p0 = scmp.ne.s32.totalorder %s184_s13, %s234_s0  ;;  %p240_p2 = scmp.lt.s32.totalorder %s234_s0, %s234_s0 }
   0x9   :  { %213 = vmatmul.mubr.msk.bf16.vlgmr.msra.gmra.mrb[0].mxu0 %vm52_vm1, %v39_v7 }
   0xa   :  { %221 = vmatmul.mubr.msk.bf16.vlgmr.msra.gmra.mrb[0].mxu1 %vm52_vm1, %v33_v8  ;;  %p241_p3 = por %p240_p2, %p239_p1 }
   0xc   :  { %p242_p4 = pnand %p241_p3, %p235_p0 }
  0xdc   :  { %v90_v9 = vpop.f32.mrb[0].mxu0 }
  0xdd   :  { %v145_v10 = vpop.f32.mrb[0].mxu1  ;;  %v214_v12 = vpop.f32.mrb[1].mxu0 }
  0xde   :  { %v146_v13 = vadd.f32 %v145_v10, %v90_v9  ;;  %v222_v14 = vpop.f32.mrb[1].mxu1  ;;  %v93_v15 = vpop.f32.mrb[2].mxu0 }
  0xdf   :  { %v148_v16 = vpop.f32.mrb[2].mxu1  ;;  %v215_v17 = vpop.f32.mrb[3].mxu0 }
  0xe0   :  { %v158_v18 = vadd.f32 %v201_v11, %v146_v13  ;;  %v223_v19 = vpop.f32.mrb[3].mxu1 }
  0xe2   :  { %v161_v20 = vmul.f32 1.442695, %v158_v18  ;;  %160 = vst.msk [vmem:[#allocation4] sm:$0x3] %vm159_vm2, %v158_v18 }
  0xe3   :  { %245 = shalt.err (!%p242_p4)
}
  0xe4   :  { %s246_s15 = scalar_lea.hbm %s383_s7, 32 }
  0xe5   :  { %p247_p5 = scmp.ne.s32.totalorder %s383_s7, %s246_s15  ;;  %p250_p6 = scmp.lt.u32.totalorder %s246_s15, %s383_s7 }
  0xe7   :  { %p252_p7 = pnand %p250_p6, %p247_p5 }
  0xe9   :  { %255 = shalt.err (!%p252_p7)
}
  0xea   :  { %186 = dma.vmem_to_hbm [thread:$0]  %s184_s13, 32, %s383_s7, [#allocation5]   ;;  %232 = vpow2.f32 %v161_v20  ;;  %v163_v21 = vld [vmem:[%s381_s5] sm:$0x3] }
  0xeb   :  { %s285_s24 = smov [#allocation2]  }
  0xec   :  { %s173_s25 = sshll.u32 %s285_s24, 4  ;;  %s174_s25 = int_to_ptr.vmem [resolvable:$true] %s173_s25 }
  0xed   :  { %s256_s26 = scalar_lea.vmem %s174_s25, 32  ;;  %p261_p9 = scmp.lt.s32.totalorder %s174_s25, %s174_s25 }
  0xee   :  { %p257_p8 = scmp.ne.s32.totalorder %s174_s25, %s256_s26  ;;  %p262_p10 = scmp.lt.s32.totalorder %s256_s26, %s256_s26 }
  0xf0   :  { %p263_p11 = por %p262_p10, %p261_p9 }
  0xf2   :  { %p264_p12 = pnand %p263_p11, %p257_p8 }
  0xf4   :  { %v233_v22 = vpop.eup %232 }
  0xf5   :  { %v164_v23 = vmul.f32 %v233_v22, %v163_v21 }
  0xf7   :  { %v165_v24 = vadd.f32 %v164_v23, %v28_v6 }
  0xf9   :  { %166 = vst.msk [vmem:[#allocation2] sm:$0x3] %vm159_vm2, %v165_v24 }
  0xfa   :  { %267 = shalt.err (!%p264_p12)
}
  0xfb   :  { %s268_s28 = scalar_lea.hbm %s382_s6, 32 }
  0xfc   :  { %p269_p13 = scmp.ne.s32.totalorder %s382_s6, %s268_s28  ;;  %p272_p0 = scmp.lt.u32.totalorder %s268_s28, %s382_s6 }
  0xfe   :  { %p274_p1 = pnand %p272_p0, %p269_p13 }
 0x100   :  { %277 = shalt.err (!%p274_p1)
}
 0x101   :  { %176 = dma.vmem_to_hbm [thread:$0]  %s174_s25, 32, %s382_s6, [#allocation3]  }
 0x102   :  { %278 = dma.done.wait [#allocation3], 32  }
 0x103   :  { %279 = vsyncadd [#allocation3], 4294967264 }
 0x104   :  { %280 = dma.done.wait [#allocation5], 32  }
 0x105   :  { %281 = vsyncadd [#allocation5], 4294967264 }
 0x106   :  { %193 = vsyncpa [#allocation3], 1 }
 0x107   :  { %194 = vsyncpa [#allocation5], 1 }

// kernel: clip_stochastic_forward.12
= control target key start
LH: loop header
LB: loop body
LE: loop exit
PB: predicated region body
PF: predicated region fallthrough
CT: control target
= control target key end

     0   :  { %s5237_s25 = smov 0   ;;  %s5239_s26 = smov 0   ;;  %s5989_s0 = inlined_call_operand.vmem [shape: f32[8,5,32], index: 0, kind: input, shape index: {}]   ;;  %s5990_s1 = inlined_call_operand.vmem [shape: f32[2,1,32], index: 1, kind: input, shape index: {}]   ;;  %s5991_s2 = inlined_call_operand.vmem [shape: f32[2,1,32], index: 2, kind: input, shape index: {}]   ;;  %s5992_s3 = inlined_call_operand.vmem [shape: bf16[2,32,96], index: 3, kind: input, shape index: {}]   ;;  %s5993_s4 = inlined_call_operand.vmem [shape: f32[2,1,96], index: 4, kind: input, shape index: {}]   ;;  %s5994_s5 = inlined_call_operand.vmem [shape: bf16[2,32,32], index: 5, kind: input, shape index: {}]   ;;  %s5995_s6 = inlined_call_operand.vmem [shape: f32[2,1,32], index: 6, kind: input, shape index: {}]   ;;  %s5996_s7 = inlined_call_operand.vmem [shape: f32[2,1,32], index: 7, kind: input, shape index: {}]   ;;  %s5997_s8 = inlined_call_operand.vmem [shape: f32[2,1,32], index: 8, kind: input, shape index: {}]   ;;  %s5998_s9 = inlined_call_operand.vmem [shape: bf16[2,32,128], index: 9, kind: input, shape index: {}]   ;;  %s5999_s10 = inlined_call_operand.vmem [shape: f32[2,1,128], index: 10, kind: input, shape index: {}]   ;;  %s6000_s11 = inlined_call_operand.vmem [shape: bf16[2,128,32], index: 11, kind: input, shape index: {}]   ;;  %s6001_s12 = inlined_call_operand.vmem [shape: f32[2,1,32], index: 12, kind: input, shape index: {}]   ;;  %s6002_s13 = inlined_call_operand.vmem [shape: f32[8,5,32], index: 13, kind: output, shape index: {}]  }
   0x1   :  { %6011 = sst [smem:[#allocation9_spill]] %s5989_s0  ;;  %s5241_s27 = smov 0  }
   0x2   :  { %6012 = sst [smem:[#allocation10_spill]] %s5990_s1  ;;  %s5243_s28 = smov 0  }
   0x3   :  { %6013 = sst [smem:[#allocation11_spill]] %s5991_s2  ;;  %s5245_s29 = smov 0  }
   0x4   :  { %6014 = sst [smem:[#allocation12_spill]] %s5992_s3 }
   0x5   :  { %6015 = sst [smem:[#allocation13_spill]] %s5993_s4 }
   0x6   :  { %6016 = sst [smem:[#allocation14_spill]] %s5994_s5 }
   0x7   :  { %6017 = sst [smem:[#allocation15_spill]] %s5995_s6 }
   0x8   :  { %6018 = sst [smem:[#allocation16_spill]] %s5996_s7 }
   0x9   :  { %6019 = sst [smem:[#allocation17_spill]] %s5997_s8 }
   0xa LB: > { %6020 = sst [smem:[#allocation3_spill]] %s5132_s25  ;;  %s32_s30 = sadd.s32 1, %s5140_s27  ;;  %s5148_s29 = sphi %s5245_s29, %s23_s29   ;;  %s5144_s28 = sphi %s5243_s28, %s6042_s28   ;;  %s5140_s27 = sphi %s5241_s27, %s6041_s27   ;;  %s5136_s26 = sphi %s5239_s26, %s6040_s26   ;;  %s5132_s25 = sphi %s5237_s25, %s6039_s25  }
   0xb   : > { %6021 = sst [smem:[#allocation4_spill]] %s5140_s27  ;;  %s35_s14 = sadd.s32 1, %s5144_s28 }
   0xc   : > { %6022 = sst [smem:[#allocation5_spill]] %s5144_s28  ;;  %p33_p0 = scmp.ge.s32.totalorder %s32_s30, 2 }
   0xd   : > { %6023 = sst [smem:[#allocation6_spill]] %s5148_s29  ;;  %p4245_p1 = scmp.ge.s32.totalorder %s5148_s29, 1 }
   0xe   : > { %p504_p2 = scmp.lt.s32.totalorder %s5148_s29, 5  ;;  %s6044_s30 = smov (%p33_p0, %s32_s30), 0 }
   0xf   : > { %6024 = sst [smem:[#allocation7_spill]] %s6044_s30  ;;  %s6046_s14 = smov (!%p33_p0, %s35_s14), %s5144_s28 }
  0x10   : > { %p505_p3 = pnand %p4245_p1, %p504_p2  ;;  %p37_p4 = scmp.ge.s32.totalorder %s6046_s14, 2 }
  0x11   : > { %s4246_s15 = sshll.u32 (!%p505_p3), %s5136_s26, 2  ;;  %p598_p5 = scmp.lt.s32.totalorder (!%p505_p3), %s5132_s25, 1 }
  0x12   : > { %s6048_s14 = smov (%p37_p4, %s6046_s14), 0  ;;  %508 = sbr.rel (%p505_p3) target bundleno = 9999 (0x270f), region = 72 }
  0x13   : > { %6025 = sst [smem:[#allocation8_spill]] %s6048_s14  ;;  %p593_p6 = scmp.lt.s32.totalorder (!%p505_p3), %s4246_s15, 7 }
  0x14   : > { %s6026_s1 = sld [smem:[#allocation10_spill]] (!%p505_p3)  ;;  %s6027_s2 = sld [smem:[#allocation11_spill]] (!%p505_p3) }
  0x15   : > { %s6028_s0 = sld [smem:[#allocation9_spill]] (!%p505_p3)  ;;  %s6029_s3 = sld [smem:[#allocation12_spill]] (!%p505_p3) }
  0x16   : > { %s6030_s4 = sld [smem:[#allocation13_spill]] (!%p505_p3)  ;;  %s6031_s5 = sld [smem:[#allocation14_spill]] (!%p505_p3) }
  0x17   : > { %s6032_s6 = sld [smem:[#allocation15_spill]] (!%p505_p3)  ;;  %s6033_s7 = sld [smem:[#allocation16_spill]] (!%p505_p3) }
  0x18   : > { %s6034_s8 = sld [smem:[#allocation17_spill]] (!%p505_p3)  ;;  %s6035_s17 = sld [smem:[#allocation3_spill]] (!%p505_p3) }
  0x19   : > { %s599_s16 = scalar_select %p598_p5, %s5132_s25, 1 }
  0x1a   : > { %s6050_s15 = smov (!%p593_p6, %s4246_s15), 7 }
  0x1b   : > { %s5274_s19 = scalar_lea.vmem %s6026_s1, %s599_s16  ;;  %s5279_s22 = scalar_lea.vmem %s6027_s2, %s599_s16 }
  0x1c   : > { %s4247_s23 = sshll.u32 %s6050_s15, 3  ;;  %s4393_s24 = sshll.u32 %s599_s16, 4 }
  0x1d   : > { %s596_s30 = scalar_lea.vmem %s6028_s0, %s4247_s23  ;;  %s5287_s29 = scalar_lea.vmem %s6029_s3, %s4393_s24 }
  0x1e   : > { %s5292_s18 = scalar_lea.vmem %s6030_s4, %s599_s16  ;;  %s5297_s21 = scalar_lea.vmem %s6031_s5, %s4393_s24 }
  0x1f   : > { %s5302_s14 = scalar_lea.vmem %s6032_s6, %s599_s16  ;;  %s5307_s27 = scalar_lea.vmem %s6033_s7, %s599_s16 }
  0x20   : > { %s5312_s25 = scalar_lea.vmem %s6034_s8, %s599_s16  ;;  %s5317_s1 = scalar_lea.vmem %s5998_s9, %s4393_s24 }
  0x21   : > { %s5322_s2 = scalar_lea.vmem %s5999_s10, %s599_s16  ;;  %s4396_s15 = sshll.u32 %s599_s16, 6 }
  0x22   : > { %s5327_s26 = scalar_lea.vmem %s6000_s11, %s4396_s15  ;;  %s5332_s28 = scalar_lea.vmem %s6001_s12, %s599_s16 }
  0x23   : > { %s5337_s24 = scalar_lea.vmem %s6002_s13, %s4247_s23  ;;  %p4258_p7 = scmp.ne.s32.totalorder %s6035_s17, 0 }
  0x24   : > { %v653_v0 = vld [vmem:[%s596_s30] sm:$0x1f] (!%p4258_p7)  ;;  %vm657_vm0 = vcmask (!%p4258_p7), 258048   ;;  %v654_v1 = vld [vmem:[%s596_s30 + $0x8] sm:$0x1f] (!%p4258_p7) }
  0x25   : > { %652 = sbr.rel (%p4258_p7) target bundleno = 44 (0x2c), region = 76  ;;  %658 = vst.msk [vmem:[#allocation2] sm:$0x1f] (!%p4258_p7), %vm657_vm0, %v653_v0  ;;  %659 = vst.msk [vmem:[#allocation2 + $0x8] sm:$0x1f] (!%p4258_p7), %vm657_vm0, %v654_v1 }
  0x26   : > { %v655_v2 = vld [vmem:[%s596_s30 + $0x10] sm:$0x1f] (!%p4258_p7)  ;;  %v656_v3 = vld [vmem:[%s596_s30 + $0x18] sm:$0x1f] (!%p4258_p7) }
  0x27   : > { %660 = vst.msk [vmem:[#allocation2 + $0x10] sm:$0x1f] (!%p4258_p7), %vm657_vm0, %v655_v2  ;;  %661 = vst.msk [vmem:[#allocation2 + $0x18] sm:$0x1f] (!%p4258_p7), %vm657_vm0, %v656_v3 }
  0x2c PF: > { %v5340_v4 = vld [vmem:[#allocation2] sm:$0x1f]  ;;  %vm665_vm1 = vcmask 258048   ;;  %v5150_v12 = vmov 0.0   ;;  %vm5151_vm2 = vmmov 0   ;;  %v4959_v13 = vld [vmem:[%s5287_s29 + $0x8] sm:$0xff]  }
  0x2d   : > { %v666_v5 = vsel %vm665_vm1, %v5340_v4, 0.0  ;;  %v4958_v11 = vld [vmem:[%s5287_s29] sm:$0xff]   ;;  %4533 = vmatprep.subr.bf16.mxu1 %v5150_v12  ;;  %4537 = vmatprep.mubr.msk.bf16.mxu1 %vm5151_vm2, %v5150_v12  ;;  %vm718_vm3 = vcmask 261120   ;;  %s5152_s5 = smov 64   ;;  %s5153_s6 = smov 96   ;;  %vm766_vm4 = vcmask 64512  }
  0x2e   : > { %667 = vadd.xlane.f32.xlu0 %v666_v5  ;;  %4534 = vmatpush3.bf16.msra.mxu1 %v4958_v11  ;;  %v5357_v18 = vld [vmem:[%s5274_s19] ss:$0 sm:$0xff]  ;;  %vm833_vm5 = vcmask 1041408   ;;  %vm834_vm6 = vcmask 1042432   ;;  %v5154_v33 = vmov 65535   ;;  %vm814_vm7 = vcmask 36864  }
  0x2f   : > { %4559 = vmatprep.subr.bf16.mxu0 %v5150_v12  ;;  %4535 = vmatprep.subr.bf16.mxu1 %v5150_v12  ;;  %v5360_v20 = vld [vmem:[%s5279_s22] ss:$0 sm:$0xff]  ;;  %v835_v34 = vsel %vm833_vm5, 4294967295, %v5154_v33  ;;  %s5155_s7 = smov 80   ;;  %s5156_s8 = smov 88   ;;  %vm829_vm8 = vcmask 39936  }
  0x30   : > { %4561 = vmatprep.mubr.msk.bf16.mxu0 %vm5151_vm2, %v5150_v12  ;;  %v5368_v24 = vld [vmem:[%s5292_s18] ss:$0 sm:$0xff]  ;;  %v5379_v35 = vsel %vm834_vm6, %v835_v34, 0  ;;  %s5157_s30 = smov 120   ;;  %s5158_s16 = smov 112   ;;  %vm1226_vm9 = vcmask 130048  }
  0x31   : > { %s5159_s23 = smov 72   ;;  %s5160_s20 = smov 104   ;;  %vm1228_vm10 = vcmask 195584  }
  0x32   : > { %4536 = vmatpush3.bf16.msra.mxu1 %v4959_v13  ;;  %s6009_s15 = smov 48   ;;  %s5162_s0 = smov 56  }
  0x33   : > { %4541 = vmatprep.subr.bf16.mxu1 %v5150_v12  ;;  %s6007_s3 = smov 40   ;;  %s5164_s4 = smov 8  }
  0x34   : > { %s5165_s17 = smov 16  }
  0xbb   : > { %v668_v6 = vpop.xlane.xlu0 %667 }
  0xbc   : > { %v670_v7 = vmul.f32 0.03125, %v668_v6 }
  0xbe   : > { %v671_v8 = vsub.f32 %v5340_v4, %v670_v7 }
  0xc0   : > { %v672_v9 = vmul.f32 %v671_v8, %v671_v8 }
  0xc2   : > { %v673_v10 = vsel %vm665_vm1, %v672_v9, 0.0 }
  0xc3   : > { %674 = vadd.xlane.f32.xlu0 %v673_v10 }
 0x150   : > { %v675_v14 = vpop.xlane.xlu0 %674 }
 0x151   : > { %v676_v15 = vmul.f32 0.03125, %v675_v14 }
 0x153   : > { %v677_v16 = vadd.f32 1e-05, %v676_v15 }
 0x155   : > { %5014 = vrsqrt.f32 %v677_v16 }
 0x15f   : > { %v5015_v17 = vpop.eup %5014 }
 0x160   : > { %v679_v19 = vmul.f32 %v5015_v17, %v671_v8 }
 0x162   : > { %v686_v21 = vmul.f32 %v5357_v18, %v679_v19 }
 0x164   : > { %v693_v22 = vadd.f32 %v5360_v20, %v686_v21 }
 0x166   : > { %v698_v23 = vpack.c.bf16 %v693_v22, %v693_v22 }
 0x168   : > { %4538 = vmatmul.mubr.msk.bf16.vlgmr.msra.gmra.mrb[0].mxu1 %vm718_vm3, %v698_v23 }
 0x169   : > { %4543 = vmatprep.mubr.msk.bf16.mxu1 %vm5151_vm2, %v5150_v12 }
 0x23b   : > { %v756_v25 = vpop.f32.mrb[0].mxu1 }
 0x23c   : > { %v757_v26 = vadd.f32 %v5368_v24, %v756_v25  ;;  %v4539_v27 = vpop.f32.mrb[1].mxu1 }
 0x23d   : > { %v759_v28 = vpop.f32.mrb[2].mxu1 }
 0x23e   : > { %v5371_v29 = vpack.c.bf16 %v757_v26, %v757_v26  ;;  %v4540_v30 = vpop.f32.mrb[3].mxu1 }
 0x240   : > { %827 = vrot.lane.b32.xlu0 %v5371_v29, %s5152_s5  ;;  %764 = vrot.lane.b32.xlu1 %v5371_v29, %s5153_s6 }
 0x2b2   : > { %v765_v31 = vpop.permute.xlu1 %764  ;;  %v828_v36 = vpop.permute.xlu0 %827 }
 0x2b3   : > { %v771_v32 = vsel %vm766_vm4, %v765_v31, 0  ;;  %v838_v37 = vand.u32 %v5379_v35, %v828_v36 }
 0x2b4   : > { %4542 = vmatpush3.bf16.xpose.msra.mxu1 %v771_v32 }
 0x2b5   : > { %4547 = vmatprep.subr.bf16.mxu1 %v5150_v12 }
 0x2bb   : > { %4544 = vmatmul.mubr.msk.bf16.vlgmr.msra.gmra.mrb[4].mxu1 %vm766_vm4, %v5371_v29 }
 0x2bc   : > { %4548 = vmatpush3.bf16.msra.mxu1 %v838_v37  ;;  %4549 = vmatprep.mubr.msk.bf16.mxu1 %vm5151_vm2, %v5150_v12 }
 0x2bd   : > { %4553 = vmatprep.subr.bf16.mxu1 %v5150_v12 }
 0x38e   : > { %v807_v38 = vpop.f32.mrb[4].mxu1 }
 0x38f   : > { %v813_v39 = vmul.f32 0.35355338, %v807_v38  ;;  %v4545_v40 = vpop.f32.mrb[5].mxu1 }
 0x390   : > { %v810_v41 = vpop.f32.mrb[6].mxu1 }
 0x391   : > { %v4546_v42 = vpop.f32.mrb[7].mxu1  ;;  %v815_v43 = vsel %vm814_vm7, %v813_v39, -inf }
 0x392   : > { %816 = vmax.xlane.f32.xlu1 %v815_v43 }
 0x3a3   : > { %993 = vrot.lane.b32.xlu1 %v5371_v29, %s5155_s7 }
 0x41f   : > { %v817_v44 = vpop.xlane.xlu1 %816 }
 0x420   : > { %v818_v45 = vsub.f32 %v813_v39, %v817_v44 }
 0x422   : > { %v819_v46 = vmul.f32 1.442695, %v818_v45 }
 0x423   : > { %v994_v56 = vpop.permute.xlu1 %993 }
 0x424   : > { %5016 = vpow2.f32 %v819_v46  ;;  %v999_v58 = vsel %vm766_vm4, %v994_v56, 0 }
 0x42e   : > { %v5017_v47 = vpop.eup %5016 }
 0x42f   : > { %v821_v48 = vsel %vm814_vm7, %v5017_v47, 0.0 }
 0x430   : > { %822 = vadd.xlane.f32.xlu0 %v821_v48 }
 0x446   : > { %882 = vrot.lane.b32.xlu0 %v5371_v29, %s5156_s8 }
 0x44a   : > { %880 = vrot.lane.b32.xlu0 %v5371_v29, %s5157_s30 }
 0x44e   : > { %991 = vrot.lane.b32.xlu0 %v5371_v29, %s5158_s16 }
 0x452   : > { %1104 = vrot.lane.b32.xlu0 %v5371_v29, %s5159_s23 }
 0x456   : > { %1102 = vrot.lane.b32.xlu0 %v5371_v29, %s5160_s20 }
 0x4bd   : > { %v823_v49 = vpop.xlane.xlu0 %822 }
 0x4be   : > { %5018 = vrcp.f32 %v823_v49 }
 0x4c1   : > { %v883_v51 = vpop.permute.xlu0 %882 }
 0x4c2   : > { %v888_v54 = vsel %vm766_vm4, %v883_v51, 0 }
 0x4c5   : > { %v881_v55 = vpop.permute.xlu0 %880 }
 0x4c8   : > { %v5019_v50 = vpop.eup %5018 }
 0x4c9   : > { %v825_v52 = vmul.f32 %v5019_v50, %v5017_v47  ;;  %v992_v57 = vpop.permute.xlu0 %991 }
 0x4cb   : > { %v826_v53 = vpack.c.bf16 %v825_v52, %v825_v52 }
 0x4cd   : > { %4550 = vmatmul.mubr.msk.bf16.vlgmr.msra.gmra.mrb[8].mxu1 %vm829_vm8, %v826_v53  ;;  %v1105_v59 = vpop.permute.xlu0 %1104 }
 0x4ce   : > { %4554 = vmatpush3.bf16.xpose.msra.mxu1 %v888_v54  ;;  %4555 = vmatprep.mubr.msk.bf16.mxu1 %vm5151_vm2, %v5150_v12  ;;  %v1110_v60 = vsel %vm766_vm4, %v1105_v59, 0  ;;  %v4960_v59 = vld [vmem:[%s5297_s21] sm:$0xff]  }
 0x4cf   : > { %4565 = vmatprep.subr.bf16.mxu1 %v5150_v12 }
 0x4d1   : > { %v1103_v61 = vpop.permute.xlu0 %1102 }
 0x4d5   : > { %4556 = vmatmul.mubr.msk.bf16.vlgmr.msra.gmra.mrb[12].mxu1 %vm766_vm4, %v881_v55 }
 0x4d6   : > { %4566 = vmatpush3.bf16.xpose.msra.mxu1 %v999_v58  ;;  %4567 = vmatprep.mubr.msk.bf16.mxu1 %vm5151_vm2, %v5150_v12 }
 0x4d7   : > { %4577 = vmatprep.subr.bf16.mxu1 %v5150_v12 }
 0x4dd   : > { %4568 = vmatmul.mubr.msk.bf16.vlgmr.msra.gmra.mrb[16].mxu1 %vm766_vm4, %v992_v57 }
 0x4de   : > { %4578 = vmatpush3.bf16.xpose.msra.mxu1 %v1110_v60  ;;  %4579 = vmatprep.mubr.msk.bf16.mxu1 %vm5151_vm2, %v5150_v12 }
 0x4df   : > { %4589 = vmatprep.subr.bf16.mxu1 %v5150_v12 }
 0x4e5   : > { %4580 = vmatmul.mubr.msk.bf16.vlgmr.msra.gmra.mrb[20].mxu1 %vm766_vm4, %v1103_v61 }
 0x4e6   : > { %4593 = vmatprep.mubr.msk.bf16.mxu1 %vm5151_vm2, %v5150_v12  ;;  %4590 = vmatpush3.bf16.msra.mxu1 %v4960_v59 }
 0x4e7   : > { %4591 = vmatprep.subr.bf16.mxu1 %v5150_v12 }
 0x5a0   : > { %v5419_v62 = vpop.f32.mrb[8].mxu1 }
 0x5a1   : > { %v4551_v63 = vpop.f32.mrb[9].mxu1 }
 0x5a2   : > { %v877_v0 = vpop.f32.mrb[10].mxu1 }
 0x5a3   : > { %v4552_v1 = vpop.f32.mrb[11].mxu1 }
 0x5a4   : > { %v4961_v1 = vld [vmem:[%s5297_s21 + $0x8] sm:$0xff]  }
 0x5a5   : > { %4592 = vmatpush3.bf16.msra.mxu1 %v4961_v1  ;;  %v4969_v1 = vld [vmem:[%s5327_s26 + $0x18] sm:$0xff]  }
 0x5a6   : > { %4605 = vmatprep.subr.bf16.mxu1 %v5150_v12 }
 0x5a8   : > { %v924_v2 = vpop.f32.mrb[12].mxu1 }
 0x5a9   : > { %v930_v3 = vmul.f32 0.35355338, %v924_v2  ;;  %v4557_v5 = vpop.f32.mrb[13].mxu1 }
 0x5aa   : > { %v927_v6 = vpop.f32.mrb[14].mxu1 }
 0x5ab   : > { %v4558_v7 = vpop.f32.mrb[15].mxu1  ;;  %v931_v8 = vsel %vm814_vm7, %v930_v3, -inf }
 0x5ac   : > { %932 = vmax.xlane.f32.xlu0 %v931_v8 }
 0x5b0   : > { %v1035_v9 = vpop.f32.mrb[16].mxu1 }
 0x5b1   : > { %v1041_v10 = vmul.f32 0.35355338, %v1035_v9  ;;  %v4569_v11 = vpop.f32.mrb[17].mxu1 }
 0x5b2   : > { %v1038_v13 = vpop.f32.mrb[18].mxu1 }
 0x5b3   : > { %v4570_v14 = vpop.f32.mrb[19].mxu1  ;;  %v1042_v15 = vsel %vm814_vm7, %v1041_v10, -inf }
 0x5b4   : > { %1043 = vmax.xlane.f32.xlu1 %v1042_v15 }
 0x5b8   : > { %v1146_v16 = vpop.f32.mrb[20].mxu1 }
 0x5b9   : > { %v1152_v17 = vmul.f32 0.35355338, %v1146_v16  ;;  %v4581_v19 = vpop.f32.mrb[21].mxu1 }
 0x5ba   : > { %v1149_v21 = vpop.f32.mrb[22].mxu1 }
 0x5bb   : > { %v4582_v22 = vpop.f32.mrb[23].mxu1  ;;  %v1153_v23 = vsel %vm814_vm7, %v1152_v17, -inf  ;;  %v5462_v21 = vld [vmem:[#allocation2 + $0x8] sm:$0x1f] }
 0x5bc   : > { %1154 = vmax.xlane.f32.xlu0 %v1153_v23  ;;  %v1520_v22 = vsel %vm665_vm1, %v5462_v21, 0.0 }
 0x5c5   : > { %1054 = vrot.lane.b32.xlu1 %v5371_v29, %s6009_s15 }
 0x639   : > { %v933_v25 = vpop.xlane.xlu0 %932 }
 0x63a   : > { %v934_v26 = vsub.f32 %v930_v3, %v933_v25  ;;  %v5467_v25 = vld [vmem:[%s5302_s14] ss:$0 sm:$0xff] }
 0x63c   : > { %v935_v27 = vmul.f32 1.442695, %v934_v26 }
 0x63e   : > { %5020 = vpow2.f32 %v935_v27 }
 0x641   : > { %v1044_v28 = vpop.xlane.xlu1 %1043 }
 0x642   : > { %v1045_v30 = vsub.f32 %v1041_v10, %v1044_v28 }
 0x644   : > { %v1046_v31 = vmul.f32 1.442695, %v1045_v30 }
 0x645   : > { %v1055_v45 = vpop.permute.xlu1 %1054 }
 0x646   : > { %5022 = vpow2.f32 %v1046_v31  ;;  %v1060_v51 = vand.u32 %v1055_v45, %v5379_v35 }
 0x648   : > { %v5021_v32 = vpop.eup %5020 }
 0x649   : > { %v1155_v33 = vpop.xlane.xlu0 %1154  ;;  %v937_v34 = vsel %vm814_vm7, %v5021_v32, 0.0 }
 0x64a   : > { %v1156_v36 = vsub.f32 %v1152_v17, %v1155_v33  ;;  %938 = vadd.xlane.f32.xlu0 %v937_v34 }
 0x64c   : > { %v1157_v37 = vmul.f32 1.442695, %v1156_v36 }
 0x64e   : > { %5024 = vpow2.f32 %v1157_v37 }
 0x650   : > { %v5023_v38 = vpop.eup %5022 }
 0x651   : > { %v1048_v39 = vsel %vm814_vm7, %v5023_v38, 0.0 }
 0x652   : > { %1049 = vadd.xlane.f32.xlu0 %v1048_v39 }
 0x658   : > { %v5025_v40 = vpop.eup %5024 }
 0x659   : > { %v1159_v41 = vsel %vm814_vm7, %v5025_v40, 0.0 }
 0x65a   : > { %1160 = vadd.xlane.f32.xlu1 %v1159_v41 }
 0x668   : > { %943 = vrot.lane.b32.xlu0 %v5371_v29, %s5162_s0 }
 0x66b   : > { %1165 = vrot.lane.b32.xlu1 %v5371_v29, %s6007_s3  ;;  %s5166_s3 = smov 24  }
 0x6d7   : > { %v939_v42 = vpop.xlane.xlu0 %938 }
 0x6d8   : > { %5026 = vrcp.f32 %v939_v42  ;;  %v4962_v42 = vld [vmem:[%s5317_s1] sm:$0xff]  }
 0x6df   : > { %v1050_v43 = vpop.xlane.xlu0 %1049 }
 0x6e0   : > { %5028 = vrcp.f32 %v1050_v43  ;;  %v4963_v43 = vld [vmem:[%s5317_s1 + $0x8] sm:$0xff]  }
 0x6e2   : > { %v5027_v44 = vpop.eup %5026 }
 0x6e3   : > { %v944_v46 = vpop.permute.xlu0 %943  ;;  %v941_v47 = vmul.f32 %v5027_v44, %v5021_v32 }
 0x6e4   : > { %v949_v48 = vand.u32 %v944_v46, %v5379_v35 }
 0x6e5   : > { %v942_v50 = vpack.c.bf16 %v941_v47, %v941_v47 }
 0x6e6   : > { %4560 = vmatpush3.bf16.msra.mxu0 %v949_v48 }
 0x6e7   : > { %v1161_v49 = vpop.xlane.xlu1 %1160  ;;  %4571 = vmatprep.subr.bf16.mxu0 %v5150_v12 }
 0x6e8   : > { %5030 = vrcp.f32 %v1161_v49 }
 0x6e9   : > { %4562 = vmatmul.mubr.msk.bf16.vlgmr.msra.gmra.mrb[0].mxu0 %vm829_vm8, %v942_v50 }
 0x6ea   : > { %v5029_v29 = vpop.eup %5028  ;;  %4572 = vmatpush3.bf16.msra.mxu0 %v1060_v51  ;;  %4573 = vmatprep.mubr.msk.bf16.mxu0 %vm5151_vm2, %v5150_v12  ;;  %v5484_v51 = vld [vmem:[%s5307_s27] ss:$0 sm:$0xff] }
 0x6eb   : > { %v1052_v52 = vmul.f32 %v5029_v29, %v5023_v38  ;;  %4583 = vmatprep.subr.bf16.mxu0 %v5150_v12  ;;  %v1166_v53 = vpop.permute.xlu1 %1165 }
 0x6ec   : > { %v1171_v55 = vand.u32 %v1166_v53, %v5379_v35 }
 0x6ed   : > { %v1053_v54 = vpack.c.bf16 %v1052_v52, %v1052_v52  ;;  %v5487_v52 = vld [vmem:[%s5312_s25] ss:$0 sm:$0xff] }
 0x6f1   : > { %4574 = vmatmul.mubr.msk.bf16.vlgmr.msra.gmra.mrb[4].mxu0 %vm829_vm8, %v1053_v54 }
 0x6f2   : > { %v5031_v56 = vpop.eup %5030  ;;  %4584 = vmatpush3.bf16.msra.mxu0 %v1171_v55  ;;  %4585 = vmatprep.mubr.msk.bf16.mxu0 %vm5151_vm2, %v5150_v12 }
 0x6f3   : > { %v1163_v57 = vmul.f32 %v5031_v56, %v5025_v40  ;;  %4597 = vmatprep.subr.bf16.mxu0 %v5150_v12 }
 0x6f5   : > { %v1164_v58 = vpack.c.bf16 %v1163_v57, %v1163_v57  ;;  %v4964_v57 = vld [vmem:[%s5287_s29] sm:$0xff]  }
 0x6f9   : > { %4586 = vmatmul.mubr.msk.bf16.vlgmr.msra.gmra.mrb[8].mxu0 %vm829_vm8, %v1164_v58 }
 0x6fa   : > { %4601 = vmatprep.mubr.msk.bf16.mxu0 %vm5151_vm2, %v5150_v12  ;;  %4598 = vmatpush3.bf16.msra.mxu0 %v4962_v42 }
 0x6fb   : > { %4599 = vmatprep.subr.bf16.mxu0 %v5150_v12 }
 0x6fe   : > { %4600 = vmatpush3.bf16.msra.mxu0 %v4963_v43 }
 0x6ff   : > { %4625 = vmatprep.subr.bf16.mxu0 %v5150_v12 }
 0x7bc   : > { %v985_v60 = vpop.f32.mrb[0].mxu0 }
 0x7bd   : > { %1214 = vrot.lane.b32.xlu1 %v985_v60, %s5164_s4  ;;  %v4563_v61 = vpop.f32.mrb[1].mxu0  ;;  %v4965_v60 = vld [vmem:[%s5287_s29 + $0x8] sm:$0xff]  }
 0x7be   : > { %v988_v63 = vpop.f32.mrb[2].mxu0 }
 0x7bf   : > { %v4564_v0 = vpop.f32.mrb[3].mxu0 }
 0x7c0   : > { %v4967_v0 = vld [vmem:[%s5327_s26 + $0x8] sm:$0xff]  }
 0x7c4   : > { %v1096_v2 = vpop.f32.mrb[4].mxu0 }
 0x7c5   : > { %1218 = vrot.lane.b32.xlu0 %v1096_v2, %s5165_s17  ;;  %v4575_v3 = vpop.f32.mrb[5].mxu0  ;;  %v4970_v2 = vld [vmem:[%s5327_s26 + $0x20] sm:$0xff]  }
 0x7c6   : > { %v1099_v5 = vpop.f32.mrb[6].mxu0  ;;  %v4971_v3 = vld [vmem:[%s5327_s26 + $0x28] sm:$0xff]  }
 0x7c7   : > { %v4576_v6 = vpop.f32.mrb[7].mxu0  ;;  %v4972_v5 = vld [vmem:[%s5327_s26 + $0x30] sm:$0xff]  }
 0x7c8   : > { %v4973_v6 = vld [vmem:[%s5327_s26 + $0x38] sm:$0xff]  }
 0x7cc   : > { %v1207_v7 = vpop.f32.mrb[8].mxu0 }
 0x7cd   : > { %1222 = vrot.lane.b32.xlu1 %v1207_v7, %s5166_s3  ;;  %v4587_v8 = vpop.f32.mrb[9].mxu0  ;;  %v5520_v7 = vld [vmem:[%s5322_s2] ss:$0 sm:$0xff] }
 0x7ce   : > { %v1210_v9 = vpop.f32.mrb[10].mxu0 }
 0x7cf   : > { %v4588_v10 = vpop.f32.mrb[11].mxu0 }
 0x7f1   : > { %1521 = vadd.xlane.f32.xlu1 %v1520_v22 }
 0x82f   : > { %v1215_v11 = vpop.permute.xlu1 %1214 }
 0x830   : > { %v1225_v14 = vsel %vm766_vm4, %v5419_v62, %v1215_v11 }
 0x837   : > { %v1219_v13 = vpop.permute.xlu0 %1218 }
 0x838   : > { %v1227_v15 = vsel %vm1226_vm9, %v1225_v14, %v1219_v13 }
 0x83f   : > { %v1223_v16 = vpop.permute.xlu1 %1222 }
 0x840   : > { %v1229_v17 = vsel %vm1228_vm10, %v1227_v15, %v1223_v16 }
 0x841   : > { %v1234_v19 = vpack.c.bf16 %v1229_v17, %v1229_v17 }
 0x843   : > { %4594 = vmatmul.mubr.msk.bf16.vlgmr.msra.gmra.mrb[24].mxu1 %vm718_vm3, %v1234_v19 }
 0x844   : > { %4621 = vmatprep.mubr.msk.bf16.mxu1 %vm5151_vm2, %v5150_v12 }
 0x87e   : > { %v1522_v32 = vpop.xlane.xlu1 %1521 }
 0x87f   : > { %v1523_v33 = vmul.f32 0.03125, %v1522_v32 }
 0x881   : > { %v1524_v37 = vsub.f32 %v5462_v21, %v1523_v33 }
 0x883   : > { %v1525_v39 = vmul.f32 %v1524_v37, %v1524_v37 }
 0x885   : > { %v1526_v41 = vsel %vm665_vm1, %v1525_v39, 0.0 }
 0x916   : > { %v1284_v23 = vpop.f32.mrb[24].mxu1 }
 0x917   : > { %v1290_v62 = vadd.f32 %v1284_v23, %v5340_v4  ;;  %v4595_v26 = vpop.f32.mrb[25].mxu1 }
 0x918   : > { %v1287_v27 = vpop.f32.mrb[26].mxu1 }
 0x919   : > { %v5471_v28 = vadd.f32 %v5467_v25, %v1290_v62  ;;  %v4596_v30 = vpop.f32.mrb[27].mxu1 }
 0x91b   : > { %v1301_v31 = vsel %vm665_vm1, %v5471_v28, 0.0 }
 0x91c   : > { %1302 = vadd.xlane.f32.xlu0 %v1301_v31 }
 0x9a9   : > { %v1303_v34 = vpop.xlane.xlu0 %1302 }
 0x9aa   : > { %v1304_v36 = vmul.f32 0.03125, %v1303_v34  ;;  %v5543_v34 = vld [vmem:[%s5332_s28] ss:$0 sm:$0xff] }
 0x9ac   : > { %v1305_v4 = vsub.f32 %v5471_v28, %v1304_v36 }
 0x9ae   : > { %v1306_v38 = vmul.f32 %v1305_v4, %v1305_v4 }
 0x9b0   : > { %v1307_v40 = vsel %vm665_vm1, %v1306_v38, 0.0 }
 0x9b1   : > { %1308 = vadd.xlane.f32.xlu0 %v1307_v40 }
 0x9b5   : > { %1527 = vadd.xlane.f32.xlu0 %v1526_v41 }
 0xa3e   : > { %v1309_v44 = vpop.xlane.xlu0 %1308 }
 0xa3f   : > { %v1310_v45 = vmul.f32 0.03125, %v1309_v44 }
 0xa41   : > { %v1311_v46 = vadd.f32 1e-05, %v1310_v45 }
 0xa42   : > { %v1528_v47 = vpop.xlane.xlu0 %1527 }
 0xa43   : > { %5032 = vrsqrt.f32 %v1311_v46  ;;  %v1529_v48 = vmul.f32 0.03125, %v1528_v47 }
 0xa45   : > { %v1530_v49 = vadd.f32 1e-05, %v1529_v48 }
 0xa47   : > { %5034 = vrsqrt.f32 %v1530_v49 }
 0xa4d   : > { %v5033_v50 = vpop.eup %5032 }
 0xa4e   : > { %v1313_v29 = vmul.f32 %v5033_v50, %v1305_v4 }
 0xa50   : > { %v1320_v53 = vmul.f32 %v5484_v51, %v1313_v29 }
 0xa51   : > { %v5035_v54 = vpop.eup %5034 }
 0xa52   : > { %v1532_v55 = vmul.f32 %v5035_v54, %v1524_v37  ;;  %v1327_v56 = vadd.f32 %v5487_v52, %v1320_v53 }
 0xa54   : > { %v1332_v58 = vpack.c.bf16 %v1327_v56, %v1327_v56  ;;  %v1539_v59 = vmul.f32 %v5357_v18, %v1532_v55  ;;  %v4966_v18 = vld [vmem:[%s5327_s26] sm:$0xff]  }
 0xa55   : > { %4606 = vmatpush3.bf16.msra.mxu1 %v4966_v18 }
 0xa56   : > { %4602 = vmatmul.mubr.msk.bf16.vlgmr.msra.gmra.mrb[12].mxu0 %vm718_vm3, %v1332_v58  ;;  %v1546_v61 = vadd.f32 %v5360_v20, %v1539_v59  ;;  %4607 = vmatprep.subr.bf16.mxu1 %v5150_v12  ;;  %v4968_v20 = vld [vmem:[%s5327_s26 + $0x10] sm:$0xff]  }
 0xa57   : > { %4626 = vmatpush3.bf16.msra.mxu0 %v4964_v57  ;;  %4629 = vmatprep.mubr.msk.bf16.mxu0 %vm5151_vm2, %v5150_v12 }
 0xa58   : > { %4627 = vmatprep.subr.bf16.mxu0 %v5150_v12  ;;  %v1551_v63 = vpack.c.bf16 %v1546_v61, %v1546_v61 }
 0xa59   : > { %4608 = vmatpush3.bf16.msra.mxu1 %v4967_v0 }
 0xa5a   : > { %4609 = vmatprep.subr.bf16.mxu1 %v5150_v12 }
 0xa5b   : > { %4628 = vmatpush3.bf16.msra.mxu0 %v4965_v60 }
 0xa5c   : > { %4633 = vmatprep.subr.bf16.mxu0 %v5150_v12 }
 0xa5d   : > { %4610 = vmatpush3.bf16.msra.mxu1 %v4968_v20 }
 0xa5e   : > { %4630 = vmatmul.mubr.msk.bf16.vlgmr.msra.gmra.mrb[16].mxu0 %vm718_vm3, %v1551_v63  ;;  %4611 = vmatprep.subr.bf16.mxu1 %v5150_v12 }
 0xa5f   : > { %4635 = vmatprep.mubr.msk.bf16.mxu0 %vm5151_vm2, %v5150_v12 }
 0xa61   : > { %4612 = vmatpush3.bf16.msra.mxu1 %v4969_v1 }
 0xa62   : > { %4613 = vmatprep.subr.bf16.mxu1 %v5150_v12 }
 0xa65   : > { %4614 = vmatpush3.bf16.msra.mxu1 %v4970_v2 }
 0xa66   : > { %4615 = vmatprep.subr.bf16.mxu1 %v5150_v12 }
 0xa69   : > { %4616 = vmatpush3.bf16.msra.mxu1 %v4971_v3 }
 0xa6a   : > { %4617 = vmatprep.subr.bf16.mxu1 %v5150_v12 }
 0xa6d   : > { %4618 = vmatpush3.bf16.msra.mxu1 %v4972_v5 }
 0xa6e   : > { %4619 = vmatprep.subr.bf16.mxu1 %v5150_v12 }
 0xa71   : > { %4620 = vmatpush3.bf16.msra.mxu1 %v4973_v6 }
 0xa72   : > { %4651 = vmatprep.subr.bf16.mxu1 %v5150_v12 }
 0xb29   : > { %v1389_v8 = vpop.f32.mrb[12].mxu0 }
 0xb2a   : > { %v1390_v9 = vadd.f32 %v5520_v7, %v1389_v8  ;;  %v4603_v10 = vpop.f32.mrb[13].mxu0 }
 0xb2b   : > { %v1392_v11 = vpop.f32.mrb[14].mxu0 }
 0xb2c   : > { %v1395_v13 = vmul.f32 -1.702, %v1390_v9  ;;  %v4604_v14 = vpop.f32.mrb[15].mxu0 }
 0xb2e   : > { %v1396_v15 = vmul.f32 1.442695, %v1395_v13 }
 0xb30   : > { %5036 = vpow2.f32 %v1396_v15 }
 0xb31   : > { %v1608_v16 = vpop.f32.mrb[16].mxu0 }
 0xb32   : > { %v1609_v17 = vadd.f32 %v5368_v24, %v1608_v16  ;;  %v4631_v19 = vpop.f32.mrb[17].mxu0 }
 0xb33   : > { %v1611_v22 = vpop.f32.mrb[18].mxu0 }
 0xb34   : > { %v5524_v23 = vpack.c.bf16 %v1609_v17, %v1609_v17  ;;  %v4632_v62 = vpop.f32.mrb[19].mxu0 }
 0xb36   : > { %1616 = vrot.lane.b32.xlu0 %v5524_v23, %s5153_s6 }
 0xb3a   : > { %v5037_v26 = vpop.eup %5036  ;;  %1727 = vrot.lane.b32.xlu0 %v5524_v23, %s5156_s8 }
 0xb3b   : > { %v1398_v27 = vadd.f32 1.0, %v5037_v26 }
 0xb3d   : > { %5038 = vrcp.f32 %v1398_v27 }
 0xb3e   : > { %1838 = vrot.lane.b32.xlu0 %v5524_v23, %s5155_s7 }
 0xb42   : > { %1949 = vrot.lane.b32.xlu0 %v5524_v23, %s5159_s23 }
 0xb47   : > { %v5039_v24 = vpop.eup %5038 }
 0xb48   : > { %v1401_v30 = vmul.f32 %v5039_v24, %v1390_v9 }
 0xb4a   : > { %v1418_v31 = vpack.c.bf16 %v1401_v30, %v1401_v30 }
 0xb4c   : > { %4622 = vmatmul.mubr.bf16.vlgmr.msra.gmra.mrb[28].mxu1 %v1418_v31 }
 0xb4d   : > { %4653 = vmatprep.mubr.msk.bf16.mxu1 %vm5151_vm2, %v5150_v12 }
 0xba8   : > { %v1617_v32 = vpop.permute.xlu0 %1616 }
 0xba9   : > { %v1622_v33 = vsel %vm766_vm4, %v1617_v32, 0 }
 0xbaa   : > { %4634 = vmatpush3.bf16.xpose.msra.mxu0 %v1622_v33 }
 0xbab   : > { %4639 = vmatprep.subr.bf16.mxu0 %v5150_v12 }
 0xbac   : > { %v1728_v58 = vpop.permute.xlu0 %1727 }
 0xbad   : > { %v1733_v60 = vsel %vm766_vm4, %v1728_v58, 0 }
 0xbb0   : > { %v1839_v61 = vpop.permute.xlu0 %1838 }
 0xbb1   : > { %4636 = vmatmul.mubr.msk.bf16.vlgmr.msra.gmra.mrb[20].mxu0 %vm766_vm4, %v5524_v23  ;;  %v1844_v18 = vsel %vm766_vm4, %v1839_v61, 0 }
 0xbb2   : > { %4641 = vmatprep.mubr.msk.bf16.mxu0 %vm5151_vm2, %v5150_v12 }
 0xbb4   : > { %v1950_v0 = vpop.permute.xlu0 %1949 }
 0xbb5   : > { %v1955_v1 = vsel %vm766_vm4, %v1950_v0, 0 }
 0xc1f   : > { %v1508_v36 = vpop.f32.mrb[28].mxu1 }
 0xc20   : > { %v1509_v37 = vadd.f32 %v5543_v34, %v1508_v36  ;;  %v4623_v4 = vpop.f32.mrb[29].mxu1 }
 0xc21   : > { %v1511_v38 = vpop.f32.mrb[30].mxu1 }
 0xc22   : > { %v1514_v39 = vadd.f32 %v1509_v37, %v5471_v28  ;;  %v4624_v40 = vpop.f32.mrb[31].mxu1 }
 0xc24   : > { %1515 = vst.msk [vmem:[#allocation2] sm:$0x1f] %vm665_vm1, %v1514_v39 }
 0xc2b   : > { %v4045_v41 = vld [vmem:[#allocation2] sm:$0x1f] }
 0xc2c   : > { %4049 = vst.msk [vmem:[%s5337_s24] sm:$0x1f] %vm665_vm1, %v4045_v41 }
 0xc84   : > { %v1658_v42 = vpop.f32.mrb[20].mxu0 }
 0xc85   : > { %v1664_v43 = vmul.f32 0.35355338, %v1658_v42  ;;  %v4637_v44 = vpop.f32.mrb[21].mxu0 }
 0xc86   : > { %v1661_v45 = vpop.f32.mrb[22].mxu0 }
 0xc87   : > { %v4638_v46 = vpop.f32.mrb[23].mxu0  ;;  %v1665_v47 = vsel %vm814_vm7, %v1664_v43, -inf }
 0xc88   : > { %1666 = vmax.xlane.f32.xlu1 %v1665_v47 }
 0xd15   : > { %v1667_v48 = vpop.xlane.xlu1 %1666 }
 0xd16   : > { %v1668_v49 = vsub.f32 %v1664_v43, %v1667_v48 }
 0xd18   : > { %v1669_v50 = vmul.f32 1.442695, %v1668_v49 }
 0xd1a   : > { %5040 = vpow2.f32 %v1669_v50 }
 0xd24   : > { %v5041_v29 = vpop.eup %5040 }
 0xd25   : > { %v1671_v28 = vsel %vm814_vm7, %v5041_v29, 0.0 }
 0xd26   : > { %1672 = vadd.xlane.f32.xlu1 %v1671_v28 }
 0xd37   : > { %1677 = vrot.lane.b32.xlu1 %v5524_v23, %s5152_s5 }
 0xd3b   : > { %1725 = vrot.lane.b32.xlu1 %v5524_v23, %s5157_s30 }
 0xd3f   : > { %1836 = vrot.lane.b32.xlu1 %v5524_v23, %s5158_s16 }
 0xd43   : > { %1947 = vrot.lane.b32.xlu1 %v5524_v23, %s5160_s20 }
 0xdb3   : > { %v1673_v53 = vpop.xlane.xlu1 %1672 }
 0xdb4   : > { %5042 = vrcp.f32 %v1673_v53 }
 0xdb7   : > { %v1678_v54 = vpop.permute.xlu1 %1677 }
 0xdb8   : > { %v1683_v55 = vand.u32 %v1678_v54, %v5379_v35 }
 0xdba   : > { %4640 = vmatpush3.bf16.msra.mxu0 %v1683_v55 }
 0xdbb   : > { %4645 = vmatprep.subr.bf16.mxu0 %v5150_v12  ;;  %v1726_v63 = vpop.permute.xlu1 %1725 }
 0xdbe   : > { %v5043_v56 = vpop.eup %5042 }
 0xdbf   : > { %v1675_v57 = vmul.f32 %v5043_v56, %v5041_v29  ;;  %v1837_v20 = vpop.permute.xlu1 %1836 }
 0xdc1   : > { %v1676_v59 = vpack.c.bf16 %v1675_v57, %v1675_v57 }
 0xdc3   : > { %4642 = vmatmul.mubr.msk.bf16.vlgmr.msra.gmra.mrb[24].mxu0 %vm829_vm8, %v1676_v59  ;;  %v1948_v2 = vpop.permute.xlu1 %1947 }
 0xdc4   : > { %4646 = vmatpush3.bf16.xpose.msra.mxu0 %v1733_v60  ;;  %4647 = vmatprep.mubr.msk.bf16.mxu0 %vm5151_vm2, %v5150_v12 }
 0xdc5   : > { %4657 = vmatprep.subr.bf16.mxu0 %v5150_v12 }
 0xdcb   : > { %4648 = vmatmul.mubr.msk.bf16.vlgmr.msra.gmra.mrb[28].mxu0 %vm766_vm4, %v1726_v63 }
 0xdcc   : > { %4658 = vmatpush3.bf16.xpose.msra.mxu0 %v1844_v18  ;;  %4659 = vmatprep.mubr.msk.bf16.mxu0 %vm5151_vm2, %v5150_v12 }
 0xdcd   : > { %4669 = vmatprep.subr.bf16.mxu0 %v5150_v12 }
 0xdd3   : > { %4660 = vmatmul.mubr.msk.bf16.vlgmr.msra.gmra.mrb[32].mxu0 %vm766_vm4, %v1837_v20 }
 0xdd4   : > { %4670 = vmatpush3.bf16.xpose.msra.mxu0 %v1955_v1  ;;  %4671 = vmatprep.mubr.msk.bf16.mxu0 %vm5151_vm2, %v5150_v12 }
 0xdd5   : > { %4681 = vmatprep.subr.bf16.mxu0 %v5150_v12 }
 0xddb   : > { %4672 = vmatmul.mubr.msk.bf16.vlgmr.msra.gmra.mrb[36].mxu0 %vm766_vm4, %v1948_v2  ;;  %v4974_v2 = vld [vmem:[%s5297_s21] sm:$0xff]  }
 0xddc   : > { %4685 = vmatprep.mubr.msk.bf16.mxu0 %vm5151_vm2, %v5150_v12  ;;  %4682 = vmatpush3.bf16.msra.mxu0 %v4974_v2  ;;  %v5649_v2 = vld [vmem:[%s5279_s22] ss:$0 sm:$0xff] }
 0xddd   : > { %4683 = vmatprep.subr.bf16.mxu0 %v5150_v12 }
 0xe96   : > { %v5580_v3 = vpop.f32.mrb[24].mxu0 }
 0xe97   : > { %v4643_v5 = vpop.f32.mrb[25].mxu0 }
 0xe98   : > { %v1722_v6 = vpop.f32.mrb[26].mxu0 }
 0xe99   : > { %v4644_v8 = vpop.f32.mrb[27].mxu0 }
 0xe9e   : > { %v1769_v9 = vpop.f32.mrb[28].mxu0 }
 0xe9f   : > { %v1775_v10 = vmul.f32 0.35355338, %v1769_v9  ;;  %v4649_v11 = vpop.f32.mrb[29].mxu0 }
 0xea0   : > { %v1772_v13 = vpop.f32.mrb[30].mxu0 }
 0xea1   : > { %v4650_v14 = vpop.f32.mrb[31].mxu0  ;;  %v1776_v15 = vsel %vm814_vm7, %v1775_v10, -inf }
 0xea2   : > { %1777 = vmax.xlane.f32.xlu0 %v1776_v15 }
 0xea6   : > { %v1880_v16 = vpop.f32.mrb[32].mxu0 }
 0xea7   : > { %v1886_v17 = vmul.f32 0.35355338, %v1880_v16  ;;  %v4661_v19 = vpop.f32.mrb[33].mxu0 }
 0xea8   : > { %v1883_v22 = vpop.f32.mrb[34].mxu0 }
 0xea9   : > { %v4662_v62 = vpop.f32.mrb[35].mxu0  ;;  %v1887_v26 = vsel %vm814_vm7, %v1886_v17, -inf }
 0xeaa   : > { %1888 = vmax.xlane.f32.xlu1 %v1887_v26 }
 0xeae   : > { %v1991_v27 = vpop.f32.mrb[36].mxu0 }
 0xeaf   : > { %v1997_v24 = vmul.f32 0.35355338, %v1991_v27  ;;  %v4673_v30 = vpop.f32.mrb[37].mxu0 }
 0xeb0   : > { %v1994_v31 = vpop.f32.mrb[38].mxu0 }
 0xeb1   : > { %v4674_v32 = vpop.f32.mrb[39].mxu0  ;;  %v1998_v33 = vsel %vm814_vm7, %v1997_v24, -inf }
 0xeb2   : > { %1999 = vmax.xlane.f32.xlu0 %v1998_v33  ;;  %v5623_v33 = vld [vmem:[#allocation2 + $0x10] sm:$0x1f] }
 0xebb   : > { %1899 = vrot.lane.b32.xlu1 %v5524_v23, %s6009_s15  ;;  %s6036_s15 = smov 40  }
 0xf2f   : > { %v1778_v36 = vpop.xlane.xlu0 %1777 }
 0xf30   : > { %v1779_v37 = vsub.f32 %v1775_v10, %v1778_v36  ;;  %v4975_v10 = vld [vmem:[%s5297_s21 + $0x8] sm:$0xff]   ;;  %v2363_v36 = vsel %vm665_vm1, %v5623_v33, 0.0 }
 0xf31   : > { %4684 = vmatpush3.bf16.msra.mxu0 %v4975_v10  ;;  %v4983_v10 = vld [vmem:[%s5327_s26 + $0x18] sm:$0xff]  }
 0xf32   : > { %v1780_v4 = vmul.f32 1.442695, %v1779_v37  ;;  %4697 = vmatprep.subr.bf16.mxu0 %v5150_v12 }
 0xf34   : > { %5044 = vpow2.f32 %v1780_v4 }
 0xf37   : > { %v1889_v38 = vpop.xlane.xlu1 %1888 }
 0xf38   : > { %v1890_v39 = vsub.f32 %v1886_v17, %v1889_v38 }
 0xf3a   : > { %v1891_v40 = vmul.f32 1.442695, %v1890_v39 }
 0xf3b   : > { %v1900_v53 = vpop.permute.xlu1 %1899 }
 0xf3c   : > { %5046 = vpow2.f32 %v1891_v40  ;;  %v1905_v59 = vand.u32 %v1900_v53, %v5379_v35 }
 0xf3e   : > { %v5045_v41 = vpop.eup %5044 }
 0xf3f   : > { %v2000_v42 = vpop.xlane.xlu0 %1999  ;;  %v1782_v43 = vsel %vm814_vm7, %v5045_v41, 0.0 }
 0xf40   : > { %v2001_v44 = vsub.f32 %v1997_v24, %v2000_v42  ;;  %1783 = vadd.xlane.f32.xlu0 %v1782_v43 }
 0xf42   : > { %v2002_v45 = vmul.f32 1.442695, %v2001_v44 }
 0xf44   : > { %5048 = vpow2.f32 %v2002_v45 }
 0xf46   : > { %v5047_v46 = vpop.eup %5046 }
 0xf47   : > { %v1893_v47 = vsel %vm814_vm7, %v5047_v46, 0.0 }
 0xf48   : > { %1894 = vadd.xlane.f32.xlu0 %v1893_v47 }
 0xf4e   : > { %v5049_v48 = vpop.eup %5048 }
 0xf4f   : > { %v2004_v49 = vsel %vm814_vm7, %v5049_v48, 0.0 }
 0xf50   : > { %2005 = vadd.xlane.f32.xlu1 %v2004_v49 }
 0xf5e   : > { %1788 = vrot.lane.b32.xlu0 %v5524_v23, %s5162_s0 }
 0xf61   : > { %2010 = vrot.lane.b32.xlu1 %v5524_v23, %s6036_s15 }
 0xfcd   : > { %v1784_v50 = vpop.xlane.xlu0 %1783 }
 0xfce   : > { %5050 = vrcp.f32 %v1784_v50  ;;  %v4976_v50 = vld [vmem:[%s5317_s1] sm:$0xff]  }
 0xfd5   : > { %v1895_v29 = vpop.xlane.xlu0 %1894 }
 0xfd6   : > { %5052 = vrcp.f32 %v1895_v29  ;;  %v4977_v29 = vld [vmem:[%s5317_s1 + $0x8] sm:$0xff]  }
 0xfd8   : > { %v5051_v28 = vpop.eup %5050 }
 0xfd9   : > { %v1786_v54 = vmul.f32 %v5051_v28, %v5045_v41  ;;  %v1789_v55 = vpop.permute.xlu0 %1788 }
 0xfda   : > { %v1794_v56 = vand.u32 %v1789_v55, %v5379_v35 }
 0xfdb   : > { %v1787_v58 = vpack.c.bf16 %v1786_v54, %v1786_v54 }
 0xfdc   : > { %4652 = vmatpush3.bf16.msra.mxu1 %v1794_v56 }
 0xfdd   : > { %v2006_v57 = vpop.xlane.xlu1 %2005  ;;  %4663 = vmatprep.subr.bf16.mxu1 %v5150_v12 }
 0xfde   : > { %5054 = vrcp.f32 %v2006_v57 }
 0xfdf   : > { %4654 = vmatmul.mubr.msk.bf16.vlgmr.msra.gmra.mrb[32].mxu1 %vm829_vm8, %v1787_v58 }
 0xfe0   : > { %v5053_v23 = vpop.eup %5052  ;;  %4664 = vmatpush3.bf16.msra.mxu1 %v1905_v59  ;;  %4665 = vmatprep.mubr.msk.bf16.mxu1 %vm5151_vm2, %v5150_v12 }
 0xfe1   : > { %v1897_v60 = vmul.f32 %v5053_v23, %v5047_v46  ;;  %4675 = vmatprep.subr.bf16.mxu1 %v5150_v12  ;;  %v2011_v61 = vpop.permute.xlu1 %2010 }
 0xfe2   : > { %v2016_v18 = vand.u32 %v2011_v61, %v5379_v35  ;;  %v5643_v61 = vld [vmem:[%s5274_s19] ss:$0 sm:$0xff]  ;;  %s6037_s19 = smov 48  }
 0xfe3   : > { %v1898_v63 = vpack.c.bf16 %v1897_v60, %v1897_v60 }
 0xfe7   : > { %4666 = vmatmul.mubr.msk.bf16.vlgmr.msra.gmra.mrb[36].mxu1 %vm829_vm8, %v1898_v63 }
 0xfe8   : > { %v5055_v0 = vpop.eup %5054  ;;  %4676 = vmatpush3.bf16.msra.mxu1 %v2016_v18  ;;  %4677 = vmatprep.mubr.msk.bf16.mxu1 %vm5151_vm2, %v5150_v12 }
 0xfe9   : > { %v2008_v20 = vmul.f32 %v5055_v0, %v5049_v48  ;;  %4689 = vmatprep.subr.bf16.mxu1 %v5150_v12  ;;  %v4978_v0 = vld [vmem:[%s5287_s29] sm:$0xff]  }
 0xfeb   : > { %v2009_v1 = vpack.c.bf16 %v2008_v20, %v2008_v20 }
 0xfef   : > { %4678 = vmatmul.mubr.msk.bf16.vlgmr.msra.gmra.mrb[40].mxu1 %vm829_vm8, %v2009_v1 }
 0xff0   : > { %4693 = vmatprep.mubr.msk.bf16.mxu1 %vm5151_vm2, %v5150_v12  ;;  %4690 = vmatpush3.bf16.msra.mxu1 %v4976_v50 }
 0xff1   : > { %4691 = vmatprep.subr.bf16.mxu1 %v5150_v12 }
 0xff4   : > { %4692 = vmatpush3.bf16.msra.mxu1 %v4977_v29 }
 0xff5   : > { %4717 = vmatprep.subr.bf16.mxu1 %v5150_v12 }
0x10b2   : > { %v1830_v5 = vpop.f32.mrb[32].mxu1 }
0x10b3   : > { %2059 = vrot.lane.b32.xlu1 %v1830_v5, %s5164_s4  ;;  %v4655_v6 = vpop.f32.mrb[33].mxu1  ;;  %v4979_v5 = vld [vmem:[%s5287_s29 + $0x8] sm:$0xff]  }
0x10b4   : > { %v1833_v8 = vpop.f32.mrb[34].mxu1  ;;  %v4980_v6 = vld [vmem:[%s5327_s26] sm:$0xff]  }
0x10b5   : > { %v4656_v9 = vpop.f32.mrb[35].mxu1  ;;  %v4981_v8 = vld [vmem:[%s5327_s26 + $0x8] sm:$0xff]  }
0x10b6   : > { %v4982_v9 = vld [vmem:[%s5327_s26 + $0x10] sm:$0xff]  }
0x10ba   : > { %v1941_v11 = vpop.f32.mrb[36].mxu1 }
0x10bb   : > { %2063 = vrot.lane.b32.xlu0 %v1941_v11, %s5165_s17  ;;  %v4667_v13 = vpop.f32.mrb[37].mxu1  ;;  %v4984_v11 = vld [vmem:[%s5327_s26 + $0x20] sm:$0xff]  }
0x10bc   : > { %v1944_v14 = vpop.f32.mrb[38].mxu1  ;;  %v4985_v13 = vld [vmem:[%s5327_s26 + $0x28] sm:$0xff]  }
0x10bd   : > { %v4668_v15 = vpop.f32.mrb[39].mxu1  ;;  %v4986_v14 = vld [vmem:[%s5327_s26 + $0x30] sm:$0xff]  }
0x10be   : > { %v4987_v15 = vld [vmem:[%s5327_s26 + $0x38] sm:$0xff]  }
0x10c2   : > { %v2052_v16 = vpop.f32.mrb[40].mxu1 }
0x10c3   : > { %2067 = vrot.lane.b32.xlu1 %v2052_v16, %s5166_s3  ;;  %v4679_v17 = vpop.f32.mrb[41].mxu1 }
0x10c4   : > { %v2055_v19 = vpop.f32.mrb[42].mxu1 }
0x10c5   : > { %v4680_v22 = vpop.f32.mrb[43].mxu1 }
0x10e7   : > { %2364 = vadd.xlane.f32.xlu1 %v2363_v36 }
0x1125   : > { %v2060_v62 = vpop.permute.xlu1 %2059 }
0x1126   : > { %v2070_v27 = vsel %vm766_vm4, %v5580_v3, %v2060_v62 }
0x112d   : > { %v2064_v26 = vpop.permute.xlu0 %2063 }
0x112e   : > { %v2071_v24 = vsel %vm1226_vm9, %v2070_v27, %v2064_v26 }
0x1135   : > { %v2068_v30 = vpop.permute.xlu1 %2067 }
0x1136   : > { %v2072_v31 = vsel %vm1228_vm10, %v2071_v24, %v2068_v30  ;;  %v5679_v24 = vld [vmem:[%s5292_s18] ss:$0 sm:$0xff] }
0x1137   : > { %v2077_v32 = vpack.c.bf16 %v2072_v31, %v2072_v31 }
0x1139   : > { %4686 = vmatmul.mubr.msk.bf16.vlgmr.msra.gmra.mrb[40].mxu0 %vm718_vm3, %v2077_v32 }
0x113a   : > { %4713 = vmatprep.mubr.msk.bf16.mxu0 %vm5151_vm2, %v5150_v12  ;;  %4698 = vmatpush3.bf16.msra.mxu0 %v4980_v6 }
0x113b   : > { %4699 = vmatprep.subr.bf16.mxu0 %v5150_v12 }
0x113e   : > { %4700 = vmatpush3.bf16.msra.mxu0 %v4981_v8 }
0x113f   : > { %4701 = vmatprep.subr.bf16.mxu0 %v5150_v12 }
0x1142   : > { %4702 = vmatpush3.bf16.msra.mxu0 %v4982_v9 }
0x1143   : > { %4703 = vmatprep.subr.bf16.mxu0 %v5150_v12 }
0x1146   : > { %4704 = vmatpush3.bf16.msra.mxu0 %v4983_v10 }
0x1147   : > { %4705 = vmatprep.subr.bf16.mxu0 %v5150_v12 }
0x114a   : > { %4706 = vmatpush3.bf16.msra.mxu0 %v4984_v11 }
0x114b   : > { %4707 = vmatprep.subr.bf16.mxu0 %v5150_v12 }
0x114e   : > { %4708 = vmatpush3.bf16.msra.mxu0 %v4985_v13 }
0x114f   : > { %4709 = vmatprep.subr.bf16.mxu0 %v5150_v12 }
0x1152   : > { %4710 = vmatpush3.bf16.msra.mxu0 %v4986_v14 }
0x1153   : > { %4711 = vmatprep.subr.bf16.mxu0 %v5150_v12 }
0x1156   : > { %4712 = vmatpush3.bf16.msra.mxu0 %v4987_v15 }
0x1157   : > { %4743 = vmatprep.subr.bf16.mxu0 %v5150_v12 }
0x1174   : > { %v2365_v42 = vpop.xlane.xlu1 %2364 }
0x1175   : > { %v2366_v43 = vmul.f32 0.03125, %v2365_v42 }
0x1177   : > { %v2367_v46 = vsub.f32 %v5623_v33, %v2366_v43 }
0x1179   : > { %v2368_v48 = vmul.f32 %v2367_v46, %v2367_v46 }
0x117b   : > { %v2369_v49 = vsel %vm665_vm1, %v2368_v48, 0.0 }
0x120c   : > { %v2127_v37 = vpop.f32.mrb[40].mxu0 }
0x120d   : > { %v2133_v3 = vadd.f32 %v2127_v37, %v5462_v21  ;;  %v4687_v4 = vpop.f32.mrb[41].mxu0 }
0x120e   : > { %v2130_v38 = vpop.f32.mrb[42].mxu0 }
0x120f   : > { %v5629_v39 = vadd.f32 %v5467_v25, %v2133_v3  ;;  %v4688_v40 = vpop.f32.mrb[43].mxu0 }
0x1211   : > { %v2144_v41 = vsel %vm665_vm1, %v5629_v39, 0.0 }
0x1212   : > { %2145 = vadd.xlane.f32.xlu0 %v2144_v41 }
0x129f   : > { %v2146_v44 = vpop.xlane.xlu0 %2145 }
0x12a0   : > { %v2147_v45 = vmul.f32 0.03125, %v2146_v44 }
0x12a2   : > { %v2148_v21 = vsub.f32 %v5629_v39, %v2147_v45 }
0x12a4   : > { %v2149_v47 = vmul.f32 %v2148_v21, %v2148_v21 }
0x12a6   : > { %v2150_v25 = vsel %vm665_vm1, %v2149_v47, 0.0 }
0x12a7   : > { %2151 = vadd.xlane.f32.xlu0 %v2150_v25 }
0x12ab   : > { %2370 = vadd.xlane.f32.xlu0 %v2369_v49 }
0x1334   : > { %v2152_v28 = vpop.xlane.xlu0 %2151 }
0x1335   : > { %v2153_v53 = vmul.f32 0.03125, %v2152_v28 }
0x1337   : > { %v2154_v54 = vadd.f32 1e-05, %v2153_v53 }
0x1338   : > { %v2371_v55 = vpop.xlane.xlu0 %2370 }
0x1339   : > { %5056 = vrsqrt.f32 %v2154_v54  ;;  %v2372_v56 = vmul.f32 0.03125, %v2371_v55 }
0x133b   : > { %v2373_v57 = vadd.f32 1e-05, %v2372_v56 }
0x133d   : > { %5058 = vrsqrt.f32 %v2373_v57 }
0x1343   : > { %v5057_v58 = vpop.eup %5056 }
0x1344   : > { %v2156_v59 = vmul.f32 %v5057_v58, %v2148_v21 }
0x1346   : > { %v2163_v23 = vmul.f32 %v5484_v51, %v2156_v59 }
0x1347   : > { %v5059_v60 = vpop.eup %5058 }
0x1348   : > { %v2375_v63 = vmul.f32 %v5059_v60, %v2367_v46  ;;  %v2170_v18 = vadd.f32 %v5487_v52, %v2163_v23 }
0x134a   : > { %v2175_v20 = vpack.c.bf16 %v2170_v18, %v2170_v18  ;;  %v2382_v1 = vmul.f32 %v5643_v61, %v2375_v63 }
0x134c   : > { %4694 = vmatmul.mubr.msk.bf16.vlgmr.msra.gmra.mrb[44].mxu1 %vm718_vm3, %v2175_v20  ;;  %v2389_v51 = vadd.f32 %v5649_v2, %v2382_v1 }
0x134d   : > { %4718 = vmatpush3.bf16.msra.mxu1 %v4978_v0  ;;  %4721 = vmatprep.mubr.msk.bf16.mxu1 %vm5151_vm2, %v5150_v12 }
0x134e   : > { %4719 = vmatprep.subr.bf16.mxu1 %v5150_v12  ;;  %v2394_v52 = vpack.c.bf16 %v2389_v51, %v2389_v51 }
0x1351   : > { %4720 = vmatpush3.bf16.msra.mxu1 %v4979_v5 }
0x1352   : > { %4725 = vmatprep.subr.bf16.mxu1 %v5150_v12 }
0x1354   : > { %4722 = vmatmul.mubr.msk.bf16.vlgmr.msra.gmra.mrb[48].mxu1 %vm718_vm3, %v2394_v52 }
0x1355   : > { %4727 = vmatprep.mubr.msk.bf16.mxu1 %vm5151_vm2, %v5150_v12 }
0x141f   : > { %v2232_v16 = vpop.f32.mrb[44].mxu1 }
0x1420   : > { %v2233_v17 = vadd.f32 %v5520_v7, %v2232_v16  ;;  %v4695_v19 = vpop.f32.mrb[45].mxu1 }
0x1421   : > { %v2235_v22 = vpop.f32.mrb[46].mxu1 }
0x1422   : > { %v2238_v62 = vmul.f32 -1.702, %v2233_v17  ;;  %v4696_v26 = vpop.f32.mrb[47].mxu1 }
0x1424   : > { %v2239_v27 = vmul.f32 1.442695, %v2238_v62 }
0x1426   : > { %5060 = vpow2.f32 %v2239_v27 }
0x1427   : > { %v2451_v30 = vpop.f32.mrb[48].mxu1 }
0x1428   : > { %v2452_v31 = vadd.f32 %v5679_v24, %v2451_v30  ;;  %v4723_v32 = vpop.f32.mrb[49].mxu1 }
0x1429   : > { %v2454_v36 = vpop.f32.mrb[50].mxu1 }
0x142a   : > { %v5682_v37 = vpack.c.bf16 %v2452_v31, %v2452_v31  ;;  %v4724_v3 = vpop.f32.mrb[51].mxu1 }
0x142c   : > { %2459 = vrot.lane.b32.xlu0 %v5682_v37, %s5153_s6 }
0x1430   : > { %v5061_v7 = vpop.eup %5060  ;;  %2570 = vrot.lane.b32.xlu0 %v5682_v37, %s5156_s8 }
0x1431   : > { %v2241_v4 = vadd.f32 1.0, %v5061_v7 }
0x1433   : > { %5062 = vrcp.f32 %v2241_v4 }
0x1434   : > { %2681 = vrot.lane.b32.xlu0 %v5682_v37, %s5155_s7 }
0x1438   : > { %2792 = vrot.lane.b32.xlu0 %v5682_v37, %s5159_s23 }
0x143d   : > { %v5063_v38 = vpop.eup %5062 }
0x143e   : > { %v2244_v40 = vmul.f32 %v5063_v38, %v2233_v17 }
0x1440   : > { %v2261_v41 = vpack.c.bf16 %v2244_v40, %v2244_v40 }
0x1442   : > { %4714 = vmatmul.mubr.bf16.vlgmr.msra.gmra.mrb[44].mxu0 %v2261_v41 }
0x1443   : > { %4745 = vmatprep.mubr.msk.bf16.mxu0 %vm5151_vm2, %v5150_v12 }
0x149e   : > { %v2460_v42 = vpop.permute.xlu0 %2459 }
0x149f   : > { %v2465_v43 = vsel %vm766_vm4, %v2460_v42, 0 }
0x14a0   : > { %4726 = vmatpush3.bf16.xpose.msra.mxu1 %v2465_v43 }
0x14a1   : > { %4731 = vmatprep.subr.bf16.mxu1 %v5150_v12 }
0x14a2   : > { %v2571_v18 = vpop.permute.xlu0 %2570 }
0x14a3   : > { %v2576_v20 = vsel %vm766_vm4, %v2571_v18, 0 }
0x14a6   : > { %v2682_v1 = vpop.permute.xlu0 %2681 }
0x14a7   : > { %4728 = vmatmul.mubr.msk.bf16.vlgmr.msra.gmra.mrb[52].mxu1 %vm766_vm4, %v5682_v37  ;;  %v2687_v51 = vsel %vm766_vm4, %v2682_v1, 0 }
0x14a8   : > { %4733 = vmatprep.mubr.msk.bf16.mxu1 %vm5151_vm2, %v5150_v12 }
0x14aa   : > { %v2793_v52 = vpop.permute.xlu0 %2792 }
0x14ab   : > { %v2798_v8 = vsel %vm766_vm4, %v2793_v52, 0 }
0x1515   : > { %v2351_v44 = vpop.f32.mrb[44].mxu0 }
0x1516   : > { %v2352_v45 = vadd.f32 %v5543_v34, %v2351_v44  ;;  %v4715_v46 = vpop.f32.mrb[45].mxu0 }
0x1517   : > { %v2354_v21 = vpop.f32.mrb[46].mxu0 }
0x1518   : > { %v2357_v47 = vadd.f32 %v2352_v45, %v5629_v39  ;;  %v4716_v48 = vpop.f32.mrb[47].mxu0 }
0x151a   : > { %2358 = vst.msk [vmem:[#allocation2 + $0x8] sm:$0x1f] %vm665_vm1, %v2357_v47 }
0x1521   : > { %v4046_v25 = vld [vmem:[#allocation2 + $0x8] sm:$0x1f] }
0x1522   : > { %4050 = vst.msk [vmem:[%s5337_s24 + $0x8] sm:$0x1f] %vm665_vm1, %v4046_v25 }
0x157a   : > { %v2501_v49 = vpop.f32.mrb[52].mxu1 }
0x157b   : > { %v2507_v50 = vmul.f32 0.35355338, %v2501_v49  ;;  %v4729_v29 = vpop.f32.mrb[53].mxu1 }
0x157c   : > { %v2504_v28 = vpop.f32.mrb[54].mxu1 }
0x157d   : > { %v4730_v53 = vpop.f32.mrb[55].mxu1  ;;  %v2508_v54 = vsel %vm814_vm7, %v2507_v50, -inf }
0x157e   : > { %2509 = vmax.xlane.f32.xlu1 %v2508_v54 }
0x160b   : > { %v2510_v55 = vpop.xlane.xlu1 %2509 }
0x160c   : > { %v2511_v34 = vsub.f32 %v2507_v50, %v2510_v55 }
0x160e   : > { %v2512_v56 = vmul.f32 1.442695, %v2511_v34 }
0x1610   : > { %5064 = vpow2.f32 %v2512_v56 }
0x161a   : > { %v5065_v57 = vpop.eup %5064 }
0x161b   : > { %v2514_v39 = vsel %vm814_vm7, %v5065_v57, 0.0 }
0x161c   : > { %2515 = vadd.xlane.f32.xlu1 %v2514_v39 }
0x162d   : > { %2520 = vrot.lane.b32.xlu1 %v5682_v37, %s5152_s5 }
0x1631   : > { %2568 = vrot.lane.b32.xlu1 %v5682_v37, %s5157_s30 }
0x1635   : > { %2679 = vrot.lane.b32.xlu1 %v5682_v37, %s5158_s16 }
0x1639   : > { %2790 = vrot.lane.b32.xlu1 %v5682_v37, %s5160_s20 }
0x16a9   : > { %v2516_v58 = vpop.xlane.xlu1 %2515 }
0x16aa   : > { %5066 = vrcp.f32 %v2516_v58 }
0x16ad   : > { %v2521_v59 = vpop.permute.xlu1 %2520 }
0x16ae   : > { %v2526_v23 = vand.u32 %v2521_v59, %v5379_v35 }
0x16b0   : > { %4732 = vmatpush3.bf16.msra.mxu1 %v2526_v23 }
0x16b1   : > { %4737 = vmatprep.subr.bf16.mxu1 %v5150_v12  ;;  %v2569_v5 = vpop.permute.xlu1 %2568 }
0x16b4   : > { %v5067_v60 = vpop.eup %5066 }
0x16b5   : > { %v2518_v63 = vmul.f32 %v5067_v60, %v5065_v57  ;;  %v2680_v6 = vpop.permute.xlu1 %2679 }
0x16b7   : > { %v2519_v0 = vpack.c.bf16 %v2518_v63, %v2518_v63 }
0x16b9   : > { %4734 = vmatmul.mubr.msk.bf16.vlgmr.msra.gmra.mrb[56].mxu1 %vm829_vm8, %v2519_v0  ;;  %v2791_v9 = vpop.permute.xlu1 %2790 }
0x16ba   : > { %4738 = vmatpush3.bf16.xpose.msra.mxu1 %v2576_v20  ;;  %4739 = vmatprep.mubr.msk.bf16.mxu1 %vm5151_vm2, %v5150_v12 }
0x16bb   : > { %4749 = vmatprep.subr.bf16.mxu1 %v5150_v12 }
0x16c1   : > { %4740 = vmatmul.mubr.msk.bf16.vlgmr.msra.gmra.mrb[60].mxu1 %vm766_vm4, %v2569_v5 }
0x16c2   : > { %4750 = vmatpush3.bf16.xpose.msra.mxu1 %v2687_v51  ;;  %4751 = vmatprep.mubr.msk.bf16.mxu1 %vm5151_vm2, %v5150_v12 }
0x16c3   : > { %4761 = vmatprep.subr.bf16.mxu1 %v5150_v12 }
0x16c9   : > { %4752 = vmatmul.mubr.msk.bf16.vlgmr.msra.gmra.mrb[64].mxu1 %vm766_vm4, %v2680_v6  ;;  %v4988_v6 = vld [vmem:[%s5297_s21] sm:$0xff]  }
0x16ca   : > { %4762 = vmatpush3.bf16.xpose.msra.mxu1 %v2798_v8  ;;  %4763 = vmatprep.mubr.msk.bf16.mxu1 %vm5151_vm2, %v5150_v12 }
0x16cb   : > { %4773 = vmatprep.subr.bf16.mxu1 %v5150_v12 }
0x16d1   : > { %4764 = vmatmul.mubr.msk.bf16.vlgmr.msra.gmra.mrb[68].mxu1 %vm766_vm4, %v2791_v9 }
0x16d2   : > { %4777 = vmatprep.mubr.msk.bf16.mxu1 %vm5151_vm2, %v5150_v12  ;;  %4774 = vmatpush3.bf16.msra.mxu1 %v4988_v6 }
0x16d3   : > { %4775 = vmatprep.subr.bf16.mxu1 %v5150_v12 }
0x178c   : > { %v5735_v10 = vpop.f32.mrb[56].mxu1 }
0x178d   : > { %v4735_v11 = vpop.f32.mrb[57].mxu1 }
0x178e   : > { %v2565_v13 = vpop.f32.mrb[58].mxu1 }
0x178f   : > { %v4736_v14 = vpop.f32.mrb[59].mxu1 }
0x1790   : > { %v4989_v14 = vld [vmem:[%s5297_s21 + $0x8] sm:$0xff]  }
0x1791   : > { %4776 = vmatpush3.bf16.msra.mxu1 %v4989_v14  ;;  %v4997_v14 = vld [vmem:[%s5327_s26 + $0x18] sm:$0xff]  }
0x1792   : > { %4789 = vmatprep.subr.bf16.mxu1 %v5150_v12 }
0x1794   : > { %v2612_v15 = vpop.f32.mrb[60].mxu1 }
0x1795   : > { %v2618_v16 = vmul.f32 0.35355338, %v2612_v15  ;;  %v4741_v17 = vpop.f32.mrb[61].mxu1 }
0x1796   : > { %v2615_v19 = vpop.f32.mrb[62].mxu1 }
0x1797   : > { %v4742_v22 = vpop.f32.mrb[63].mxu1  ;;  %v2619_v62 = vsel %vm814_vm7, %v2618_v16, -inf }
0x1798   : > { %2620 = vmax.xlane.f32.xlu0 %v2619_v62 }
0x179c   : > { %v2723_v26 = vpop.f32.mrb[64].mxu1 }
0x179d   : > { %v2729_v27 = vmul.f32 0.35355338, %v2723_v26  ;;  %v4753_v30 = vpop.f32.mrb[65].mxu1 }
0x179e   : > { %v2726_v31 = vpop.f32.mrb[66].mxu1 }
0x179f   : > { %v4754_v32 = vpop.f32.mrb[67].mxu1  ;;  %v2730_v36 = vsel %vm814_vm7, %v2729_v27, -inf }
0x17a0   : > { %2731 = vmax.xlane.f32.xlu1 %v2730_v36 }
0x17a4   : > { %v2834_v3 = vpop.f32.mrb[68].mxu1 }
0x17a5   : > { %v2840_v7 = vmul.f32 0.35355338, %v2834_v3  ;;  %v4765_v4 = vpop.f32.mrb[69].mxu1 }
0x17a6   : > { %v2837_v38 = vpop.f32.mrb[70].mxu1 }
0x17a7   : > { %v4766_v40 = vpop.f32.mrb[71].mxu1  ;;  %v2841_v41 = vsel %vm814_vm7, %v2840_v7, -inf  ;;  %v5778_v38 = vld [vmem:[#allocation2 + $0x18] sm:$0x1f] }
0x17a8   : > { %2842 = vmax.xlane.f32.xlu0 %v2841_v41  ;;  %v3206_v40 = vsel %vm665_vm1, %v5778_v38, 0.0 }
0x17b1   : > { %2742 = vrot.lane.b32.xlu1 %v5682_v37, %s6037_s19 }
0x1825   : > { %v2621_v42 = vpop.xlane.xlu0 %2620 }
0x1826   : > { %v2622_v43 = vsub.f32 %v2618_v16, %v2621_v42  ;;  %v5783_v42 = vld [vmem:[%s5302_s14] ss:$0 sm:$0xff] }
0x1828   : > { %v2623_v44 = vmul.f32 1.442695, %v2622_v43 }
0x182a   : > { %5068 = vpow2.f32 %v2623_v44 }
0x182d   : > { %v2732_v45 = vpop.xlane.xlu1 %2731 }
0x182e   : > { %v2733_v46 = vsub.f32 %v2729_v27, %v2732_v45 }
0x1830   : > { %v2734_v21 = vmul.f32 1.442695, %v2733_v46 }
0x1831   : > { %v2743_v57 = vpop.permute.xlu1 %2742 }
0x1832   : > { %5070 = vpow2.f32 %v2734_v21  ;;  %v2748_v63 = vand.u32 %v2743_v57, %v5379_v35 }
0x1834   : > { %v5069_v47 = vpop.eup %5068 }
0x1835   : > { %v2843_v48 = vpop.xlane.xlu0 %2842  ;;  %v2625_v25 = vsel %vm814_vm7, %v5069_v47, 0.0 }
0x1836   : > { %v2844_v49 = vsub.f32 %v2840_v7, %v2843_v48  ;;  %2626 = vadd.xlane.f32.xlu0 %v2625_v25 }
0x1838   : > { %v2845_v50 = vmul.f32 1.442695, %v2844_v49 }
0x183a   : > { %5072 = vpow2.f32 %v2845_v50 }
0x183c   : > { %v5071_v29 = vpop.eup %5070 }
0x183d   : > { %v2736_v28 = vsel %vm814_vm7, %v5071_v29, 0.0 }
0x183e   : > { %2737 = vadd.xlane.f32.xlu0 %v2736_v28 }
0x1844   : > { %v5073_v53 = vpop.eup %5072 }
0x1845   : > { %v2847_v54 = vsel %vm814_vm7, %v5073_v53, 0.0 }
0x1846   : > { %2848 = vadd.xlane.f32.xlu1 %v2847_v54 }
0x1854   : > { %2631 = vrot.lane.b32.xlu0 %v5682_v37, %s5162_s0 }
0x1857   : > { %2853 = vrot.lane.b32.xlu1 %v5682_v37, %s6036_s15 }
0x18c3   : > { %v2627_v55 = vpop.xlane.xlu0 %2626 }
0x18c4   : > { %5074 = vrcp.f32 %v2627_v55  ;;  %v4990_v55 = vld [vmem:[%s5317_s1] sm:$0xff]  }
0x18cb   : > { %v2738_v34 = vpop.xlane.xlu0 %2737 }
0x18cc   : > { %5076 = vrcp.f32 %v2738_v34  ;;  %v4991_v34 = vld [vmem:[%s5317_s1 + $0x8] sm:$0xff]  }
0x18ce   : > { %v5075_v56 = vpop.eup %5074 }
0x18cf   : > { %v2629_v39 = vmul.f32 %v5075_v56, %v5069_v47  ;;  %v2632_v58 = vpop.permute.xlu0 %2631 }
0x18d0   : > { %v2637_v59 = vand.u32 %v2632_v58, %v5379_v35 }
0x18d1   : > { %v2630_v60 = vpack.c.bf16 %v2629_v39, %v2629_v39 }
0x18d2   : > { %4744 = vmatpush3.bf16.msra.mxu0 %v2637_v59 }
0x18d3   : > { %v2849_v23 = vpop.xlane.xlu1 %2848  ;;  %4755 = vmatprep.subr.bf16.mxu0 %v5150_v12 }
0x18d4   : > { %5078 = vrcp.f32 %v2849_v23 }
0x18d5   : > { %4746 = vmatmul.mubr.msk.bf16.vlgmr.msra.gmra.mrb[48].mxu0 %vm829_vm8, %v2630_v60 }
0x18d6   : > { %v5077_v37 = vpop.eup %5076  ;;  %4756 = vmatpush3.bf16.msra.mxu0 %v2748_v63  ;;  %4757 = vmatprep.mubr.msk.bf16.mxu0 %vm5151_vm2, %v5150_v12  ;;  %v5800_v63 = vld [vmem:[%s5307_s27] ss:$0 sm:$0xff] }
0x18d7   : > { %v2740_v18 = vmul.f32 %v5077_v37, %v5071_v29  ;;  %4767 = vmatprep.subr.bf16.mxu0 %v5150_v12  ;;  %v2854_v0 = vpop.permute.xlu1 %2853 }
0x18d8   : > { %v2859_v1 = vand.u32 %v2854_v0, %v5379_v35 }
0x18d9   : > { %v2741_v20 = vpack.c.bf16 %v2740_v18, %v2740_v18  ;;  %v5803_v18 = vld [vmem:[%s5312_s25] ss:$0 sm:$0xff] }
0x18dd   : > { %4758 = vmatmul.mubr.msk.bf16.vlgmr.msra.gmra.mrb[52].mxu0 %vm829_vm8, %v2741_v20 }
0x18de   : > { %v5079_v5 = vpop.eup %5078  ;;  %4768 = vmatpush3.bf16.msra.mxu0 %v2859_v1  ;;  %4769 = vmatprep.mubr.msk.bf16.mxu0 %vm5151_vm2, %v5150_v12 }
0x18df   : > { %v2851_v51 = vmul.f32 %v5079_v5, %v5073_v53  ;;  %4781 = vmatprep.subr.bf16.mxu0 %v5150_v12 }
0x18e1   : > { %v2852_v52 = vpack.c.bf16 %v2851_v51, %v2851_v51  ;;  %v4992_v51 = vld [vmem:[%s5287_s29] sm:$0xff]  }
0x18e5   : > { %4770 = vmatmul.mubr.msk.bf16.vlgmr.msra.gmra.mrb[56].mxu0 %vm829_vm8, %v2852_v52 }
0x18e6   : > { %4785 = vmatprep.mubr.msk.bf16.mxu0 %vm5151_vm2, %v5150_v12  ;;  %4782 = vmatpush3.bf16.msra.mxu0 %v4990_v55 }
0x18e7   : > { %4783 = vmatprep.subr.bf16.mxu0 %v5150_v12 }
0x18ea   : > { %4784 = vmatpush3.bf16.msra.mxu0 %v4991_v34 }
0x18eb   : > { %4809 = vmatprep.subr.bf16.mxu0 %v5150_v12 }
0x19a8   : > { %v2673_v8 = vpop.f32.mrb[48].mxu0 }
0x19a9   : > { %2902 = vrot.lane.b32.xlu1 %v2673_v8, %s5164_s4  ;;  %v4747_v9 = vpop.f32.mrb[49].mxu0  ;;  %v4993_v8 = vld [vmem:[%s5287_s29 + $0x8] sm:$0xff]  }
0x19aa   : > { %v2676_v11 = vpop.f32.mrb[50].mxu0 }
0x19ab   : > { %v4748_v13 = vpop.f32.mrb[51].mxu0 }
0x19ac   : > { %v4995_v13 = vld [vmem:[%s5327_s26 + $0x8] sm:$0xff]  }
0x19b0   : > { %v2784_v15 = vpop.f32.mrb[52].mxu0 }
0x19b1   : > { %2906 = vrot.lane.b32.xlu0 %v2784_v15, %s5165_s17  ;;  %v4759_v16 = vpop.f32.mrb[53].mxu0  ;;  %v4998_v15 = vld [vmem:[%s5327_s26 + $0x20] sm:$0xff]  }
0x19b2   : > { %v2787_v17 = vpop.f32.mrb[54].mxu0  ;;  %v4999_v16 = vld [vmem:[%s5327_s26 + $0x28] sm:$0xff]  }
0x19b3   : > { %v4760_v19 = vpop.f32.mrb[55].mxu0  ;;  %v5000_v17 = vld [vmem:[%s5327_s26 + $0x30] sm:$0xff]  }
0x19b4   : > { %v5001_v19 = vld [vmem:[%s5327_s26 + $0x38] sm:$0xff]  }
0x19b8   : > { %v2895_v22 = vpop.f32.mrb[56].mxu0 }
0x19b9   : > { %2910 = vrot.lane.b32.xlu1 %v2895_v22, %s5166_s3  ;;  %v4771_v62 = vpop.f32.mrb[57].mxu0  ;;  %v5836_v22 = vld [vmem:[%s5322_s2] ss:$0 sm:$0xff] }
0x19ba   : > { %v2898_v26 = vpop.f32.mrb[58].mxu0 }
0x19bb   : > { %v4772_v27 = vpop.f32.mrb[59].mxu0 }
0x19dd   : > { %3207 = vadd.xlane.f32.xlu1 %v3206_v40 }
0x1a1b   : > { %v2903_v30 = vpop.permute.xlu1 %2902 }
0x1a1c   : > { %v2913_v32 = vsel %vm766_vm4, %v5735_v10, %v2903_v30 }
0x1a23   : > { %v2907_v31 = vpop.permute.xlu0 %2906 }
0x1a24   : > { %v2914_v36 = vsel %vm1226_vm9, %v2913_v32, %v2907_v31 }
0x1a2b   : > { %v2911_v3 = vpop.permute.xlu1 %2910 }
0x1a2c   : > { %v2915_v7 = vsel %vm1228_vm10, %v2914_v36, %v2911_v3 }
0x1a2d   : > { %v2920_v4 = vpack.c.bf16 %v2915_v7, %v2915_v7 }
0x1a2f   : > { %4778 = vmatmul.mubr.msk.bf16.vlgmr.msra.gmra.mrb[72].mxu1 %vm718_vm3, %v2920_v4 }
0x1a30   : > { %4805 = vmatprep.mubr.msk.bf16.mxu1 %vm5151_vm2, %v5150_v12 }
0x1a6a   : > { %v3208_v47 = vpop.xlane.xlu1 %3207 }
0x1a6b   : > { %v3209_v48 = vmul.f32 0.03125, %v3208_v47 }
0x1a6d   : > { %v3210_v50 = vsub.f32 %v5778_v38, %v3209_v48 }
0x1a6f   : > { %v3211_v28 = vmul.f32 %v3210_v50, %v3210_v50 }
0x1a71   : > { %v3212_v54 = vsel %vm665_vm1, %v3211_v28, 0.0 }
0x1b02   : > { %v2970_v41 = vpop.f32.mrb[72].mxu1 }
0x1b03   : > { %v2976_v10 = vadd.f32 %v2970_v41, %v5623_v33  ;;  %v4779_v43 = vpop.f32.mrb[73].mxu1 }
0x1b04   : > { %v2973_v44 = vpop.f32.mrb[74].mxu1 }
0x1b05   : > { %v5787_v45 = vadd.f32 %v5783_v42, %v2976_v10  ;;  %v4780_v46 = vpop.f32.mrb[75].mxu1 }
0x1b07   : > { %v2987_v21 = vsel %vm665_vm1, %v5787_v45, 0.0 }
0x1b08   : > { %2988 = vadd.xlane.f32.xlu0 %v2987_v21 }
0x1b95   : > { %v2989_v25 = vpop.xlane.xlu0 %2988 }
0x1b96   : > { %v2990_v49 = vmul.f32 0.03125, %v2989_v25  ;;  %v5859_v25 = vld [vmem:[%s5332_s28] ss:$0 sm:$0xff] }
0x1b98   : > { %v2991_v33 = vsub.f32 %v5787_v45, %v2990_v49 }
0x1b9a   : > { %v2992_v29 = vmul.f32 %v2991_v33, %v2991_v33 }
0x1b9c   : > { %v2993_v53 = vsel %vm665_vm1, %v2992_v29, 0.0 }
0x1b9d   : > { %2994 = vadd.xlane.f32.xlu0 %v2993_v53 }
0x1ba1   : > { %3213 = vadd.xlane.f32.xlu0 %v3212_v54 }
0x1c2a   : > { %v2995_v56 = vpop.xlane.xlu0 %2994 }
0x1c2b   : > { %v2996_v57 = vmul.f32 0.03125, %v2995_v56 }
0x1c2d   : > { %v2997_v39 = vadd.f32 1e-05, %v2996_v57 }
0x1c2e   : > { %v3214_v58 = vpop.xlane.xlu0 %3213 }
0x1c2f   : > { %5080 = vrsqrt.f32 %v2997_v39  ;;  %v3215_v59 = vmul.f32 0.03125, %v3214_v58 }
0x1c31   : > { %v3216_v23 = vadd.f32 1e-05, %v3215_v59 }
0x1c33   : > { %5082 = vrsqrt.f32 %v3216_v23 }
0x1c39   : > { %v5081_v60 = vpop.eup %5080 }
0x1c3a   : > { %v2999_v37 = vmul.f32 %v5081_v60, %v2991_v33 }
0x1c3c   : > { %v3006_v0 = vmul.f32 %v5800_v63, %v2999_v37 }
0x1c3d   : > { %v5083_v20 = vpop.eup %5082 }
0x1c3e   : > { %v3218_v1 = vmul.f32 %v5083_v20, %v3210_v50  ;;  %v3013_v5 = vadd.f32 %v5803_v18, %v3006_v0 }
0x1c40   : > { %v3018_v52 = vpack.c.bf16 %v3013_v5, %v3013_v5  ;;  %v3225_v6 = vmul.f32 %v5643_v61, %v3218_v1  ;;  %v4994_v61 = vld [vmem:[%s5327_s26] sm:$0xff]  }
0x1c41   : > { %4790 = vmatpush3.bf16.msra.mxu1 %v4994_v61 }
0x1c42   : > { %4786 = vmatmul.mubr.msk.bf16.vlgmr.msra.gmra.mrb[60].mxu0 %vm718_vm3, %v3018_v52  ;;  %v3232_v9 = vadd.f32 %v5649_v2, %v3225_v6  ;;  %4791 = vmatprep.subr.bf16.mxu1 %v5150_v12  ;;  %v4996_v2 = vld [vmem:[%s5327_s26 + $0x10] sm:$0xff]  }
0x1c43   : > { %4810 = vmatpush3.bf16.msra.mxu0 %v4992_v51  ;;  %4813 = vmatprep.mubr.msk.bf16.mxu0 %vm5151_vm2, %v5150_v12 }
0x1c44   : > { %4811 = vmatprep.subr.bf16.mxu0 %v5150_v12  ;;  %v3237_v11 = vpack.c.bf16 %v3232_v9, %v3232_v9 }
0x1c45   : > { %4792 = vmatpush3.bf16.msra.mxu1 %v4995_v13 }
0x1c46   : > { %4793 = vmatprep.subr.bf16.mxu1 %v5150_v12 }
0x1c47   : > { %4812 = vmatpush3.bf16.msra.mxu0 %v4993_v8 }
0x1c48   : > { %4817 = vmatprep.subr.bf16.mxu0 %v5150_v12 }
0x1c49   : > { %4794 = vmatpush3.bf16.msra.mxu1 %v4996_v2 }
0x1c4a   : > { %4814 = vmatmul.mubr.msk.bf16.vlgmr.msra.gmra.mrb[64].mxu0 %vm718_vm3, %v3237_v11  ;;  %4795 = vmatprep.subr.bf16.mxu1 %v5150_v12 }
0x1c4b   : > { %4819 = vmatprep.mubr.msk.bf16.mxu0 %vm5151_vm2, %v5150_v12 }
0x1c4d   : > { %4796 = vmatpush3.bf16.msra.mxu1 %v4997_v14 }
0x1c4e   : > { %4797 = vmatprep.subr.bf16.mxu1 %v5150_v12 }
0x1c51   : > { %4798 = vmatpush3.bf16.msra.mxu1 %v4998_v15 }
0x1c52   : > { %4799 = vmatprep.subr.bf16.mxu1 %v5150_v12 }
0x1c55   : > { %4800 = vmatpush3.bf16.msra.mxu1 %v4999_v16 }
0x1c56   : > { %4801 = vmatprep.subr.bf16.mxu1 %v5150_v12 }
0x1c59   : > { %4802 = vmatpush3.bf16.msra.mxu1 %v5000_v17 }
0x1c5a   : > { %4803 = vmatprep.subr.bf16.mxu1 %v5150_v12 }
0x1c5d   : > { %4804 = vmatpush3.bf16.msra.mxu1 %v5001_v19 }
0x1c5e   : > { %4835 = vmatprep.subr.bf16.mxu1 %v5150_v12 }
0x1d15   : > { %v3075_v62 = vpop.f32.mrb[60].mxu0 }
0x1d16   : > { %v3076_v26 = vadd.f32 %v5836_v22, %v3075_v62  ;;  %v4787_v27 = vpop.f32.mrb[61].mxu0 }
0x1d17   : > { %v3078_v30 = vpop.f32.mrb[62].mxu0 }
0x1d18   : > { %v3081_v31 = vmul.f32 -1.702, %v3076_v26  ;;  %v4788_v32 = vpop.f32.mrb[63].mxu0 }
0x1d1a   : > { %v3082_v36 = vmul.f32 1.442695, %v3081_v31 }
0x1d1c   : > { %5084 = vpow2.f32 %v3082_v36 }
0x1d1d   : > { %v3294_v3 = vpop.f32.mrb[64].mxu0 }
0x1d1e   : > { %v3295_v7 = vadd.f32 %v5679_v24, %v3294_v3  ;;  %v4815_v4 = vpop.f32.mrb[65].mxu0 }
0x1d1f   : > { %v3297_v40 = vpop.f32.mrb[66].mxu0 }
0x1d20   : > { %v5840_v41 = vpack.c.bf16 %v3295_v7, %v3295_v7  ;;  %v4816_v10 = vpop.f32.mrb[67].mxu0 }
0x1d22   : > { %3302 = vrot.lane.b32.xlu0 %v5840_v41, %s5153_s6 }
0x1d26   : > { %v5085_v43 = vpop.eup %5084  ;;  %3413 = vrot.lane.b32.xlu0 %v5840_v41, %s5156_s8 }
0x1d27   : > { %v3084_v44 = vadd.f32 1.0, %v5085_v43 }
0x1d29   : > { %5086 = vrcp.f32 %v3084_v44 }
0x1d2a   : > { %3524 = vrot.lane.b32.xlu0 %v5840_v41, %s5155_s7 }
0x1d2e   : > { %3635 = vrot.lane.b32.xlu0 %v5840_v41, %s5159_s23 }
0x1d33   : > { %v5087_v24 = vpop.eup %5086 }
0x1d34   : > { %v3087_v46 = vmul.f32 %v5087_v24, %v3076_v26 }
0x1d36   : > { %v3104_v21 = vpack.c.bf16 %v3087_v46, %v3087_v46 }
0x1d38   : > { %4806 = vmatmul.mubr.bf16.vlgmr.msra.gmra.mrb[76].mxu1 %v3104_v21 }
0x1d39   : > { %4837 = vmatprep.mubr.msk.bf16.mxu1 %vm5151_vm2, %v5150_v12 }
0x1d94   : > { %v3303_v47 = vpop.permute.xlu0 %3302 }
0x1d95   : > { %v3308_v48 = vsel %vm766_vm4, %v3303_v47, 0 }
0x1d96   : > { %4818 = vmatpush3.bf16.xpose.msra.mxu0 %v3308_v48 }
0x1d97   : > { %4823 = vmatprep.subr.bf16.mxu0 %v5150_v12 }
0x1d98   : > { %v3414_v52 = vpop.permute.xlu0 %3413 }
0x1d99   : > { %v3419_v8 = vsel %vm766_vm4, %v3414_v52, 0 }
0x1d9c   : > { %v3525_v9 = vpop.permute.xlu0 %3524 }
0x1d9d   : > { %4820 = vmatmul.mubr.msk.bf16.vlgmr.msra.gmra.mrb[68].mxu0 %vm766_vm4, %v5840_v41  ;;  %v3530_v61 = vsel %vm766_vm4, %v3525_v9, 0 }
0x1d9e   : > { %4825 = vmatprep.mubr.msk.bf16.mxu0 %vm5151_vm2, %v5150_v12 }
0x1da0   : > { %v3636_v13 = vpop.permute.xlu0 %3635 }
0x1da1   : > { %v3641_v14 = vsel %vm766_vm4, %v3636_v13, 0 }
0x1e0b   : > { %v3194_v49 = vpop.f32.mrb[76].mxu1 }
0x1e0c   : > { %v3195_v50 = vadd.f32 %v5859_v25, %v3194_v49  ;;  %v4807_v33 = vpop.f32.mrb[77].mxu1 }
0x1e0d   : > { %v3197_v29 = vpop.f32.mrb[78].mxu1 }
0x1e0e   : > { %v3200_v28 = vadd.f32 %v3195_v50, %v5787_v45  ;;  %v4808_v53 = vpop.f32.mrb[79].mxu1 }
0x1e10   : > { %3201 = vst.msk [vmem:[#allocation2 + $0x10] sm:$0x1f] %vm665_vm1, %v3200_v28 }
0x1e17   : > { %v4047_v54 = vld [vmem:[#allocation2 + $0x10] sm:$0x1f] }
0x1e18   : > { %4051 = vst.msk [vmem:[%s5337_s24 + $0x10] sm:$0x1f] %vm665_vm1, %v4047_v54 }
0x1e70   : > { %v3344_v55 = vpop.f32.mrb[68].mxu0 }
0x1e71   : > { %v3350_v34 = vmul.f32 0.35355338, %v3344_v55  ;;  %v4821_v56 = vpop.f32.mrb[69].mxu0 }
0x1e72   : > { %v3347_v57 = vpop.f32.mrb[70].mxu0 }
0x1e73   : > { %v4822_v39 = vpop.f32.mrb[71].mxu0  ;;  %v3351_v58 = vsel %vm814_vm7, %v3350_v34, -inf }
0x1e74   : > { %3352 = vmax.xlane.f32.xlu1 %v3351_v58 }
0x1f01   : > { %v3353_v59 = vpop.xlane.xlu1 %3352 }
0x1f02   : > { %v3354_v23 = vsub.f32 %v3350_v34, %v3353_v59 }
0x1f04   : > { %v3355_v60 = vmul.f32 1.442695, %v3354_v23 }
0x1f06   : > { %5088 = vpow2.f32 %v3355_v60 }
0x1f10   : > { %v5089_v37 = vpop.eup %5088 }
0x1f11   : > { %v3357_v45 = vsel %vm814_vm7, %v5089_v37, 0.0 }
0x1f12   : > { %3358 = vadd.xlane.f32.xlu1 %v3357_v45 }
0x1f23   : > { %3363 = vrot.lane.b32.xlu1 %v5840_v41, %s5152_s5 }
0x1f27   : > { %3411 = vrot.lane.b32.xlu1 %v5840_v41, %s5157_s30 }
0x1f2b   : > { %3522 = vrot.lane.b32.xlu1 %v5840_v41, %s5158_s16 }
0x1f2f   : > { %3633 = vrot.lane.b32.xlu1 %v5840_v41, %s5160_s20 }
0x1f9f   : > { %v3359_v0 = vpop.xlane.xlu1 %3358 }
0x1fa0   : > { %5090 = vrcp.f32 %v3359_v0 }
0x1fa3   : > { %v3364_v20 = vpop.permute.xlu1 %3363 }
0x1fa4   : > { %v3369_v1 = vand.u32 %v3364_v20, %v5379_v35 }
0x1fa6   : > { %4824 = vmatpush3.bf16.msra.mxu0 %v3369_v1 }
0x1fa7   : > { %4829 = vmatprep.subr.bf16.mxu0 %v5150_v12  ;;  %v3412_v11 = vpop.permute.xlu1 %3411 }
0x1faa   : > { %v5091_v5 = vpop.eup %5090 }
0x1fab   : > { %v3361_v51 = vmul.f32 %v5091_v5, %v5089_v37  ;;  %v3523_v2 = vpop.permute.xlu1 %3522 }
0x1fad   : > { %v3362_v6 = vpack.c.bf16 %v3361_v51, %v3361_v51 }
0x1faf   : > { %4826 = vmatmul.mubr.msk.bf16.vlgmr.msra.gmra.mrb[72].mxu0 %vm829_vm8, %v3362_v6  ;;  %v3634_v15 = vpop.permute.xlu1 %3633 }
0x1fb0   : > { %4830 = vmatpush3.bf16.xpose.msra.mxu0 %v3419_v8  ;;  %4831 = vmatprep.mubr.msk.bf16.mxu0 %vm5151_vm2, %v5150_v12 }
0x1fb1   : > { %4841 = vmatprep.subr.bf16.mxu0 %v5150_v12 }
0x1fb7   : > { %4832 = vmatmul.mubr.msk.bf16.vlgmr.msra.gmra.mrb[76].mxu0 %vm766_vm4, %v3412_v11 }
0x1fb8   : > { %4842 = vmatpush3.bf16.xpose.msra.mxu0 %v3530_v61  ;;  %4843 = vmatprep.mubr.msk.bf16.mxu0 %vm5151_vm2, %v5150_v12 }
0x1fb9   : > { %4853 = vmatprep.subr.bf16.mxu0 %v5150_v12 }
0x1fbf   : > { %4844 = vmatmul.mubr.msk.bf16.vlgmr.msra.gmra.mrb[80].mxu0 %vm766_vm4, %v3523_v2 }
0x1fc0   : > { %4854 = vmatpush3.bf16.xpose.msra.mxu0 %v3641_v14  ;;  %4855 = vmatprep.mubr.msk.bf16.mxu0 %vm5151_vm2, %v5150_v12 }
0x1fc1   : > { %4865 = vmatprep.subr.bf16.mxu0 %v5150_v12 }
0x1fc7   : > { %4856 = vmatmul.mubr.msk.bf16.vlgmr.msra.gmra.mrb[84].mxu0 %vm766_vm4, %v3634_v15  ;;  %v5002_v15 = vld [vmem:[%s5297_s21] sm:$0xff]  }
0x1fc8   : > { %4869 = vmatprep.mubr.msk.bf16.mxu0 %vm5151_vm2, %v5150_v12  ;;  %4866 = vmatpush3.bf16.msra.mxu0 %v5002_v15 }
0x1fc9   : > { %4867 = vmatprep.subr.bf16.mxu0 %v5150_v12 }
0x2082   : > { %v5896_v16 = vpop.f32.mrb[72].mxu0 }
0x2083   : > { %v4827_v17 = vpop.f32.mrb[73].mxu0 }
0x2084   : > { %v3408_v19 = vpop.f32.mrb[74].mxu0 }
0x2085   : > { %v4828_v62 = vpop.f32.mrb[75].mxu0 }
0x208a   : > { %v3455_v26 = vpop.f32.mrb[76].mxu0 }
0x208b   : > { %v3461_v27 = vmul.f32 0.35355338, %v3455_v26  ;;  %v4833_v30 = vpop.f32.mrb[77].mxu0  ;;  %v5003_v26 = vld [vmem:[%s5297_s21 + $0x8] sm:$0xff]  }
0x208c   : > { %v3458_v31 = vpop.f32.mrb[78].mxu0  ;;  %4868 = vmatpush3.bf16.msra.mxu0 %v5003_v26 }
0x208d   : > { %v4834_v32 = vpop.f32.mrb[79].mxu0  ;;  %v3462_v36 = vsel %vm814_vm7, %v3461_v27, -inf  ;;  %4881 = vmatprep.subr.bf16.mxu0 %v5150_v12 }
0x208e   : > { %3463 = vmax.xlane.f32.xlu0 %v3462_v36 }
0x2092   : > { %v3566_v3 = vpop.f32.mrb[80].mxu0 }
0x2093   : > { %v3572_v7 = vmul.f32 0.35355338, %v3566_v3  ;;  %v4845_v4 = vpop.f32.mrb[81].mxu0 }
0x2094   : > { %v3569_v40 = vpop.f32.mrb[82].mxu0 }
0x2095   : > { %v4846_v10 = vpop.f32.mrb[83].mxu0  ;;  %v3573_v43 = vsel %vm814_vm7, %v3572_v7, -inf }
0x2096   : > { %3574 = vmax.xlane.f32.xlu1 %v3573_v43 }
0x209a   : > { %v3677_v44 = vpop.f32.mrb[84].mxu0 }
0x209b   : > { %v3683_v24 = vmul.f32 0.35355338, %v3677_v44  ;;  %v4857_v46 = vpop.f32.mrb[85].mxu0 }
0x209c   : > { %v3680_v21 = vpop.f32.mrb[86].mxu0 }
0x209d   : > { %v4858_v47 = vpop.f32.mrb[87].mxu0  ;;  %v3684_v48 = vsel %vm814_vm7, %v3683_v24, -inf }
0x209e   : > { %3685 = vmax.xlane.f32.xlu0 %v3684_v48 }
0x20a7   : > { %3585 = vrot.lane.b32.xlu1 %v5840_v41, %s6037_s19 }
0x211b   : > { %v3464_v49 = vpop.xlane.xlu0 %3463 }
0x211c   : > { %v3465_v50 = vsub.f32 %v3461_v27, %v3464_v49 }
0x211e   : > { %v3466_v33 = vmul.f32 1.442695, %v3465_v50 }
0x2120   : > { %5092 = vpow2.f32 %v3466_v33 }
0x2123   : > { %v3575_v29 = vpop.xlane.xlu1 %3574 }
0x2124   : > { %v3576_v28 = vsub.f32 %v3572_v7, %v3575_v29 }
0x2126   : > { %v3577_v53 = vmul.f32 1.442695, %v3576_v28 }
0x2127   : > { %v3586_v0 = vpop.permute.xlu1 %3585 }
0x2128   : > { %5094 = vpow2.f32 %v3577_v53  ;;  %v3591_v6 = vand.u32 %v3586_v0, %v5379_v35  ;;  %v5007_v0 = vld [vmem:[%s5327_s26 + $0x8] sm:$0xff]  }
0x212a   : > { %v5093_v54 = vpop.eup %5092 }
0x212b   : > { %v3686_v55 = vpop.xlane.xlu0 %3685  ;;  %v3468_v34 = vsel %vm814_vm7, %v5093_v54, 0.0 }
0x212c   : > { %v3687_v56 = vsub.f32 %v3683_v24, %v3686_v55  ;;  %3469 = vadd.xlane.f32.xlu0 %v3468_v34 }
0x212e   : > { %v3688_v57 = vmul.f32 1.442695, %v3687_v56  ;;  %v5005_v56 = vld [vmem:[%s5317_s1 + $0x8] sm:$0xff]  }
0x2130   : > { %5096 = vpow2.f32 %v3688_v57 }
0x2132   : > { %v5095_v39 = vpop.eup %5094 }
0x2133   : > { %v3579_v58 = vsel %vm814_vm7, %v5095_v39, 0.0 }
0x2134   : > { %3580 = vadd.xlane.f32.xlu0 %v3579_v58 }
0x213a   : > { %v5097_v59 = vpop.eup %5096 }
0x213b   : > { %v3690_v23 = vsel %vm814_vm7, %v5097_v59, 0.0 }
0x213c   : > { %3691 = vadd.xlane.f32.xlu1 %v3690_v23 }
0x214a   : > { %3474 = vrot.lane.b32.xlu0 %v5840_v41, %s5162_s0 }
0x214d   : > { %3696 = vrot.lane.b32.xlu1 %v5840_v41, %s6036_s15 }
0x21b9   : > { %v3470_v60 = vpop.xlane.xlu0 %3469 }
0x21ba   : > { %5098 = vrcp.f32 %v3470_v60 }
0x21c1   : > { %v3581_v37 = vpop.xlane.xlu0 %3580 }
0x21c2   : > { %5100 = vrcp.f32 %v3581_v37 }
0x21c4   : > { %v5099_v45 = vpop.eup %5098 }
0x21c5   : > { %v3472_v20 = vmul.f32 %v5099_v45, %v5093_v54  ;;  %v3475_v1 = vpop.permute.xlu0 %3474  ;;  %v5006_v45 = vld [vmem:[%s5327_s26] sm:$0xff]  }
0x21c6   : > { %v3480_v5 = vand.u32 %v3475_v1, %v5379_v35  ;;  %v5011_v1 = vld [vmem:[%s5327_s26 + $0x28] sm:$0xff]  }
0x21c7   : > { %v3473_v52 = vpack.c.bf16 %v3472_v20, %v3472_v20  ;;  %v5008_v20 = vld [vmem:[%s5327_s26 + $0x10] sm:$0xff]  }
0x21c8   : > { %4836 = vmatpush3.bf16.msra.mxu1 %v3480_v5  ;;  %v5012_v5 = vld [vmem:[%s5327_s26 + $0x30] sm:$0xff]  }
0x21c9   : > { %v3692_v51 = vpop.xlane.xlu1 %3691  ;;  %4847 = vmatprep.subr.bf16.mxu1 %v5150_v12 }
0x21ca   : > { %5102 = vrcp.f32 %v3692_v51  ;;  %v5013_v51 = vld [vmem:[%s5327_s26 + $0x38] sm:$0xff]  }
0x21cb   : > { %4838 = vmatmul.mubr.msk.bf16.vlgmr.msra.gmra.mrb[80].mxu1 %vm829_vm8, %v3473_v52 }
0x21cc   : > { %v5101_v41 = vpop.eup %5100  ;;  %4848 = vmatpush3.bf16.msra.mxu1 %v3591_v6  ;;  %4849 = vmatprep.mubr.msk.bf16.mxu1 %vm5151_vm2, %v5150_v12 }
0x21cd   : > { %v3583_v8 = vmul.f32 %v5101_v41, %v5095_v39  ;;  %4859 = vmatprep.subr.bf16.mxu1 %v5150_v12  ;;  %v3697_v9 = vpop.permute.xlu1 %3696 }
0x21ce   : > { %v3702_v61 = vand.u32 %v3697_v9, %v5379_v35 }
0x21cf   : > { %v3584_v11 = vpack.c.bf16 %v3583_v8, %v3583_v8 }
0x21d3   : > { %4850 = vmatmul.mubr.msk.bf16.vlgmr.msra.gmra.mrb[84].mxu1 %vm829_vm8, %v3584_v11 }
0x21d4   : > { %v5103_v13 = vpop.eup %5102  ;;  %4860 = vmatpush3.bf16.msra.mxu1 %v3702_v61  ;;  %4861 = vmatprep.mubr.msk.bf16.mxu1 %vm5151_vm2, %v5150_v12 }
0x21d5   : > { %v3694_v2 = vmul.f32 %v5103_v13, %v5097_v59  ;;  %4873 = vmatprep.subr.bf16.mxu1 %v5150_v12 }
0x21d7   : > { %v3695_v14 = vpack.c.bf16 %v3694_v2, %v3694_v2 }
0x21db   : > { %4862 = vmatmul.mubr.msk.bf16.vlgmr.msra.gmra.mrb[88].mxu1 %vm829_vm8, %v3695_v14 }
0x21dc   : > { %4877 = vmatprep.mubr.msk.bf16.mxu1 %vm5151_vm2, %v5150_v12 }
0x229e   : > { %v3516_v35 = vpop.f32.mrb[80].mxu1 }
0x229f   : > { %3745 = vrot.lane.b32.xlu1 %v3516_v35, %s5164_s4  ;;  %v4839_v17 = vpop.f32.mrb[81].mxu1 }
0x22a0   : > { %v3519_v19 = vpop.f32.mrb[82].mxu1 }
0x22a1   : > { %v4840_v62 = vpop.f32.mrb[83].mxu1 }
0x22a6   : > { %v3627_v27 = vpop.f32.mrb[84].mxu1 }
0x22a7   : > { %3749 = vrot.lane.b32.xlu0 %v3627_v27, %s5165_s17  ;;  %v4851_v30 = vpop.f32.mrb[85].mxu1 }
0x22a8   : > { %v3630_v31 = vpop.f32.mrb[86].mxu1 }
0x22a9   : > { %v4852_v32 = vpop.f32.mrb[87].mxu1 }
0x22ae   : > { %v3738_v36 = vpop.f32.mrb[88].mxu1 }
0x22af   : > { %3753 = vrot.lane.b32.xlu1 %v3738_v36, %s5166_s3  ;;  %v4863_v3 = vpop.f32.mrb[89].mxu1 }
0x22b0   : > { %v3741_v7 = vpop.f32.mrb[90].mxu1 }
0x22b1   : > { %v4864_v4 = vpop.f32.mrb[91].mxu1 }
0x2311   : > { %v3746_v40 = vpop.permute.xlu1 %3745 }
0x2312   : > { %v3756_v43 = vsel %vm766_vm4, %v5896_v16, %v3746_v40 }
0x2319   : > { %v3750_v10 = vpop.permute.xlu0 %3749 }
0x231a   : > { %v3757_v44 = vsel %vm1226_vm9, %v3756_v43, %v3750_v10 }
0x2321   : > { %v3754_v24 = vpop.permute.xlu1 %3753 }
0x2322   : > { %v3758_v46 = vsel %vm1228_vm10, %v3757_v44, %v3754_v24 }
0x2323   : > { %v3763_v21 = vpack.c.bf16 %v3758_v46, %v3758_v46 }
0x2325   : > { %4870 = vmatmul.mubr.msk.bf16.vlgmr.msra.gmra.mrb[88].mxu0 %vm718_vm3, %v3763_v21 }
0x2326   : > { %4897 = vmatprep.mubr.msk.bf16.mxu0 %vm5151_vm2, %v5150_v12  ;;  %4882 = vmatpush3.bf16.msra.mxu0 %v5006_v45 }
0x2327   : > { %4883 = vmatprep.subr.bf16.mxu0 %v5150_v12 }
0x232a   : > { %4884 = vmatpush3.bf16.msra.mxu0 %v5007_v0 }
0x232b   : > { %4885 = vmatprep.subr.bf16.mxu0 %v5150_v12 }
0x232e   : > { %4886 = vmatpush3.bf16.msra.mxu0 %v5008_v20 }
0x232f   : > { %4887 = vmatprep.subr.bf16.mxu0 %v5150_v12 }
0x23f8   : > { %v3813_v47 = vpop.f32.mrb[88].mxu0 }
0x23f9   : > { %v3819_v48 = vadd.f32 %v3813_v47, %v5778_v38  ;;  %v4871_v49 = vpop.f32.mrb[89].mxu0  ;;  %v5004_v38 = vld [vmem:[%s5317_s1] sm:$0xff]  }
0x23fa   : > { %v3816_v50 = vpop.f32.mrb[90].mxu0  ;;  %4874 = vmatpush3.bf16.msra.mxu1 %v5004_v38 }
0x23fb   : > { %v5941_v16 = vadd.f32 %v5783_v42, %v3819_v48  ;;  %v4872_v33 = vpop.f32.mrb[91].mxu0  ;;  %4875 = vmatprep.subr.bf16.mxu1 %v5150_v12 }
0x23fd   : > { %v3830_v29 = vsel %vm665_vm1, %v5941_v16, 0.0 }
0x23fe   : > { %3831 = vadd.xlane.f32.xlu0 %v3830_v29  ;;  %4876 = vmatpush3.bf16.msra.mxu1 %v5005_v56 }
0x248b   : > { %v3832_v28 = vpop.xlane.xlu0 %3831 }
0x248c   : > { %v3833_v53 = vmul.f32 0.03125, %v3832_v28 }
0x248e   : > { %v3834_v54 = vsub.f32 %v5941_v16, %v3833_v53 }
0x2490   : > { %v3835_v55 = vmul.f32 %v3834_v54, %v3834_v54 }
0x2492   : > { %v3836_v34 = vsel %vm665_vm1, %v3835_v55, 0.0 }
0x2493   : > { %3837 = vadd.xlane.f32.xlu1 %v3836_v34 }
0x2520   : > { %v3838_v42 = vpop.xlane.xlu1 %3837 }
0x2521   : > { %v3839_v57 = vmul.f32 0.03125, %v3838_v42 }
0x2523   : > { %v3840_v39 = vadd.f32 1e-05, %v3839_v57 }
0x2525   : > { %5104 = vrsqrt.f32 %v3840_v39 }
0x252f   : > { %v5105_v58 = vpop.eup %5104 }
0x2530   : > { %v3842_v59 = vmul.f32 %v5105_v58, %v3834_v54 }
0x2532   : > { %v3849_v23 = vmul.f32 %v5800_v63, %v3842_v59  ;;  %v5009_v63 = vld [vmem:[%s5327_s26 + $0x18] sm:$0xff]  }
0x2533   : > { %4888 = vmatpush3.bf16.msra.mxu0 %v5009_v63 }
0x2534   : > { %v3856_v60 = vadd.f32 %v5803_v18, %v3849_v23  ;;  %4889 = vmatprep.subr.bf16.mxu0 %v5150_v12  ;;  %v5010_v18 = vld [vmem:[%s5327_s26 + $0x20] sm:$0xff]  }
0x2536   : > { %v3861_v37 = vpack.c.bf16 %v3856_v60, %v3856_v60 }
0x2537   : > { %4890 = vmatpush3.bf16.msra.mxu0 %v5010_v18 }
0x2538   : > { %4878 = vmatmul.mubr.msk.bf16.vlgmr.msra.gmra.mrb[92].mxu1 %vm718_vm3, %v3861_v37  ;;  %4891 = vmatprep.subr.bf16.mxu0 %v5150_v12 }
0x253b   : > { %4892 = vmatpush3.bf16.msra.mxu0 %v5011_v1 }
0x253c   : > { %4893 = vmatprep.subr.bf16.mxu0 %v5150_v12 }
0x253f   : > { %4894 = vmatpush3.bf16.msra.mxu0 %v5012_v5 }
0x2540   : > { %4895 = vmatprep.subr.bf16.mxu0 %v5150_v12 }
0x2543   : > { %4896 = vmatpush3.bf16.msra.mxu0 %v5013_v51 }
0x260b   : > { %v3918_v52 = vpop.f32.mrb[92].mxu1 }
0x260c   : > { %v3919_v6 = vadd.f32 %v5836_v22, %v3918_v52  ;;  %v4879_v41 = vpop.f32.mrb[93].mxu1 }
0x260d   : > { %v3921_v8 = vpop.f32.mrb[94].mxu1 }
0x260e   : > { %v3924_v9 = vmul.f32 -1.702, %v3919_v6  ;;  %v4880_v11 = vpop.f32.mrb[95].mxu1 }
0x2610   : > { %v3925_v61 = vmul.f32 1.442695, %v3924_v9 }
0x2612   : > { %5106 = vpow2.f32 %v3925_v61 }
0x261c   : > { %v5107_v13 = vpop.eup %5106 }
0x261d   : > { %v3927_v2 = vadd.f32 1.0, %v5107_v13 }
0x261f   : > { %5108 = vrcp.f32 %v3927_v2 }
0x2629   : > { %v5109_v14 = vpop.eup %5108 }
0x262a   : > { %v3930_v15 = vmul.f32 %v5109_v14, %v3919_v6 }
0x262c   : > { %v3947_v35 = vpack.c.bf16 %v3930_v15, %v3930_v15 }
0x262e   : > { %4898 = vmatmul.mubr.bf16.vlgmr.msra.gmra.mrb[92].mxu0 %v3947_v35 }
0x2701   : > { %v4037_v12 = vpop.f32.mrb[92].mxu0 }
0x2702   : > { %v4038_v17 = vadd.f32 %v5859_v25, %v4037_v12  ;;  %v4899_v19 = vpop.f32.mrb[93].mxu0 }
0x2703   : > { %v4040_v62 = vpop.f32.mrb[94].mxu0 }
0x2704   : > { %v4043_v22 = vadd.f32 %v4038_v17, %v5941_v16  ;;  %v4900_v26 = vpop.f32.mrb[95].mxu0 }
0x2706   : > { %4044 = vst.msk [vmem:[#allocation2 + $0x18] sm:$0x1f] %vm665_vm1, %v4043_v22 }
0x270d   : > { %v4048_v27 = vld [vmem:[#allocation2 + $0x18] sm:$0x1f] }
0x270e   : > { %4052 = vst.msk [vmem:[%s5337_s24 + $0x18] sm:$0x1f] %vm665_vm1, %v4048_v27 }
0x270f PF: > { %s6038_s29 = sld [smem:[#allocation6_spill]]  ;;  %s6039_s25 = sld [smem:[#allocation4_spill]] }
0x2710   : > { %s6040_s26 = sld [smem:[#allocation5_spill]]  ;;  %s6041_s27 = sld [smem:[#allocation7_spill]] }
0x2711   : > { %s6042_s28 = sld [smem:[#allocation8_spill]] }
0x2715   : > { %s23_s29 = sadd.s32 1, %s6038_s29  }
0x2716   : > { %p20_p8 = scmp.ge.s32.totalorder %s23_s29, 6  }
0x2718   :  { %22 = sbr.rel (!%p20_p8) target bundleno = 10 (0xa), region = 145 }

</bundles_post_ra>
